<compile_context>
chip_gen: v5e
topology: v5e:2x2
jax: 0.10.0
libtpu: 0.0.40
codegen_flags: <defaults>
</compile_context>

<pallas_src>
import functools

import jax
import jax.numpy as jnp
from jax.experimental import pallas as pl
from jax.experimental.pallas import tpu as pltpu

EPS = 1e-5
NEG_SLOPE = 0.2
# Modest scoped-VMEM raise: enough for the tiles below, leaves headroom on
# v7x (64 MiB physical) and is comfortable on v5e/v6e (128 MiB).
_VMEM_LIMIT = 40 * 1024 * 1024


def _round_up(x, m):
    return (x + m - 1) // m * m


# ---------------------------------------------------------------------------
# Kernel 1: tiled matmul + bias (+ optional fused tanh)  -- im2col conv path
# ---------------------------------------------------------------------------

def _matmul_bias_kernel(x_ref, w_ref, b_ref, o_ref, acc_ref, *, activation):
    @pl.when(pl.program_id(2) == 0)
    def _():
        acc_ref[...] = jnp.zeros_like(acc_ref)

    acc_ref[...] += jnp.dot(x_ref[...], w_ref[...],
                            preferred_element_type=jnp.float32)

    @pl.when(pl.program_id(2) == pl.num_programs(2) - 1)
    def _():
        y = acc_ref[...] + b_ref[...]          # bias added once, on last K step
        if activation == "tanh":
            y = jnp.tanh(y)
        o_ref[...] = y


def matmul_bias_act(x, w, b, activation=None):
    """Y = X @ W + b (optionally tanh).  X:(M,K) W:(K,N) b:(N,).  f32 out."""
    M, K = x.shape
    N = w.shape[1]
    tm = min(256, _round_up(M, 8))
    tn = 128
    Mp = _round_up(M, tm)
    Np = _round_up(N, tn)                      # lane-dense (>=128) output tiles
    Kp = _round_up(K, 128)
    tk = next(t for t in (512, 256, 128) if Kp % t == 0)

    xp = jnp.pad(x.astype(jnp.bfloat16), ((0, Mp - M), (0, Kp - K)))
    wp = jnp.pad(w.astype(jnp.bfloat16), ((0, Kp - K), (0, Np - N)))
    bp = jnp.pad(b.astype(jnp.float32).reshape(1, N), ((0, 0), (0, Np - N)))

    out = pl.pallas_call(
        functools.partial(_matmul_bias_kernel, activation=activation),
        out_shape=jax.ShapeDtypeStruct((Mp, Np), jnp.float32),
        grid_spec=pltpu.PrefetchScalarGridSpec(
            num_scalar_prefetch=0,
            grid=(Mp // tm, Np // tn, Kp // tk),
            in_specs=[pl.BlockSpec((tm, tk), lambda i, j, k: (i, k)),
                      pl.BlockSpec((tk, tn), lambda i, j, k: (k, j)),
                      pl.BlockSpec((1, tn), lambda i, j, k: (0, j))],
            out_specs=pl.BlockSpec((tm, tn), lambda i, j, k: (i, j)),
            scratch_shapes=[pltpu.VMEM((tm, tn), jnp.float32)]),
        compiler_params=pltpu.CompilerParams(
            dimension_semantics=("parallel", "parallel", "arbitrary"),
            vmem_limit_bytes=_VMEM_LIMIT),
    )(xp, wp, bp)
    return out[:M, :N]


# ---------------------------------------------------------------------------
# Kernel 2: direct (im2col-free) stride-1 convolution.
# Input is pre-padded and kept flat: x_flat[(y*Wp + x), c].  Tap (i,j)
# contributes x_flat[f + i*Wp + j] @ W[i,j]; columns x >= Wo of each output
# row are garbage and are sliced off in JAX afterwards.
# ---------------------------------------------------------------------------

def _direct_conv_kernel(x_ref, w_ref, b_ref, o_ref, acc_ref,
                        *, kh, kw, wp, cin, lout, activation):
    t = 0
    for i in range(kh):
        for j in range(kw):
            off = i * wp + j
            contrib = jnp.dot(x_ref[off:off + lout, :],
                              w_ref[t * cin:(t + 1) * cin, :],
                              preferred_element_type=jnp.float32)
            if t == 0:
                acc_ref[...] = contrib
            else:
                acc_ref[...] += contrib
            t += 1
    y = acc_ref[...] + b_ref[...]
    if activation == "tanh":
        y = jnp.tanh(y)
    o_ref[...] = y


def _direct_conv_call(xp, wmat, bias, kh, kw, Ho, Wo, activation=None):
    """Valid stride-1 conv on pre-padded NHWC input.

    xp: (N, Hp, Wp, Cin) with Hp=Ho+kh-1, Wp=Wo+kw-1.
    wmat: (kh*kw*Cin, Cout), tap-major (i, j, cin) row order.
    """
    N, Hp, Wp, Cin = xp.shape
    Cout = wmat.shape[1]
    assert Hp == Ho + kh - 1 and Wp == Wo + kw - 1
    lout = Ho * Wp                 # flat output rows (incl. garbage columns)
    extra = kw - 1                 # extra zero rows so every tap slice is in-bounds
    lin = Hp * Wp + extra

    xf = jnp.pad(xp.reshape(N, Hp * Wp, Cin).astype(jnp.bfloat16),
                 ((0, 0), (0, extra), (0, 0)))
    wq = wmat.astype(jnp.bfloat16)
    bq = bias.astype(jnp.float32).reshape(1, Cout)

    tn = 128 if Cout % 128 == 0 else Cout
    grid = (N, Cout // tn)

    out_flat = pl.pallas_call(
        functools.partial(_direct_conv_kernel, kh=kh, kw=kw, wp=Wp, cin=Cin,
                          lout=lout, activation=activation),
        out_shape=jax.ShapeDtypeStruct((N, lout, Cout), jnp.float32),
        grid_spec=pltpu.PrefetchScalarGridSpec(
            num_scalar_prefetch=0,
            grid=grid,
            in_specs=[pl.BlockSpec((None, lin, Cin), lambda n, c: (n, 0, 0)),
                      pl.BlockSpec((kh * kw * Cin, tn), lambda n, c: (0, c)),
                      pl.BlockSpec((1, tn), lambda n, c: (0, c))],
            out_specs=pl.BlockSpec((None, lout, tn), lambda n, c: (n, 0, c)),
            scratch_shapes=[pltpu.VMEM((lout, tn), jnp.float32)]),
        compiler_params=pltpu.CompilerParams(
            dimension_semantics=("parallel", "parallel"),
            vmem_limit_bytes=_VMEM_LIMIT),
    )(xf, wq, bq)

    return out_flat.reshape(N, Ho, Wp, Cout)[:, :, :Wo, :]


# ---------------------------------------------------------------------------
# Kernel 3/4: InstanceNorm (+LeakyReLU) and InstanceNorm (+residual add),
# gridded over (batch, channel tiles); stats in f32.
# ---------------------------------------------------------------------------

def _in_lrelu_kernel(x_ref, o_ref):
    x = x_ref[...]                                   # (H*W, ct)
    mu = jnp.mean(x, axis=0, keepdims=True)
    var = jnp.mean(jnp.square(x - mu), axis=0, keepdims=True)
    y = (x - mu) * jax.lax.rsqrt(var + EPS)
    o_ref[...] = jnp.where(y >= 0, y, NEG_SLOPE * y)


def _in_add_kernel(x_ref, r_ref, o_ref):
    x = x_ref[...]
    mu = jnp.mean(x, axis=0, keepdims=True)
    var = jnp.mean(jnp.square(x - mu), axis=0, keepdims=True)
    o_ref[...] = (x - mu) * jax.lax.rsqrt(var + EPS) + r_ref[...]


def _in_call(kernel, inputs, N, H, W, C, aliases=None):
    hw = H * W
    ct = 128 if C % 128 == 0 else C
    kwargs = {}
    if aliases is not None:
        kwargs["input_output_aliases"] = aliases
    spec = pl.BlockSpec((None, hw, ct), lambda n, c: (n, 0, c))
    y = pl.pallas_call(
        kernel,
        out_shape=jax.ShapeDtypeStruct((N, hw, C), jnp.float32),
        grid_spec=pltpu.PrefetchScalarGridSpec(
            num_scalar_prefetch=0,
            grid=(N, C // ct),
            in_specs=[spec] * len(inputs),
            out_specs=spec),
        compiler_params=pltpu.CompilerParams(
            dimension_semantics=("parallel", "parallel"),
            vmem_limit_bytes=_VMEM_LIMIT),
        **kwargs,
    )(*inputs)
    return y.reshape(N, H, W, C)


def instance_norm_lrelu(x):
    N, H, W, C = x.shape
    return _in_call(_in_lrelu_kernel, (x.reshape(N, H * W, C),), N, H, W, C)


def instance_norm_add(x, res):
    N, H, W, C = x.shape
    return _in_call(_in_add_kernel,
                    (x.reshape(N, H * W, C), res.reshape(N, H * W, C)),
                    N, H, W, C, aliases={1: 0})   # result overwrites the skip buffer


# ---------------------------------------------------------------------------
# Convolution lowerings
# ---------------------------------------------------------------------------

def _im2col(x, kh, kw, stride):
    """x: (N,H,W,C) already padded -> (N*Ho*Wo, kh*kw*C), K order = (kh,kw,C)."""
    N, H, W, C = x.shape
    Ho = (H - kh) // stride + 1
    Wo = (W - kw) // stride + 1
    cols = []
    for i in range(kh):
        for j in range(kw):
            cols.append(x[:, i:i + (Ho - 1) * stride + 1:stride,
                             j:j + (Wo - 1) * stride + 1:stride, :])
    patches = jnp.stack(cols, axis=3)               # (N, Ho, Wo, kh*kw, C)
    return patches.reshape(N * Ho * Wo, kh * kw * C), (N, Ho, Wo)


def _pad_spatial(x, padding, pad_mode):
    if padding == 0:
        return x
    mode = "reflect" if pad_mode == "reflect" else "constant"
    return jnp.pad(x, ((0, 0), (padding, padding), (padding, padding), (0, 0)),
                   mode=mode)


def _torch_weight_to_mat(weight):
    """(Cout, Cin, kh, kw) -> (kh*kw*Cin, Cout), tap-major (i, j, cin) rows."""
    Cout, Cin, kh, kw = weight.shape
    return jnp.transpose(weight, (2, 3, 1, 0)).reshape(kh * kw * Cin, Cout)


def conv2d_im2col(x, weight, bias, stride=1, padding=0, pad_mode="zero",
                  activation=None):
    """Used for the 7x7 convs and the stride-2 downsampling convs."""
    Cout, Cin, kh, kw = weight.shape
    xp = _pad_spatial(x, padding, pad_mode)
    cols, (N, Ho, Wo) = _im2col(xp, kh, kw, stride)
    y = matmul_bias_act(cols, _torch_weight_to_mat(weight), bias,
                        activation=activation)
    return y.reshape(N, Ho, Wo, Cout)


def conv2d_s1_direct(x, weight, bias, padding=1, pad_mode="reflect"):
    """Stride-1 conv through the direct (im2col-free) Pallas kernel."""
    Cout, Cin, kh, kw = weight.shape
    N, H, W, _ = x.shape
    xp = _pad_spatial(x, padding, pad_mode)
    return _direct_conv_call(xp, _torch_weight_to_mat(weight), bias, kh, kw, H, W)


def conv_transpose2d(x, weight, bias):
    """ConvTranspose2d(k=3, stride=2, padding=1, output_padding=1) via the
    sub-pixel decomposition: 4 phase-wise stride-1 convs, interleaved."""
    Cin, Cout, kh, kw = weight.shape
    assert kh == 3 and kw == 3
    N, H, W, _ = x.shape
    rows = []
    for py in (0, 1):
        row = []
        for px in (0, 1):
            dis = [d for d in (0, 1) if 0 <= py + 1 - 2 * d <= kh - 1]
            djs = [d for d in (0, 1) if 0 <= px + 1 - 2 * d <= kw - 1]
            taps = []
            for di in dis:
                for dj in djs:
                    ky = py + 1 - 2 * di
                    kx = px + 1 - 2 * dj
                    taps.append(weight[:, :, ky, kx])        # (Cin, Cout)
            wmat = jnp.concatenate(taps, axis=0)             # (ntaps*Cin, Cout)
            kph, kpw = len(dis), len(djs)
            xpad = jnp.pad(x, ((0, 0), (0, kph - 1), (0, kpw - 1), (0, 0)))
            row.append(_direct_conv_call(xpad, wmat, bias, kph, kpw, H, W))
        rows.append(jnp.stack(row, axis=0))                  # (2, N, H, W, Cout)
    stacked = jnp.stack(rows, axis=0)                        # (py, px, N, H, W, C)
    y = jnp.transpose(stacked, (2, 3, 0, 4, 1, 5))           # (N, H, py, W, px, C)
    return y.reshape(N, 2 * H, 2 * W, Cout)


# ---------------------------------------------------------------------------
# Model parameters
# ---------------------------------------------------------------------------

def _conv_init(key, cout, cin, kh, kw):
    k1, k2 = jax.random.split(key)
    scale = 1.0 / jnp.sqrt(float(cin * kh * kw))
    w = jax.random.normal(k1, (cout, cin, kh, kw), jnp.float32) * scale
    b = jax.random.normal(k2, (cout,), jnp.float32) * scale
    return w, b


def _deconv_init(key, cin, cout, kh, kw):
    k1, k2 = jax.random.split(key)
    scale = 1.0 / jnp.sqrt(float(cout * kh * kw))
    w = jax.random.normal(k1, (cin, cout, kh, kw), jnp.float32) * scale
    b = jax.random.normal(k2, (cout,), jnp.float32) * scale
    return w, b


def init_generator_params(key, in_channels, out_channels):
    keys = jax.random.split(key, 7 + 2 * 9)
    p = {}
    p["c1"] = _conv_init(keys[0], 64, in_channels, 7, 7)
    p["c2"] = _conv_init(keys[1], 128, 64, 3, 3)
    p["c3"] = _conv_init(keys[2], 256, 128, 3, 3)
    for i in range(9):
        p[f"res{i}_a"] = _conv_init(keys[3 + 2 * i], 256, 256, 3, 3)
        p[f"res{i}_b"] = _conv_init(keys[4 + 2 * i], 256, 256, 3, 3)
    p["d1"] = _deconv_init(keys[21], 256, 128, 3, 3)
    p["d2"] = _deconv_init(keys[22], 128, 64, 3, 3)
    p["c_out"] = _conv_init(keys[23], out_channels, 64, 7, 7)
    return p


# ---------------------------------------------------------------------------
# Forward pass
# ---------------------------------------------------------------------------

def residual_block(x, pa, pb):
    # TODO(synk): ResidualBlock definition not included in the reference file;
    # standard CycleGAN residual block assumed (refl-pad/conv/IN/LeakyReLU ->
    # refl-pad/conv/IN -> + skip).
    h = conv2d_s1_direct(x, *pa, padding=1, pad_mode="reflect")
    h = instance_norm_lrelu(h)
    h = conv2d_s1_direct(h, *pb, padding=1, pad_mode="reflect")
    return instance_norm_add(h, x)


def generator_forward(params, x_nchw):
    x = jnp.transpose(x_nchw, (0, 2, 3, 1)).astype(jnp.float32)  # -> NHWC

    # ReflectionPad2d(3) + Conv 7x7 (in->64) + IN + LeakyReLU(0.2) [+ Dropout2d=id]
    h = conv2d_im2col(x, *params["c1"], stride=1, padding=3, pad_mode="reflect")
    h = instance_norm_lrelu(h)

    # Conv 3x3 s2 (64->128) + IN + LeakyReLU [+ Dropout2d=id]
    h = conv2d_im2col(h, *params["c2"], stride=2, padding=1)
    h = instance_norm_lrelu(h)

    # Conv 3x3 s2 (128->256) + IN + LeakyReLU [+ Dropout2d=id]
    h = conv2d_im2col(h, *params["c3"], stride=2, padding=1)
    h = instance_norm_lrelu(h)

    # 9 residual blocks @ 256 channels (direct, im2col-free conv kernel)
    for i in range(9):
        h = residual_block(h, params[f"res{i}_a"], params[f"res{i}_b"])

    # ConvTranspose 3x3 s2 (256->128) + IN + LeakyReLU [+ Dropout2d=id]
    h = conv_transpose2d(h, *params["d1"])
    h = instance_norm_lrelu(h)

    # ConvTranspose 3x3 s2 (128->64) + IN + LeakyReLU [+ Dropout2d=id]
    h = conv_transpose2d(h, *params["d2"])
    h = instance_norm_lrelu(h)

    # ReflectionPad2d(3) + Conv 7x7 (64->out) + Tanh (tanh fused in the matmul
    # epilogue; the matmul runs lane-dense at 128 cols and slices back to 3).
    h = conv2d_im2col(h, *params["c_out"], stride=1, padding=3,
                      pad_mode="reflect", activation="tanh")

    return jnp.transpose(h, (0, 3, 1, 2))  # back to NCHW


# ---------------------------------------------------------------------------

if __name__ == "__main__":
    in_channels, out_channels = 4, 3
    key = jax.random.PRNGKey(0)
    k_x, k_p = jax.random.split(key)

    x = jax.random.normal(k_x, (2, in_channels, 16, 16), jnp.float32)  # NCHW
    params = init_generator_params(k_p, in_channels, out_channels)

    fwd = jax.jit(generator_forward)
    y = fwd(params, x)
    y = jax.block_until_ready(y)

    assert y.shape == (2, out_channels, 16, 16), y.shape
    assert bool(jnp.all(jnp.isfinite(y)))
    print("KERNEL_OK")
</pallas_src>

<mosaic_0001>
module attributes {stable_mosaic.version = 11 : i64} {
  func.func @_in_lrelu_kernel(%arg0: i32, %arg1: i32, %arg2: memref<1x256x64xf32, #tpu.memory_space<vmem>>, %arg3: memref<1x256x64xf32, #tpu.memory_space<vmem>>) attributes {dimension_semantics = [#tpu.dimension_semantics<parallel>, #tpu.dimension_semantics<parallel>], iteration_bounds = array<i64: 2, 1>, scalar_prefetch = 0 : i64, scratch_operands = 0 : i64, tpu.core_type = #tpu.core_type<tc>, window_params = [{transform_indices = @transform_0, window_bounds = array<i64: 1, 256, 64>}, {transform_indices = @transform_1, window_bounds = array<i64: 1, 256, 64>}]} {
    %c0 = arith.constant 0 : index
    %c0_0 = arith.constant 0 : index
    %c0_1 = arith.constant 0 : index
    %0 = vector.load %arg2[%c0, %c0_0, %c0_1] : memref<1x256x64xf32, #tpu.memory_space<vmem>>, vector<1x256x64xf32>
    %1 = vector.shape_cast %0 : vector<1x256x64xf32> to vector<256x64xf32>
    %cst = arith.constant dense<0.000000e+00> : vector<64xf32>
    %2 = vector.multi_reduction <add>, %1, %cst [0] : vector<256x64xf32> to vector<64xf32>
    %3 = vector.shape_cast %2 : vector<64xf32> to vector<1x64xf32>
    %cst_2 = arith.constant 2.560000e+02 : f32
    %4 = vector.broadcast %cst_2 : f32 to vector<1x64xf32>
    %5 = arith.divf %3, %4 : vector<1x64xf32>
    %6 = vector.broadcast %5 : vector<1x64xf32> to vector<256x64xf32>
    %7 = arith.subf %1, %6 : vector<256x64xf32>
    %8 = arith.mulf %7, %7 : vector<256x64xf32>
    %cst_3 = arith.constant dense<0.000000e+00> : vector<64xf32>
    %9 = vector.multi_reduction <add>, %8, %cst_3 [0] : vector<256x64xf32> to vector<64xf32>
    %10 = vector.shape_cast %9 : vector<64xf32> to vector<1x64xf32>
    %cst_4 = arith.constant 2.560000e+02 : f32
    %11 = vector.broadcast %cst_4 : f32 to vector<1x64xf32>
    %12 = arith.divf %10, %11 : vector<1x64xf32>
    %13 = vector.broadcast %5 : vector<1x64xf32> to vector<256x64xf32>
    %14 = arith.subf %1, %13 : vector<256x64xf32>
    %cst_5 = arith.constant 9.99999974E-6 : f32
    %15 = vector.broadcast %cst_5 : f32 to vector<1x64xf32>
    %16 = arith.addf %12, %15 : vector<1x64xf32>
    %17 = math.rsqrt %16 : vector<1x64xf32>
    %18 = vector.broadcast %17 : vector<1x64xf32> to vector<256x64xf32>
    %19 = arith.mulf %14, %18 : vector<256x64xf32>
    %cst_6 = arith.constant 0.000000e+00 : f32
    %20 = vector.broadcast %cst_6 : f32 to vector<256x64xf32>
    %21 = arith.cmpf oge, %19, %20 : vector<256x64xf32>
    %cst_7 = arith.constant 2.000000e-01 : f32
    %22 = vector.broadcast %cst_7 : f32 to vector<256x64xf32>
    %23 = arith.mulf %22, %19 : vector<256x64xf32>
    %24 = arith.select %21, %19, %23 : vector<256x64xi1>, vector<256x64xf32>
    %c0_8 = arith.constant 0 : index
    %c0_9 = arith.constant 0 : index
    %c0_10 = arith.constant 0 : index
    %25 = vector.load %arg3[%c0_8, %c0_9, %c0_10] : memref<1x256x64xf32, #tpu.memory_space<vmem>>, vector<1x256x64xf32>
    %26 = vector.shape_cast %25 : vector<1x256x64xf32> to vector<256x64xf32>
    %27 = vector.shape_cast %24 : vector<256x64xf32> to vector<1x256x64xf32>
    tpu.vector_store %arg3[%c0_8, %c0_9, %c0_10], %27 {strides = array<i32>} : memref<1x256x64xf32, #tpu.memory_space<vmem>>, vector<1x256x64xf32>,
    return
  }
  func.func @transform_0(%arg0: i32, %arg1: i32) -> (i32, i32, i32) {
    %c0_i32 = arith.constant 0 : i32
    %c0_i32_0 = arith.constant 0 : i32
    return %arg0, %c0_i32, %arg1 : i32, i32, i32
  }
  func.func @transform_1(%arg0: i32, %arg1: i32) -> (i32, i32, i32) {
    %c0_i32 = arith.constant 0 : i32
    %c0_i32_0 = arith.constant 0 : i32
    return %arg0, %c0_i32, %arg1 : i32, i32, i32
  }
}

module attributes {stable_mosaic.version = 11 : i64} {
  func.func @_matmul_bias_kernel(%arg0: i32, %arg1: i32, %arg2: i32, %arg3: memref<256x256xbf16, #tpu.memory_space<vmem>>, %arg4: memref<256x128xbf16, #tpu.memory_space<vmem>>, %arg5: memref<1x128xf32, #tpu.memory_space<vmem>>, %arg6: memref<256x128xf32, #tpu.memory_space<vmem>>, %arg7: memref<256x128xf32, #tpu.memory_space<vmem>>) attributes {dimension_semantics = [#tpu.dimension_semantics<parallel>, #tpu.dimension_semantics<parallel>, #tpu.dimension_semantics<arbitrary>], iteration_bounds = array<i64: 2, 1, 1>, scalar_prefetch = 0 : i64, scratch_operands = 1 : i64, tpu.core_type = #tpu.core_type<tc>, window_params = [{transform_indices = @transform_0, window_bounds = array<i64: 256, 256>}, {transform_indices = @transform_1, window_bounds = array<i64: 256, 128>}, {transform_indices = @transform_2, window_bounds = array<i64: 1, 128>}, {transform_indices = @transform_3, window_bounds = array<i64: 256, 128>}]} {
    %c0_i32 = arith.constant 0 : i32
    %0 = arith.cmpi eq, %arg2, %c0_i32 : i32
    %1 = arith.extui %0 : i1 to i32
    %c0_i32_0 = arith.constant 0 : i32
    %2 = arith.cmpi ne, %1, %c0_i32_0 : i32
    scf.if %2 {
      %cst_10 = arith.constant 0.000000e+00 : f32
      %12 = vector.broadcast %cst_10 : f32 to vector<256x128xf32>
      %c0_11 = arith.constant 0 : index
      %c0_12 = arith.constant 0 : index
      %13 = vector.load %arg7[%c0_11, %c0_12] : memref<256x128xf32, #tpu.memory_space<vmem>>, vector<256x128xf32>
      tpu.vector_store %arg7[%c0_11, %c0_12], %12 {strides = array<i32>} : memref<256x128xf32, #tpu.memory_space<vmem>>, vector<256x128xf32>,
    } else {
    }
    %c0 = arith.constant 0 : index
    %c0_1 = arith.constant 0 : index
    %3 = vector.load %arg7[%c0, %c0_1] : memref<256x128xf32, #tpu.memory_space<vmem>>, vector<256x128xf32>
    %c0_2 = arith.constant 0 : index
    %c0_3 = arith.constant 0 : index
    %4 = vector.load %arg3[%c0_2, %c0_3] : memref<256x256xbf16, #tpu.memory_space<vmem>>, vector<256x256xbf16>
    %c0_4 = arith.constant 0 : index
    %c0_5 = arith.constant 0 : index
    %5 = vector.load %arg4[%c0_4, %c0_5] : memref<256x128xbf16, #tpu.memory_space<vmem>>, vector<256x128xbf16>
    %cst = arith.constant dense<0.000000e+00> : vector<256x128xf32>
    %6 = tpu.matmul %4, %5, %cst {dimension_numbers = #tpu.dot_dimension_numbers<[1], [0], [0], [1], [0, 0, 1, 1], [], []>} : vector<256x256xbf16>, vector<256x128xbf16>, vector<256x128xf32> -> vector<256x128xf32>
    %7 = arith.addf %3, %6 : vector<256x128xf32>
    %c0_6 = arith.constant 0 : index
    %c0_7 = arith.constant 0 : index
    %8 = vector.load %arg7[%c0_6, %c0_7] : memref<256x128xf32, #tpu.memory_space<vmem>>, vector<256x128xf32>
    tpu.vector_store %arg7[%c0_6, %c0_7], %7 {strides = array<i32>} : memref<256x128xf32, #tpu.memory_space<vmem>>, vector<256x128xf32>,
    %c0_i32_8 = arith.constant 0 : i32
    %9 = arith.cmpi eq, %arg2, %c0_i32_8 : i32
    %10 = arith.extui %9 : i1 to i32
    %c0_i32_9 = arith.constant 0 : i32
    %11 = arith.cmpi ne, %10, %c0_i32_9 : i32
    scf.if %11 {
      %c0_10 = arith.constant 0 : index
      %c0_11 = arith.constant 0 : index
      %12 = vector.load %arg7[%c0_10, %c0_11] : memref<256x128xf32, #tpu.memory_space<vmem>>, vector<256x128xf32>
      %c0_12 = arith.constant 0 : index
      %c0_13 = arith.constant 0 : index
      %13 = vector.load %arg5[%c0_12, %c0_13] : memref<1x128xf32, #tpu.memory_space<vmem>>, vector<1x128xf32>
      %14 = vector.broadcast %13 : vector<1x128xf32> to vector<256x128xf32>
      %15 = arith.addf %12, %14 : vector<256x128xf32>
      %c0_14 = arith.constant 0 : index
      %c0_15 = arith.constant 0 : index
      %16 = vector.load %arg6[%c0_14, %c0_15] : memref<256x128xf32, #tpu.memory_space<vmem>>, vector<256x128xf32>
      tpu.vector_store %arg6[%c0_14, %c0_15], %15 {strides = array<i32>} : memref<256x128xf32, #tpu.memory_space<vmem>>, vector<256x128xf32>,
    } else {
    }
    return
  }
  func.func @transform_0(%arg0: i32, %arg1: i32, %arg2: i32) -> (i32, i32) {
    %c0_i32 = arith.constant 0 : i32
    return %arg0, %arg2 : i32, i32
  }
  func.func @transform_1(%arg0: i32, %arg1: i32, %arg2: i32) -> (i32, i32) {
    %c0_i32 = arith.constant 0 : i32
    return %arg2, %arg1 : i32, i32
  }
  func.func @transform_2(%arg0: i32, %arg1: i32, %arg2: i32) -> (i32, i32) {
    %c0_i32 = arith.constant 0 : i32
    %c0_i32_0 = arith.constant 0 : i32
    return %c0_i32, %arg1 : i32, i32
  }
  func.func @transform_3(%arg0: i32, %arg1: i32, %arg2: i32) -> (i32, i32) {
    %c0_i32 = arith.constant 0 : i32
    return %arg0, %arg1 : i32, i32
  }
}

module attributes {stable_mosaic.version = 11 : i64} {
  func.func @_matmul_bias_kernel(%arg0: i32, %arg1: i32, %arg2: i32, %arg3: memref<128x128xbf16, #tpu.memory_space<vmem>>, %arg4: memref<128x128xbf16, #tpu.memory_space<vmem>>, %arg5: memref<1x128xf32, #tpu.memory_space<vmem>>, %arg6: memref<128x128xf32, #tpu.memory_space<vmem>>, %arg7: memref<128x128xf32, #tpu.memory_space<vmem>>) attributes {dimension_semantics = [#tpu.dimension_semantics<parallel>, #tpu.dimension_semantics<parallel>, #tpu.dimension_semantics<arbitrary>], iteration_bounds = array<i64: 1, 1, 5>, scalar_prefetch = 0 : i64, scratch_operands = 1 : i64, tpu.core_type = #tpu.core_type<tc>, window_params = [{transform_indices = @transform_0, window_bounds = array<i64: 128, 128>}, {transform_indices = @transform_1, window_bounds = array<i64: 128, 128>}, {transform_indices = @transform_2, window_bounds = array<i64: 1, 128>}, {transform_indices = @transform_3, window_bounds = array<i64: 128, 128>}]} {
    %c0_i32 = arith.constant 0 : i32
    %0 = arith.cmpi eq, %arg2, %c0_i32 : i32
    %1 = arith.extui %0 : i1 to i32
    %c0_i32_0 = arith.constant 0 : i32
    %2 = arith.cmpi ne, %1, %c0_i32_0 : i32
    scf.if %2 {
      %cst_9 = arith.constant 0.000000e+00 : f32
      %12 = vector.broadcast %cst_9 : f32 to vector<128x128xf32>
      %c0_10 = arith.constant 0 : index
      %c0_11 = arith.constant 0 : index
      %13 = vector.load %arg7[%c0_10, %c0_11] : memref<128x128xf32, #tpu.memory_space<vmem>>, vector<128x128xf32>
      tpu.vector_store %arg7[%c0_10, %c0_11], %12 {strides = array<i32>} : memref<128x128xf32, #tpu.memory_space<vmem>>, vector<128x128xf32>,
    } else {
    }
    %c0 = arith.constant 0 : index
    %c0_1 = arith.constant 0 : index
    %3 = vector.load %arg7[%c0, %c0_1] : memref<128x128xf32, #tpu.memory_space<vmem>>, vector<128x128xf32>
    %c0_2 = arith.constant 0 : index
    %c0_3 = arith.constant 0 : index
    %4 = vector.load %arg3[%c0_2, %c0_3] : memref<128x128xbf16, #tpu.memory_space<vmem>>, vector<128x128xbf16>
    %c0_4 = arith.constant 0 : index
    %c0_5 = arith.constant 0 : index
    %5 = vector.load %arg4[%c0_4, %c0_5] : memref<128x128xbf16, #tpu.memory_space<vmem>>, vector<128x128xbf16>
    %cst = arith.constant dense<0.000000e+00> : vector<128x128xf32>
    %6 = tpu.matmul %4, %5, %cst {dimension_numbers = #tpu.dot_dimension_numbers<[1], [0], [0], [1], [0, 0, 1, 1], [], []>} : vector<128x128xbf16>, vector<128x128xbf16>, vector<128x128xf32> -> vector<128x128xf32>
    %7 = arith.addf %3, %6 : vector<128x128xf32>
    %c0_6 = arith.constant 0 : index
    %c0_7 = arith.constant 0 : index
    %8 = vector.load %arg7[%c0_6, %c0_7] : memref<128x128xf32, #tpu.memory_space<vmem>>, vector<128x128xf32>
    tpu.vector_store %arg7[%c0_6, %c0_7], %7 {strides = array<i32>} : memref<128x128xf32, #tpu.memory_space<vmem>>, vector<128x128xf32>,
    %c4_i32 = arith.constant 4 : i32
    %9 = arith.cmpi eq, %arg2, %c4_i32 : i32
    %10 = arith.extui %9 : i1 to i32
    %c0_i32_8 = arith.constant 0 : i32
    %11 = arith.cmpi ne, %10, %c0_i32_8 : i32
    scf.if %11 {
      %c0_9 = arith.constant 0 : index
      %c0_10 = arith.constant 0 : index
      %12 = vector.load %arg7[%c0_9, %c0_10] : memref<128x128xf32, #tpu.memory_space<vmem>>, vector<128x128xf32>
      %c0_11 = arith.constant 0 : index
      %c0_12 = arith.constant 0 : index
      %13 = vector.load %arg5[%c0_11, %c0_12] : memref<1x128xf32, #tpu.memory_space<vmem>>, vector<1x128xf32>
      %14 = vector.broadcast %13 : vector<1x128xf32> to vector<128x128xf32>
      %15 = arith.addf %12, %14 : vector<128x128xf32>
      %c0_13 = arith.constant 0 : index
      %c0_14 = arith.constant 0 : index
      %16 = vector.load %arg6[%c0_13, %c0_14] : memref<128x128xf32, #tpu.memory_space<vmem>>, vector<128x128xf32>
      tpu.vector_store %arg6[%c0_13, %c0_14], %15 {strides = array<i32>} : memref<128x128xf32, #tpu.memory_space<vmem>>, vector<128x128xf32>,
    } else {
    }
    return
  }
  func.func @transform_0(%arg0: i32, %arg1: i32, %arg2: i32) -> (i32, i32) {
    %c0_i32 = arith.constant 0 : i32
    return %arg0, %arg2 : i32, i32
  }
  func.func @transform_1(%arg0: i32, %arg1: i32, %arg2: i32) -> (i32, i32) {
    %c0_i32 = arith.constant 0 : i32
    return %arg2, %arg1 : i32, i32
  }
  func.func @transform_2(%arg0: i32, %arg1: i32, %arg2: i32) -> (i32, i32) {
    %c0_i32 = arith.constant 0 : i32
    %c0_i32_0 = arith.constant 0 : i32
    return %c0_i32, %arg1 : i32, i32
  }
  func.func @transform_3(%arg0: i32, %arg1: i32, %arg2: i32) -> (i32, i32) {
    %c0_i32 = arith.constant 0 : i32
    return %arg0, %arg1 : i32, i32
  }
}

module attributes {stable_mosaic.version = 11 : i64} {
  func.func @_in_lrelu_kernel(%arg0: i32, %arg1: i32, %arg2: memref<1x64x128xf32, #tpu.memory_space<vmem>>, %arg3: memref<1x64x128xf32, #tpu.memory_space<vmem>>) attributes {dimension_semantics = [#tpu.dimension_semantics<parallel>, #tpu.dimension_semantics<parallel>], iteration_bounds = array<i64: 2, 1>, scalar_prefetch = 0 : i64, scratch_operands = 0 : i64, tpu.core_type = #tpu.core_type<tc>, window_params = [{transform_indices = @transform_0, window_bounds = array<i64: 1, 64, 128>}, {transform_indices = @transform_1, window_bounds = array<i64: 1, 64, 128>}]} {
    %c0 = arith.constant 0 : index
    %c0_0 = arith.constant 0 : index
    %c0_1 = arith.constant 0 : index
    %0 = vector.load %arg2[%c0, %c0_0, %c0_1] : memref<1x64x128xf32, #tpu.memory_space<vmem>>, vector<1x64x128xf32>
    %1 = vector.shape_cast %0 : vector<1x64x128xf32> to vector<64x128xf32>
    %cst = arith.constant dense<0.000000e+00> : vector<128xf32>
    %2 = vector.multi_reduction <add>, %1, %cst [0] : vector<64x128xf32> to vector<128xf32>
    %3 = vector.shape_cast %2 : vector<128xf32> to vector<1x128xf32>
    %cst_2 = arith.constant 6.400000e+01 : f32
    %4 = vector.broadcast %cst_2 : f32 to vector<1x128xf32>
    %5 = arith.divf %3, %4 : vector<1x128xf32>
    %6 = vector.broadcast %5 : vector<1x128xf32> to vector<64x128xf32>
    %7 = arith.subf %1, %6 : vector<64x128xf32>
    %8 = arith.mulf %7, %7 : vector<64x128xf32>
    %cst_3 = arith.constant dense<0.000000e+00> : vector<128xf32>
    %9 = vector.multi_reduction <add>, %8, %cst_3 [0] : vector<64x128xf32> to vector<128xf32>
    %10 = vector.shape_cast %9 : vector<128xf32> to vector<1x128xf32>
    %cst_4 = arith.constant 6.400000e+01 : f32
    %11 = vector.broadcast %cst_4 : f32 to vector<1x128xf32>
    %12 = arith.divf %10, %11 : vector<1x128xf32>
    %13 = vector.broadcast %5 : vector<1x128xf32> to vector<64x128xf32>
    %14 = arith.subf %1, %13 : vector<64x128xf32>
    %cst_5 = arith.constant 9.99999974E-6 : f32
    %15 = vector.broadcast %cst_5 : f32 to vector<1x128xf32>
    %16 = arith.addf %12, %15 : vector<1x128xf32>
    %17 = math.rsqrt %16 : vector<1x128xf32>
    %18 = vector.broadcast %17 : vector<1x128xf32> to vector<64x128xf32>
    %19 = arith.mulf %14, %18 : vector<64x128xf32>
    %cst_6 = arith.constant 0.000000e+00 : f32
    %20 = vector.broadcast %cst_6 : f32 to vector<64x128xf32>
    %21 = arith.cmpf oge, %19, %20 : vector<64x128xf32>
    %cst_7 = arith.constant 2.000000e-01 : f32
    %22 = vector.broadcast %cst_7 : f32 to vector<64x128xf32>
    %23 = arith.mulf %22, %19 : vector<64x128xf32>
    %24 = arith.select %21, %19, %23 : vector<64x128xi1>, vector<64x128xf32>
    %c0_8 = arith.constant 0 : index
    %c0_9 = arith.constant 0 : index
    %c0_10 = arith.constant 0 : index
    %25 = vector.load %arg3[%c0_8, %c0_9, %c0_10] : memref<1x64x128xf32, #tpu.memory_space<vmem>>, vector<1x64x128xf32>
    %26 = vector.shape_cast %25 : vector<1x64x128xf32> to vector<64x128xf32>
    %27 = vector.shape_cast %24 : vector<64x128xf32> to vector<1x64x128xf32>
    tpu.vector_store %arg3[%c0_8, %c0_9, %c0_10], %27 {strides = array<i32>} : memref<1x64x128xf32, #tpu.memory_space<vmem>>, vector<1x64x128xf32>,
    return
  }
  func.func @transform_0(%arg0: i32, %arg1: i32) -> (i32, i32, i32) {
    %c0_i32 = arith.constant 0 : i32
    %c0_i32_0 = arith.constant 0 : i32
    return %arg0, %c0_i32, %arg1 : i32, i32, i32
  }
  func.func @transform_1(%arg0: i32, %arg1: i32) -> (i32, i32, i32) {
    %c0_i32 = arith.constant 0 : i32
    %c0_i32_0 = arith.constant 0 : i32
    return %arg0, %c0_i32, %arg1 : i32, i32, i32
  }
}

module attributes {stable_mosaic.version = 11 : i64} {
  func.func @_matmul_bias_kernel(%arg0: i32, %arg1: i32, %arg2: i32, %arg3: memref<32x128xbf16, #tpu.memory_space<vmem>>, %arg4: memref<128x128xbf16, #tpu.memory_space<vmem>>, %arg5: memref<1x128xf32, #tpu.memory_space<vmem>>, %arg6: memref<32x128xf32, #tpu.memory_space<vmem>>, %arg7: memref<32x128xf32, #tpu.memory_space<vmem>>) attributes {dimension_semantics = [#tpu.dimension_semantics<parallel>, #tpu.dimension_semantics<parallel>, #tpu.dimension_semantics<arbitrary>], iteration_bounds = array<i64: 1, 2, 9>, scalar_prefetch = 0 : i64, scratch_operands = 1 : i64, tpu.core_type = #tpu.core_type<tc>, window_params = [{transform_indices = @transform_0, window_bounds = array<i64: 32, 128>}, {transform_indices = @transform_1, window_bounds = array<i64: 128, 128>}, {transform_indices = @transform_2, window_bounds = array<i64: 1, 128>}, {transform_indices = @transform_3, window_bounds = array<i64: 32, 128>}]} {
    %c0_i32 = arith.constant 0 : i32
    %0 = arith.cmpi eq, %arg2, %c0_i32 : i32
    %1 = arith.extui %0 : i1 to i32
    %c0_i32_0 = arith.constant 0 : i32
    %2 = arith.cmpi ne, %1, %c0_i32_0 : i32
    scf.if %2 {
      %cst_9 = arith.constant 0.000000e+00 : f32
      %12 = vector.broadcast %cst_9 : f32 to vector<32x128xf32>
      %c0_10 = arith.constant 0 : index
      %c0_11 = arith.constant 0 : index
      %13 = vector.load %arg7[%c0_10, %c0_11] : memref<32x128xf32, #tpu.memory_space<vmem>>, vector<32x128xf32>
      tpu.vector_store %arg7[%c0_10, %c0_11], %12 {strides = array<i32>} : memref<32x128xf32, #tpu.memory_space<vmem>>, vector<32x128xf32>,
    } else {
    }
    %c0 = arith.constant 0 : index
    %c0_1 = arith.constant 0 : index
    %3 = vector.load %arg7[%c0, %c0_1] : memref<32x128xf32, #tpu.memory_space<vmem>>, vector<32x128xf32>
    %c0_2 = arith.constant 0 : index
    %c0_3 = arith.constant 0 : index
    %4 = vector.load %arg3[%c0_2, %c0_3] : memref<32x128xbf16, #tpu.memory_space<vmem>>, vector<32x128xbf16>
    %c0_4 = arith.constant 0 : index
    %c0_5 = arith.constant 0 : index
    %5 = vector.load %arg4[%c0_4, %c0_5] : memref<128x128xbf16, #tpu.memory_space<vmem>>, vector<128x128xbf16>
    %cst = arith.constant dense<0.000000e+00> : vector<32x128xf32>
    %6 = tpu.matmul %4, %5, %cst {dimension_numbers = #tpu.dot_dimension_numbers<[1], [0], [0], [1], [0, 0, 1, 1], [], []>} : vector<32x128xbf16>, vector<128x128xbf16>, vector<32x128xf32> -> vector<32x128xf32>
    %7 = arith.addf %3, %6 : vector<32x128xf32>
    %c0_6 = arith.constant 0 : index
    %c0_7 = arith.constant 0 : index
    %8 = vector.load %arg7[%c0_6, %c0_7] : memref<32x128xf32, #tpu.memory_space<vmem>>, vector<32x128xf32>
    tpu.vector_store %arg7[%c0_6, %c0_7], %7 {strides = array<i32>} : memref<32x128xf32, #tpu.memory_space<vmem>>, vector<32x128xf32>,
    %c8_i32 = arith.constant 8 : i32
    %9 = arith.cmpi eq, %arg2, %c8_i32 : i32
    %10 = arith.extui %9 : i1 to i32
    %c0_i32_8 = arith.constant 0 : i32
    %11 = arith.cmpi ne, %10, %c0_i32_8 : i32
    scf.if %11 {
      %c0_9 = arith.constant 0 : index
      %c0_10 = arith.constant 0 : index
      %12 = vector.load %arg7[%c0_9, %c0_10] : memref<32x128xf32, #tpu.memory_space<vmem>>, vector<32x128xf32>
      %c0_11 = arith.constant 0 : index
      %c0_12 = arith.constant 0 : index
      %13 = vector.load %arg5[%c0_11, %c0_12] : memref<1x128xf32, #tpu.memory_space<vmem>>, vector<1x128xf32>
      %14 = vector.broadcast %13 : vector<1x128xf32> to vector<32x128xf32>
      %15 = arith.addf %12, %14 : vector<32x128xf32>
      %c0_13 = arith.constant 0 : index
      %c0_14 = arith.constant 0 : index
      %16 = vector.load %arg6[%c0_13, %c0_14] : memref<32x128xf32, #tpu.memory_space<vmem>>, vector<32x128xf32>
      tpu.vector_store %arg6[%c0_13, %c0_14], %15 {strides = array<i32>} : memref<32x128xf32, #tpu.memory_space<vmem>>, vector<32x128xf32>,
    } else {
    }
    return
  }
  func.func @transform_0(%arg0: i32, %arg1: i32, %arg2: i32) -> (i32, i32) {
    %c0_i32 = arith.constant 0 : i32
    return %arg0, %arg2 : i32, i32
  }
  func.func @transform_1(%arg0: i32, %arg1: i32, %arg2: i32) -> (i32, i32) {
    %c0_i32 = arith.constant 0 : i32
    return %arg2, %arg1 : i32, i32
  }
  func.func @transform_2(%arg0: i32, %arg1: i32, %arg2: i32) -> (i32, i32) {
    %c0_i32 = arith.constant 0 : i32
    %c0_i32_0 = arith.constant 0 : i32
    return %c0_i32, %arg1 : i32, i32
  }
  func.func @transform_3(%arg0: i32, %arg1: i32, %arg2: i32) -> (i32, i32) {
    %c0_i32 = arith.constant 0 : i32
    return %arg0, %arg1 : i32, i32
  }
}

module attributes {stable_mosaic.version = 11 : i64} {
  func.func @_in_lrelu_kernel(%arg0: i32, %arg1: i32, %arg2: memref<1x16x128xf32, #tpu.memory_space<vmem>>, %arg3: memref<1x16x128xf32, #tpu.memory_space<vmem>>) attributes {dimension_semantics = [#tpu.dimension_semantics<parallel>, #tpu.dimension_semantics<parallel>], iteration_bounds = array<i64: 2, 2>, scalar_prefetch = 0 : i64, scratch_operands = 0 : i64, tpu.core_type = #tpu.core_type<tc>, window_params = [{transform_indices = @transform_0, window_bounds = array<i64: 1, 16, 128>}, {transform_indices = @transform_1, window_bounds = array<i64: 1, 16, 128>}]} {
    %c0 = arith.constant 0 : index
    %c0_0 = arith.constant 0 : index
    %c0_1 = arith.constant 0 : index
    %0 = vector.load %arg2[%c0, %c0_0, %c0_1] : memref<1x16x128xf32, #tpu.memory_space<vmem>>, vector<1x16x128xf32>
    %1 = vector.shape_cast %0 : vector<1x16x128xf32> to vector<16x128xf32>
    %cst = arith.constant dense<0.000000e+00> : vector<128xf32>
    %2 = vector.multi_reduction <add>, %1, %cst [0] : vector<16x128xf32> to vector<128xf32>
    %3 = vector.shape_cast %2 : vector<128xf32> to vector<1x128xf32>
    %cst_2 = arith.constant 1.600000e+01 : f32
    %4 = vector.broadcast %cst_2 : f32 to vector<1x128xf32>
    %5 = arith.divf %3, %4 : vector<1x128xf32>
    %6 = vector.broadcast %5 : vector<1x128xf32> to vector<16x128xf32>
    %7 = arith.subf %1, %6 : vector<16x128xf32>
    %8 = arith.mulf %7, %7 : vector<16x128xf32>
    %cst_3 = arith.constant dense<0.000000e+00> : vector<128xf32>
    %9 = vector.multi_reduction <add>, %8, %cst_3 [0] : vector<16x128xf32> to vector<128xf32>
    %10 = vector.shape_cast %9 : vector<128xf32> to vector<1x128xf32>
    %cst_4 = arith.constant 1.600000e+01 : f32
    %11 = vector.broadcast %cst_4 : f32 to vector<1x128xf32>
    %12 = arith.divf %10, %11 : vector<1x128xf32>
    %13 = vector.broadcast %5 : vector<1x128xf32> to vector<16x128xf32>
    %14 = arith.subf %1, %13 : vector<16x128xf32>
    %cst_5 = arith.constant 9.99999974E-6 : f32
    %15 = vector.broadcast %cst_5 : f32 to vector<1x128xf32>
    %16 = arith.addf %12, %15 : vector<1x128xf32>
    %17 = math.rsqrt %16 : vector<1x128xf32>
    %18 = vector.broadcast %17 : vector<1x128xf32> to vector<16x128xf32>
    %19 = arith.mulf %14, %18 : vector<16x128xf32>
    %cst_6 = arith.constant 0.000000e+00 : f32
    %20 = vector.broadcast %cst_6 : f32 to vector<16x128xf32>
    %21 = arith.cmpf oge, %19, %20 : vector<16x128xf32>
    %cst_7 = arith.constant 2.000000e-01 : f32
    %22 = vector.broadcast %cst_7 : f32 to vector<16x128xf32>
    %23 = arith.mulf %22, %19 : vector<16x128xf32>
    %24 = arith.select %21, %19, %23 : vector<16x128xi1>, vector<16x128xf32>
    %c0_8 = arith.constant 0 : index
    %c0_9 = arith.constant 0 : index
    %c0_10 = arith.constant 0 : index
    %25 = vector.load %arg3[%c0_8, %c0_9, %c0_10] : memref<1x16x128xf32, #tpu.memory_space<vmem>>, vector<1x16x128xf32>
    %26 = vector.shape_cast %25 : vector<1x16x128xf32> to vector<16x128xf32>
    %27 = vector.shape_cast %24 : vector<16x128xf32> to vector<1x16x128xf32>
    tpu.vector_store %arg3[%c0_8, %c0_9, %c0_10], %27 {strides = array<i32>} : memref<1x16x128xf32, #tpu.memory_space<vmem>>, vector<1x16x128xf32>,
    return
  }
  func.func @transform_0(%arg0: i32, %arg1: i32) -> (i32, i32, i32) {
    %c0_i32 = arith.constant 0 : i32
    %c0_i32_0 = arith.constant 0 : i32
    return %arg0, %c0_i32, %arg1 : i32, i32, i32
  }
  func.func @transform_1(%arg0: i32, %arg1: i32) -> (i32, i32, i32) {
    %c0_i32 = arith.constant 0 : i32
    %c0_i32_0 = arith.constant 0 : i32
    return %arg0, %c0_i32, %arg1 : i32, i32, i32
  }
}

module attributes {stable_mosaic.version = 11 : i64} {
  func.func @_direct_conv_kernel(%arg0: i32, %arg1: i32, %arg2: memref<1x38x256xbf16, #tpu.memory_space<vmem>>, %arg3: memref<2304x128xbf16, #tpu.memory_space<vmem>>, %arg4: memref<1x128xf32, #tpu.memory_space<vmem>>, %arg5: memref<1x24x128xf32, #tpu.memory_space<vmem>>, %arg6: memref<24x128xf32, #tpu.memory_space<vmem>>) attributes {dimension_semantics = [#tpu.dimension_semantics<parallel>, #tpu.dimension_semantics<parallel>], iteration_bounds = array<i64: 2, 2>, scalar_prefetch = 0 : i64, scratch_operands = 1 : i64, tpu.core_type = #tpu.core_type<tc>, window_params = [{transform_indices = @transform_0, window_bounds = array<i64: 1, 38, 256>}, {transform_indices = @transform_1, window_bounds = array<i64: 2304, 128>}, {transform_indices = @transform_2, window_bounds = array<i64: 1, 128>}, {transform_indices = @transform_3, window_bounds = array<i64: 1, 24, 128>}]} {
    %c0 = arith.constant 0 : index
    %c0_0 = arith.constant 0 : index
    %c0_1 = arith.constant 0 : index
    %0 = vector.load %arg2[%c0, %c0_0, %c0_1] : memref<1x38x256xbf16, #tpu.memory_space<vmem>>, vector<1x24x256xbf16>
    %1 = vector.shape_cast %0 : vector<1x24x256xbf16> to vector<24x256xbf16>
    %c0_2 = arith.constant 0 : index
    %c0_3 = arith.constant 0 : index
    %2 = vector.load %arg3[%c0_2, %c0_3] : memref<2304x128xbf16, #tpu.memory_space<vmem>>, vector<256x128xbf16>
    %cst = arith.constant dense<0.000000e+00> : vector<24x128xf32>
    %3 = tpu.matmul %1, %2, %cst {dimension_numbers = #tpu.dot_dimension_numbers<[1], [0], [0], [1], [0, 0, 1, 1], [], []>} : vector<24x256xbf16>, vector<256x128xbf16>, vector<24x128xf32> -> vector<24x128xf32>
    %c0_4 = arith.constant 0 : index
    %c0_5 = arith.constant 0 : index
    %4 = vector.load %arg6[%c0_4, %c0_5] : memref<24x128xf32, #tpu.memory_space<vmem>>, vector<24x128xf32>
    tpu.vector_store %arg6[%c0_4, %c0_5], %3 {strides = array<i32>} : memref<24x128xf32, #tpu.memory_space<vmem>>, vector<24x128xf32>,
    %c0_6 = arith.constant 0 : index
    %c1 = arith.constant 1 : index
    %c0_7 = arith.constant 0 : index
    %5 = vector.load %arg2[%c0_6, %c1, %c0_7] : memref<1x38x256xbf16, #tpu.memory_space<vmem>>, vector<1x24x256xbf16>
    %6 = vector.shape_cast %5 : vector<1x24x256xbf16> to vector<24x256xbf16>
    %c256 = arith.constant 256 : index
    %c0_8 = arith.constant 0 : index
    %7 = vector.load %arg3[%c256, %c0_8] : memref<2304x128xbf16, #tpu.memory_space<vmem>>, vector<256x128xbf16>
    %cst_9 = arith.constant dense<0.000000e+00> : vector<24x128xf32>
    %8 = tpu.matmul %6, %7, %cst_9 {dimension_numbers = #tpu.dot_dimension_numbers<[1], [0], [0], [1], [0, 0, 1, 1], [], []>} : vector<24x256xbf16>, vector<256x128xbf16>, vector<24x128xf32> -> vector<24x128xf32>
    %c0_10 = arith.constant 0 : index
    %c0_11 = arith.constant 0 : index
    %9 = vector.load %arg6[%c0_10, %c0_11] : memref<24x128xf32, #tpu.memory_space<vmem>>, vector<24x128xf32>
    %10 = arith.addf %9, %8 : vector<24x128xf32>
    %c0_12 = arith.constant 0 : index
    %c0_13 = arith.constant 0 : index
    %11 = vector.load %arg6[%c0_12, %c0_13] : memref<24x128xf32, #tpu.memory_space<vmem>>, vector<24x128xf32>
    tpu.vector_store %arg6[%c0_12, %c0_13], %10 {strides = array<i32>} : memref<24x128xf32, #tpu.memory_space<vmem>>, vector<24x128xf32>,
    %c0_14 = arith.constant 0 : index
    %c2 = arith.constant 2 : index
    %c0_15 = arith.constant 0 : index
    %12 = vector.load %arg2[%c0_14, %c2, %c0_15] : memref<1x38x256xbf16, #tpu.memory_space<vmem>>, vector<1x24x256xbf16>
    %13 = vector.shape_cast %12 : vector<1x24x256xbf16> to vector<24x256xbf16>
    %c512 = arith.constant 512 : index
    %c0_16 = arith.constant 0 : index
    %14 = vector.load %arg3[%c512, %c0_16] : memref<2304x128xbf16, #tpu.memory_space<vmem>>, vector<256x128xbf16>
    %cst_17 = arith.constant dense<0.000000e+00> : vector<24x128xf32>
    %15 = tpu.matmul %13, %14, %cst_17 {dimension_numbers = #tpu.dot_dimension_numbers<[1], [0], [0], [1], [0, 0, 1, 1], [], []>} : vector<24x256xbf16>, vector<256x128xbf16>, vector<24x128xf32> -> vector<24x128xf32>
    %c0_18 = arith.constant 0 : index
    %c0_19 = arith.constant 0 : index
    %16 = vector.load %arg6[%c0_18, %c0_19] : memref<24x128xf32, #tpu.memory_space<vmem>>, vector<24x128xf32>
    %17 = arith.addf %16, %15 : vector<24x128xf32>
    %c0_20 = arith.constant 0 : index
    %c0_21 = arith.constant 0 : index
    %18 = vector.load %arg6[%c0_20, %c0_21] : memref<24x128xf32, #tpu.memory_space<vmem>>, vector<24x128xf32>
    tpu.vector_store %arg6[%c0_20, %c0_21], %17 {strides = array<i32>} : memref<24x128xf32, #tpu.memory_space<vmem>>, vector<24x128xf32>,
    %c0_22 = arith.constant 0 : index
    %c6 = arith.constant 6 : index
    %c0_23 = arith.constant 0 : index
    %19 = vector.load %arg2[%c0_22, %c6, %c0_23] : memref<1x38x256xbf16, #tpu.memory_space<vmem>>, vector<1x24x256xbf16>
    %20 = vector.shape_cast %19 : vector<1x24x256xbf16> to vector<24x256xbf16>
    %c768 = arith.constant 768 : index
    %c0_24 = arith.constant 0 : index
    %21 = vector.load %arg3[%c768, %c0_24] : memref<2304x128xbf16, #tpu.memory_space<vmem>>, vector<256x128xbf16>
    %cst_25 = arith.constant dense<0.000000e+00> : vector<24x128xf32>
    %22 = tpu.matmul %20, %21, %cst_25 {dimension_numbers = #tpu.dot_dimension_numbers<[1], [0], [0], [1], [0, 0, 1, 1], [], []>} : vector<24x256xbf16>, vector<256x128xbf16>, vector<24x128xf32> -> vector<24x128xf32>
    %c0_26 = arith.constant 0 : index
    %c0_27 = arith.constant 0 : index
    %23 = vector.load %arg6[%c0_26, %c0_27] : memref<24x128xf32, #tpu.memory_space<vmem>>, vector<24x128xf32>
    %24 = arith.addf %23, %22 : vector<24x128xf32>
    %c0_28 = arith.constant 0 : index
    %c0_29 = arith.constant 0 : index
    %25 = vector.load %arg6[%c0_28, %c0_29] : memref<24x128xf32, #tpu.memory_space<vmem>>, vector<24x128xf32>
    tpu.vector_store %arg6[%c0_28, %c0_29], %24 {strides = array<i32>} : memref<24x128xf32, #tpu.memory_space<vmem>>, vector<24x128xf32>,
    %c0_30 = arith.constant 0 : index
    %c7 = arith.constant 7 : index
    %c0_31 = arith.constant 0 : index
    %26 = vector.load %arg2[%c0_30, %c7, %c0_31] : memref<1x38x256xbf16, #tpu.memory_space<vmem>>, vector<1x24x256xbf16>
    %27 = vector.shape_cast %26 : vector<1x24x256xbf16> to vector<24x256xbf16>
    %c1024 = arith.constant 1024 : index
    %c0_32 = arith.constant 0 : index
    %28 = vector.load %arg3[%c1024, %c0_32] : memref<2304x128xbf16, #tpu.memory_space<vmem>>, vector<256x128xbf16>
    %cst_33 = arith.constant dense<0.000000e+00> : vector<24x128xf32>
    %29 = tpu.matmul %27, %28, %cst_33 {dimension_numbers = #tpu.dot_dimension_numbers<[1], [0], [0], [1], [0, 0, 1, 1], [], []>} : vector<24x256xbf16>, vector<256x128xbf16>, vector<24x128xf32> -> vector<24x128xf32>
    %c0_34 = arith.constant 0 : index
    %c0_35 = arith.constant 0 : index
    %30 = vector.load %arg6[%c0_34, %c0_35] : memref<24x128xf32, #tpu.memory_space<vmem>>, vector<24x128xf32>
    %31 = arith.addf %30, %29 : vector<24x128xf32>
    %c0_36 = arith.constant 0 : index
    %c0_37 = arith.constant 0 : index
    %32 = vector.load %arg6[%c0_36, %c0_37] : memref<24x128xf32, #tpu.memory_space<vmem>>, vector<24x128xf32>
    tpu.vector_store %arg6[%c0_36, %c0_37], %31 {strides = array<i32>} : memref<24x128xf32, #tpu.memory_space<vmem>>, vector<24x128xf32>,
    %c0_38 = arith.constant 0 : index
    %c8 = arith.constant 8 : index
    %c0_39 = arith.constant 0 : index
    %33 = vector.load %arg2[%c0_38, %c8, %c0_39] : memref<1x38x256xbf16, #tpu.memory_space<vmem>>, vector<1x24x256xbf16>
    %34 = vector.shape_cast %33 : vector<1x24x256xbf16> to vector<24x256xbf16>
    %c1280 = arith.constant 1280 : index
    %c0_40 = arith.constant 0 : index
    %35 = vector.load %arg3[%c1280, %c0_40] : memref<2304x128xbf16, #tpu.memory_space<vmem>>, vector<256x128xbf16>
    %cst_41 = arith.constant dense<0.000000e+00> : vector<24x128xf32>
    %36 = tpu.matmul %34, %35, %cst_41 {dimension_numbers = #tpu.dot_dimension_numbers<[1], [0], [0], [1], [0, 0, 1, 1], [], []>} : vector<24x256xbf16>, vector<256x128xbf16>, vector<24x128xf32> -> vector<24x128xf32>
    %c0_42 = arith.constant 0 : index
    %c0_43 = arith.constant 0 : index
    %37 = vector.load %arg6[%c0_42, %c0_43] : memref<24x128xf32, #tpu.memory_space<vmem>>, vector<24x128xf32>
    %38 = arith.addf %37, %36 : vector<24x128xf32>
    %c0_44 = arith.constant 0 : index
    %c0_45 = arith.constant 0 : index
    %39 = vector.load %arg6[%c0_44, %c0_45] : memref<24x128xf32, #tpu.memory_space<vmem>>, vector<24x128xf32>
    tpu.vector_store %arg6[%c0_44, %c0_45], %38 {strides = array<i32>} : memref<24x128xf32, #tpu.memory_space<vmem>>, vector<24x128xf32>,
    %c0_46 = arith.constant 0 : index
    %c12 = arith.constant 12 : index
    %c0_47 = arith.constant 0 : index
    %40 = vector.load %arg2[%c0_46, %c12, %c0_47] : memref<1x38x256xbf16, #tpu.memory_space<vmem>>, vector<1x24x256xbf16>
    %41 = vector.shape_cast %40 : vector<1x24x256xbf16> to vector<24x256xbf16>
    %c1536 = arith.constant 1536 : index
    %c0_48 = arith.constant 0 : index
    %42 = vector.load %arg3[%c1536, %c0_48] : memref<2304x128xbf16, #tpu.memory_space<vmem>>, vector<256x128xbf16>
    %cst_49 = arith.constant dense<0.000000e+00> : vector<24x128xf32>
    %43 = tpu.matmul %41, %42, %cst_49 {dimension_numbers = #tpu.dot_dimension_numbers<[1], [0], [0], [1], [0, 0, 1, 1], [], []>} : vector<24x256xbf16>, vector<256x128xbf16>, vector<24x128xf32> -> vector<24x128xf32>
    %c0_50 = arith.constant 0 : index
    %c0_51 = arith.constant 0 : index
    %44 = vector.load %arg6[%c0_50, %c0_51] : memref<24x128xf32, #tpu.memory_space<vmem>>, vector<24x128xf32>
    %45 = arith.addf %44, %43 : vector<24x128xf32>
    %c0_52 = arith.constant 0 : index
    %c0_53 = arith.constant 0 : index
    %46 = vector.load %arg6[%c0_52, %c0_53] : memref<24x128xf32, #tpu.memory_space<vmem>>, vector<24x128xf32>
    tpu.vector_store %arg6[%c0_52, %c0_53], %45 {strides = array<i32>} : memref<24x128xf32, #tpu.memory_space<vmem>>, vector<24x128xf32>,
    %c0_54 = arith.constant 0 : index
    %c13 = arith.constant 13 : index
    %c0_55 = arith.constant 0 : index
    %47 = vector.load %arg2[%c0_54, %c13, %c0_55] : memref<1x38x256xbf16, #tpu.memory_space<vmem>>, vector<1x24x256xbf16>
    %48 = vector.shape_cast %47 : vector<1x24x256xbf16> to vector<24x256xbf16>
    %c1792 = arith.constant 1792 : index
    %c0_56 = arith.constant 0 : index
    %49 = vector.load %arg3[%c1792, %c0_56] : memref<2304x128xbf16, #tpu.memory_space<vmem>>, vector<256x128xbf16>
    %cst_57 = arith.constant dense<0.000000e+00> : vector<24x128xf32>
    %50 = tpu.matmul %48, %49, %cst_57 {dimension_numbers = #tpu.dot_dimension_numbers<[1], [0], [0], [1], [0, 0, 1, 1], [], []>} : vector<24x256xbf16>, vector<256x128xbf16>, vector<24x128xf32> -> vector<24x128xf32>
    %c0_58 = arith.constant 0 : index
    %c0_59 = arith.constant 0 : index
    %51 = vector.load %arg6[%c0_58, %c0_59] : memref<24x128xf32, #tpu.memory_space<vmem>>, vector<24x128xf32>
    %52 = arith.addf %51, %50 : vector<24x128xf32>
    %c0_60 = arith.constant 0 : index
    %c0_61 = arith.constant 0 : index
    %53 = vector.load %arg6[%c0_60, %c0_61] : memref<24x128xf32, #tpu.memory_space<vmem>>, vector<24x128xf32>
    tpu.vector_store %arg6[%c0_60, %c0_61], %52 {strides = array<i32>} : memref<24x128xf32, #tpu.memory_space<vmem>>, vector<24x128xf32>,
    %c0_62 = arith.constant 0 : index
    %c14 = arith.constant 14 : index
    %c0_63 = arith.constant 0 : index
    %54 = vector.load %arg2[%c0_62, %c14, %c0_63] : memref<1x38x256xbf16, #tpu.memory_space<vmem>>, vector<1x24x256xbf16>
    %55 = vector.shape_cast %54 : vector<1x24x256xbf16> to vector<24x256xbf16>
    %c2048 = arith.constant 2048 : index
    %c0_64 = arith.constant 0 : index
    %56 = vector.load %arg3[%c2048, %c0_64] : memref<2304x128xbf16, #tpu.memory_space<vmem>>, vector<256x128xbf16>
    %cst_65 = arith.constant dense<0.000000e+00> : vector<24x128xf32>
    %57 = tpu.matmul %55, %56, %cst_65 {dimension_numbers = #tpu.dot_dimension_numbers<[1], [0], [0], [1], [0, 0, 1, 1], [], []>} : vector<24x256xbf16>, vector<256x128xbf16>, vector<24x128xf32> -> vector<24x128xf32>
    %c0_66 = arith.constant 0 : index
    %c0_67 = arith.constant 0 : index
    %58 = vector.load %arg6[%c0_66, %c0_67] : memref<24x128xf32, #tpu.memory_space<vmem>>, vector<24x128xf32>
    %59 = arith.addf %58, %57 : vector<24x128xf32>
    %c0_68 = arith.constant 0 : index
    %c0_69 = arith.constant 0 : index
    %60 = vector.load %arg6[%c0_68, %c0_69] : memref<24x128xf32, #tpu.memory_space<vmem>>, vector<24x128xf32>
    tpu.vector_store %arg6[%c0_68, %c0_69], %59 {strides = array<i32>} : memref<24x128xf32, #tpu.memory_space<vmem>>, vector<24x128xf32>,
    %c0_70 = arith.constant 0 : index
    %c0_71 = arith.constant 0 : index
    %61 = vector.load %arg6[%c0_70, %c0_71] : memref<24x128xf32, #tpu.memory_space<vmem>>, vector<24x128xf32>
    %c0_72 = arith.constant 0 : index
    %c0_73 = arith.constant 0 : index
    %62 = vector.load %arg4[%c0_72, %c0_73] : memref<1x128xf32, #tpu.memory_space<vmem>>, vector<1x128xf32>
    %63 = vector.broadcast %62 : vector<1x128xf32> to vector<24x128xf32>
    %64 = arith.addf %61, %63 : vector<24x128xf32>
    %c0_74 = arith.constant 0 : index
    %c0_75 = arith.constant 0 : index
    %c0_76 = arith.constant 0 : index
    %65 = vector.load %arg5[%c0_74, %c0_75, %c0_76] : memref<1x24x128xf32, #tpu.memory_space<vmem>>, vector<1x24x128xf32>
    %66 = vector.shape_cast %65 : vector<1x24x128xf32> to vector<24x128xf32>
    %67 = vector.shape_cast %64 : vector<24x128xf32> to vector<1x24x128xf32>
    tpu.vector_store %arg5[%c0_74, %c0_75, %c0_76], %67 {strides = array<i32>} : memref<1x24x128xf32, #tpu.memory_space<vmem>>, vector<1x24x128xf32>,
    return
  }
  func.func @transform_0(%arg0: i32, %arg1: i32) -> (i32, i32, i32) {
    %c0_i32 = arith.constant 0 : i32
    %c0_i32_0 = arith.constant 0 : i32
    %c0_i32_1 = arith.constant 0 : i32
    return %arg0, %c0_i32, %c0_i32_0 : i32, i32, i32
  }
  func.func @transform_1(%arg0: i32, %arg1: i32) -> (i32, i32) {
    %c0_i32 = arith.constant 0 : i32
    %c0_i32_0 = arith.constant 0 : i32
    return %c0_i32, %arg1 : i32, i32
  }
  func.func @transform_2(%arg0: i32, %arg1: i32) -> (i32, i32) {
    %c0_i32 = arith.constant 0 : i32
    %c0_i32_0 = arith.constant 0 : i32
    return %c0_i32, %arg1 : i32, i32
  }
  func.func @transform_3(%arg0: i32, %arg1: i32) -> (i32, i32, i32) {
    %c0_i32 = arith.constant 0 : i32
    %c0_i32_0 = arith.constant 0 : i32
    return %arg0, %c0_i32, %arg1 : i32, i32, i32
  }
}

module attributes {stable_mosaic.version = 11 : i64} {
  func.func @_in_add_kernel(%arg0: i32, %arg1: i32, %arg2: memref<1x16x128xf32, #tpu.memory_space<vmem>>, %arg3: memref<1x16x128xf32, #tpu.memory_space<vmem>>, %arg4: memref<1x16x128xf32, #tpu.memory_space<vmem>>) attributes {dimension_semantics = [#tpu.dimension_semantics<parallel>, #tpu.dimension_semantics<parallel>], iteration_bounds = array<i64: 2, 2>, scalar_prefetch = 0 : i64, scratch_operands = 0 : i64, tpu.core_type = #tpu.core_type<tc>, window_params = [{transform_indices = @transform_0, window_bounds = array<i64: 1, 16, 128>}, {transform_indices = @transform_1, window_bounds = array<i64: 1, 16, 128>}, {transform_indices = @transform_2, window_bounds = array<i64: 1, 16, 128>}]} {
    %c0 = arith.constant 0 : index
    %c0_0 = arith.constant 0 : index
    %c0_1 = arith.constant 0 : index
    %0 = vector.load %arg2[%c0, %c0_0, %c0_1] : memref<1x16x128xf32, #tpu.memory_space<vmem>>, vector<1x16x128xf32>
    %1 = vector.shape_cast %0 : vector<1x16x128xf32> to vector<16x128xf32>
    %cst = arith.constant dense<0.000000e+00> : vector<128xf32>
    %2 = vector.multi_reduction <add>, %1, %cst [0] : vector<16x128xf32> to vector<128xf32>
    %3 = vector.shape_cast %2 : vector<128xf32> to vector<1x128xf32>
    %cst_2 = arith.constant 1.600000e+01 : f32
    %4 = vector.broadcast %cst_2 : f32 to vector<1x128xf32>
    %5 = arith.divf %3, %4 : vector<1x128xf32>
    %6 = vector.broadcast %5 : vector<1x128xf32> to vector<16x128xf32>
    %7 = arith.subf %1, %6 : vector<16x128xf32>
    %8 = arith.mulf %7, %7 : vector<16x128xf32>
    %cst_3 = arith.constant dense<0.000000e+00> : vector<128xf32>
    %9 = vector.multi_reduction <add>, %8, %cst_3 [0] : vector<16x128xf32> to vector<128xf32>
    %10 = vector.shape_cast %9 : vector<128xf32> to vector<1x128xf32>
    %cst_4 = arith.constant 1.600000e+01 : f32
    %11 = vector.broadcast %cst_4 : f32 to vector<1x128xf32>
    %12 = arith.divf %10, %11 : vector<1x128xf32>
    %13 = vector.broadcast %5 : vector<1x128xf32> to vector<16x128xf32>
    %14 = arith.subf %1, %13 : vector<16x128xf32>
    %cst_5 = arith.constant 9.99999974E-6 : f32
    %15 = vector.broadcast %cst_5 : f32 to vector<1x128xf32>
    %16 = arith.addf %12, %15 : vector<1x128xf32>
    %17 = math.rsqrt %16 : vector<1x128xf32>
    %18 = vector.broadcast %17 : vector<1x128xf32> to vector<16x128xf32>
    %19 = arith.mulf %14, %18 : vector<16x128xf32>
    %c0_6 = arith.constant 0 : index
    %c0_7 = arith.constant 0 : index
    %c0_8 = arith.constant 0 : index
    %20 = vector.load %arg3[%c0_6, %c0_7, %c0_8] : memref<1x16x128xf32, #tpu.memory_space<vmem>>, vector<1x16x128xf32>
    %21 = vector.shape_cast %20 : vector<1x16x128xf32> to vector<16x128xf32>
    %22 = arith.addf %19, %21 : vector<16x128xf32>
    %c0_9 = arith.constant 0 : index
    %c0_10 = arith.constant 0 : index
    %c0_11 = arith.constant 0 : index
    %23 = vector.load %arg4[%c0_9, %c0_10, %c0_11] : memref<1x16x128xf32, #tpu.memory_space<vmem>>, vector<1x16x128xf32>
    %24 = vector.shape_cast %23 : vector<1x16x128xf32> to vector<16x128xf32>
    %25 = vector.shape_cast %22 : vector<16x128xf32> to vector<1x16x128xf32>
    tpu.vector_store %arg4[%c0_9, %c0_10, %c0_11], %25 {strides = array<i32>} : memref<1x16x128xf32, #tpu.memory_space<vmem>>, vector<1x16x128xf32>,
    return
  }
  func.func @transform_0(%arg0: i32, %arg1: i32) -> (i32, i32, i32) {
    %c0_i32 = arith.constant 0 : i32
    %c0_i32_0 = arith.constant 0 : i32
    return %arg0, %c0_i32, %arg1 : i32, i32, i32
  }
  func.func @transform_1(%arg0: i32, %arg1: i32) -> (i32, i32, i32) {
    %c0_i32 = arith.constant 0 : i32
    %c0_i32_0 = arith.constant 0 : i32
    return %arg0, %c0_i32, %arg1 : i32, i32, i32
  }
  func.func @transform_2(%arg0: i32, %arg1: i32) -> (i32, i32, i32) {
    %c0_i32 = arith.constant 0 : i32
    %c0_i32_0 = arith.constant 0 : i32
    return %arg0, %c0_i32, %arg1 : i32, i32, i32
  }
}

module attributes {stable_mosaic.version = 11 : i64} {
  func.func @_direct_conv_kernel(%arg0: i32, %arg1: i32, %arg2: memref<1x21x256xbf16, #tpu.memory_space<vmem>>, %arg3: memref<512x128xbf16, #tpu.memory_space<vmem>>, %arg4: memref<1x128xf32, #tpu.memory_space<vmem>>, %arg5: memref<1x20x128xf32, #tpu.memory_space<vmem>>, %arg6: memref<20x128xf32, #tpu.memory_space<vmem>>) attributes {dimension_semantics = [#tpu.dimension_semantics<parallel>, #tpu.dimension_semantics<parallel>], iteration_bounds = array<i64: 2, 1>, scalar_prefetch = 0 : i64, scratch_operands = 1 : i64, tpu.core_type = #tpu.core_type<tc>, window_params = [{transform_indices = @transform_0, window_bounds = array<i64: 1, 21, 256>}, {transform_indices = @transform_1, window_bounds = array<i64: 512, 128>}, {transform_indices = @transform_2, window_bounds = array<i64: 1, 128>}, {transform_indices = @transform_3, window_bounds = array<i64: 1, 20, 128>}]} {
    %c0 = arith.constant 0 : index
    %c0_0 = arith.constant 0 : index
    %c0_1 = arith.constant 0 : index
    %0 = vector.load %arg2[%c0, %c0_0, %c0_1] : memref<1x21x256xbf16, #tpu.memory_space<vmem>>, vector<1x20x256xbf16>
    %1 = vector.shape_cast %0 : vector<1x20x256xbf16> to vector<20x256xbf16>
    %c0_2 = arith.constant 0 : index
    %c0_3 = arith.constant 0 : index
    %2 = vector.load %arg3[%c0_2, %c0_3] : memref<512x128xbf16, #tpu.memory_space<vmem>>, vector<256x128xbf16>
    %cst = arith.constant dense<0.000000e+00> : vector<20x128xf32>
    %3 = tpu.matmul %1, %2, %cst {dimension_numbers = #tpu.dot_dimension_numbers<[1], [0], [0], [1], [0, 0, 1, 1], [], []>} : vector<20x256xbf16>, vector<256x128xbf16>, vector<20x128xf32> -> vector<20x128xf32>
    %c0_4 = arith.constant 0 : index
    %c0_5 = arith.constant 0 : index
    %4 = vector.load %arg6[%c0_4, %c0_5] : memref<20x128xf32, #tpu.memory_space<vmem>>, vector<20x128xf32>
    tpu.vector_store %arg6[%c0_4, %c0_5], %3 {strides = array<i32>} : memref<20x128xf32, #tpu.memory_space<vmem>>, vector<20x128xf32>,
    %c0_6 = arith.constant 0 : index
    %c1 = arith.constant 1 : index
    %c0_7 = arith.constant 0 : index
    %5 = vector.load %arg2[%c0_6, %c1, %c0_7] : memref<1x21x256xbf16, #tpu.memory_space<vmem>>, vector<1x20x256xbf16>
    %6 = vector.shape_cast %5 : vector<1x20x256xbf16> to vector<20x256xbf16>
    %c256 = arith.constant 256 : index
    %c0_8 = arith.constant 0 : index
    %7 = vector.load %arg3[%c256, %c0_8] : memref<512x128xbf16, #tpu.memory_space<vmem>>, vector<256x128xbf16>
    %cst_9 = arith.constant dense<0.000000e+00> : vector<20x128xf32>
    %8 = tpu.matmul %6, %7, %cst_9 {dimension_numbers = #tpu.dot_dimension_numbers<[1], [0], [0], [1], [0, 0, 1, 1], [], []>} : vector<20x256xbf16>, vector<256x128xbf16>, vector<20x128xf32> -> vector<20x128xf32>
    %c0_10 = arith.constant 0 : index
    %c0_11 = arith.constant 0 : index
    %9 = vector.load %arg6[%c0_10, %c0_11] : memref<20x128xf32, #tpu.memory_space<vmem>>, vector<20x128xf32>
    %10 = arith.addf %9, %8 : vector<20x128xf32>
    %c0_12 = arith.constant 0 : index
    %c0_13 = arith.constant 0 : index
    %11 = vector.load %arg6[%c0_12, %c0_13] : memref<20x128xf32, #tpu.memory_space<vmem>>, vector<20x128xf32>
    tpu.vector_store %arg6[%c0_12, %c0_13], %10 {strides = array<i32>} : memref<20x128xf32, #tpu.memory_space<vmem>>, vector<20x128xf32>,
    %c0_14 = arith.constant 0 : index
    %c0_15 = arith.constant 0 : index
    %12 = vector.load %arg6[%c0_14, %c0_15] : memref<20x128xf32, #tpu.memory_space<vmem>>, vector<20x128xf32>
    %c0_16 = arith.constant 0 : index
    %c0_17 = arith.constant 0 : index
    %13 = vector.load %arg4[%c0_16, %c0_17] : memref<1x128xf32, #tpu.memory_space<vmem>>, vector<1x128xf32>
    %14 = vector.broadcast %13 : vector<1x128xf32> to vector<20x128xf32>
    %15 = arith.addf %12, %14 : vector<20x128xf32>
    %c0_18 = arith.constant 0 : index
    %c0_19 = arith.constant 0 : index
    %c0_20 = arith.constant 0 : index
    %16 = vector.load %arg5[%c0_18, %c0_19, %c0_20] : memref<1x20x128xf32, #tpu.memory_space<vmem>>, vector<1x20x128xf32>
    %17 = vector.shape_cast %16 : vector<1x20x128xf32> to vector<20x128xf32>
    %18 = vector.shape_cast %15 : vector<20x128xf32> to vector<1x20x128xf32>
    tpu.vector_store %arg5[%c0_18, %c0_19, %c0_20], %18 {strides = array<i32>} : memref<1x20x128xf32, #tpu.memory_space<vmem>>, vector<1x20x128xf32>,
    return
  }
  func.func @transform_0(%arg0: i32, %arg1: i32) -> (i32, i32, i32) {
    %c0_i32 = arith.constant 0 : i32
    %c0_i32_0 = arith.constant 0 : i32
    %c0_i32_1 = arith.constant 0 : i32
    return %arg0, %c0_i32, %c0_i32_0 : i32, i32, i32
  }
  func.func @transform_1(%arg0: i32, %arg1: i32) -> (i32, i32) {
    %c0_i32 = arith.constant 0 : i32
    %c0_i32_0 = arith.constant 0 : i32
    return %c0_i32, %arg1 : i32, i32
  }
  func.func @transform_2(%arg0: i32, %arg1: i32) -> (i32, i32) {
    %c0_i32 = arith.constant 0 : i32
    %c0_i32_0 = arith.constant 0 : i32
    return %c0_i32, %arg1 : i32, i32
  }
  func.func @transform_3(%arg0: i32, %arg1: i32) -> (i32, i32, i32) {
    %c0_i32 = arith.constant 0 : i32
    %c0_i32_0 = arith.constant 0 : i32
    return %arg0, %c0_i32, %arg1 : i32, i32, i32
  }
}

module attributes {stable_mosaic.version = 11 : i64} {
  func.func @_direct_conv_kernel(%arg0: i32, %arg1: i32, %arg2: memref<1x16x256xbf16, #tpu.memory_space<vmem>>, %arg3: memref<256x128xbf16, #tpu.memory_space<vmem>>, %arg4: memref<1x128xf32, #tpu.memory_space<vmem>>, %arg5: memref<1x16x128xf32, #tpu.memory_space<vmem>>, %arg6: memref<16x128xf32, #tpu.memory_space<vmem>>) attributes {dimension_semantics = [#tpu.dimension_semantics<parallel>, #tpu.dimension_semantics<parallel>], iteration_bounds = array<i64: 2, 1>, scalar_prefetch = 0 : i64, scratch_operands = 1 : i64, tpu.core_type = #tpu.core_type<tc>, window_params = [{transform_indices = @transform_0, window_bounds = array<i64: 1, 16, 256>}, {transform_indices = @transform_1, window_bounds = array<i64: 256, 128>}, {transform_indices = @transform_2, window_bounds = array<i64: 1, 128>}, {transform_indices = @transform_3, window_bounds = array<i64: 1, 16, 128>}]} {
    %c0 = arith.constant 0 : index
    %c0_0 = arith.constant 0 : index
    %c0_1 = arith.constant 0 : index
    %0 = vector.load %arg2[%c0, %c0_0, %c0_1] : memref<1x16x256xbf16, #tpu.memory_space<vmem>>, vector<1x16x256xbf16>
    %1 = vector.shape_cast %0 : vector<1x16x256xbf16> to vector<16x256xbf16>
    %c0_2 = arith.constant 0 : index
    %c0_3 = arith.constant 0 : index
    %2 = vector.load %arg3[%c0_2, %c0_3] : memref<256x128xbf16, #tpu.memory_space<vmem>>, vector<256x128xbf16>
    %cst = arith.constant dense<0.000000e+00> : vector<16x128xf32>
    %3 = tpu.matmul %1, %2, %cst {dimension_numbers = #tpu.dot_dimension_numbers<[1], [0], [0], [1], [0, 0, 1, 1], [], []>} : vector<16x256xbf16>, vector<256x128xbf16>, vector<16x128xf32> -> vector<16x128xf32>
    %c0_4 = arith.constant 0 : index
    %c0_5 = arith.constant 0 : index
    %4 = vector.load %arg6[%c0_4, %c0_5] : memref<16x128xf32, #tpu.memory_space<vmem>>, vector<16x128xf32>
    tpu.vector_store %arg6[%c0_4, %c0_5], %3 {strides = array<i32>} : memref<16x128xf32, #tpu.memory_space<vmem>>, vector<16x128xf32>,
    %c0_6 = arith.constant 0 : index
    %c0_7 = arith.constant 0 : index
    %5 = vector.load %arg6[%c0_6, %c0_7] : memref<16x128xf32, #tpu.memory_space<vmem>>, vector<16x128xf32>
    %c0_8 = arith.constant 0 : index
    %c0_9 = arith.constant 0 : index
    %6 = vector.load %arg4[%c0_8, %c0_9] : memref<1x128xf32, #tpu.memory_space<vmem>>, vector<1x128xf32>
    %7 = vector.broadcast %6 : vector<1x128xf32> to vector<16x128xf32>
    %8 = arith.addf %5, %7 : vector<16x128xf32>
    %c0_10 = arith.constant 0 : index
    %c0_11 = arith.constant 0 : index
    %c0_12 = arith.constant 0 : index
    %9 = vector.load %arg5[%c0_10, %c0_11, %c0_12] : memref<1x16x128xf32, #tpu.memory_space<vmem>>, vector<1x16x128xf32>
    %10 = vector.shape_cast %9 : vector<1x16x128xf32> to vector<16x128xf32>
    %11 = vector.shape_cast %8 : vector<16x128xf32> to vector<1x16x128xf32>
    tpu.vector_store %arg5[%c0_10, %c0_11, %c0_12], %11 {strides = array<i32>} : memref<1x16x128xf32, #tpu.memory_space<vmem>>, vector<1x16x128xf32>,
    return
  }
  func.func @transform_0(%arg0: i32, %arg1: i32) -> (i32, i32, i32) {
    %c0_i32 = arith.constant 0 : i32
    %c0_i32_0 = arith.constant 0 : i32
    %c0_i32_1 = arith.constant 0 : i32
    return %arg0, %c0_i32, %c0_i32_0 : i32, i32, i32
  }
  func.func @transform_1(%arg0: i32, %arg1: i32) -> (i32, i32) {
    %c0_i32 = arith.constant 0 : i32
    %c0_i32_0 = arith.constant 0 : i32
    return %c0_i32, %arg1 : i32, i32
  }
  func.func @transform_2(%arg0: i32, %arg1: i32) -> (i32, i32) {
    %c0_i32 = arith.constant 0 : i32
    %c0_i32_0 = arith.constant 0 : i32
    return %c0_i32, %arg1 : i32, i32
  }
  func.func @transform_3(%arg0: i32, %arg1: i32) -> (i32, i32, i32) {
    %c0_i32 = arith.constant 0 : i32
    %c0_i32_0 = arith.constant 0 : i32
    return %arg0, %c0_i32, %arg1 : i32, i32, i32
  }
}

module attributes {stable_mosaic.version = 11 : i64} {
  func.func @_direct_conv_kernel(%arg0: i32, %arg1: i32, %arg2: memref<1x20x256xbf16, #tpu.memory_space<vmem>>, %arg3: memref<512x128xbf16, #tpu.memory_space<vmem>>, %arg4: memref<1x128xf32, #tpu.memory_space<vmem>>, %arg5: memref<1x16x128xf32, #tpu.memory_space<vmem>>, %arg6: memref<16x128xf32, #tpu.memory_space<vmem>>) attributes {dimension_semantics = [#tpu.dimension_semantics<parallel>, #tpu.dimension_semantics<parallel>], iteration_bounds = array<i64: 2, 1>, scalar_prefetch = 0 : i64, scratch_operands = 1 : i64, tpu.core_type = #tpu.core_type<tc>, window_params = [{transform_indices = @transform_0, window_bounds = array<i64: 1, 20, 256>}, {transform_indices = @transform_1, window_bounds = array<i64: 512, 128>}, {transform_indices = @transform_2, window_bounds = array<i64: 1, 128>}, {transform_indices = @transform_3, window_bounds = array<i64: 1, 16, 128>}]} {
    %c0 = arith.constant 0 : index
    %c0_0 = arith.constant 0 : index
    %c0_1 = arith.constant 0 : index
    %0 = vector.load %arg2[%c0, %c0_0, %c0_1] : memref<1x20x256xbf16, #tpu.memory_space<vmem>>, vector<1x16x256xbf16>
    %1 = vector.shape_cast %0 : vector<1x16x256xbf16> to vector<16x256xbf16>
    %c0_2 = arith.constant 0 : index
    %c0_3 = arith.constant 0 : index
    %2 = vector.load %arg3[%c0_2, %c0_3] : memref<512x128xbf16, #tpu.memory_space<vmem>>, vector<256x128xbf16>
    %cst = arith.constant dense<0.000000e+00> : vector<16x128xf32>
    %3 = tpu.matmul %1, %2, %cst {dimension_numbers = #tpu.dot_dimension_numbers<[1], [0], [0], [1], [0, 0, 1, 1], [], []>} : vector<16x256xbf16>, vector<256x128xbf16>, vector<16x128xf32> -> vector<16x128xf32>
    %c0_4 = arith.constant 0 : index
    %c0_5 = arith.constant 0 : index
    %4 = vector.load %arg6[%c0_4, %c0_5] : memref<16x128xf32, #tpu.memory_space<vmem>>, vector<16x128xf32>
    tpu.vector_store %arg6[%c0_4, %c0_5], %3 {strides = array<i32>} : memref<16x128xf32, #tpu.memory_space<vmem>>, vector<16x128xf32>,
    %c0_6 = arith.constant 0 : index
    %c4 = arith.constant 4 : index
    %c0_7 = arith.constant 0 : index
    %5 = vector.load %arg2[%c0_6, %c4, %c0_7] : memref<1x20x256xbf16, #tpu.memory_space<vmem>>, vector<1x16x256xbf16>
    %6 = vector.shape_cast %5 : vector<1x16x256xbf16> to vector<16x256xbf16>
    %c256 = arith.constant 256 : index
    %c0_8 = arith.constant 0 : index
    %7 = vector.load %arg3[%c256, %c0_8] : memref<512x128xbf16, #tpu.memory_space<vmem>>, vector<256x128xbf16>
    %cst_9 = arith.constant dense<0.000000e+00> : vector<16x128xf32>
    %8 = tpu.matmul %6, %7, %cst_9 {dimension_numbers = #tpu.dot_dimension_numbers<[1], [0], [0], [1], [0, 0, 1, 1], [], []>} : vector<16x256xbf16>, vector<256x128xbf16>, vector<16x128xf32> -> vector<16x128xf32>
    %c0_10 = arith.constant 0 : index
    %c0_11 = arith.constant 0 : index
    %9 = vector.load %arg6[%c0_10, %c0_11] : memref<16x128xf32, #tpu.memory_space<vmem>>, vector<16x128xf32>
    %10 = arith.addf %9, %8 : vector<16x128xf32>
    %c0_12 = arith.constant 0 : index
    %c0_13 = arith.constant 0 : index
    %11 = vector.load %arg6[%c0_12, %c0_13] : memref<16x128xf32, #tpu.memory_space<vmem>>, vector<16x128xf32>
    tpu.vector_store %arg6[%c0_12, %c0_13], %10 {strides = array<i32>} : memref<16x128xf32, #tpu.memory_space<vmem>>, vector<16x128xf32>,
    %c0_14 = arith.constant 0 : index
    %c0_15 = arith.constant 0 : index
    %12 = vector.load %arg6[%c0_14, %c0_15] : memref<16x128xf32, #tpu.memory_space<vmem>>, vector<16x128xf32>
    %c0_16 = arith.constant 0 : index
    %c0_17 = arith.constant 0 : index
    %13 = vector.load %arg4[%c0_16, %c0_17] : memref<1x128xf32, #tpu.memory_space<vmem>>, vector<1x128xf32>
    %14 = vector.broadcast %13 : vector<1x128xf32> to vector<16x128xf32>
    %15 = arith.addf %12, %14 : vector<16x128xf32>
    %c0_18 = arith.constant 0 : index
    %c0_19 = arith.constant 0 : index
    %c0_20 = arith.constant 0 : index
    %16 = vector.load %arg5[%c0_18, %c0_19, %c0_20] : memref<1x16x128xf32, #tpu.memory_space<vmem>>, vector<1x16x128xf32>
    %17 = vector.shape_cast %16 : vector<1x16x128xf32> to vector<16x128xf32>
    %18 = vector.shape_cast %15 : vector<16x128xf32> to vector<1x16x128xf32>
    tpu.vector_store %arg5[%c0_18, %c0_19, %c0_20], %18 {strides = array<i32>} : memref<1x16x128xf32, #tpu.memory_space<vmem>>, vector<1x16x128xf32>,
    return
  }
  func.func @transform_0(%arg0: i32, %arg1: i32) -> (i32, i32, i32) {
    %c0_i32 = arith.constant 0 : i32
    %c0_i32_0 = arith.constant 0 : i32
    %c0_i32_1 = arith.constant 0 : i32
    return %arg0, %c0_i32, %c0_i32_0 : i32, i32, i32
  }
  func.func @transform_1(%arg0: i32, %arg1: i32) -> (i32, i32) {
    %c0_i32 = arith.constant 0 : i32
    %c0_i32_0 = arith.constant 0 : i32
    return %c0_i32, %arg1 : i32, i32
  }
  func.func @transform_2(%arg0: i32, %arg1: i32) -> (i32, i32) {
    %c0_i32 = arith.constant 0 : i32
    %c0_i32_0 = arith.constant 0 : i32
    return %c0_i32, %arg1 : i32, i32
  }
  func.func @transform_3(%arg0: i32, %arg1: i32) -> (i32, i32, i32) {
    %c0_i32 = arith.constant 0 : i32
    %c0_i32_0 = arith.constant 0 : i32
    return %arg0, %c0_i32, %arg1 : i32, i32, i32
  }
}

module attributes {stable_mosaic.version = 11 : i64} {
  func.func @_direct_conv_kernel(%arg0: i32, %arg1: i32, %arg2: memref<1x26x256xbf16, #tpu.memory_space<vmem>>, %arg3: memref<1024x128xbf16, #tpu.memory_space<vmem>>, %arg4: memref<1x128xf32, #tpu.memory_space<vmem>>, %arg5: memref<1x20x128xf32, #tpu.memory_space<vmem>>, %arg6: memref<20x128xf32, #tpu.memory_space<vmem>>) attributes {dimension_semantics = [#tpu.dimension_semantics<parallel>, #tpu.dimension_semantics<parallel>], iteration_bounds = array<i64: 2, 1>, scalar_prefetch = 0 : i64, scratch_operands = 1 : i64, tpu.core_type = #tpu.core_type<tc>, window_params = [{transform_indices = @transform_0, window_bounds = array<i64: 1, 26, 256>}, {transform_indices = @transform_1, window_bounds = array<i64: 1024, 128>}, {transform_indices = @transform_2, window_bounds = array<i64: 1, 128>}, {transform_indices = @transform_3, window_bounds = array<i64: 1, 20, 128>}]} {
    %c0 = arith.constant 0 : index
    %c0_0 = arith.constant 0 : index
    %c0_1 = arith.constant 0 : index
    %0 = vector.load %arg2[%c0, %c0_0, %c0_1] : memref<1x26x256xbf16, #tpu.memory_space<vmem>>, vector<1x20x256xbf16>
    %1 = vector.shape_cast %0 : vector<1x20x256xbf16> to vector<20x256xbf16>
    %c0_2 = arith.constant 0 : index
    %c0_3 = arith.constant 0 : index
    %2 = vector.load %arg3[%c0_2, %c0_3] : memref<1024x128xbf16, #tpu.memory_space<vmem>>, vector<256x128xbf16>
    %cst = arith.constant dense<0.000000e+00> : vector<20x128xf32>
    %3 = tpu.matmul %1, %2, %cst {dimension_numbers = #tpu.dot_dimension_numbers<[1], [0], [0], [1], [0, 0, 1, 1], [], []>} : vector<20x256xbf16>, vector<256x128xbf16>, vector<20x128xf32> -> vector<20x128xf32>
    %c0_4 = arith.constant 0 : index
    %c0_5 = arith.constant 0 : index
    %4 = vector.load %arg6[%c0_4, %c0_5] : memref<20x128xf32, #tpu.memory_space<vmem>>, vector<20x128xf32>
    tpu.vector_store %arg6[%c0_4, %c0_5], %3 {strides = array<i32>} : memref<20x128xf32, #tpu.memory_space<vmem>>, vector<20x128xf32>,
    %c0_6 = arith.constant 0 : index
    %c1 = arith.constant 1 : index
    %c0_7 = arith.constant 0 : index
    %5 = vector.load %arg2[%c0_6, %c1, %c0_7] : memref<1x26x256xbf16, #tpu.memory_space<vmem>>, vector<1x20x256xbf16>
    %6 = vector.shape_cast %5 : vector<1x20x256xbf16> to vector<20x256xbf16>
    %c256 = arith.constant 256 : index
    %c0_8 = arith.constant 0 : index
    %7 = vector.load %arg3[%c256, %c0_8] : memref<1024x128xbf16, #tpu.memory_space<vmem>>, vector<256x128xbf16>
    %cst_9 = arith.constant dense<0.000000e+00> : vector<20x128xf32>
    %8 = tpu.matmul %6, %7, %cst_9 {dimension_numbers = #tpu.dot_dimension_numbers<[1], [0], [0], [1], [0, 0, 1, 1], [], []>} : vector<20x256xbf16>, vector<256x128xbf16>, vector<20x128xf32> -> vector<20x128xf32>
    %c0_10 = arith.constant 0 : index
    %c0_11 = arith.constant 0 : index
    %9 = vector.load %arg6[%c0_10, %c0_11] : memref<20x128xf32, #tpu.memory_space<vmem>>, vector<20x128xf32>
    %10 = arith.addf %9, %8 : vector<20x128xf32>
    %c0_12 = arith.constant 0 : index
    %c0_13 = arith.constant 0 : index
    %11 = vector.load %arg6[%c0_12, %c0_13] : memref<20x128xf32, #tpu.memory_space<vmem>>, vector<20x128xf32>
    tpu.vector_store %arg6[%c0_12, %c0_13], %10 {strides = array<i32>} : memref<20x128xf32, #tpu.memory_space<vmem>>, vector<20x128xf32>,
    %c0_14 = arith.constant 0 : index
    %c5 = arith.constant 5 : index
    %c0_15 = arith.constant 0 : index
    %12 = vector.load %arg2[%c0_14, %c5, %c0_15] : memref<1x26x256xbf16, #tpu.memory_space<vmem>>, vector<1x20x256xbf16>
    %13 = vector.shape_cast %12 : vector<1x20x256xbf16> to vector<20x256xbf16>
    %c512 = arith.constant 512 : index
    %c0_16 = arith.constant 0 : index
    %14 = vector.load %arg3[%c512, %c0_16] : memref<1024x128xbf16, #tpu.memory_space<vmem>>, vector<256x128xbf16>
    %cst_17 = arith.constant dense<0.000000e+00> : vector<20x128xf32>
    %15 = tpu.matmul %13, %14, %cst_17 {dimension_numbers = #tpu.dot_dimension_numbers<[1], [0], [0], [1], [0, 0, 1, 1], [], []>} : vector<20x256xbf16>, vector<256x128xbf16>, vector<20x128xf32> -> vector<20x128xf32>
    %c0_18 = arith.constant 0 : index
    %c0_19 = arith.constant 0 : index
    %16 = vector.load %arg6[%c0_18, %c0_19] : memref<20x128xf32, #tpu.memory_space<vmem>>, vector<20x128xf32>
    %17 = arith.addf %16, %15 : vector<20x128xf32>
    %c0_20 = arith.constant 0 : index
    %c0_21 = arith.constant 0 : index
    %18 = vector.load %arg6[%c0_20, %c0_21] : memref<20x128xf32, #tpu.memory_space<vmem>>, vector<20x128xf32>
    tpu.vector_store %arg6[%c0_20, %c0_21], %17 {strides = array<i32>} : memref<20x128xf32, #tpu.memory_space<vmem>>, vector<20x128xf32>,
    %c0_22 = arith.constant 0 : index
    %c6 = arith.constant 6 : index
    %c0_23 = arith.constant 0 : index
    %19 = vector.load %arg2[%c0_22, %c6, %c0_23] : memref<1x26x256xbf16, #tpu.memory_space<vmem>>, vector<1x20x256xbf16>
    %20 = vector.shape_cast %19 : vector<1x20x256xbf16> to vector<20x256xbf16>
    %c768 = arith.constant 768 : index
    %c0_24 = arith.constant 0 : index
    %21 = vector.load %arg3[%c768, %c0_24] : memref<1024x128xbf16, #tpu.memory_space<vmem>>, vector<256x128xbf16>
    %cst_25 = arith.constant dense<0.000000e+00> : vector<20x128xf32>
    %22 = tpu.matmul %20, %21, %cst_25 {dimension_numbers = #tpu.dot_dimension_numbers<[1], [0], [0], [1], [0, 0, 1, 1], [], []>} : vector<20x256xbf16>, vector<256x128xbf16>, vector<20x128xf32> -> vector<20x128xf32>
    %c0_26 = arith.constant 0 : index
    %c0_27 = arith.constant 0 : index
    %23 = vector.load %arg6[%c0_26, %c0_27] : memref<20x128xf32, #tpu.memory_space<vmem>>, vector<20x128xf32>
    %24 = arith.addf %23, %22 : vector<20x128xf32>
    %c0_28 = arith.constant 0 : index
    %c0_29 = arith.constant 0 : index
    %25 = vector.load %arg6[%c0_28, %c0_29] : memref<20x128xf32, #tpu.memory_space<vmem>>, vector<20x128xf32>
    tpu.vector_store %arg6[%c0_28, %c0_29], %24 {strides = array<i32>} : memref<20x128xf32, #tpu.memory_space<vmem>>, vector<20x128xf32>,
    %c0_30 = arith.constant 0 : index
    %c0_31 = arith.constant 0 : index
    %26 = vector.load %arg6[%c0_30, %c0_31] : memref<20x128xf32, #tpu.memory_space<vmem>>, vector<20x128xf32>
    %c0_32 = arith.constant 0 : index
    %c0_33 = arith.constant 0 : index
    %27 = vector.load %arg4[%c0_32, %c0_33] : memref<1x128xf32, #tpu.memory_space<vmem>>, vector<1x128xf32>
    %28 = vector.broadcast %27 : vector<1x128xf32> to vector<20x128xf32>
    %29 = arith.addf %26, %28 : vector<20x128xf32>
    %c0_34 = arith.constant 0 : index
    %c0_35 = arith.constant 0 : index
    %c0_36 = arith.constant 0 : index
    %30 = vector.load %arg5[%c0_34, %c0_35, %c0_36] : memref<1x20x128xf32, #tpu.memory_space<vmem>>, vector<1x20x128xf32>
    %31 = vector.shape_cast %30 : vector<1x20x128xf32> to vector<20x128xf32>
    %32 = vector.shape_cast %29 : vector<20x128xf32> to vector<1x20x128xf32>
    tpu.vector_store %arg5[%c0_34, %c0_35, %c0_36], %32 {strides = array<i32>} : memref<1x20x128xf32, #tpu.memory_space<vmem>>, vector<1x20x128xf32>,
    return
  }
  func.func @transform_0(%arg0: i32, %arg1: i32) -> (i32, i32, i32) {
    %c0_i32 = arith.constant 0 : i32
    %c0_i32_0 = arith.constant 0 : i32
    %c0_i32_1 = arith.constant 0 : i32
    return %arg0, %c0_i32, %c0_i32_0 : i32, i32, i32
  }
  func.func @transform_1(%arg0: i32, %arg1: i32) -> (i32, i32) {
    %c0_i32 = arith.constant 0 : i32
    %c0_i32_0 = arith.constant 0 : i32
    return %c0_i32, %arg1 : i32, i32
  }
  func.func @transform_2(%arg0: i32, %arg1: i32) -> (i32, i32) {
    %c0_i32 = arith.constant 0 : i32
    %c0_i32_0 = arith.constant 0 : i32
    return %c0_i32, %arg1 : i32, i32
  }
  func.func @transform_3(%arg0: i32, %arg1: i32) -> (i32, i32, i32) {
    %c0_i32 = arith.constant 0 : i32
    %c0_i32_0 = arith.constant 0 : i32
    return %arg0, %c0_i32, %arg1 : i32, i32, i32
  }
}

module attributes {stable_mosaic.version = 11 : i64} {
  func.func @_direct_conv_kernel(%arg0: i32, %arg1: i32, %arg2: memref<1x73x128xbf16, #tpu.memory_space<vmem>>, %arg3: memref<256x64xbf16, #tpu.memory_space<vmem>>, %arg4: memref<1x64xf32, #tpu.memory_space<vmem>>, %arg5: memref<1x72x64xf32, #tpu.memory_space<vmem>>, %arg6: memref<72x64xf32, #tpu.memory_space<vmem>>) attributes {dimension_semantics = [#tpu.dimension_semantics<parallel>, #tpu.dimension_semantics<parallel>], iteration_bounds = array<i64: 2, 1>, scalar_prefetch = 0 : i64, scratch_operands = 1 : i64, tpu.core_type = #tpu.core_type<tc>, window_params = [{transform_indices = @transform_0, window_bounds = array<i64: 1, 73, 128>}, {transform_indices = @transform_1, window_bounds = array<i64: 256, 64>}, {transform_indices = @transform_2, window_bounds = array<i64: 1, 64>}, {transform_indices = @transform_3, window_bounds = array<i64: 1, 72, 64>}]} {
    %c0 = arith.constant 0 : index
    %c0_0 = arith.constant 0 : index
    %c0_1 = arith.constant 0 : index
    %0 = vector.load %arg2[%c0, %c0_0, %c0_1] : memref<1x73x128xbf16, #tpu.memory_space<vmem>>, vector<1x72x128xbf16>
    %1 = vector.shape_cast %0 : vector<1x72x128xbf16> to vector<72x128xbf16>
    %c0_2 = arith.constant 0 : index
    %c0_3 = arith.constant 0 : index
    %2 = vector.load %arg3[%c0_2, %c0_3] : memref<256x64xbf16, #tpu.memory_space<vmem>>, vector<128x64xbf16>
    %cst = arith.constant dense<0.000000e+00> : vector<72x64xf32>
    %3 = tpu.matmul %1, %2, %cst {dimension_numbers = #tpu.dot_dimension_numbers<[1], [0], [0], [1], [0, 0, 1, 1], [], []>} : vector<72x128xbf16>, vector<128x64xbf16>, vector<72x64xf32> -> vector<72x64xf32>
    %c0_4 = arith.constant 0 : index
    %c0_5 = arith.constant 0 : index
    %4 = vector.load %arg6[%c0_4, %c0_5] : memref<72x64xf32, #tpu.memory_space<vmem>>, vector<72x64xf32>
    tpu.vector_store %arg6[%c0_4, %c0_5], %3 {strides = array<i32>} : memref<72x64xf32, #tpu.memory_space<vmem>>, vector<72x64xf32>,
    %c0_6 = arith.constant 0 : index
    %c1 = arith.constant 1 : index
    %c0_7 = arith.constant 0 : index
    %5 = vector.load %arg2[%c0_6, %c1, %c0_7] : memref<1x73x128xbf16, #tpu.memory_space<vmem>>, vector<1x72x128xbf16>
    %6 = vector.shape_cast %5 : vector<1x72x128xbf16> to vector<72x128xbf16>
    %c128 = arith.constant 128 : index
    %c0_8 = arith.constant 0 : index
    %7 = vector.load %arg3[%c128, %c0_8] : memref<256x64xbf16, #tpu.memory_space<vmem>>, vector<128x64xbf16>
    %cst_9 = arith.constant dense<0.000000e+00> : vector<72x64xf32>
    %8 = tpu.matmul %6, %7, %cst_9 {dimension_numbers = #tpu.dot_dimension_numbers<[1], [0], [0], [1], [0, 0, 1, 1], [], []>} : vector<72x128xbf16>, vector<128x64xbf16>, vector<72x64xf32> -> vector<72x64xf32>
    %c0_10 = arith.constant 0 : index
    %c0_11 = arith.constant 0 : index
    %9 = vector.load %arg6[%c0_10, %c0_11] : memref<72x64xf32, #tpu.memory_space<vmem>>, vector<72x64xf32>
    %10 = arith.addf %9, %8 : vector<72x64xf32>
    %c0_12 = arith.constant 0 : index
    %c0_13 = arith.constant 0 : index
    %11 = vector.load %arg6[%c0_12, %c0_13] : memref<72x64xf32, #tpu.memory_space<vmem>>, vector<72x64xf32>
    tpu.vector_store %arg6[%c0_12, %c0_13], %10 {strides = array<i32>} : memref<72x64xf32, #tpu.memory_space<vmem>>, vector<72x64xf32>,
    %c0_14 = arith.constant 0 : index
    %c0_15 = arith.constant 0 : index
    %12 = vector.load %arg6[%c0_14, %c0_15] : memref<72x64xf32, #tpu.memory_space<vmem>>, vector<72x64xf32>
    %c0_16 = arith.constant 0 : index
    %c0_17 = arith.constant 0 : index
    %13 = vector.load %arg4[%c0_16, %c0_17] : memref<1x64xf32, #tpu.memory_space<vmem>>, vector<1x64xf32>
    %14 = vector.broadcast %13 : vector<1x64xf32> to vector<72x64xf32>
    %15 = arith.addf %12, %14 : vector<72x64xf32>
    %c0_18 = arith.constant 0 : index
    %c0_19 = arith.constant 0 : index
    %c0_20 = arith.constant 0 : index
    %16 = vector.load %arg5[%c0_18, %c0_19, %c0_20] : memref<1x72x64xf32, #tpu.memory_space<vmem>>, vector<1x72x64xf32>
    %17 = vector.shape_cast %16 : vector<1x72x64xf32> to vector<72x64xf32>
    %18 = vector.shape_cast %15 : vector<72x64xf32> to vector<1x72x64xf32>
    tpu.vector_store %arg5[%c0_18, %c0_19, %c0_20], %18 {strides = array<i32>} : memref<1x72x64xf32, #tpu.memory_space<vmem>>, vector<1x72x64xf32>,
    return
  }
  func.func @transform_0(%arg0: i32, %arg1: i32) -> (i32, i32, i32) {
    %c0_i32 = arith.constant 0 : i32
    %c0_i32_0 = arith.constant 0 : i32
    %c0_i32_1 = arith.constant 0 : i32
    return %arg0, %c0_i32, %c0_i32_0 : i32, i32, i32
  }
  func.func @transform_1(%arg0: i32, %arg1: i32) -> (i32, i32) {
    %c0_i32 = arith.constant 0 : i32
    %c0_i32_0 = arith.constant 0 : i32
    return %c0_i32, %arg1 : i32, i32
  }
  func.func @transform_2(%arg0: i32, %arg1: i32) -> (i32, i32) {
    %c0_i32 = arith.constant 0 : i32
    %c0_i32_0 = arith.constant 0 : i32
    return %c0_i32, %arg1 : i32, i32
  }
  func.func @transform_3(%arg0: i32, %arg1: i32) -> (i32, i32, i32) {
    %c0_i32 = arith.constant 0 : i32
    %c0_i32_0 = arith.constant 0 : i32
    return %arg0, %c0_i32, %arg1 : i32, i32, i32
  }
}

module attributes {stable_mosaic.version = 11 : i64} {
  func.func @_direct_conv_kernel(%arg0: i32, %arg1: i32, %arg2: memref<1x64x128xbf16, #tpu.memory_space<vmem>>, %arg3: memref<128x64xbf16, #tpu.memory_space<vmem>>, %arg4: memref<1x64xf32, #tpu.memory_space<vmem>>, %arg5: memref<1x64x64xf32, #tpu.memory_space<vmem>>, %arg6: memref<64x64xf32, #tpu.memory_space<vmem>>) attributes {dimension_semantics = [#tpu.dimension_semantics<parallel>, #tpu.dimension_semantics<parallel>], iteration_bounds = array<i64: 2, 1>, scalar_prefetch = 0 : i64, scratch_operands = 1 : i64, tpu.core_type = #tpu.core_type<tc>, window_params = [{transform_indices = @transform_0, window_bounds = array<i64: 1, 64, 128>}, {transform_indices = @transform_1, window_bounds = array<i64: 128, 64>}, {transform_indices = @transform_2, window_bounds = array<i64: 1, 64>}, {transform_indices = @transform_3, window_bounds = array<i64: 1, 64, 64>}]} {
    %c0 = arith.constant 0 : index
    %c0_0 = arith.constant 0 : index
    %c0_1 = arith.constant 0 : index
    %0 = vector.load %arg2[%c0, %c0_0, %c0_1] : memref<1x64x128xbf16, #tpu.memory_space<vmem>>, vector<1x64x128xbf16>
    %1 = vector.shape_cast %0 : vector<1x64x128xbf16> to vector<64x128xbf16>
    %c0_2 = arith.constant 0 : index
    %c0_3 = arith.constant 0 : index
    %2 = vector.load %arg3[%c0_2, %c0_3] : memref<128x64xbf16, #tpu.memory_space<vmem>>, vector<128x64xbf16>
    %cst = arith.constant dense<0.000000e+00> : vector<64x64xf32>
    %3 = tpu.matmul %1, %2, %cst {dimension_numbers = #tpu.dot_dimension_numbers<[1], [0], [0], [1], [0, 0, 1, 1], [], []>} : vector<64x128xbf16>, vector<128x64xbf16>, vector<64x64xf32> -> vector<64x64xf32>
    %c0_4 = arith.constant 0 : index
    %c0_5 = arith.constant 0 : index
    %4 = vector.load %arg6[%c0_4, %c0_5] : memref<64x64xf32, #tpu.memory_space<vmem>>, vector<64x64xf32>
    tpu.vector_store %arg6[%c0_4, %c0_5], %3 {strides = array<i32>} : memref<64x64xf32, #tpu.memory_space<vmem>>, vector<64x64xf32>,
    %c0_6 = arith.constant 0 : index
    %c0_7 = arith.constant 0 : index
    %5 = vector.load %arg6[%c0_6, %c0_7] : memref<64x64xf32, #tpu.memory_space<vmem>>, vector<64x64xf32>
    %c0_8 = arith.constant 0 : index
    %c0_9 = arith.constant 0 : index
    %6 = vector.load %arg4[%c0_8, %c0_9] : memref<1x64xf32, #tpu.memory_space<vmem>>, vector<1x64xf32>
    %7 = vector.broadcast %6 : vector<1x64xf32> to vector<64x64xf32>
    %8 = arith.addf %5, %7 : vector<64x64xf32>
    %c0_10 = arith.constant 0 : index
    %c0_11 = arith.constant 0 : index
    %c0_12 = arith.constant 0 : index
    %9 = vector.load %arg5[%c0_10, %c0_11, %c0_12] : memref<1x64x64xf32, #tpu.memory_space<vmem>>, vector<1x64x64xf32>
    %10 = vector.shape_cast %9 : vector<1x64x64xf32> to vector<64x64xf32>
    %11 = vector.shape_cast %8 : vector<64x64xf32> to vector<1x64x64xf32>
    tpu.vector_store %arg5[%c0_10, %c0_11, %c0_12], %11 {strides = array<i32>} : memref<1x64x64xf32, #tpu.memory_space<vmem>>, vector<1x64x64xf32>,
    return
  }
  func.func @transform_0(%arg0: i32, %arg1: i32) -> (i32, i32, i32) {
    %c0_i32 = arith.constant 0 : i32
    %c0_i32_0 = arith.constant 0 : i32
    %c0_i32_1 = arith.constant 0 : i32
    return %arg0, %c0_i32, %c0_i32_0 : i32, i32, i32
  }
  func.func @transform_1(%arg0: i32, %arg1: i32) -> (i32, i32) {
    %c0_i32 = arith.constant 0 : i32
    %c0_i32_0 = arith.constant 0 : i32
    return %c0_i32, %arg1 : i32, i32
  }
  func.func @transform_2(%arg0: i32, %arg1: i32) -> (i32, i32) {
    %c0_i32 = arith.constant 0 : i32
    %c0_i32_0 = arith.constant 0 : i32
    return %c0_i32, %arg1 : i32, i32
  }
  func.func @transform_3(%arg0: i32, %arg1: i32) -> (i32, i32, i32) {
    %c0_i32 = arith.constant 0 : i32
    %c0_i32_0 = arith.constant 0 : i32
    return %arg0, %c0_i32, %arg1 : i32, i32, i32
  }
}

module attributes {stable_mosaic.version = 11 : i64} {
  func.func @_direct_conv_kernel(%arg0: i32, %arg1: i32, %arg2: memref<1x72x128xbf16, #tpu.memory_space<vmem>>, %arg3: memref<256x64xbf16, #tpu.memory_space<vmem>>, %arg4: memref<1x64xf32, #tpu.memory_space<vmem>>, %arg5: memref<1x64x64xf32, #tpu.memory_space<vmem>>, %arg6: memref<64x64xf32, #tpu.memory_space<vmem>>) attributes {dimension_semantics = [#tpu.dimension_semantics<parallel>, #tpu.dimension_semantics<parallel>], iteration_bounds = array<i64: 2, 1>, scalar_prefetch = 0 : i64, scratch_operands = 1 : i64, tpu.core_type = #tpu.core_type<tc>, window_params = [{transform_indices = @transform_0, window_bounds = array<i64: 1, 72, 128>}, {transform_indices = @transform_1, window_bounds = array<i64: 256, 64>}, {transform_indices = @transform_2, window_bounds = array<i64: 1, 64>}, {transform_indices = @transform_3, window_bounds = array<i64: 1, 64, 64>}]} {
    %c0 = arith.constant 0 : index
    %c0_0 = arith.constant 0 : index
    %c0_1 = arith.constant 0 : index
    %0 = vector.load %arg2[%c0, %c0_0, %c0_1] : memref<1x72x128xbf16, #tpu.memory_space<vmem>>, vector<1x64x128xbf16>
    %1 = vector.shape_cast %0 : vector<1x64x128xbf16> to vector<64x128xbf16>
    %c0_2 = arith.constant 0 : index
    %c0_3 = arith.constant 0 : index
    %2 = vector.load %arg3[%c0_2, %c0_3] : memref<256x64xbf16, #tpu.memory_space<vmem>>, vector<128x64xbf16>
    %cst = arith.constant dense<0.000000e+00> : vector<64x64xf32>
    %3 = tpu.matmul %1, %2, %cst {dimension_numbers = #tpu.dot_dimension_numbers<[1], [0], [0], [1], [0, 0, 1, 1], [], []>} : vector<64x128xbf16>, vector<128x64xbf16>, vector<64x64xf32> -> vector<64x64xf32>
    %c0_4 = arith.constant 0 : index
    %c0_5 = arith.constant 0 : index
    %4 = vector.load %arg6[%c0_4, %c0_5] : memref<64x64xf32, #tpu.memory_space<vmem>>, vector<64x64xf32>
    tpu.vector_store %arg6[%c0_4, %c0_5], %3 {strides = array<i32>} : memref<64x64xf32, #tpu.memory_space<vmem>>, vector<64x64xf32>,
    %c0_6 = arith.constant 0 : index
    %c8 = arith.constant 8 : index
    %c0_7 = arith.constant 0 : index
    %5 = vector.load %arg2[%c0_6, %c8, %c0_7] : memref<1x72x128xbf16, #tpu.memory_space<vmem>>, vector<1x64x128xbf16>
    %6 = vector.shape_cast %5 : vector<1x64x128xbf16> to vector<64x128xbf16>
    %c128 = arith.constant 128 : index
    %c0_8 = arith.constant 0 : index
    %7 = vector.load %arg3[%c128, %c0_8] : memref<256x64xbf16, #tpu.memory_space<vmem>>, vector<128x64xbf16>
    %cst_9 = arith.constant dense<0.000000e+00> : vector<64x64xf32>
    %8 = tpu.matmul %6, %7, %cst_9 {dimension_numbers = #tpu.dot_dimension_numbers<[1], [0], [0], [1], [0, 0, 1, 1], [], []>} : vector<64x128xbf16>, vector<128x64xbf16>, vector<64x64xf32> -> vector<64x64xf32>
    %c0_10 = arith.constant 0 : index
    %c0_11 = arith.constant 0 : index
    %9 = vector.load %arg6[%c0_10, %c0_11] : memref<64x64xf32, #tpu.memory_space<vmem>>, vector<64x64xf32>
    %10 = arith.addf %9, %8 : vector<64x64xf32>
    %c0_12 = arith.constant 0 : index
    %c0_13 = arith.constant 0 : index
    %11 = vector.load %arg6[%c0_12, %c0_13] : memref<64x64xf32, #tpu.memory_space<vmem>>, vector<64x64xf32>
    tpu.vector_store %arg6[%c0_12, %c0_13], %10 {strides = array<i32>} : memref<64x64xf32, #tpu.memory_space<vmem>>, vector<64x64xf32>,
    %c0_14 = arith.constant 0 : index
    %c0_15 = arith.constant 0 : index
    %12 = vector.load %arg6[%c0_14, %c0_15] : memref<64x64xf32, #tpu.memory_space<vmem>>, vector<64x64xf32>
    %c0_16 = arith.constant 0 : index
    %c0_17 = arith.constant 0 : index
    %13 = vector.load %arg4[%c0_16, %c0_17] : memref<1x64xf32, #tpu.memory_space<vmem>>, vector<1x64xf32>
    %14 = vector.broadcast %13 : vector<1x64xf32> to vector<64x64xf32>
    %15 = arith.addf %12, %14 : vector<64x64xf32>
    %c0_18 = arith.constant 0 : index
    %c0_19 = arith.constant 0 : index
    %c0_20 = arith.constant 0 : index
    %16 = vector.load %arg5[%c0_18, %c0_19, %c0_20] : memref<1x64x64xf32, #tpu.memory_space<vmem>>, vector<1x64x64xf32>
    %17 = vector.shape_cast %16 : vector<1x64x64xf32> to vector<64x64xf32>
    %18 = vector.shape_cast %15 : vector<64x64xf32> to vector<1x64x64xf32>
    tpu.vector_store %arg5[%c0_18, %c0_19, %c0_20], %18 {strides = array<i32>} : memref<1x64x64xf32, #tpu.memory_space<vmem>>, vector<1x64x64xf32>,
    return
  }
  func.func @transform_0(%arg0: i32, %arg1: i32) -> (i32, i32, i32) {
    %c0_i32 = arith.constant 0 : i32
    %c0_i32_0 = arith.constant 0 : i32
    %c0_i32_1 = arith.constant 0 : i32
    return %arg0, %c0_i32, %c0_i32_0 : i32, i32, i32
  }
  func.func @transform_1(%arg0: i32, %arg1: i32) -> (i32, i32) {
    %c0_i32 = arith.constant 0 : i32
    %c0_i32_0 = arith.constant 0 : i32
    return %c0_i32, %arg1 : i32, i32
  }
  func.func @transform_2(%arg0: i32, %arg1: i32) -> (i32, i32) {
    %c0_i32 = arith.constant 0 : i32
    %c0_i32_0 = arith.constant 0 : i32
    return %c0_i32, %arg1 : i32, i32
  }
  func.func @transform_3(%arg0: i32, %arg1: i32) -> (i32, i32, i32) {
    %c0_i32 = arith.constant 0 : i32
    %c0_i32_0 = arith.constant 0 : i32
    return %arg0, %c0_i32, %arg1 : i32, i32, i32
  }
}

module attributes {stable_mosaic.version = 11 : i64} {
  func.func @_direct_conv_kernel(%arg0: i32, %arg1: i32, %arg2: memref<1x82x128xbf16, #tpu.memory_space<vmem>>, %arg3: memref<512x64xbf16, #tpu.memory_space<vmem>>, %arg4: memref<1x64xf32, #tpu.memory_space<vmem>>, %arg5: memref<1x72x64xf32, #tpu.memory_space<vmem>>, %arg6: memref<72x64xf32, #tpu.memory_space<vmem>>) attributes {dimension_semantics = [#tpu.dimension_semantics<parallel>, #tpu.dimension_semantics<parallel>], iteration_bounds = array<i64: 2, 1>, scalar_prefetch = 0 : i64, scratch_operands = 1 : i64, tpu.core_type = #tpu.core_type<tc>, window_params = [{transform_indices = @transform_0, window_bounds = array<i64: 1, 82, 128>}, {transform_indices = @transform_1, window_bounds = array<i64: 512, 64>}, {transform_indices = @transform_2, window_bounds = array<i64: 1, 64>}, {transform_indices = @transform_3, window_bounds = array<i64: 1, 72, 64>}]} {
    %c0 = arith.constant 0 : index
    %c0_0 = arith.constant 0 : index
    %c0_1 = arith.constant 0 : index
    %0 = vector.load %arg2[%c0, %c0_0, %c0_1] : memref<1x82x128xbf16, #tpu.memory_space<vmem>>, vector<1x72x128xbf16>
    %1 = vector.shape_cast %0 : vector<1x72x128xbf16> to vector<72x128xbf16>
    %c0_2 = arith.constant 0 : index
    %c0_3 = arith.constant 0 : index
    %2 = vector.load %arg3[%c0_2, %c0_3] : memref<512x64xbf16, #tpu.memory_space<vmem>>, vector<128x64xbf16>
    %cst = arith.constant dense<0.000000e+00> : vector<72x64xf32>
    %3 = tpu.matmul %1, %2, %cst {dimension_numbers = #tpu.dot_dimension_numbers<[1], [0], [0], [1], [0, 0, 1, 1], [], []>} : vector<72x128xbf16>, vector<128x64xbf16>, vector<72x64xf32> -> vector<72x64xf32>
    %c0_4 = arith.constant 0 : index
    %c0_5 = arith.constant 0 : index
    %4 = vector.load %arg6[%c0_4, %c0_5] : memref<72x64xf32, #tpu.memory_space<vmem>>, vector<72x64xf32>
    tpu.vector_store %arg6[%c0_4, %c0_5], %3 {strides = array<i32>} : memref<72x64xf32, #tpu.memory_space<vmem>>, vector<72x64xf32>,
    %c0_6 = arith.constant 0 : index
    %c1 = arith.constant 1 : index
    %c0_7 = arith.constant 0 : index
    %5 = vector.load %arg2[%c0_6, %c1, %c0_7] : memref<1x82x128xbf16, #tpu.memory_space<vmem>>, vector<1x72x128xbf16>
    %6 = vector.shape_cast %5 : vector<1x72x128xbf16> to vector<72x128xbf16>
    %c128 = arith.constant 128 : index
    %c0_8 = arith.constant 0 : index
    %7 = vector.load %arg3[%c128, %c0_8] : memref<512x64xbf16, #tpu.memory_space<vmem>>, vector<128x64xbf16>
    %cst_9 = arith.constant dense<0.000000e+00> : vector<72x64xf32>
    %8 = tpu.matmul %6, %7, %cst_9 {dimension_numbers = #tpu.dot_dimension_numbers<[1], [0], [0], [1], [0, 0, 1, 1], [], []>} : vector<72x128xbf16>, vector<128x64xbf16>, vector<72x64xf32> -> vector<72x64xf32>
    %c0_10 = arith.constant 0 : index
    %c0_11 = arith.constant 0 : index
    %9 = vector.load %arg6[%c0_10, %c0_11] : memref<72x64xf32, #tpu.memory_space<vmem>>, vector<72x64xf32>
    %10 = arith.addf %9, %8 : vector<72x64xf32>
    %c0_12 = arith.constant 0 : index
    %c0_13 = arith.constant 0 : index
    %11 = vector.load %arg6[%c0_12, %c0_13] : memref<72x64xf32, #tpu.memory_space<vmem>>, vector<72x64xf32>
    tpu.vector_store %arg6[%c0_12, %c0_13], %10 {strides = array<i32>} : memref<72x64xf32, #tpu.memory_space<vmem>>, vector<72x64xf32>,
    %c0_14 = arith.constant 0 : index
    %c9 = arith.constant 9 : index
    %c0_15 = arith.constant 0 : index
    %12 = vector.load %arg2[%c0_14, %c9, %c0_15] : memref<1x82x128xbf16, #tpu.memory_space<vmem>>, vector<1x72x128xbf16>
    %13 = vector.shape_cast %12 : vector<1x72x128xbf16> to vector<72x128xbf16>
    %c256 = arith.constant 256 : index
    %c0_16 = arith.constant 0 : index
    %14 = vector.load %arg3[%c256, %c0_16] : memref<512x64xbf16, #tpu.memory_space<vmem>>, vector<128x64xbf16>
    %cst_17 = arith.constant dense<0.000000e+00> : vector<72x64xf32>
    %15 = tpu.matmul %13, %14, %cst_17 {dimension_numbers = #tpu.dot_dimension_numbers<[1], [0], [0], [1], [0, 0, 1, 1], [], []>} : vector<72x128xbf16>, vector<128x64xbf16>, vector<72x64xf32> -> vector<72x64xf32>
    %c0_18 = arith.constant 0 : index
    %c0_19 = arith.constant 0 : index
    %16 = vector.load %arg6[%c0_18, %c0_19] : memref<72x64xf32, #tpu.memory_space<vmem>>, vector<72x64xf32>
    %17 = arith.addf %16, %15 : vector<72x64xf32>
    %c0_20 = arith.constant 0 : index
    %c0_21 = arith.constant 0 : index
    %18 = vector.load %arg6[%c0_20, %c0_21] : memref<72x64xf32, #tpu.memory_space<vmem>>, vector<72x64xf32>
    tpu.vector_store %arg6[%c0_20, %c0_21], %17 {strides = array<i32>} : memref<72x64xf32, #tpu.memory_space<vmem>>, vector<72x64xf32>,
    %c0_22 = arith.constant 0 : index
    %c10 = arith.constant 10 : index
    %c0_23 = arith.constant 0 : index
    %19 = vector.load %arg2[%c0_22, %c10, %c0_23] : memref<1x82x128xbf16, #tpu.memory_space<vmem>>, vector<1x72x128xbf16>
    %20 = vector.shape_cast %19 : vector<1x72x128xbf16> to vector<72x128xbf16>
    %c384 = arith.constant 384 : index
    %c0_24 = arith.constant 0 : index
    %21 = vector.load %arg3[%c384, %c0_24] : memref<512x64xbf16, #tpu.memory_space<vmem>>, vector<128x64xbf16>
    %cst_25 = arith.constant dense<0.000000e+00> : vector<72x64xf32>
    %22 = tpu.matmul %20, %21, %cst_25 {dimension_numbers = #tpu.dot_dimension_numbers<[1], [0], [0], [1], [0, 0, 1, 1], [], []>} : vector<72x128xbf16>, vector<128x64xbf16>, vector<72x64xf32> -> vector<72x64xf32>
    %c0_26 = arith.constant 0 : index
    %c0_27 = arith.constant 0 : index
    %23 = vector.load %arg6[%c0_26, %c0_27] : memref<72x64xf32, #tpu.memory_space<vmem>>, vector<72x64xf32>
    %24 = arith.addf %23, %22 : vector<72x64xf32>
    %c0_28 = arith.constant 0 : index
    %c0_29 = arith.constant 0 : index
    %25 = vector.load %arg6[%c0_28, %c0_29] : memref<72x64xf32, #tpu.memory_space<vmem>>, vector<72x64xf32>
    tpu.vector_store %arg6[%c0_28, %c0_29], %24 {strides = array<i32>} : memref<72x64xf32, #tpu.memory_space<vmem>>, vector<72x64xf32>,
    %c0_30 = arith.constant 0 : index
    %c0_31 = arith.constant 0 : index
    %26 = vector.load %arg6[%c0_30, %c0_31] : memref<72x64xf32, #tpu.memory_space<vmem>>, vector<72x64xf32>
    %c0_32 = arith.constant 0 : index
    %c0_33 = arith.constant 0 : index
    %27 = vector.load %arg4[%c0_32, %c0_33] : memref<1x64xf32, #tpu.memory_space<vmem>>, vector<1x64xf32>
    %28 = vector.broadcast %27 : vector<1x64xf32> to vector<72x64xf32>
    %29 = arith.addf %26, %28 : vector<72x64xf32>
    %c0_34 = arith.constant 0 : index
    %c0_35 = arith.constant 0 : index
    %c0_36 = arith.constant 0 : index
    %30 = vector.load %arg5[%c0_34, %c0_35, %c0_36] : memref<1x72x64xf32, #tpu.memory_space<vmem>>, vector<1x72x64xf32>
    %31 = vector.shape_cast %30 : vector<1x72x64xf32> to vector<72x64xf32>
    %32 = vector.shape_cast %29 : vector<72x64xf32> to vector<1x72x64xf32>
    tpu.vector_store %arg5[%c0_34, %c0_35, %c0_36], %32 {strides = array<i32>} : memref<1x72x64xf32, #tpu.memory_space<vmem>>, vector<1x72x64xf32>,
    return
  }
  func.func @transform_0(%arg0: i32, %arg1: i32) -> (i32, i32, i32) {
    %c0_i32 = arith.constant 0 : i32
    %c0_i32_0 = arith.constant 0 : i32
    %c0_i32_1 = arith.constant 0 : i32
    return %arg0, %c0_i32, %c0_i32_0 : i32, i32, i32
  }
  func.func @transform_1(%arg0: i32, %arg1: i32) -> (i32, i32) {
    %c0_i32 = arith.constant 0 : i32
    %c0_i32_0 = arith.constant 0 : i32
    return %c0_i32, %arg1 : i32, i32
  }
  func.func @transform_2(%arg0: i32, %arg1: i32) -> (i32, i32) {
    %c0_i32 = arith.constant 0 : i32
    %c0_i32_0 = arith.constant 0 : i32
    return %c0_i32, %arg1 : i32, i32
  }
  func.func @transform_3(%arg0: i32, %arg1: i32) -> (i32, i32, i32) {
    %c0_i32 = arith.constant 0 : i32
    %c0_i32_0 = arith.constant 0 : i32
    return %arg0, %c0_i32, %arg1 : i32, i32, i32
  }
}

module attributes {stable_mosaic.version = 11 : i64} {
  func.func @_matmul_bias_kernel(%arg0: i32, %arg1: i32, %arg2: i32, %arg3: memref<256x128xbf16, #tpu.memory_space<vmem>>, %arg4: memref<128x128xbf16, #tpu.memory_space<vmem>>, %arg5: memref<1x128xf32, #tpu.memory_space<vmem>>, %arg6: memref<256x128xf32, #tpu.memory_space<vmem>>, %arg7: memref<256x128xf32, #tpu.memory_space<vmem>>) attributes {dimension_semantics = [#tpu.dimension_semantics<parallel>, #tpu.dimension_semantics<parallel>, #tpu.dimension_semantics<arbitrary>], iteration_bounds = array<i64: 2, 1, 25>, scalar_prefetch = 0 : i64, scratch_operands = 1 : i64, tpu.core_type = #tpu.core_type<tc>, window_params = [{transform_indices = @transform_0, window_bounds = array<i64: 256, 128>}, {transform_indices = @transform_1, window_bounds = array<i64: 128, 128>}, {transform_indices = @transform_2, window_bounds = array<i64: 1, 128>}, {transform_indices = @transform_3, window_bounds = array<i64: 256, 128>}]} {
    %c0_i32 = arith.constant 0 : i32
    %0 = arith.cmpi eq, %arg2, %c0_i32 : i32
    %1 = arith.extui %0 : i1 to i32
    %c0_i32_0 = arith.constant 0 : i32
    %2 = arith.cmpi ne, %1, %c0_i32_0 : i32
    scf.if %2 {
      %cst_9 = arith.constant 0.000000e+00 : f32
      %12 = vector.broadcast %cst_9 : f32 to vector<256x128xf32>
      %c0_10 = arith.constant 0 : index
      %c0_11 = arith.constant 0 : index
      %13 = vector.load %arg7[%c0_10, %c0_11] : memref<256x128xf32, #tpu.memory_space<vmem>>, vector<256x128xf32>
      tpu.vector_store %arg7[%c0_10, %c0_11], %12 {strides = array<i32>} : memref<256x128xf32, #tpu.memory_space<vmem>>, vector<256x128xf32>,
    } else {
    }
    %c0 = arith.constant 0 : index
    %c0_1 = arith.constant 0 : index
    %3 = vector.load %arg7[%c0, %c0_1] : memref<256x128xf32, #tpu.memory_space<vmem>>, vector<256x128xf32>
    %c0_2 = arith.constant 0 : index
    %c0_3 = arith.constant 0 : index
    %4 = vector.load %arg3[%c0_2, %c0_3] : memref<256x128xbf16, #tpu.memory_space<vmem>>, vector<256x128xbf16>
    %c0_4 = arith.constant 0 : index
    %c0_5 = arith.constant 0 : index
    %5 = vector.load %arg4[%c0_4, %c0_5] : memref<128x128xbf16, #tpu.memory_space<vmem>>, vector<128x128xbf16>
    %cst = arith.constant dense<0.000000e+00> : vector<256x128xf32>
    %6 = tpu.matmul %4, %5, %cst {dimension_numbers = #tpu.dot_dimension_numbers<[1], [0], [0], [1], [0, 0, 1, 1], [], []>} : vector<256x128xbf16>, vector<128x128xbf16>, vector<256x128xf32> -> vector<256x128xf32>
    %7 = arith.addf %3, %6 : vector<256x128xf32>
    %c0_6 = arith.constant 0 : index
    %c0_7 = arith.constant 0 : index
    %8 = vector.load %arg7[%c0_6, %c0_7] : memref<256x128xf32, #tpu.memory_space<vmem>>, vector<256x128xf32>
    tpu.vector_store %arg7[%c0_6, %c0_7], %7 {strides = array<i32>} : memref<256x128xf32, #tpu.memory_space<vmem>>, vector<256x128xf32>,
    %c24_i32 = arith.constant 24 : i32
    %9 = arith.cmpi eq, %arg2, %c24_i32 : i32
    %10 = arith.extui %9 : i1 to i32
    %c0_i32_8 = arith.constant 0 : i32
    %11 = arith.cmpi ne, %10, %c0_i32_8 : i32
    scf.if %11 {
      %c0_9 = arith.constant 0 : index
      %c0_10 = arith.constant 0 : index
      %12 = vector.load %arg7[%c0_9, %c0_10] : memref<256x128xf32, #tpu.memory_space<vmem>>, vector<256x128xf32>
      %c0_11 = arith.constant 0 : index
      %c0_12 = arith.constant 0 : index
      %13 = vector.load %arg5[%c0_11, %c0_12] : memref<1x128xf32, #tpu.memory_space<vmem>>, vector<1x128xf32>
      %14 = vector.broadcast %13 : vector<1x128xf32> to vector<256x128xf32>
      %15 = arith.addf %12, %14 : vector<256x128xf32>
      %16 = math.tanh %15 : vector<256x128xf32>
      %c0_13 = arith.constant 0 : index
      %c0_14 = arith.constant 0 : index
      %17 = vector.load %arg6[%c0_13, %c0_14] : memref<256x128xf32, #tpu.memory_space<vmem>>, vector<256x128xf32>
      tpu.vector_store %arg6[%c0_13, %c0_14], %16 {strides = array<i32>} : memref<256x128xf32, #tpu.memory_space<vmem>>, vector<256x128xf32>,
    } else {
    }
    return
  }
  func.func @transform_0(%arg0: i32, %arg1: i32, %arg2: i32) -> (i32, i32) {
    %c0_i32 = arith.constant 0 : i32
    return %arg0, %arg2 : i32, i32
  }
  func.func @transform_1(%arg0: i32, %arg1: i32, %arg2: i32) -> (i32, i32) {
    %c0_i32 = arith.constant 0 : i32
    return %arg2, %arg1 : i32, i32
  }
  func.func @transform_2(%arg0: i32, %arg1: i32, %arg2: i32) -> (i32, i32) {
    %c0_i32 = arith.constant 0 : i32
    %c0_i32_0 = arith.constant 0 : i32
    return %c0_i32, %arg1 : i32, i32
  }
  func.func @transform_3(%arg0: i32, %arg1: i32, %arg2: i32) -> (i32, i32) {
    %c0_i32 = arith.constant 0 : i32
    return %arg0, %arg1 : i32, i32
  }
}

</mosaic_0001>

<bundles_post_ra>
// kernel: generator_forward.54
= control target key start
LH: loop header
LB: loop body
LE: loop exit
PB: predicated region body
PF: predicated region fallthrough
CT: control target
= control target key end

     0   :  { %s723_s6 = smov 0   ;;  %s725_s7 = smov 0   ;;  %s1287_s0 = inlined_call_operand.vmem [shape: f32[2,256,64], index: 0, kind: input, shape index: {}]   ;;  %s1288_s1 = inlined_call_operand.vmem [shape: f32[2,256,64], index: 1, kind: output, shape index: {}]  }
   0x1   :  { %s727_s8 = smov 0  }
   0x2 LB: > { %s23_s9 = sadd.s32 1, %s706_s7  ;;  %p650_p0 = scmp.ge.s32.totalorder %s710_s8, 1  ;;  %s710_s8 = sphi %s727_s8, %s11_s8   ;;  %s706_s7 = sphi %s725_s7, %s1290_s7   ;;  %s702_s6 = sphi %s723_s6, %s1289_s6  }
   0x3   : > { %p25_p1 = scmp.ge.s32.totalorder %s23_s9, 2  ;;  %p106_p2 = scmp.lt.s32.totalorder %s710_s8, 3 }
   0x5   : > { %s1292_s9 = smov (%p25_p1, %s23_s9), 0  ;;  %p107_p3 = pnand %p650_p0, %p106_p2 }
   0x6   : > { %p132_p4 = scmp.lt.s32.totalorder (!%p107_p3), %s702_s6, 1 }
   0x7   : > { %110 = sbr.rel (%p107_p3) target bundleno = 231 (0xe7), region = 24 }
   0xc   : > { %s1294_s6 = smov (!%p132_p4, %s702_s6), 1  ;;  %vm180_vm0 = vcmask 523264  }
   0xd   : > { %s657_s10 = sshll.u32 %s1294_s6, 8 }
   0xe   : > { %s749_s13 = scalar_lea.vmem %s1287_s0, %s657_s10  ;;  %s1164_s16 = scalar_lea.vmem %s1288_s1, %s657_s10 }
   0xf   : > { %v752_v0 = vld [vmem:[%s749_s13] sm:$0xff]  ;;  %v755_v1 = vld [vmem:[%s749_s13 + $0x8] sm:$0xff]  ;;  %v758_v2 = vld [vmem:[%s749_s13 + $0x10] sm:$0xff] }
  0x10   : > { %v761_v3 = vld [vmem:[%s749_s13 + $0x18] sm:$0xff]  ;;  %v181_v4 = vsel %vm180_vm0, %v752_v0, 0.0  ;;  %v182_v5 = vsel %vm180_vm0, %v755_v1, 0.0  ;;  %v184_v6 = vsel %vm180_vm0, %v758_v2, 0.0  ;;  %v770_v7 = vld [vmem:[%s749_s13 + $0x20] sm:$0xff]  ;;  %v775_v10 = vld [vmem:[%s749_s13 + $0x28] sm:$0xff] }
  0x11   : > { %v183_v8 = vadd.f32 %v182_v5, %v181_v4  ;;  %v186_v9 = vsel %vm180_vm0, %v761_v3, 0.0  ;;  %v188_v12 = vsel %vm180_vm0, %v770_v7, 0.0  ;;  %v780_v13 = vld [vmem:[%s749_s13 + $0x30] sm:$0xff]  ;;  %v190_v15 = vsel %vm180_vm0, %v775_v10, 0.0  ;;  %v785_v16 = vld [vmem:[%s749_s13 + $0x38] sm:$0xff]  ;;  %v790_v19 = vld [vmem:[%s749_s13 + $0x40] sm:$0xff] }
  0x12   : > { %v192_v18 = vsel %vm180_vm0, %v780_v13, 0.0  ;;  %v194_v21 = vsel %vm180_vm0, %v785_v16, 0.0  ;;  %v795_v22 = vld [vmem:[%s749_s13 + $0x48] sm:$0xff]  ;;  %v196_v24 = vsel %vm180_vm0, %v790_v19, 0.0  ;;  %v800_v25 = vld [vmem:[%s749_s13 + $0x50] sm:$0xff]  ;;  %v805_v28 = vld [vmem:[%s749_s13 + $0x58] sm:$0xff] }
  0x13   : > { %v185_v11 = vadd.f32 %v184_v6, %v183_v8  ;;  %v198_v27 = vsel %vm180_vm0, %v795_v22, 0.0  ;;  %v200_v30 = vsel %vm180_vm0, %v800_v25, 0.0  ;;  %v810_v31 = vld [vmem:[%s749_s13 + $0x60] sm:$0xff]  ;;  %v202_v33 = vsel %vm180_vm0, %v805_v28, 0.0  ;;  %v815_v34 = vld [vmem:[%s749_s13 + $0x68] sm:$0xff]  ;;  %v820_v37 = vld [vmem:[%s749_s13 + $0x70] sm:$0xff] }
  0x14   : > { %v204_v36 = vsel %vm180_vm0, %v810_v31, 0.0  ;;  %v206_v39 = vsel %vm180_vm0, %v815_v34, 0.0  ;;  %v825_v40 = vld [vmem:[%s749_s13 + $0x78] sm:$0xff]  ;;  %v208_v42 = vsel %vm180_vm0, %v820_v37, 0.0  ;;  %v830_v43 = vld [vmem:[%s749_s13 + $0x80] sm:$0xff]  ;;  %v835_v46 = vld [vmem:[%s749_s13 + $0x88] sm:$0xff] }
  0x15   : > { %v187_v14 = vadd.f32 %v186_v9, %v185_v11  ;;  %v210_v45 = vsel %vm180_vm0, %v825_v40, 0.0  ;;  %v212_v48 = vsel %vm180_vm0, %v830_v43, 0.0  ;;  %v840_v49 = vld [vmem:[%s749_s13 + $0x90] sm:$0xff]  ;;  %v214_v51 = vsel %vm180_vm0, %v835_v46, 0.0  ;;  %v845_v52 = vld [vmem:[%s749_s13 + $0x98] sm:$0xff]  ;;  %v850_v55 = vld [vmem:[%s749_s13 + $0xa0] sm:$0xff] }
  0x16   : > { %v216_v54 = vsel %vm180_vm0, %v840_v49, 0.0  ;;  %v218_v57 = vsel %vm180_vm0, %v845_v52, 0.0  ;;  %v855_v58 = vld [vmem:[%s749_s13 + $0xa8] sm:$0xff]  ;;  %v220_v60 = vsel %vm180_vm0, %v850_v55, 0.0  ;;  %v860_v61 = vld [vmem:[%s749_s13 + $0xb0] sm:$0xff]  ;;  %v865_v4 = vld [vmem:[%s749_s13 + $0xb8] sm:$0xff] }
  0x17   : > { %v189_v17 = vadd.f32 %v188_v12, %v187_v14  ;;  %v222_v63 = vsel %vm180_vm0, %v855_v58, 0.0  ;;  %v224_v6 = vsel %vm180_vm0, %v860_v61, 0.0  ;;  %v870_v8 = vld [vmem:[%s749_s13 + $0xc0] sm:$0xff]  ;;  %v226_v11 = vsel %vm180_vm0, %v865_v4, 0.0  ;;  %v875_v12 = vld [vmem:[%s749_s13 + $0xc8] sm:$0xff] }
  0x19   : > { %v191_v20 = vadd.f32 %v190_v15, %v189_v17  ;;  %v228_v15 = vsel %vm180_vm0, %v870_v8, 0.0  ;;  %v880_v17 = vld [vmem:[%s749_s13 + $0xd0] sm:$0xff] }
  0x1b   : > { %v193_v23 = vadd.f32 %v192_v18, %v191_v20  ;;  %v230_v20 = vsel %vm180_vm0, %v875_v12, 0.0 }
  0x1d   : > { %v195_v26 = vadd.f32 %v194_v21, %v193_v23  ;;  %v885_v21 = vld [vmem:[%s749_s13 + $0xd8] sm:$0xff] }
  0x1f   : > { %v197_v29 = vadd.f32 %v196_v24, %v195_v26  ;;  %v232_v24 = vsel %vm180_vm0, %v880_v17, 0.0  ;;  %v890_v26 = vld [vmem:[%s749_s13 + $0xe0] sm:$0xff] }
  0x21   : > { %v199_v32 = vadd.f32 %v198_v27, %v197_v29  ;;  %v234_v29 = vsel %vm180_vm0, %v885_v21, 0.0 }
  0x23   : > { %v201_v35 = vadd.f32 %v200_v30, %v199_v32  ;;  %v895_v30 = vld [vmem:[%s749_s13 + $0xe8] sm:$0xff] }
  0x25   : > { %v203_v38 = vadd.f32 %v202_v33, %v201_v35  ;;  %v236_v33 = vsel %vm180_vm0, %v890_v26, 0.0  ;;  %v900_v35 = vld [vmem:[%s749_s13 + $0xf0] sm:$0xff] }
  0x27   : > { %v205_v41 = vadd.f32 %v204_v36, %v203_v38  ;;  %v712_v38 = vmov 256.0  }
  0x28   : > { %684 = vrcp.f32 %v712_v38 }
  0x29   : > { %v207_v44 = vadd.f32 %v206_v39, %v205_v41  ;;  %v238_v39 = vsel %vm180_vm0, %v895_v30, 0.0  ;;  %v905_v41 = vld [vmem:[%s749_s13 + $0xf8] sm:$0xff] }
  0x2b   : > { %v209_v47 = vadd.f32 %v208_v42, %v207_v44  ;;  %v240_v44 = vsel %vm180_vm0, %v900_v35, 0.0 }
  0x2d   : > { %v211_v50 = vadd.f32 %v210_v45, %v209_v47  ;;  %v242_v47 = vsel %vm180_vm0, %v905_v41, 0.0 }
  0x2f   : > { %v213_v53 = vadd.f32 %v212_v48, %v211_v50  ;;  %v685_v48 = vpop.eup %684 }
  0x30   : > { %vm255_vm1 = vweird.f32 %v685_v48 }
  0x31   : > { %v215_v56 = vadd.f32 %v214_v51, %v213_v53  ;;  %v251_v53 = vmul.f32 256.0, %v685_v48 }
  0x33   : > { %v217_v59 = vadd.f32 %v216_v54, %v215_v56 }
  0x35   : > { %v219_v62 = vadd.f32 %v218_v57, %v217_v59  ;;  %v252_v57 = vsub.f32 1.0, %v251_v53 }
  0x37   : > { %v221_v5 = vadd.f32 %v220_v60, %v219_v62  ;;  %v253_v62 = vmul.f32 %v685_v48, %v252_v57 }
  0x39   : > { %v223_v9 = vadd.f32 %v222_v63, %v221_v5  ;;  %v254_v5 = vadd.f32 %v685_v48, %v253_v62 }
  0x3b   : > { %v225_v14 = vadd.f32 %v224_v6, %v223_v9  ;;  %v911_v9 = vsel %vm255_vm1, %v685_v48, %v254_v5 }
  0x3d   : > { %v227_v18 = vadd.f32 %v226_v11, %v225_v14 }
  0x3f   : > { %v229_v23 = vadd.f32 %v228_v15, %v227_v18 }
  0x41   : > { %v231_v27 = vadd.f32 %v230_v20, %v229_v23 }
  0x43   : > { %v233_v32 = vadd.f32 %v232_v24, %v231_v27 }
  0x45   : > { %v235_v36 = vadd.f32 %v234_v29, %v233_v32 }
  0x47   : > { %v237_v42 = vadd.f32 %v236_v33, %v235_v36 }
  0x49   : > { %v239_v45 = vadd.f32 %v238_v39, %v237_v42 }
  0x4b   : > { %v241_v50 = vadd.f32 %v240_v44, %v239_v45 }
  0x4d   : > { %v243_v51 = vadd.f32 %v242_v47, %v241_v50 }
  0x4f   : > { %v244_v54 = vrot.slane %v243_v51, 4 }
  0x51   : > { %v245_v56 = vadd.f32 %v244_v54, %v243_v51 }
  0x53   : > { %v246_v59 = vrot.slane %v245_v56, 2 }
  0x55   : > { %v247_v60 = vadd.f32 %v246_v59, %v245_v56 }
  0x57   : > { %v248_v63 = vrot.slane %v247_v60, 1 }
  0x59   : > { %v249_v6 = vadd.f32 %v248_v63, %v247_v60 }
  0x5b   : > { %v914_v11 = vmul.f32 %v911_v9, %v249_v6 }
  0x5d   : > { %v918_v14 = vsub.f32 %v752_v0, %v914_v11  ;;  %v922_v15 = vsub.f32 %v755_v1, %v914_v11  ;;  %v926_v18 = vsub.f32 %v758_v2, %v914_v11  ;;  %v930_v20 = vsub.f32 %v761_v3, %v914_v11 }
  0x5e   : > { %v934_v23 = vsub.f32 %v770_v7, %v914_v11  ;;  %v944_v2 = vsub.f32 %v775_v10, %v914_v11  ;;  %v950_v7 = vsub.f32 %v780_v13, %v914_v11  ;;  %v959_v10 = vsub.f32 %v785_v16, %v914_v11 }
  0x5f   : > { %v290_v0 = vmul.f32 %v918_v14, %v918_v14  ;;  %v291_v24 = vmul.f32 %v922_v15, %v922_v15  ;;  %v292_v1 = vmul.f32 %v926_v18, %v926_v18  ;;  %v293_v3 = vmul.f32 %v930_v20, %v930_v20 }
  0x60   : > { %v294_v27 = vmul.f32 %v934_v23, %v934_v23  ;;  %v295_v38 = vmul.f32 %v944_v2, %v944_v2  ;;  %v966_v42 = vsub.f32 %v790_v19, %v914_v11  ;;  %v296_v44 = vmul.f32 %v950_v7, %v950_v7 }
  0x61   : > { %v322_v29 = vsel %vm180_vm0, %v290_v0, 0.0  ;;  %v323_v32 = vsel %vm180_vm0, %v291_v24, 0.0  ;;  %v325_v33 = vsel %vm180_vm0, %v292_v1, 0.0  ;;  %v327_v13 = vsel %vm180_vm0, %v293_v3, 0.0 }
  0x62   : > { %v324_v36 = vadd.f32 %v323_v32, %v322_v29  ;;  %v329_v45 = vsel %vm180_vm0, %v294_v27, 0.0  ;;  %v973_v16 = vsub.f32 %v795_v22, %v914_v11  ;;  %v297_v48 = vmul.f32 %v959_v10, %v959_v10 }
  0x63   : > { %v331_v50 = vsel %vm180_vm0, %v295_v38, 0.0  ;;  %v980_v19 = vsub.f32 %v800_v25, %v914_v11  ;;  %v298_v53 = vmul.f32 %v966_v42, %v966_v42  ;;  %v333_v54 = vsel %vm180_vm0, %v296_v44, 0.0 }
  0x64   : > { %v326_v39 = vadd.f32 %v325_v33, %v324_v36  ;;  %v987_v22 = vsub.f32 %v805_v28, %v914_v11  ;;  %v299_v57 = vmul.f32 %v973_v16, %v973_v16  ;;  %v335_v59 = vsel %vm180_vm0, %v297_v48, 0.0 }
  0x65   : > { %v994_v25 = vsub.f32 %v810_v31, %v914_v11  ;;  %v300_v62 = vmul.f32 %v980_v19, %v980_v19  ;;  %v337_v63 = vsel %vm180_vm0, %v298_v53, 0.0  ;;  %v1001_v28 = vsub.f32 %v815_v34, %v914_v11 }
  0x66   : > { %v328_v47 = vadd.f32 %v327_v13, %v326_v39  ;;  %v301_v6 = vmul.f32 %v987_v22, %v987_v22  ;;  %v339_v0 = vsel %vm180_vm0, %v299_v57, 0.0  ;;  %v1008_v31 = vsub.f32 %v820_v37, %v914_v11 }
  0x67   : > { %v302_v1 = vmul.f32 %v994_v25, %v994_v25  ;;  %v341_v3 = vsel %vm180_vm0, %v300_v62, 0.0  ;;  %v1015_v34 = vsub.f32 %v825_v40, %v914_v11  ;;  %v303_v29 = vmul.f32 %v1001_v28, %v1001_v28 }
  0x68   : > { %v330_v51 = vadd.f32 %v329_v45, %v328_v47  ;;  %v343_v32 = vsel %vm180_vm0, %v301_v6, 0.0  ;;  %v1022_v37 = vsub.f32 %v830_v43, %v914_v11  ;;  %v304_v36 = vmul.f32 %v1008_v31, %v1008_v31 }
  0x69   : > { %v345_v38 = vsel %vm180_vm0, %v302_v1, 0.0  ;;  %v1029_v40 = vsub.f32 %v835_v46, %v914_v11  ;;  %v305_v39 = vmul.f32 %v1015_v34, %v1015_v34  ;;  %v347_v44 = vsel %vm180_vm0, %v303_v29, 0.0 }
  0x6a   : > { %v332_v56 = vadd.f32 %v331_v50, %v330_v51  ;;  %v1036_v43 = vsub.f32 %v840_v49, %v914_v11  ;;  %v306_v47 = vmul.f32 %v1022_v37, %v1022_v37  ;;  %v349_v48 = vsel %vm180_vm0, %v304_v36, 0.0 }
  0x6b   : > { %v1043_v46 = vsub.f32 %v845_v52, %v914_v11  ;;  %v307_v51 = vmul.f32 %v1029_v40, %v1029_v40  ;;  %v351_v53 = vsel %vm180_vm0, %v305_v39, 0.0  ;;  %v1050_v49 = vsub.f32 %v850_v55, %v914_v11 }
  0x6c   : > { %v334_v60 = vadd.f32 %v333_v54, %v332_v56  ;;  %v308_v56 = vmul.f32 %v1036_v43, %v1036_v43  ;;  %v353_v57 = vsel %vm180_vm0, %v306_v47, 0.0  ;;  %v1057_v52 = vsub.f32 %v855_v58, %v914_v11 }
  0x6d   : > { %v355_v62 = vsel %vm180_vm0, %v307_v51, 0.0  ;;  %v1064_v55 = vsub.f32 %v860_v61, %v914_v11  ;;  %v1071_v58 = vsub.f32 %v865_v4, %v914_v11  ;;  %v1078_v61 = vsub.f32 %v870_v8, %v914_v11 }
  0x6e   : > { %v336_v5 = vadd.f32 %v335_v59, %v334_v60  ;;  %v309_v60 = vmul.f32 %v1043_v46, %v1043_v46  ;;  %v357_v6 = vsel %vm180_vm0, %v308_v56, 0.0  ;;  %v1085_v4 = vsub.f32 %v875_v12, %v914_v11 }
  0x6f   : > { %v1092_v8 = vsub.f32 %v880_v17, %v914_v11  ;;  %v1099_v12 = vsub.f32 %v885_v21, %v914_v11  ;;  %v1106_v17 = vsub.f32 %v890_v26, %v914_v11  ;;  %v1113_v21 = vsub.f32 %v895_v30, %v914_v11 }
  0x70   : > { %v338_v24 = vadd.f32 %v337_v63, %v336_v5  ;;  %v310_v5 = vmul.f32 %v1050_v49, %v1050_v49  ;;  %v359_v1 = vsel %vm180_vm0, %v309_v60, 0.0  ;;  %v1120_v26 = vsub.f32 %v900_v35, %v914_v11 }
  0x71   : > { %v1127_v30 = vsub.f32 %v905_v41, %v914_v11 }
  0x72   : > { %v340_v27 = vadd.f32 %v339_v0, %v338_v24  ;;  %v311_v24 = vmul.f32 %v1057_v52, %v1057_v52  ;;  %v361_v29 = vsel %vm180_vm0, %v310_v5, 0.0  ;;  %v320_v35 = vmul.f32 %v1120_v26, %v1120_v26 }
  0x74   : > { %v342_v33 = vadd.f32 %v341_v3, %v340_v27  ;;  %v312_v27 = vmul.f32 %v1064_v55, %v1064_v55  ;;  %v363_v36 = vsel %vm180_vm0, %v311_v24, 0.0  ;;  %v381_v41 = vsel %vm180_vm0, %v320_v35, 0.0 }
  0x76   : > { %v344_v13 = vadd.f32 %v343_v32, %v342_v33  ;;  %v313_v33 = vmul.f32 %v1071_v58, %v1071_v58  ;;  %v365_v39 = vsel %vm180_vm0, %v312_v27, 0.0 }
  0x78   : > { %v346_v45 = vadd.f32 %v345_v38, %v344_v13  ;;  %v314_v13 = vmul.f32 %v1078_v61, %v1078_v61  ;;  %v367_v47 = vsel %vm180_vm0, %v313_v33, 0.0 }
  0x7a   : > { %v348_v50 = vadd.f32 %v347_v44, %v346_v45  ;;  %v315_v45 = vmul.f32 %v1085_v4, %v1085_v4  ;;  %v369_v51 = vsel %vm180_vm0, %v314_v13, 0.0 }
  0x7c   : > { %v350_v54 = vadd.f32 %v349_v48, %v348_v50  ;;  %v316_v50 = vmul.f32 %v1092_v8, %v1092_v8  ;;  %v371_v56 = vsel %vm180_vm0, %v315_v45, 0.0 }
  0x7e   : > { %v352_v59 = vadd.f32 %v351_v53, %v350_v54  ;;  %v317_v54 = vmul.f32 %v1099_v12, %v1099_v12  ;;  %v373_v60 = vsel %vm180_vm0, %v316_v50, 0.0 }
  0x80   : > { %v354_v63 = vadd.f32 %v353_v57, %v352_v59  ;;  %v318_v59 = vmul.f32 %v1106_v17, %v1106_v17  ;;  %v375_v5 = vsel %vm180_vm0, %v317_v54, 0.0 }
  0x82   : > { %v356_v0 = vadd.f32 %v355_v62, %v354_v63  ;;  %v319_v63 = vmul.f32 %v1113_v21, %v1113_v21 }
  0x84   : > { %v358_v3 = vadd.f32 %v357_v6, %v356_v0  ;;  %v377_v0 = vsel %vm180_vm0, %v318_v59, 0.0 }
  0x86   : > { %v360_v32 = vadd.f32 %v359_v1, %v358_v3  ;;  %v321_v1 = vmul.f32 %v1127_v30, %v1127_v30  ;;  %v379_v3 = vsel %vm180_vm0, %v319_v63, 0.0 }
  0x88   : > { %v362_v38 = vadd.f32 %v361_v29, %v360_v32  ;;  %v383_v29 = vsel %vm180_vm0, %v321_v1, 0.0 }
  0x8a   : > { %v364_v44 = vadd.f32 %v363_v36, %v362_v38 }
  0x8c   : > { %v366_v48 = vadd.f32 %v365_v39, %v364_v44 }
  0x8e   : > { %v368_v53 = vadd.f32 %v367_v47, %v366_v48 }
  0x90   : > { %v370_v57 = vadd.f32 %v369_v51, %v368_v53 }
  0x92   : > { %v372_v62 = vadd.f32 %v371_v56, %v370_v57 }
  0x94   : > { %v374_v6 = vadd.f32 %v373_v60, %v372_v62 }
  0x96   : > { %v376_v24 = vadd.f32 %v375_v5, %v374_v6 }
  0x98   : > { %v378_v27 = vadd.f32 %v377_v0, %v376_v24 }
  0x9a   : > { %v380_v11 = vadd.f32 %v379_v3, %v378_v27 }
  0x9c   : > { %v382_v32 = vadd.f32 %v381_v41, %v380_v11 }
  0x9e   : > { %v384_v33 = vadd.f32 %v383_v29, %v382_v32 }
  0xa0   : > { %v385_v36 = vrot.slane %v384_v33, 4 }
  0xa2   : > { %v386_v38 = vadd.f32 %v385_v36, %v384_v33 }
  0xa4   : > { %v387_v13 = vrot.slane %v386_v38, 2 }
  0xa6   : > { %v388_v39 = vadd.f32 %v387_v13, %v386_v38 }
  0xa8   : > { %v389_v44 = vrot.slane %v388_v39, 1 }
  0xaa   : > { %v390_v45 = vadd.f32 %v389_v44, %v388_v39 }
  0xac   : > { %v391_v47 = vmul.f32 %v390_v45, %v911_v9 }
  0xae   : > { %v392_v48 = vadd.f32 1e-05, %v391_v47 }
  0xb0   : > { %686 = vrsqrt.f32 %v392_v48  ;;  %vm399_vm2 = vweird.f32 %v392_v48 }
  0xb6   : > { %v687_v50 = vpop.eup %686 }
  0xb7   : > { %v394_v51 = vmul.f32 %v687_v50, %v392_v48  ;;  %vm400_vm3 = vweird.f32 %v687_v50 }
  0xb8   : > { %vm401_vm4 = vmor %vm399_vm2, %vm400_vm3 }
  0xb9   : > { %v395_v53 = vmul.f32 %v687_v50, %v394_v51 }
  0xbb   : > { %v396_v54 = vmul.f32 0.5, %v395_v53 }
  0xbd   : > { %v397_v56 = vsub.f32 1.5, %v396_v54 }
  0xbf   : > { %v398_v57 = vmul.f32 %v687_v50, %v397_v56 }
  0xc1   : > { %v1141_v59 = vsel %vm401_vm4, %v687_v50, %v398_v57 }
  0xc2   : > { %v403_v60 = vmul.f32 %v1141_v59, %v918_v14  ;;  %v404_v9 = vmul.f32 %v1141_v59, %v922_v15  ;;  %v405_v62 = vmul.f32 %v1141_v59, %v926_v18  ;;  %v406_v63 = vmul.f32 %v1141_v59, %v930_v20 }
  0xc3   : > { %v407_v5 = vmul.f32 %v1141_v59, %v934_v23  ;;  %v408_v6 = vmul.f32 %v1141_v59, %v944_v2  ;;  %v409_v35 = vmul.f32 %v1141_v59, %v950_v7  ;;  %v410_v14 = vmul.f32 %v1141_v59, %v959_v10 }
  0xc4   : > { %vm435_vm5 = vcmp.ge.f32.partialorder %v403_v60, 0.0  ;;  %v467_v15 = vmul.f32 0.2, %v403_v60  ;;  %vm436_vm6 = vcmp.ge.f32.partialorder %v404_v9, 0.0  ;;  %v468_v18 = vmul.f32 0.2, %v404_v9 }
  0xc5   : > { %vm437_vm7 = vcmp.ge.f32.partialorder %v405_v62, 0.0  ;;  %v469_v20 = vmul.f32 0.2, %v405_v62  ;;  %vm438_vm8 = vcmp.ge.f32.partialorder %v406_v63, 0.0  ;;  %v470_v23 = vmul.f32 0.2, %v406_v63 }
  0xc6   : > { %v499_v2 = vsel %vm435_vm5, %v403_v60, %v467_v15  ;;  %v500_v7 = vsel %vm436_vm6, %v404_v9, %v468_v18  ;;  %vm439_vm9 = vcmp.ge.f32.partialorder %v407_v5, 0.0  ;;  %v471_v10 = vmul.f32 0.2, %v407_v5 }
  0xc7   : > { %531 = vst.msk [vmem:[%s1164_s16] sm:$0xff] %vm180_vm0, %v499_v2  ;;  %v501_v0 = vsel %vm437_vm7, %v405_v62, %v469_v20  ;;  %v502_v24 = vsel %vm438_vm8, %v406_v63, %v470_v23  ;;  %vm440_vm10 = vcmp.ge.f32.partialorder %v408_v6, 0.0  ;;  %v472_v1 = vmul.f32 0.2, %v408_v6 }
  0xc8   : > { %532 = vst.msk [vmem:[%s1164_s16 + $0x8] sm:$0xff] %vm180_vm0, %v500_v7  ;;  %v503_v3 = vsel %vm439_vm9, %v407_v5, %v471_v10  ;;  %vm441_vm11 = vcmp.ge.f32.partialorder %v409_v35, 0.0  ;;  %v473_v27 = vmul.f32 0.2, %v409_v35  ;;  %vm442_vm12 = vcmp.ge.f32.partialorder %v410_v14, 0.0 }
  0xc9   : > { %533 = vst.msk [vmem:[%s1164_s16 + $0x10] sm:$0xff] %vm180_vm0, %v501_v0  ;;  %v504_v41 = vsel %vm440_vm10, %v408_v6, %v472_v1  ;;  %v474_v11 = vmul.f32 0.2, %v410_v14  ;;  %v411_v29 = vmul.f32 %v1141_v59, %v966_v42  ;;  %v412_v32 = vmul.f32 %v1141_v59, %v973_v16 }
  0xca   : > { %534 = vst.msk [vmem:[%s1164_s16 + $0x18] sm:$0xff] %vm180_vm0, %v502_v24  ;;  %v505_v33 = vsel %vm441_vm11, %v409_v35, %v473_v27  ;;  %v413_v36 = vmul.f32 %v1141_v59, %v980_v19  ;;  %v414_v38 = vmul.f32 %v1141_v59, %v987_v22  ;;  %v415_v13 = vmul.f32 %v1141_v59, %v994_v25 }
  0xcb   : > { %535 = vst.msk [vmem:[%s1164_s16 + $0x20] sm:$0xff] %vm180_vm0, %v503_v3  ;;  %v506_v42 = vsel %vm442_vm12, %v410_v14, %v474_v11  ;;  %vm443_vm13 = vcmp.ge.f32.partialorder %v411_v29, 0.0  ;;  %v475_v39 = vmul.f32 0.2, %v411_v29  ;;  %vm444_vm14 = vcmp.ge.f32.partialorder %v412_v32, 0.0 }
  0xcc   : > { %536 = vst.msk [vmem:[%s1164_s16 + $0x28] sm:$0xff] %vm180_vm0, %v504_v41  ;;  %v476_v16 = vmul.f32 0.2, %v412_v32  ;;  %vm445_vm15 = vcmp.ge.f32.partialorder %v413_v36, 0.0  ;;  %v477_v44 = vmul.f32 0.2, %v413_v36  ;;  %v416_v19 = vmul.f32 %v1141_v59, %v1001_v28 }
  0xcd   : > { %537 = vst.msk [vmem:[%s1164_s16 + $0x30] sm:$0xff] %vm180_vm0, %v505_v33  ;;  %v507_v22 = vsel %vm443_vm13, %v411_v29, %v475_v39  ;;  %vm446_vm1 = vcmp.ge.f32.partialorder %v414_v38, 0.0  ;;  %v478_v25 = vmul.f32 0.2, %v414_v38  ;;  %vm447_vm2 = vcmp.ge.f32.partialorder %v415_v13, 0.0 }
  0xce   : > { %538 = vst.msk [vmem:[%s1164_s16 + $0x38] sm:$0xff] %vm180_vm0, %v506_v42  ;;  %v508_v45 = vsel %vm444_vm14, %v412_v32, %v476_v16  ;;  %v509_v47 = vsel %vm445_vm15, %v413_v36, %v477_v44  ;;  %v479_v48 = vmul.f32 0.2, %v415_v13  ;;  %vm448_vm3 = vcmp.ge.f32.partialorder %v416_v19, 0.0 }
  0xcf   : > { %539 = vst.msk [vmem:[%s1164_s16 + $0x40] sm:$0xff] %vm180_vm0, %v507_v22  ;;  %v510_v50 = vsel %vm446_vm1, %v414_v38, %v478_v25  ;;  %v480_v51 = vmul.f32 0.2, %v416_v19  ;;  %v417_v28 = vmul.f32 %v1141_v59, %v1008_v31  ;;  %v418_v53 = vmul.f32 %v1141_v59, %v1015_v34 }
  0xd0   : > { %540 = vst.msk [vmem:[%s1164_s16 + $0x48] sm:$0xff] %vm180_vm0, %v508_v45  ;;  %v511_v54 = vsel %vm447_vm2, %v415_v13, %v479_v48  ;;  %v419_v56 = vmul.f32 %v1141_v59, %v1022_v37  ;;  %v420_v57 = vmul.f32 %v1141_v59, %v1029_v40  ;;  %v421_v60 = vmul.f32 %v1141_v59, %v1036_v43 }
  0xd1   : > { %541 = vst.msk [vmem:[%s1164_s16 + $0x50] sm:$0xff] %vm180_vm0, %v509_v47  ;;  %v512_v31 = vsel %vm448_vm3, %v416_v19, %v480_v51  ;;  %vm449_vm4 = vcmp.ge.f32.partialorder %v417_v28, 0.0  ;;  %v481_v9 = vmul.f32 0.2, %v417_v28  ;;  %vm450_vm5 = vcmp.ge.f32.partialorder %v418_v53, 0.0 }
  0xd2   : > { %542 = vst.msk [vmem:[%s1164_s16 + $0x58] sm:$0xff] %vm180_vm0, %v510_v50  ;;  %v482_v34 = vmul.f32 0.2, %v418_v53  ;;  %vm451_vm6 = vcmp.ge.f32.partialorder %v419_v56, 0.0  ;;  %v483_v62 = vmul.f32 0.2, %v419_v56  ;;  %v422_v37 = vmul.f32 %v1141_v59, %v1043_v46 }
  0xd3   : > { %543 = vst.msk [vmem:[%s1164_s16 + $0x60] sm:$0xff] %vm180_vm0, %v511_v54  ;;  %v513_v40 = vsel %vm449_vm4, %v417_v28, %v481_v9  ;;  %vm452_vm7 = vcmp.ge.f32.partialorder %v420_v57, 0.0  ;;  %v484_v43 = vmul.f32 0.2, %v420_v57  ;;  %vm453_vm8 = vcmp.ge.f32.partialorder %v421_v60, 0.0 }
  0xd4   : > { %544 = vst.msk [vmem:[%s1164_s16 + $0x68] sm:$0xff] %vm180_vm0, %v512_v31  ;;  %v514_v63 = vsel %vm450_vm5, %v418_v53, %v482_v34  ;;  %v515_v5 = vsel %vm451_vm6, %v419_v56, %v483_v62  ;;  %v485_v6 = vmul.f32 0.2, %v421_v60  ;;  %vm454_vm9 = vcmp.ge.f32.partialorder %v422_v37, 0.0 }
  0xd5   : > { %545 = vst.msk [vmem:[%s1164_s16 + $0x70] sm:$0xff] %vm180_vm0, %v513_v40  ;;  %v516_v35 = vsel %vm452_vm7, %v420_v57, %v484_v43  ;;  %v486_v14 = vmul.f32 0.2, %v422_v37  ;;  %v423_v46 = vmul.f32 %v1141_v59, %v1050_v49  ;;  %v424_v15 = vmul.f32 %v1141_v59, %v1057_v52 }
  0xd6   : > { %546 = vst.msk [vmem:[%s1164_s16 + $0x78] sm:$0xff] %vm180_vm0, %v514_v63  ;;  %v517_v18 = vsel %vm453_vm8, %v421_v60, %v485_v6  ;;  %v425_v20 = vmul.f32 %v1141_v59, %v1064_v55  ;;  %v426_v23 = vmul.f32 %v1141_v59, %v1071_v58  ;;  %v427_v2 = vmul.f32 %v1141_v59, %v1078_v61 }
  0xd7   : > { %547 = vst.msk [vmem:[%s1164_s16 + $0x80] sm:$0xff] %vm180_vm0, %v515_v5  ;;  %v518_v49 = vsel %vm454_vm9, %v422_v37, %v486_v14  ;;  %vm455_vm10 = vcmp.ge.f32.partialorder %v423_v46, 0.0  ;;  %v487_v7 = vmul.f32 0.2, %v423_v46  ;;  %vm456_vm11 = vcmp.ge.f32.partialorder %v424_v15, 0.0 }
  0xd8   : > { %548 = vst.msk [vmem:[%s1164_s16 + $0x88] sm:$0xff] %vm180_vm0, %v516_v35  ;;  %v488_v52 = vmul.f32 0.2, %v424_v15  ;;  %vm457_vm12 = vcmp.ge.f32.partialorder %v425_v20, 0.0  ;;  %v489_v10 = vmul.f32 0.2, %v425_v20  ;;  %v428_v55 = vmul.f32 %v1141_v59, %v1085_v4 }
  0xd9   : > { %549 = vst.msk [vmem:[%s1164_s16 + $0x90] sm:$0xff] %vm180_vm0, %v517_v18  ;;  %v519_v58 = vsel %vm455_vm10, %v423_v46, %v487_v7  ;;  %vm458_vm13 = vcmp.ge.f32.partialorder %v426_v23, 0.0  ;;  %v490_v61 = vmul.f32 0.2, %v426_v23  ;;  %vm459_vm14 = vcmp.ge.f32.partialorder %v427_v2, 0.0 }
  0xda   : > { %550 = vst.msk [vmem:[%s1164_s16 + $0x98] sm:$0xff] %vm180_vm0, %v518_v49  ;;  %v520_v0 = vsel %vm456_vm11, %v424_v15, %v488_v52  ;;  %v521_v24 = vsel %vm457_vm12, %v425_v20, %v489_v10  ;;  %v491_v1 = vmul.f32 0.2, %v427_v2  ;;  %vm460_vm15 = vcmp.ge.f32.partialorder %v428_v55, 0.0 }
  0xdb   : > { %551 = vst.msk [vmem:[%s1164_s16 + $0xa0] sm:$0xff] %vm180_vm0, %v519_v58  ;;  %v522_v3 = vsel %vm458_vm13, %v426_v23, %v490_v61  ;;  %v492_v27 = vmul.f32 0.2, %v428_v55  ;;  %v429_v4 = vmul.f32 %v1141_v59, %v1092_v8  ;;  %v430_v41 = vmul.f32 %v1141_v59, %v1099_v12 }
  0xdc   : > { %552 = vst.msk [vmem:[%s1164_s16 + $0xa8] sm:$0xff] %vm180_vm0, %v520_v0  ;;  %v523_v11 = vsel %vm459_vm14, %v427_v2, %v491_v1  ;;  %v431_v29 = vmul.f32 %v1141_v59, %v1106_v17  ;;  %v432_v32 = vmul.f32 %v1141_v59, %v1113_v21  ;;  %v433_v33 = vmul.f32 %v1141_v59, %v1120_v26 }
  0xdd   : > { %553 = vst.msk [vmem:[%s1164_s16 + $0xb0] sm:$0xff] %vm180_vm0, %v521_v24  ;;  %v524_v8 = vsel %vm460_vm15, %v428_v55, %v492_v27  ;;  %vm461_vm1 = vcmp.ge.f32.partialorder %v429_v4, 0.0  ;;  %v493_v36 = vmul.f32 0.2, %v429_v4  ;;  %vm462_vm2 = vcmp.ge.f32.partialorder %v430_v41, 0.0 }
  0xde   : > { %554 = vst.msk [vmem:[%s1164_s16 + $0xb8] sm:$0xff] %vm180_vm0, %v522_v3  ;;  %v494_v12 = vmul.f32 0.2, %v430_v41  ;;  %vm463_vm3 = vcmp.ge.f32.partialorder %v431_v29, 0.0  ;;  %v495_v17 = vmul.f32 0.2, %v431_v29  ;;  %v434_v21 = vmul.f32 %v1141_v59, %v1127_v30 }
  0xdf   : > { %555 = vst.msk [vmem:[%s1164_s16 + $0xc0] sm:$0xff] %vm180_vm0, %v523_v11  ;;  %v525_v26 = vsel %vm461_vm1, %v429_v4, %v493_v36  ;;  %vm464_vm4 = vcmp.ge.f32.partialorder %v432_v32, 0.0  ;;  %v496_v38 = vmul.f32 0.2, %v432_v32  ;;  %vm465_vm5 = vcmp.ge.f32.partialorder %v433_v33, 0.0 }
  0xe0   : > { %556 = vst.msk [vmem:[%s1164_s16 + $0xc8] sm:$0xff] %vm180_vm0, %v524_v8  ;;  %v526_v13 = vsel %vm462_vm2, %v430_v41, %v494_v12  ;;  %v527_v42 = vsel %vm463_vm3, %v431_v29, %v495_v17  ;;  %v497_v39 = vmul.f32 0.2, %v433_v33  ;;  %vm466_vm6 = vcmp.ge.f32.partialorder %v434_v21, 0.0 }
  0xe1   : > { %557 = vst.msk [vmem:[%s1164_s16 + $0xd0] sm:$0xff] %vm180_vm0, %v525_v26  ;;  %v528_v16 = vsel %vm464_vm4, %v432_v32, %v496_v38  ;;  %v498_v30 = vmul.f32 0.2, %v434_v21 }
  0xe2   : > { %558 = vst.msk [vmem:[%s1164_s16 + $0xd8] sm:$0xff] %vm180_vm0, %v526_v13  ;;  %v529_v59 = vsel %vm465_vm5, %v433_v33, %v497_v39 }
  0xe3   : > { %559 = vst.msk [vmem:[%s1164_s16 + $0xe0] sm:$0xff] %vm180_vm0, %v527_v42  ;;  %v530_v44 = vsel %vm466_vm6, %v434_v21, %v498_v30 }
  0xe4   : > { %560 = vst.msk [vmem:[%s1164_s16 + $0xe8] sm:$0xff] %vm180_vm0, %v528_v16 }
  0xe5   : > { %561 = vst.msk [vmem:[%s1164_s16 + $0xf0] sm:$0xff] %vm180_vm0, %v529_v59 }
  0xe6   : > { %562 = vst.msk [vmem:[%s1164_s16 + $0xf8] sm:$0xff] %vm180_vm0, %v530_v44 }
  0xe7 PF: > { %s11_s8 = sadd.s32 1, %s710_s8   ;;  %s1289_s6 = smov %s706_s7 }
  0xe8   : > { %p8_p5 = scmp.ge.s32.totalorder %s11_s8, 4   ;;  %s1290_s7 = smov %s1292_s9 }
  0xea   :  { %10 = sbr.rel (!%p8_p5) target bundleno = 2 (0x2), region = 54 }

// kernel: generator_forward.53
= control target key start
LH: loop header
LB: loop body
LE: loop exit
PB: predicated region body
PF: predicated region fallthrough
CT: control target
= control target key end

     0   :  { %s1454_s12 = smov 0   ;;  %s1456_s13 = smov 0   ;;  %s1682_s0 = inlined_call_operand.vmem [shape: bf16[512,256], index: 0, kind: input, shape index: {}]   ;;  %s1683_s1 = inlined_call_operand.vmem [shape: bf16[256,128], index: 1, kind: input, shape index: {}]   ;;  %s1684_s2 = inlined_call_operand.vmem [shape: f32[1,128], index: 2, kind: input, shape index: {}]   ;;  %s1685_s3 = inlined_call_operand.vmem [shape: f32[512,128], index: 3, kind: output, shape index: {}]  }
   0x1   :  { %s1458_s14 = smov 0  }
   0x2 LB: > { %s32_s15 = sadd.s32 1, %s1428_s13  ;;  %p1120_p0 = scmp.ge.s32.totalorder %s1432_s14, 1  ;;  %s1432_s14 = sphi %s1458_s14, %s13_s14   ;;  %s1428_s13 = sphi %s1456_s13, %s1687_s13   ;;  %s1424_s12 = sphi %s1454_s12, %s1686_s12  }
   0x3   : > { %p34_p1 = scmp.ge.s32.totalorder %s32_s15, 2  ;;  %p191_p2 = scmp.lt.s32.totalorder %s1432_s14, 3 }
   0x5   : > { %s1689_s15 = smov (%p34_p1, %s32_s15), 0  ;;  %p192_p3 = pnand %p1120_p0, %p191_p2 }
   0x6   : > { %s1121_s28 = sshll.u32 (!%p192_p3), %s1424_s12, 5 }
   0x7   : > { %195 = sbr.rel (%p192_p3) target bundleno = 302 (0x12e), region = 32  ;;  %p236_p4 = scmp.lt.s32.totalorder (!%p192_p3), %s1121_s28, 63 }
   0xc   : > { %v1360_v0 = vld [vmem:[%s1683_s1 + $0x38] sm:$0xff]  ;;  %v1359_v2 = vld [vmem:[%s1683_s1 + $0x30] sm:$0xff]  ;;  %v1358_v4 = vld [vmem:[%s1683_s1 + $0x28] sm:$0xff]  ;;  %s1691_s28 = smov (!%p236_p4, %s1121_s28), 63 }
   0xd   : > { %v1368_v1 = vld [vmem:[%s1683_s1 + $0x78] sm:$0xff]  ;;  %655 = vmatpush.bf16.msra.mxu0 %v1360_v0  ;;  %1369 = vmatpush.bf16.msra.mxu2 %v1360_v0  ;;  %v1367_v3 = vld [vmem:[%s1683_s1 + $0x70] sm:$0xff]  ;;  %v1366_v5 = vld [vmem:[%s1683_s1 + $0x68] sm:$0xff]  ;;  %s1320_s17 = sshll.u32 %s1691_s28, 3 }
   0xe   : > { %744 = vmatpush.bf16.msra.mxu1 %v1368_v1  ;;  %1377 = vmatpush.bf16.msra.mxu3 %v1368_v1  ;;  %v1357_v6 = vld [vmem:[%s1683_s1 + $0x20] sm:$0xff]  ;;  %v1356_v8 = vld [vmem:[%s1683_s1 + $0x18] sm:$0xff]  ;;  %v1355_v10 = vld [vmem:[%s1683_s1 + $0x10] sm:$0xff]  ;;  %s1522_s22 = scalar_lea.vmem %s1682_s0, %s1320_s17  ;;  %s1607_s7 = scalar_lea.vmem %s1685_s3, %s1320_s17 }
   0xf   : > { %v1365_v7 = vld [vmem:[%s1683_s1 + $0x60] sm:$0xff]  ;;  %v1364_v9 = vld [vmem:[%s1683_s1 + $0x58] sm:$0xff]  ;;  %v1363_v11 = vld [vmem:[%s1683_s1 + $0x50] sm:$0xff] }
  0x10   : > { %v1354_v12 = vld [vmem:[%s1683_s1 + $0x8] sm:$0xff]  ;;  %v1353_v14 = vld [vmem:[%s1683_s1] sm:$0xff]  ;;  %v1136_v28 = vld [vmem:[%s1522_s22 + $0x10] sm:$0xf] }
  0x11   : > { %656 = vmatpush.bf16.msra.mxu0 %v1359_v2  ;;  %1370 = vmatpush.bf16.msra.mxu2 %v1359_v2  ;;  %v1362_v13 = vld [vmem:[%s1683_s1 + $0x48] sm:$0xff]  ;;  %v1361_v15 = vld [vmem:[%s1683_s1 + $0x40] sm:$0xff]  ;;  %v1324_v29 = vld [vmem:[%s1522_s22 + $0x14] sm:$0xf0] }
  0x12   : > { %745 = vmatpush.bf16.msra.mxu1 %v1367_v3  ;;  %1378 = vmatpush.bf16.msra.mxu3 %v1367_v3  ;;  %v1128_v16 = vld [vmem:[%s1522_s22] sm:$0xf]  ;;  %v1322_v17 = vld [vmem:[%s1522_s22 + $0x4] sm:$0xf0]  ;;  %v1321_v20 = vld [vmem:[%s1522_s22 + $0x4] sm:$0xf]  ;;  %v1137_v36 = vor.u32 %v1324_v29, %v1136_v28 }
  0x13   : > { %v1192_v18 = vld [vmem:[%s1522_s22 + $0x80] sm:$0xf]  ;;  %v1338_v19 = vld [vmem:[%s1522_s22 + $0x84] sm:$0xf0]  ;;  %v1130_v21 = vld [vmem:[%s1522_s22 + $0x8] sm:$0xf0]  ;;  %v1129_v24 = vor.u32 %v1322_v17, %v1128_v16 }
  0x14   : > { %v1337_v22 = vld [vmem:[%s1522_s22 + $0x84] sm:$0xf]  ;;  %v1194_v23 = vld [vmem:[%s1522_s22 + $0x88] sm:$0xf0]  ;;  %v1193_v25 = vor.u32 %v1338_v19, %v1192_v18  ;;  %v1133_v26 = vor.u32 %v1321_v20, %v1130_v21  ;;  %v1200_v30 = vld [vmem:[%s1522_s22 + $0x90] sm:$0xf] }
  0x15   : > { %657 = vmatpush.bf16.msra.mxu0 %v1358_v4  ;;  %1371 = vmatpush.bf16.msra.mxu2 %v1358_v4  ;;  %v1197_v27 = vor.u32 %v1337_v22, %v1194_v23  ;;  %v1340_v31 = vld [vmem:[%s1522_s22 + $0x94] sm:$0xf0]  ;;  %v1323_v32 = vld [vmem:[%s1522_s22 + $0x14] sm:$0xf]  ;;  %v1138_v33 = vld [vmem:[%s1522_s22 + $0x18] sm:$0xf0] }
  0x16   : > { %746 = vmatpush.bf16.msra.mxu1 %v1366_v5  ;;  %1379 = vmatpush.bf16.msra.mxu3 %v1366_v5  ;;  %v1339_v34 = vld [vmem:[%s1522_s22 + $0x94] sm:$0xf]  ;;  %v1202_v35 = vld [vmem:[%s1522_s22 + $0x98] sm:$0xf0]  ;;  %v1201_v37 = vor.u32 %v1340_v31, %v1200_v30  ;;  %v1141_v38 = vor.u32 %v1323_v32, %v1138_v33  ;;  %v1144_v40 = vld [vmem:[%s1522_s22 + $0x20] sm:$0xf] }
  0x17   : > { %v1205_v39 = vor.u32 %v1339_v34, %v1202_v35  ;;  %v1326_v41 = vld [vmem:[%s1522_s22 + $0x24] sm:$0xf0]  ;;  %v1208_v42 = vld [vmem:[%s1522_s22 + $0xa0] sm:$0xf]  ;;  %v1325_v44 = vld [vmem:[%s1522_s22 + $0x24] sm:$0xf] }
  0x18   : > { %v1342_v43 = vld [vmem:[%s1522_s22 + $0xa4] sm:$0xf0]  ;;  %v1146_v45 = vld [vmem:[%s1522_s22 + $0x28] sm:$0xf0]  ;;  %v1341_v46 = vld [vmem:[%s1522_s22 + $0xa4] sm:$0xf]  ;;  %v1145_v48 = vor.u32 %v1326_v41, %v1144_v40 }
  0x19   : > { %658 = vmatpush.bf16.msra.mxu0 %v1357_v6  ;;  %1372 = vmatpush.bf16.msra.mxu2 %v1357_v6  ;;  %v1210_v47 = vld [vmem:[%s1522_s22 + $0xa8] sm:$0xf0]  ;;  %v1209_v49 = vor.u32 %v1342_v43, %v1208_v42  ;;  %v1149_v50 = vor.u32 %v1325_v44, %v1146_v45  ;;  %v1152_v52 = vld [vmem:[%s1522_s22 + $0x30] sm:$0xf]  ;;  %v1328_v53 = vld [vmem:[%s1522_s22 + $0x34] sm:$0xf0] }
  0x1a   : > { %747 = vmatpush.bf16.msra.mxu1 %v1365_v7  ;;  %1380 = vmatpush.bf16.msra.mxu3 %v1365_v7  ;;  %v1213_v51 = vor.u32 %v1341_v46, %v1210_v47  ;;  %v1216_v54 = vld [vmem:[%s1522_s22 + $0xb0] sm:$0xf]  ;;  %v1344_v55 = vld [vmem:[%s1522_s22 + $0xb4] sm:$0xf0]  ;;  %v1327_v56 = vld [vmem:[%s1522_s22 + $0x34] sm:$0xf]  ;;  %v1153_v60 = vor.u32 %v1328_v53, %v1152_v52 }
  0x1b   : > { %v1154_v57 = vld [vmem:[%s1522_s22 + $0x38] sm:$0xf0]  ;;  %v1343_v58 = vld [vmem:[%s1522_s22 + $0xb4] sm:$0xf]  ;;  %v1217_v61 = vor.u32 %v1344_v55, %v1216_v54  ;;  %v1160_v0 = vld [vmem:[%s1522_s22 + $0x40] sm:$0xf] }
  0x1c   : > { %v1218_v59 = vld [vmem:[%s1522_s22 + $0xb8] sm:$0xf0]  ;;  %v1157_v62 = vor.u32 %v1327_v56, %v1154_v57  ;;  %v1330_v1 = vld [vmem:[%s1522_s22 + $0x44] sm:$0xf0]  ;;  %v1224_v2 = vld [vmem:[%s1522_s22 + $0xc0] sm:$0xf] }
  0x1d   : > { %659 = vmatpush.bf16.msra.mxu0 %v1356_v8  ;;  %1373 = vmatpush.bf16.msra.mxu2 %v1356_v8  ;;  %v1221_v63 = vor.u32 %v1343_v58, %v1218_v59  ;;  %v1346_v3 = vld [vmem:[%s1522_s22 + $0xc4] sm:$0xf0]  ;;  %v1329_v4 = vld [vmem:[%s1522_s22 + $0x44] sm:$0xf]  ;;  %v1162_v5 = vld [vmem:[%s1522_s22 + $0x48] sm:$0xf0]  ;;  %v1161_v8 = vor.u32 %v1330_v1, %v1160_v0 }
  0x1e   : > { %748 = vmatpush.bf16.msra.mxu1 %v1364_v9  ;;  %1381 = vmatpush.bf16.msra.mxu3 %v1364_v9  ;;  %v1345_v6 = vld [vmem:[%s1522_s22 + $0xc4] sm:$0xf]  ;;  %v1226_v7 = vld [vmem:[%s1522_s22 + $0xc8] sm:$0xf0]  ;;  %v1225_v9 = vor.u32 %v1346_v3, %v1224_v2  ;;  %v1331_v16 = vld [vmem:[%s1522_s22 + $0x54] sm:$0xf] }
  0x1f   : > { %v1170_v17 = vld [vmem:[%s1522_s22 + $0x58] sm:$0xf0]  ;;  %v1347_v18 = vld [vmem:[%s1522_s22 + $0xd4] sm:$0xf]  ;;  %v1333_v28 = vld [vmem:[%s1522_s22 + $0x64] sm:$0xf] }
  0x20   : > { %v1234_v19 = vld [vmem:[%s1522_s22 + $0xd8] sm:$0xf0]  ;;  %v1173_v22 = vor.u32 %v1331_v16, %v1170_v17  ;;  %v1178_v29 = vld [vmem:[%s1522_s22 + $0x68] sm:$0xf0]  ;;  %v1349_v30 = vld [vmem:[%s1522_s22 + $0xe4] sm:$0xf] }
  0x21   : > { %660 = vmatpush.bf16.msra.mxu0 %v1355_v10  ;;  %1374 = vmatpush.bf16.msra.mxu2 %v1355_v10  ;;  %v1165_v10 = vor.u32 %v1329_v4, %v1162_v5  ;;  %v1237_v23 = vor.u32 %v1347_v18, %v1234_v19  ;;  %v1242_v31 = vld [vmem:[%s1522_s22 + $0xe8] sm:$0xf0]  ;;  %v1181_v34 = vor.u32 %v1333_v28, %v1178_v29  ;;  %v1335_v40 = vld [vmem:[%s1522_s22 + $0x74] sm:$0xf]  ;;  %v1186_v41 = vld [vmem:[%s1522_s22 + $0x78] sm:$0xf0] }
  0x22   : > { %749 = vmatpush.bf16.msra.mxu1 %v1363_v11  ;;  %1382 = vmatpush.bf16.msra.mxu3 %v1363_v11  ;;  %v1229_v11 = vor.u32 %v1345_v6, %v1226_v7  ;;  %v1245_v35 = vor.u32 %v1349_v30, %v1242_v31  ;;  %v1351_v42 = vld [vmem:[%s1522_s22 + $0xf4] sm:$0xf]  ;;  %v1250_v43 = vld [vmem:[%s1522_s22 + $0xf8] sm:$0xf0]  ;;  %v1189_v46 = vor.u32 %v1335_v40, %v1186_v41 }
  0x23   : > { %v1253_v47 = vor.u32 %v1351_v42, %v1250_v43 }
  0x25   : > { %661 = vmatpush.bf16.msra.mxu0 %v1354_v12  ;;  %1375 = vmatpush.bf16.msra.mxu2 %v1354_v12  ;;  %v1168_v12 = vld [vmem:[%s1522_s22 + $0x50] sm:$0xf] }
  0x26   : > { %750 = vmatpush.bf16.msra.mxu1 %v1362_v13  ;;  %1383 = vmatpush.bf16.msra.mxu3 %v1362_v13  ;;  %v1332_v13 = vld [vmem:[%s1522_s22 + $0x54] sm:$0xf0] }
  0x27   : > { %v1169_v20 = vor.u32 %v1332_v13, %v1168_v12 }
  0x29   : > { %662 = vmatpush.bf16.msra.mxu0 %v1353_v14  ;;  %1376 = vmatpush.bf16.msra.mxu2 %v1353_v14  ;;  %v1232_v14 = vld [vmem:[%s1522_s22 + $0xd0] sm:$0xf] }
  0x2a   : > { %751 = vmatpush.bf16.msra.mxu1 %v1361_v15  ;;  %1384 = vmatpush.bf16.msra.mxu3 %v1361_v15  ;;  %v1348_v15 = vld [vmem:[%s1522_s22 + $0xd4] sm:$0xf0] }
  0x2b   : > { %v1233_v21 = vor.u32 %v1348_v15, %v1232_v14 }
  0x2c   : > { %663 = vmatmul.bf16.vlgmr.msra.gmra.mxu0 %v1129_v24  ;;  %703 = vmatmul.bf16.vlgmr.msra.gmra.mxu2 %v1193_v25  ;;  %v1176_v24 = vld [vmem:[%s1522_s22 + $0x60] sm:$0xf]  ;;  %v1334_v25 = vld [vmem:[%s1522_s22 + $0x64] sm:$0xf0] }
  0x2d   : > { %752 = vmatmul.bf16.vlgmr.msra.gmra.mxu1 %v1133_v26  ;;  %792 = vmatmul.bf16.vlgmr.msra.gmra.mxu3 %v1197_v27  ;;  %v1240_v26 = vld [vmem:[%s1522_s22 + $0xe0] sm:$0xf]  ;;  %v1350_v27 = vld [vmem:[%s1522_s22 + $0xe4] sm:$0xf0]  ;;  %v1177_v32 = vor.u32 %v1334_v25, %v1176_v24 }
  0x2e   : > { %v1241_v33 = vor.u32 %v1350_v27, %v1240_v26 }
  0x3c   : > { %668 = vmatmul.bf16.gmra.mxu0 %v1137_v36  ;;  %708 = vmatmul.bf16.gmra.mxu2 %v1201_v37  ;;  %v1184_v36 = vld [vmem:[%s1522_s22 + $0x70] sm:$0xf]  ;;  %v1336_v37 = vld [vmem:[%s1522_s22 + $0x74] sm:$0xf0] }
  0x3d   : > { %757 = vmatmul.bf16.gmra.mxu1 %v1141_v38  ;;  %797 = vmatmul.bf16.gmra.mxu3 %v1205_v39  ;;  %v1248_v38 = vld [vmem:[%s1522_s22 + $0xf0] sm:$0xf]  ;;  %v1352_v39 = vld [vmem:[%s1522_s22 + $0xf4] sm:$0xf0]  ;;  %v1185_v44 = vor.u32 %v1336_v37, %v1184_v36 }
  0x3e   : > { %v1249_v45 = vor.u32 %v1352_v39, %v1248_v38 }
  0x4c   : > { %673 = vmatmul.bf16.gmra.mxu0 %v1145_v48  ;;  %713 = vmatmul.bf16.gmra.mxu2 %v1209_v49  ;;  %v1600_v49 = vld [vmem:[%s1684_s2] ss:$0 sm:$0xff] }
  0x4d   : > { %762 = vmatmul.bf16.gmra.mxu1 %v1149_v50  ;;  %802 = vmatmul.bf16.gmra.mxu3 %v1213_v51 }
  0x5c   : > { %678 = vmatmul.bf16.gmra.mxu0 %v1153_v60  ;;  %718 = vmatmul.bf16.gmra.mxu2 %v1217_v61 }
  0x5d   : > { %767 = vmatmul.bf16.gmra.mxu1 %v1157_v62  ;;  %807 = vmatmul.bf16.gmra.mxu3 %v1221_v63 }
  0x6c   : > { %683 = vmatmul.bf16.gmra.mxu0 %v1161_v8  ;;  %723 = vmatmul.bf16.gmra.mxu2 %v1225_v9 }
  0x6d   : > { %772 = vmatmul.bf16.gmra.mxu1 %v1165_v10  ;;  %812 = vmatmul.bf16.gmra.mxu3 %v1229_v11 }
  0x7c   : > { %688 = vmatmul.bf16.gmra.mxu0 %v1169_v20  ;;  %728 = vmatmul.bf16.gmra.mxu2 %v1233_v21 }
  0x7d   : > { %777 = vmatmul.bf16.gmra.mxu1 %v1173_v22  ;;  %817 = vmatmul.bf16.gmra.mxu3 %v1237_v23 }
  0x8c   : > { %693 = vmatmul.bf16.gmra.mxu0 %v1177_v32  ;;  %733 = vmatmul.bf16.gmra.mxu2 %v1241_v33 }
  0x8d   : > { %782 = vmatmul.bf16.gmra.mxu1 %v1181_v34  ;;  %822 = vmatmul.bf16.gmra.mxu3 %v1245_v35 }
  0x9c   : > { %698 = vmatmul.bf16.gmra.mxu0 %v1185_v44  ;;  %738 = vmatmul.bf16.gmra.mxu2 %v1249_v45 }
  0x9d   : > { %787 = vmatmul.bf16.gmra.mxu1 %v1189_v46  ;;  %827 = vmatmul.bf16.gmra.mxu3 %v1253_v47 }
  0xa9   : > { %v664_v48 = vpop.f32.mrf.mxu0 }
  0xaa   : > { %v753_v50 = vpop.f32.mrf.mxu1 }
  0xab   : > { %v754_v51 = vadd.f32 %v753_v50, %v664_v48 }
  0xad   : > { %v936_v52 = vadd.f32 %v1600_v49, %v754_v51 }
  0xaf   : > { %968 = vst [vmem:[%s1607_s7] sm:$0xff] %v936_v52  ;;  %v704_v53 = vpop.f32.mrf.mxu2 }
  0xb0   : > { %v793_v54 = vpop.f32.mrf.mxu3 }
  0xb1   : > { %v794_v55 = vadd.f32 %v793_v54, %v704_v53  ;;  %v666_v56 = vpop.f32.mrf.mxu0 }
  0xb2   : > { %v755_v57 = vpop.f32.mrf.mxu1 }
  0xb3   : > { %v952_v58 = vadd.f32 %v1600_v49, %v794_v55  ;;  %v756_v59 = vadd.f32 %v755_v57, %v666_v56 }
  0xb5   : > { %984 = vst [vmem:[%s1607_s7 + $0x80] sm:$0xff] %v952_v58  ;;  %v937_v60 = vadd.f32 %v1600_v49, %v756_v59 }
  0xb7   : > { %969 = vst [vmem:[%s1607_s7 + $0x8] sm:$0xff] %v937_v60  ;;  %v706_v61 = vpop.f32.mrf.mxu2 }
  0xb8   : > { %v795_v62 = vpop.f32.mrf.mxu3 }
  0xb9   : > { %v796_v63 = vadd.f32 %v795_v62, %v706_v61  ;;  %v669_v0 = vpop.f32.mrf.mxu0 }
  0xba   : > { %v758_v1 = vpop.f32.mrf.mxu1 }
  0xbb   : > { %v953_v2 = vadd.f32 %v1600_v49, %v796_v63  ;;  %v759_v3 = vadd.f32 %v758_v1, %v669_v0 }
  0xbd   : > { %985 = vst [vmem:[%s1607_s7 + $0x88] sm:$0xff] %v953_v2  ;;  %v938_v4 = vadd.f32 %v1600_v49, %v759_v3 }
  0xbf   : > { %970 = vst [vmem:[%s1607_s7 + $0x10] sm:$0xff] %v938_v4  ;;  %v709_v5 = vpop.f32.mrf.mxu2 }
  0xc0   : > { %v798_v6 = vpop.f32.mrf.mxu3 }
  0xc1   : > { %v799_v7 = vadd.f32 %v798_v6, %v709_v5  ;;  %v671_v8 = vpop.f32.mrf.mxu0 }
  0xc2   : > { %v760_v9 = vpop.f32.mrf.mxu1 }
  0xc3   : > { %v954_v10 = vadd.f32 %v1600_v49, %v799_v7  ;;  %v761_v11 = vadd.f32 %v760_v9, %v671_v8 }
  0xc5   : > { %986 = vst [vmem:[%s1607_s7 + $0x90] sm:$0xff] %v954_v10  ;;  %v939_v12 = vadd.f32 %v1600_v49, %v761_v11 }
  0xc7   : > { %971 = vst [vmem:[%s1607_s7 + $0x18] sm:$0xff] %v939_v12  ;;  %v711_v13 = vpop.f32.mrf.mxu2 }
  0xc8   : > { %v800_v14 = vpop.f32.mrf.mxu3 }
  0xc9   : > { %v801_v15 = vadd.f32 %v800_v14, %v711_v13  ;;  %v674_v16 = vpop.f32.mrf.mxu0 }
  0xca   : > { %v763_v17 = vpop.f32.mrf.mxu1 }
  0xcb   : > { %v955_v18 = vadd.f32 %v1600_v49, %v801_v15  ;;  %v764_v19 = vadd.f32 %v763_v17, %v674_v16 }
  0xcd   : > { %987 = vst [vmem:[%s1607_s7 + $0x98] sm:$0xff] %v955_v18  ;;  %v940_v20 = vadd.f32 %v1600_v49, %v764_v19 }
  0xcf   : > { %972 = vst [vmem:[%s1607_s7 + $0x20] sm:$0xff] %v940_v20  ;;  %v714_v21 = vpop.f32.mrf.mxu2 }
  0xd0   : > { %v803_v22 = vpop.f32.mrf.mxu3 }
  0xd1   : > { %v804_v23 = vadd.f32 %v803_v22, %v714_v21  ;;  %v676_v24 = vpop.f32.mrf.mxu0 }
  0xd2   : > { %v765_v25 = vpop.f32.mrf.mxu1 }
  0xd3   : > { %v956_v26 = vadd.f32 %v1600_v49, %v804_v23  ;;  %v766_v27 = vadd.f32 %v765_v25, %v676_v24 }
  0xd5   : > { %988 = vst [vmem:[%s1607_s7 + $0xa0] sm:$0xff] %v956_v26  ;;  %v941_v28 = vadd.f32 %v1600_v49, %v766_v27 }
  0xd7   : > { %973 = vst [vmem:[%s1607_s7 + $0x28] sm:$0xff] %v941_v28  ;;  %v716_v29 = vpop.f32.mrf.mxu2 }
  0xd8   : > { %v805_v30 = vpop.f32.mrf.mxu3 }
  0xd9   : > { %v806_v31 = vadd.f32 %v805_v30, %v716_v29  ;;  %v679_v32 = vpop.f32.mrf.mxu0 }
  0xda   : > { %v768_v33 = vpop.f32.mrf.mxu1 }
  0xdb   : > { %v957_v34 = vadd.f32 %v1600_v49, %v806_v31  ;;  %v769_v35 = vadd.f32 %v768_v33, %v679_v32 }
  0xdd   : > { %989 = vst [vmem:[%s1607_s7 + $0xa8] sm:$0xff] %v957_v34  ;;  %v942_v36 = vadd.f32 %v1600_v49, %v769_v35 }
  0xdf   : > { %974 = vst [vmem:[%s1607_s7 + $0x30] sm:$0xff] %v942_v36  ;;  %v719_v37 = vpop.f32.mrf.mxu2 }
  0xe0   : > { %v808_v38 = vpop.f32.mrf.mxu3 }
  0xe1   : > { %v809_v39 = vadd.f32 %v808_v38, %v719_v37  ;;  %v681_v40 = vpop.f32.mrf.mxu0 }
  0xe2   : > { %v770_v41 = vpop.f32.mrf.mxu1 }
  0xe3   : > { %v958_v42 = vadd.f32 %v1600_v49, %v809_v39  ;;  %v771_v43 = vadd.f32 %v770_v41, %v681_v40 }
  0xe5   : > { %990 = vst [vmem:[%s1607_s7 + $0xb0] sm:$0xff] %v958_v42  ;;  %v943_v44 = vadd.f32 %v1600_v49, %v771_v43 }
  0xe7   : > { %975 = vst [vmem:[%s1607_s7 + $0x38] sm:$0xff] %v943_v44  ;;  %v721_v45 = vpop.f32.mrf.mxu2 }
  0xe8   : > { %v810_v46 = vpop.f32.mrf.mxu3 }
  0xe9   : > { %v811_v47 = vadd.f32 %v810_v46, %v721_v45  ;;  %v684_v48 = vpop.f32.mrf.mxu0 }
  0xea   : > { %v773_v50 = vpop.f32.mrf.mxu1 }
  0xeb   : > { %v959_v51 = vadd.f32 %v1600_v49, %v811_v47  ;;  %v774_v52 = vadd.f32 %v773_v50, %v684_v48 }
  0xed   : > { %991 = vst [vmem:[%s1607_s7 + $0xb8] sm:$0xff] %v959_v51  ;;  %v944_v53 = vadd.f32 %v1600_v49, %v774_v52 }
  0xef   : > { %976 = vst [vmem:[%s1607_s7 + $0x40] sm:$0xff] %v944_v53  ;;  %v724_v54 = vpop.f32.mrf.mxu2 }
  0xf0   : > { %v813_v55 = vpop.f32.mrf.mxu3 }
  0xf1   : > { %v814_v56 = vadd.f32 %v813_v55, %v724_v54  ;;  %v686_v57 = vpop.f32.mrf.mxu0 }
  0xf2   : > { %v775_v58 = vpop.f32.mrf.mxu1 }
  0xf3   : > { %v960_v59 = vadd.f32 %v1600_v49, %v814_v56  ;;  %v776_v60 = vadd.f32 %v775_v58, %v686_v57 }
  0xf5   : > { %992 = vst [vmem:[%s1607_s7 + $0xc0] sm:$0xff] %v960_v59  ;;  %v945_v61 = vadd.f32 %v1600_v49, %v776_v60 }
  0xf7   : > { %977 = vst [vmem:[%s1607_s7 + $0x48] sm:$0xff] %v945_v61  ;;  %v726_v62 = vpop.f32.mrf.mxu2 }
  0xf8   : > { %v815_v63 = vpop.f32.mrf.mxu3 }
  0xf9   : > { %v816_v0 = vadd.f32 %v815_v63, %v726_v62  ;;  %v689_v1 = vpop.f32.mrf.mxu0 }
  0xfa   : > { %v778_v2 = vpop.f32.mrf.mxu1 }
  0xfb   : > { %v961_v3 = vadd.f32 %v1600_v49, %v816_v0  ;;  %v779_v4 = vadd.f32 %v778_v2, %v689_v1 }
  0xfd   : > { %993 = vst [vmem:[%s1607_s7 + $0xc8] sm:$0xff] %v961_v3  ;;  %v946_v5 = vadd.f32 %v1600_v49, %v779_v4 }
  0xff   : > { %978 = vst [vmem:[%s1607_s7 + $0x50] sm:$0xff] %v946_v5  ;;  %v729_v6 = vpop.f32.mrf.mxu2 }
 0x100   : > { %v818_v7 = vpop.f32.mrf.mxu3 }
 0x101   : > { %v819_v8 = vadd.f32 %v818_v7, %v729_v6  ;;  %v691_v9 = vpop.f32.mrf.mxu0 }
 0x102   : > { %v780_v10 = vpop.f32.mrf.mxu1 }
 0x103   : > { %v962_v11 = vadd.f32 %v1600_v49, %v819_v8  ;;  %v781_v12 = vadd.f32 %v780_v10, %v691_v9 }
 0x105   : > { %994 = vst [vmem:[%s1607_s7 + $0xd0] sm:$0xff] %v962_v11  ;;  %v947_v13 = vadd.f32 %v1600_v49, %v781_v12 }
 0x107   : > { %979 = vst [vmem:[%s1607_s7 + $0x58] sm:$0xff] %v947_v13  ;;  %v731_v14 = vpop.f32.mrf.mxu2 }
 0x108   : > { %v820_v15 = vpop.f32.mrf.mxu3 }
 0x109   : > { %v821_v16 = vadd.f32 %v820_v15, %v731_v14  ;;  %v694_v17 = vpop.f32.mrf.mxu0 }
 0x10a   : > { %v783_v18 = vpop.f32.mrf.mxu1 }
 0x10b   : > { %v963_v19 = vadd.f32 %v1600_v49, %v821_v16  ;;  %v784_v20 = vadd.f32 %v783_v18, %v694_v17 }
 0x10d   : > { %995 = vst [vmem:[%s1607_s7 + $0xd8] sm:$0xff] %v963_v19  ;;  %v948_v21 = vadd.f32 %v1600_v49, %v784_v20 }
 0x10f   : > { %980 = vst [vmem:[%s1607_s7 + $0x60] sm:$0xff] %v948_v21  ;;  %v734_v22 = vpop.f32.mrf.mxu2 }
 0x110   : > { %v823_v23 = vpop.f32.mrf.mxu3 }
 0x111   : > { %v824_v24 = vadd.f32 %v823_v23, %v734_v22  ;;  %v696_v25 = vpop.f32.mrf.mxu0 }
 0x112   : > { %v785_v26 = vpop.f32.mrf.mxu1 }
 0x113   : > { %v964_v27 = vadd.f32 %v1600_v49, %v824_v24  ;;  %v786_v28 = vadd.f32 %v785_v26, %v696_v25 }
 0x115   : > { %996 = vst [vmem:[%s1607_s7 + $0xe0] sm:$0xff] %v964_v27  ;;  %v949_v29 = vadd.f32 %v1600_v49, %v786_v28 }
 0x117   : > { %981 = vst [vmem:[%s1607_s7 + $0x68] sm:$0xff] %v949_v29  ;;  %v736_v30 = vpop.f32.mrf.mxu2 }
 0x118   : > { %v825_v31 = vpop.f32.mrf.mxu3 }
 0x119   : > { %v826_v32 = vadd.f32 %v825_v31, %v736_v30  ;;  %v699_v33 = vpop.f32.mrf.mxu0 }
 0x11a   : > { %v788_v34 = vpop.f32.mrf.mxu1 }
 0x11b   : > { %v965_v35 = vadd.f32 %v1600_v49, %v826_v32  ;;  %v789_v36 = vadd.f32 %v788_v34, %v699_v33 }
 0x11d   : > { %997 = vst [vmem:[%s1607_s7 + $0xe8] sm:$0xff] %v965_v35  ;;  %v950_v37 = vadd.f32 %v1600_v49, %v789_v36 }
 0x11f   : > { %982 = vst [vmem:[%s1607_s7 + $0x70] sm:$0xff] %v950_v37  ;;  %v739_v38 = vpop.f32.mrf.mxu2 }
 0x120   : > { %v828_v39 = vpop.f32.mrf.mxu3 }
 0x121   : > { %v829_v40 = vadd.f32 %v828_v39, %v739_v38  ;;  %v701_v41 = vpop.f32.mrf.mxu0 }
 0x122   : > { %v790_v42 = vpop.f32.mrf.mxu1 }
 0x123   : > { %v966_v43 = vadd.f32 %v1600_v49, %v829_v40  ;;  %v791_v44 = vadd.f32 %v790_v42, %v701_v41 }
 0x125   : > { %998 = vst [vmem:[%s1607_s7 + $0xf0] sm:$0xff] %v966_v43  ;;  %v951_v45 = vadd.f32 %v1600_v49, %v791_v44 }
 0x127   : > { %983 = vst [vmem:[%s1607_s7 + $0x78] sm:$0xff] %v951_v45  ;;  %v741_v46 = vpop.f32.mrf.mxu2 }
 0x128   : > { %v830_v47 = vpop.f32.mrf.mxu3 }
 0x129   : > { %v831_v48 = vadd.f32 %v830_v47, %v741_v46 }
 0x12b   : > { %v967_v50 = vadd.f32 %v1600_v49, %v831_v48 }
 0x12d   : > { %999 = vst [vmem:[%s1607_s7 + $0xf8] sm:$0xff] %v967_v50 }
 0x12e PF: > { %s13_s14 = sadd.s32 1, %s1432_s14   ;;  %s1686_s12 = smov %s1428_s13 }
 0x12f   : > { %p10_p5 = scmp.ge.s32.totalorder %s13_s14, 4   ;;  %s1687_s13 = smov %s1689_s15 }
 0x131   :  { %12 = sbr.rel (!%p10_p5) target bundleno = 2 (0x2), region = 76 }

// kernel: generator_forward.55
= control target key start
LH: loop header
LB: loop body
LE: loop exit
PB: predicated region body
PF: predicated region fallthrough
CT: control target
= control target key end

     0   :  { %s989_s12 = smov 0   ;;  %s991_s13 = smov 0   ;;  %s1145_s0 = inlined_call_operand.vmem [shape: bf16[128,640], index: 0, kind: input, shape index: {}]   ;;  %s1146_s1 = inlined_call_operand.vmem [shape: bf16[640,128], index: 1, kind: input, shape index: {}]   ;;  %s1147_s2 = inlined_call_operand.vmem [shape: f32[1,128], index: 2, kind: input, shape index: {}]   ;;  %s1148_s3 = inlined_call_operand.vmem [shape: f32[128,128], index: 3, kind: output, shape index: {}]  }
   0x1   :  { %s993_s14 = smov 0   ;;  %s995_s15 = smov 0  }
   0x2   :  { %s997_s16 = smov 0  }
   0x3 LB: > { %s25_s17 = sadd.s32 1, %s962_s15  ;;  %p48_p1 = scmp.ne.s32.totalorder %s954_s13, %s950_s12  ;;  %s966_s16 = sphi %s997_s16, %s13_s16   ;;  %s962_s15 = sphi %s995_s15, %s1152_s15   ;;  %s958_s14 = sphi %s993_s14, %s1151_s14   ;;  %s954_s13 = sphi %s991_s13, %s1150_s13   ;;  %s950_s12 = sphi %s989_s12, %s1149_s12  }
   0x4   : > { %p26_p0 = scmp.ge.s32.totalorder %s25_s17, 5  ;;  %p49_p2 = scmp.eq.s32.totalorder %s966_s16, 0 }
   0x5   : > { %s41_s19 = sadd.s32 1, %s954_s13  ;;  %p769_p5 = scmp.ge.s32.totalorder %s966_s16, 5 }
   0x6   : > { %s1154_s17 = smov (%p26_p0, %s25_s17), 0  ;;  %p50_p3 = por %p49_p2, %p48_p1 }
   0x7   : > { %s37_s18 = ssub.s32 %s962_s15, %s1154_s17  ;;  %162 = sbr.rel (%p769_p5) target bundleno = 32 (0x20), region = 20 }
   0x8   : > { %p39_p4 = scmp.eq.s32.totalorder %s37_s18, 0 }
   0xa   : > { %s1024_s20 = scalar_select %p39_p4, %s954_s13, %s41_s19  }
   0xc   : > { %165 = sbr.rel (!%p50_p3) target bundleno = 32 (0x20), region = 24  ;;  %s167_s21 = sand.u32 (%p50_p3), 1, %s954_s13  }
   0xd   : > { %s771_s22 = sshll.u32 (%p50_p3), %s962_s15, 2  ;;  %s770_s23 = sshll.u32 (%p50_p3), %s167_s21, 6 }
   0xe   : > { %s1032_s26 = scalar_lea.vmem (%p50_p3), %s1145_s0, %s771_s22  ;;  %s169_s27 = scalar_lea.vmem (%p50_p3), [#allocation3], %s770_s23 }
   0xf   : > { %v191_v0 = vld [vmem:[%s1032_s26] sm:$0xf] (%p50_p3)  ;;  %v193_v1 = vld [vmem:[%s1032_s26 + $0x14] sm:$0xf] (%p50_p3)  ;;  %v195_v2 = vld [vmem:[%s1032_s26 + $0x28] sm:$0xf] (%p50_p3) }
  0x10   : > { %192 = vst [vmem:[%s169_s27] sm:$0xf] (%p50_p3), %v191_v0  ;;  %v197_v3 = vld [vmem:[%s1032_s26 + $0x3c] sm:$0xf] (%p50_p3)  ;;  %v199_v4 = vld [vmem:[%s1032_s26 + $0x50] sm:$0xf] (%p50_p3) }
  0x11   : > { %194 = vst [vmem:[%s169_s27 + $0x4] sm:$0xf] %v193_v1  ;;  %v201_v5 = vld [vmem:[%s1032_s26 + $0x64] sm:$0xf]  ;;  %v203_v6 = vld [vmem:[%s1032_s26 + $0x78] sm:$0xf] }
  0x12   : > { %196 = vst [vmem:[%s169_s27 + $0x8] sm:$0xf] %v195_v2  ;;  %v205_v7 = vld [vmem:[%s1032_s26 + $0x8c] sm:$0xf]  ;;  %v207_v8 = vld [vmem:[%s1032_s26 + $0xa0] sm:$0xf] }
  0x13   : > { %198 = vst [vmem:[%s169_s27 + $0xc] sm:$0xf] %v197_v3  ;;  %v209_v9 = vld [vmem:[%s1032_s26 + $0xb4] sm:$0xf]  ;;  %v211_v10 = vld [vmem:[%s1032_s26 + $0xc8] sm:$0xf] }
  0x14   : > { %200 = vst [vmem:[%s169_s27 + $0x10] sm:$0xf] %v199_v4  ;;  %v213_v11 = vld [vmem:[%s1032_s26 + $0xdc] sm:$0xf]  ;;  %v215_v12 = vld [vmem:[%s1032_s26 + $0xf0] sm:$0xf] }
  0x15   : > { %202 = vst [vmem:[%s169_s27 + $0x14] sm:$0xf] %v201_v5  ;;  %v217_v13 = vld [vmem:[%s1032_s26 + $0x104] sm:$0xf]  ;;  %v219_v14 = vld [vmem:[%s1032_s26 + $0x118] sm:$0xf] }
  0x16   : > { %204 = vst [vmem:[%s169_s27 + $0x18] sm:$0xf] %v203_v6  ;;  %v221_v15 = vld [vmem:[%s1032_s26 + $0x12c] sm:$0xf] }
  0x17   : > { %206 = vst [vmem:[%s169_s27 + $0x1c] sm:$0xf] %v205_v7 }
  0x18   : > { %208 = vst [vmem:[%s169_s27 + $0x20] sm:$0xf] %v207_v8 }
  0x19   : > { %210 = vst [vmem:[%s169_s27 + $0x24] sm:$0xf] %v209_v9 }
  0x1a   : > { %212 = vst [vmem:[%s169_s27 + $0x28] sm:$0xf] %v211_v10 }
  0x1b   : > { %214 = vst [vmem:[%s169_s27 + $0x2c] sm:$0xf] %v213_v11 }
  0x1c   : > { %216 = vst [vmem:[%s169_s27 + $0x30] sm:$0xf] %v215_v12 }
  0x1d   : > { %218 = vst [vmem:[%s169_s27 + $0x34] sm:$0xf] %v217_v13 }
  0x1e   : > { %220 = vst [vmem:[%s169_s27 + $0x38] sm:$0xf] %v219_v14 }
  0x1f   : > { %222 = vst [vmem:[%s169_s27 + $0x3c] sm:$0xf] %v221_v15 }
  0x20 PF: > { %p772_p6 = scmp.ge.s32.totalorder %s966_s16, 1  ;;  %p289_p7 = scmp.lt.s32.totalorder %s966_s16, 6 }
  0x22   : > { %p290_p8 = pnand %p772_p6, %p289_p7 }
  0x23   : > { %s296_s28 = sand.u32 (!%p290_p8), 1, %s950_s12   ;;  %s774_s29 = sshll.u32 (!%p290_p8), %s958_s14, 4 }
  0x24   : > { %293 = sbr.rel (%p290_p8) target bundleno = 275 (0x113), region = 69  ;;  %s773_s30 = sshll.u32 (!%p290_p8), %s296_s28, 6 }
  0x25   : > { %p335_p9 = scmp.lt.s32.totalorder (!%p290_p8), %s774_s29, 79  ;;  %s1059_s8 = scalar_lea.vmem (!%p290_p8), [#allocation3], %s773_s30 }
  0x26   : > { %p776_p10 = scmp.ne.s32.totalorder (!%p290_p8), %s958_s14, 0 }
  0x29   : > { %s1156_s29 = smov (!%p335_p9, %s774_s29), 79  ;;  %358 = sbr.rel (%p776_p10) target bundleno = 63 (0x3f), region = 77 }
  0x2a   : > { %s775_s4 = sshll.u32 %s1156_s29, 2 }
  0x2b   : > { %s1057_s7 = scalar_lea.vmem %s1146_s1, %s775_s4 }
  0x2e   : > { %v968_v16 = vmov 0.0  }
  0x2f   : > { %359 = vst [vmem:[#allocation2 + $0x30] sm:$0xff] %v968_v16 }
  0x30   : > { %360 = vst [vmem:[#allocation2] sm:$0xff] %v968_v16 }
  0x31   : > { %361 = vst [vmem:[#allocation2 + $0x58] sm:$0xff] %v968_v16 }
  0x32   : > { %362 = vst [vmem:[#allocation2 + $0x18] sm:$0xff] %v968_v16 }
  0x33   : > { %363 = vst [vmem:[#allocation2 + $0x50] sm:$0xff] %v968_v16 }
  0x34   : > { %364 = vst [vmem:[#allocation2 + $0x68] sm:$0xff] %v968_v16 }
  0x35   : > { %365 = vst [vmem:[#allocation2 + $0x8] sm:$0xff] %v968_v16 }
  0x36   : > { %366 = vst [vmem:[#allocation2 + $0x48] sm:$0xff] %v968_v16 }
  0x37   : > { %367 = vst [vmem:[#allocation2 + $0x40] sm:$0xff] %v968_v16 }
  0x38   : > { %368 = vst [vmem:[#allocation2 + $0x20] sm:$0xff] %v968_v16 }
  0x39   : > { %369 = vst [vmem:[#allocation2 + $0x10] sm:$0xff] %v968_v16 }
  0x3a   : > { %370 = vst [vmem:[#allocation2 + $0x38] sm:$0xff] %v968_v16 }
  0x3b   : > { %371 = vst [vmem:[#allocation2 + $0x60] sm:$0xff] %v968_v16 }
  0x3c   : > { %372 = vst [vmem:[#allocation2 + $0x70] sm:$0xff] %v968_v16 }
  0x3d   : > { %373 = vst [vmem:[#allocation2 + $0x78] sm:$0xff] %v968_v16 }
  0x3e   : > { %374 = vst [vmem:[#allocation2 + $0x28] sm:$0xff] %v968_v16 }
  0x3f PF: > { %v861_v17 = vld [vmem:[%s1057_s7 + $0x38] sm:$0xff]  ;;  %v860_v18 = vld [vmem:[%s1057_s7 + $0x30] sm:$0xff]  ;;  %v859_v19 = vld [vmem:[%s1057_s7 + $0x28] sm:$0xff]  ;;  %p841_p11 = scmp.ne.s32.totalorder %s958_s14, 4 }
  0x40   : > { %519 = vmatpush.bf16.msra.mxu0 %v861_v17  ;;  %862 = vmatpush.bf16.msra.mxu1 %v861_v17  ;;  %v858_v20 = vld [vmem:[%s1057_s7 + $0x20] sm:$0xff]  ;;  %v857_v21 = vld [vmem:[%s1057_s7 + $0x18] sm:$0xff]  ;;  %v856_v22 = vld [vmem:[%s1057_s7 + $0x10] sm:$0xff] }
  0x41   : > { %863 = vmatpush.bf16.msra.mxu2 %v861_v17  ;;  %864 = vmatpush.bf16.msra.mxu3 %v861_v17  ;;  %v855_v23 = vld [vmem:[%s1057_s7 + $0x8] sm:$0xff]  ;;  %v854_v24 = vld [vmem:[%s1057_s7] sm:$0xff]  ;;  %v848_v26 = vld [vmem:[%s1059_s8 + $0x10] sm:$0xff] }
  0x42   : > { %v846_v25 = vld [vmem:[%s1059_s8] sm:$0xff]  ;;  %v852_v28 = vld [vmem:[%s1059_s8 + $0x30] sm:$0xff]  ;;  %v847_v29 = vld [vmem:[%s1059_s8 + $0x8] sm:$0xff] }
  0x43   : > { %v850_v27 = vld [vmem:[%s1059_s8 + $0x20] sm:$0xff]  ;;  %v849_v30 = vld [vmem:[%s1059_s8 + $0x18] sm:$0xff]  ;;  %v851_v31 = vld [vmem:[%s1059_s8 + $0x28] sm:$0xff] }
  0x44   : > { %520 = vmatpush.bf16.msra.mxu0 %v860_v18  ;;  %865 = vmatpush.bf16.msra.mxu1 %v860_v18  ;;  %v853_v32 = vld [vmem:[%s1059_s8 + $0x38] sm:$0xff]  ;;  %v375_v33 = vld [vmem:[#allocation2 + $0x30] sm:$0xff]  ;;  %v383_v39 = vld [vmem:[#allocation2 + $0x40] sm:$0xff] }
  0x45   : > { %866 = vmatpush.bf16.msra.mxu2 %v860_v18  ;;  %867 = vmatpush.bf16.msra.mxu3 %v860_v18  ;;  %v379_v34 = vld [vmem:[#allocation2 + $0x50] sm:$0xff]  ;;  %v387_v40 = vld [vmem:[#allocation2 + $0x60] sm:$0xff]  ;;  %v380_v42 = vld [vmem:[#allocation2 + $0x68] sm:$0xff] }
  0x46   : > { %v376_v41 = vld [vmem:[#allocation2] sm:$0xff]  ;;  %v388_v52 = vld [vmem:[#allocation2 + $0x70] sm:$0xff]  ;;  %v377_v53 = vld [vmem:[#allocation2 + $0x58] sm:$0xff] }
  0x47   : > { %v384_v51 = vld [vmem:[#allocation2 + $0x20] sm:$0xff]  ;;  %v381_v54 = vld [vmem:[#allocation2 + $0x8] sm:$0xff]  ;;  %v385_v63 = vld [vmem:[#allocation2 + $0x10] sm:$0xff] }
  0x48   : > { %521 = vmatpush.bf16.msra.mxu0 %v859_v19  ;;  %868 = vmatpush.bf16.msra.mxu1 %v859_v19  ;;  %v389_v0 = vld [vmem:[#allocation2 + $0x78] sm:$0xff]  ;;  %v382_v2 = vld [vmem:[#allocation2 + $0x48] sm:$0xff] }
  0x49   : > { %869 = vmatpush.bf16.msra.mxu2 %v859_v19  ;;  %870 = vmatpush.bf16.msra.mxu3 %v859_v19  ;;  %v378_v1 = vld [vmem:[#allocation2 + $0x18] sm:$0xff]  ;;  %v390_v12 = vld [vmem:[#allocation2 + $0x28] sm:$0xff] }
  0x4a   : > { %v386_v11 = vld [vmem:[#allocation2 + $0x38] sm:$0xff] }
  0x4c   : > { %522 = vmatpush.bf16.msra.mxu0 %v858_v20  ;;  %871 = vmatpush.bf16.msra.mxu1 %v858_v20 }
  0x4d   : > { %872 = vmatpush.bf16.msra.mxu2 %v858_v20  ;;  %873 = vmatpush.bf16.msra.mxu3 %v858_v20 }
  0x50   : > { %523 = vmatpush.bf16.msra.mxu0 %v857_v21  ;;  %874 = vmatpush.bf16.msra.mxu1 %v857_v21 }
  0x51   : > { %875 = vmatpush.bf16.msra.mxu2 %v857_v21  ;;  %876 = vmatpush.bf16.msra.mxu3 %v857_v21 }
  0x54   : > { %524 = vmatpush.bf16.msra.mxu0 %v856_v22  ;;  %877 = vmatpush.bf16.msra.mxu1 %v856_v22 }
  0x55   : > { %878 = vmatpush.bf16.msra.mxu2 %v856_v22  ;;  %879 = vmatpush.bf16.msra.mxu3 %v856_v22 }
  0x58   : > { %525 = vmatpush.bf16.msra.mxu0 %v855_v23  ;;  %880 = vmatpush.bf16.msra.mxu1 %v855_v23 }
  0x59   : > { %881 = vmatpush.bf16.msra.mxu2 %v855_v23  ;;  %882 = vmatpush.bf16.msra.mxu3 %v855_v23 }
  0x5c   : > { %526 = vmatpush.bf16.msra.mxu0 %v854_v24  ;;  %883 = vmatpush.bf16.msra.mxu1 %v854_v24 }
  0x5d   : > { %884 = vmatpush.bf16.msra.mxu2 %v854_v24  ;;  %885 = vmatpush.bf16.msra.mxu3 %v854_v24 }
  0x5f   : > { %527 = vmatmul.bf16.vlgmr.msra.gmra.mxu0 %v846_v25  ;;  %537 = vmatmul.bf16.vlgmr.msra.gmra.mxu1 %v848_v26 }
  0x60   : > { %547 = vmatmul.bf16.vlgmr.msra.gmra.mxu2 %v850_v27  ;;  %557 = vmatmul.bf16.vlgmr.msra.gmra.mxu3 %v852_v28 }
  0x6f   : > { %532 = vmatmul.bf16.gmra.mxu0 %v847_v29  ;;  %542 = vmatmul.bf16.gmra.mxu1 %v849_v30 }
  0x70   : > { %552 = vmatmul.bf16.gmra.mxu2 %v851_v31  ;;  %562 = vmatmul.bf16.gmra.mxu3 %v853_v32 }
  0xdc   : > { %v528_v35 = vpop.f32.mrf.mxu0  ;;  %v538_v36 = vpop.f32.mrf.mxu1 }
  0xdd   : > { %v568_v37 = vadd.f32 %v528_v35, %v375_v33  ;;  %v572_v38 = vadd.f32 %v538_v36, %v379_v34 }
  0xdf   : > { %584 = vst [vmem:[#allocation2 + $0x30] sm:$0xff] %v568_v37 }
  0xe0   : > { %588 = vst [vmem:[#allocation2 + $0x50] sm:$0xff] %v572_v38 }
  0xe3   : > { %v548_v43 = vpop.f32.mrf.mxu2  ;;  %v558_v44 = vpop.f32.mrf.mxu3 }
  0xe4   : > { %v576_v45 = vadd.f32 %v548_v43, %v383_v39  ;;  %v580_v46 = vadd.f32 %v558_v44, %v387_v40  ;;  %v530_v47 = vpop.f32.mrf.mxu0  ;;  %v540_v48 = vpop.f32.mrf.mxu1 }
  0xe5   : > { %v569_v49 = vadd.f32 %v530_v47, %v376_v41  ;;  %v573_v50 = vadd.f32 %v540_v48, %v380_v42 }
  0xe6   : > { %592 = vst [vmem:[#allocation2 + $0x40] sm:$0xff] %v576_v45 }
  0xe7   : > { %596 = vst [vmem:[#allocation2 + $0x60] sm:$0xff] %v580_v46 }
  0xe8   : > { %585 = vst [vmem:[#allocation2] sm:$0xff] %v569_v49 }
  0xe9   : > { %589 = vst [vmem:[#allocation2 + $0x68] sm:$0xff] %v573_v50 }
  0xeb   : > { %v550_v55 = vpop.f32.mrf.mxu2  ;;  %v560_v56 = vpop.f32.mrf.mxu3 }
  0xec   : > { %v577_v57 = vadd.f32 %v550_v55, %v384_v51  ;;  %v581_v58 = vadd.f32 %v560_v56, %v388_v52  ;;  %v533_v59 = vpop.f32.mrf.mxu0  ;;  %v543_v60 = vpop.f32.mrf.mxu1 }
  0xed   : > { %v570_v61 = vadd.f32 %v533_v59, %v377_v53  ;;  %v574_v62 = vadd.f32 %v543_v60, %v381_v54 }
  0xee   : > { %593 = vst [vmem:[#allocation2 + $0x20] sm:$0xff] %v577_v57 }
  0xef   : > { %597 = vst [vmem:[#allocation2 + $0x70] sm:$0xff] %v581_v58 }
  0xf0   : > { %586 = vst [vmem:[#allocation2 + $0x58] sm:$0xff] %v570_v61 }
  0xf1   : > { %590 = vst [vmem:[#allocation2 + $0x8] sm:$0xff] %v574_v62 }
  0xf3   : > { %v553_v3 = vpop.f32.mrf.mxu2  ;;  %v563_v4 = vpop.f32.mrf.mxu3 }
  0xf4   : > { %v578_v5 = vadd.f32 %v553_v3, %v385_v63  ;;  %v582_v6 = vadd.f32 %v563_v4, %v389_v0  ;;  %v535_v7 = vpop.f32.mrf.mxu0  ;;  %v545_v8 = vpop.f32.mrf.mxu1 }
  0xf5   : > { %v571_v9 = vadd.f32 %v535_v7, %v378_v1  ;;  %v575_v10 = vadd.f32 %v545_v8, %v382_v2 }
  0xf6   : > { %594 = vst [vmem:[#allocation2 + $0x10] sm:$0xff] %v578_v5 }
  0xf7   : > { %598 = vst [vmem:[#allocation2 + $0x78] sm:$0xff] %v582_v6 }
  0xf8   : > { %587 = vst [vmem:[#allocation2 + $0x18] sm:$0xff] %v571_v9 }
  0xf9   : > { %591 = vst [vmem:[#allocation2 + $0x48] sm:$0xff] %v575_v10 }
  0xfb   : > { %v555_v13 = vpop.f32.mrf.mxu2  ;;  %v565_v14 = vpop.f32.mrf.mxu3  ;;  %603 = sbr.rel (%p841_p11) target bundleno = 275 (0x113), region = 81 }
  0xfc   : > { %v579_v15 = vadd.f32 %v555_v13, %v386_v11  ;;  %v583_v16 = vadd.f32 %v565_v14, %v390_v12 }
  0xfe   : > { %595 = vst [vmem:[#allocation2 + $0x38] sm:$0xff] %v579_v15 }
  0xff   : > { %599 = vst [vmem:[#allocation2 + $0x28] sm:$0xff] %v583_v16 }
 0x100   : > { %v604_v17 = vld [vmem:[#allocation2 + $0x30] sm:$0xff]  ;;  %v927_v18 = vld [vmem:[%s1147_s2] ss:$0 sm:$0xff]  ;;  %v606_v20 = vld [vmem:[#allocation2 + $0x58] sm:$0xff] }
 0x101   : > { %v605_v19 = vld [vmem:[#allocation2] sm:$0xff]  ;;  %v607_v21 = vld [vmem:[#allocation2 + $0x18] sm:$0xff]  ;;  %v624_v22 = vadd.f32 %v927_v18, %v604_v17  ;;  %v626_v24 = vadd.f32 %v927_v18, %v606_v20  ;;  %v608_v25 = vld [vmem:[#allocation2 + $0x50] sm:$0xff] }
 0x102   : > { %v625_v23 = vadd.f32 %v927_v18, %v605_v19  ;;  %v609_v26 = vld [vmem:[#allocation2 + $0x68] sm:$0xff]  ;;  %v627_v27 = vadd.f32 %v927_v18, %v607_v21  ;;  %v628_v29 = vadd.f32 %v927_v18, %v608_v25  ;;  %v612_v32 = vld [vmem:[#allocation2 + $0x40] sm:$0xff]  ;;  %v614_v36 = vld [vmem:[#allocation2 + $0x10] sm:$0xff] }
 0x103   : > { %v610_v28 = vld [vmem:[#allocation2 + $0x8] sm:$0xff]  ;;  %640 = vst [vmem:[%s1148_s3] sm:$0xff] %v624_v22  ;;  %v629_v31 = vadd.f32 %v927_v18, %v609_v26  ;;  %v613_v34 = vld [vmem:[#allocation2 + $0x20] sm:$0xff]  ;;  %v632_v37 = vadd.f32 %v927_v18, %v612_v32  ;;  %v634_v41 = vadd.f32 %v927_v18, %v614_v36  ;;  %v617_v42 = vld [vmem:[#allocation2 + $0x70] sm:$0xff] }
 0x104   : > { %v611_v30 = vld [vmem:[#allocation2 + $0x48] sm:$0xff]  ;;  %641 = vst [vmem:[%s1148_s3 + $0x8] sm:$0xff] %v625_v23  ;;  %v630_v33 = vadd.f32 %v927_v18, %v610_v28  ;;  %v633_v39 = vadd.f32 %v927_v18, %v613_v34  ;;  %v616_v40 = vld [vmem:[#allocation2 + $0x60] sm:$0xff]  ;;  %v618_v44 = vld [vmem:[#allocation2 + $0x78] sm:$0xff]  ;;  %v637_v47 = vadd.f32 %v927_v18, %v617_v42 }
 0x105   : > { %642 = vst [vmem:[%s1148_s3 + $0x10] sm:$0xff] %v626_v24  ;;  %v631_v35 = vadd.f32 %v927_v18, %v611_v30  ;;  %v615_v38 = vld [vmem:[#allocation2 + $0x38] sm:$0xff]  ;;  %v636_v45 = vadd.f32 %v927_v18, %v616_v40  ;;  %v638_v48 = vadd.f32 %v927_v18, %v618_v44 }
 0x106   : > { %643 = vst [vmem:[%s1148_s3 + $0x18] sm:$0xff] %v627_v27  ;;  %v635_v43 = vadd.f32 %v927_v18, %v615_v38  ;;  %v619_v46 = vld [vmem:[#allocation2 + $0x28] sm:$0xff] }
 0x107   : > { %644 = vst [vmem:[%s1148_s3 + $0x20] sm:$0xff] %v628_v29  ;;  %v639_v49 = vadd.f32 %v927_v18, %v619_v46 }
 0x108   : > { %645 = vst [vmem:[%s1148_s3 + $0x28] sm:$0xff] %v629_v31 }
 0x109   : > { %646 = vst [vmem:[%s1148_s3 + $0x30] sm:$0xff] %v630_v33 }
 0x10a   : > { %647 = vst [vmem:[%s1148_s3 + $0x38] sm:$0xff] %v631_v35 }
 0x10b   : > { %648 = vst [vmem:[%s1148_s3 + $0x40] sm:$0xff] %v632_v37 }
 0x10c   : > { %649 = vst [vmem:[%s1148_s3 + $0x48] sm:$0xff] %v633_v39 }
 0x10d   : > { %650 = vst [vmem:[%s1148_s3 + $0x50] sm:$0xff] %v634_v41 }
 0x10e   : > { %651 = vst [vmem:[%s1148_s3 + $0x58] sm:$0xff] %v635_v43 }
 0x10f   : > { %652 = vst [vmem:[%s1148_s3 + $0x60] sm:$0xff] %v636_v45 }
 0x110   : > { %653 = vst [vmem:[%s1148_s3 + $0x68] sm:$0xff] %v637_v47 }
 0x111   : > { %654 = vst [vmem:[%s1148_s3 + $0x70] sm:$0xff] %v638_v48 }
 0x112   : > { %655 = vst [vmem:[%s1148_s3 + $0x78] sm:$0xff] %v639_v49 }
 0x113 PF: > { %s13_s16 = sadd.s32 1, %s966_s16   ;;  %s1149_s12 = smov %s954_s13 }
 0x114   : > { %p10_p12 = scmp.ge.s32.totalorder %s13_s16, 7   ;;  %s1150_s13 = smov %s1024_s20 }
 0x115   : > { %s1151_s14 = smov %s962_s15  ;;  %s1152_s15 = smov %s1154_s17 }
 0x116   :  { %12 = sbr.rel (!%p10_p12) target bundleno = 3 (0x3), region = 122 }

// kernel: generator_forward.56
= control target key start
LH: loop header
LB: loop body
LE: loop exit
PB: predicated region body
PF: predicated region fallthrough
CT: control target
= control target key end

     0   :  { %s418_s6 = smov 0   ;;  %s420_s7 = smov 0   ;;  %s468_s0 = inlined_call_operand.vmem [shape: f32[2,64,128], index: 0, kind: input, shape index: {}]   ;;  %s469_s1 = inlined_call_operand.vmem [shape: f32[2,64,128], index: 1, kind: output, shape index: {}]  }
   0x1   :  { %s422_s8 = smov 0  }
   0x2 LB: > { %s23_s9 = sadd.s32 1, %s401_s7  ;;  %p345_p0 = scmp.ge.s32.totalorder %s405_s8, 1  ;;  %s405_s8 = sphi %s422_s8, %s11_s8   ;;  %s401_s7 = sphi %s420_s7, %s471_s7   ;;  %s397_s6 = sphi %s418_s6, %s470_s6  }
   0x3   : > { %p25_p1 = scmp.ge.s32.totalorder %s23_s9, 2  ;;  %p106_p2 = scmp.lt.s32.totalorder %s405_s8, 3 }
   0x5   : > { %s473_s9 = smov (%p25_p1, %s23_s9), 0  ;;  %p107_p3 = pnand %p345_p0, %p106_p2 }
   0x6   : > { %p132_p4 = scmp.lt.s32.totalorder (!%p107_p3), %s397_s6, 1 }
   0x7   : > { %110 = sbr.rel (%p107_p3) target bundleno = 109 (0x6d), region = 24 }
   0xc   : > { %s475_s6 = smov (!%p132_p4, %s397_s6), 1  ;;  %v407_v0 = vmov 64.0  }
   0xd   : > { %s352_s10 = sshll.u32 %s475_s6, 6  ;;  %379 = vrcp.f32 %v407_v0 }
   0xe   : > { %s139_s13 = scalar_lea.vmem %s468_s0, %s352_s10  ;;  %s449_s16 = scalar_lea.vmem %s469_s1, %s352_s10 }
   0xf   : > { %v148_v1 = vld [vmem:[%s139_s13] sm:$0xff]  ;;  %v149_v2 = vld [vmem:[%s139_s13 + $0x8] sm:$0xff]  ;;  %v150_v3 = vld [vmem:[%s139_s13 + $0x10] sm:$0xff] }
  0x10   : > { %v156_v4 = vadd.f32 %v149_v2, %v148_v1  ;;  %v151_v5 = vld [vmem:[%s139_s13 + $0x18] sm:$0xff]  ;;  %v152_v7 = vld [vmem:[%s139_s13 + $0x20] sm:$0xff]  ;;  %v153_v10 = vld [vmem:[%s139_s13 + $0x28] sm:$0xff] }
  0x11   : > { %v154_v12 = vld [vmem:[%s139_s13 + $0x30] sm:$0xff]  ;;  %v155_v15 = vld [vmem:[%s139_s13 + $0x38] sm:$0xff] }
  0x12   : > { %v157_v6 = vadd.f32 %v156_v4, %v150_v3 }
  0x13   : > { %v380_v8 = vpop.eup %379 }
  0x14   : > { %v158_v9 = vadd.f32 %v157_v6, %v151_v5  ;;  %v170_v13 = vmul.f32 64.0, %v380_v8  ;;  %vm174_vm0 = vweird.f32 %v380_v8 }
  0x16   : > { %v159_v11 = vadd.f32 %v158_v9, %v152_v7  ;;  %v171_v17 = vsub.f32 1.0, %v170_v13 }
  0x18   : > { %v160_v14 = vadd.f32 %v159_v11, %v153_v10  ;;  %v172_v20 = vmul.f32 %v380_v8, %v171_v17 }
  0x1a   : > { %v161_v16 = vadd.f32 %v160_v14, %v154_v12  ;;  %v173_v23 = vadd.f32 %v380_v8, %v172_v20 }
  0x1c   : > { %v162_v18 = vadd.f32 %v161_v16, %v155_v15  ;;  %v175_v26 = vsel %vm174_vm0, %v380_v8, %v173_v23 }
  0x1e   : > { %v163_v19 = vrot.slane %v162_v18, 4 }
  0x20   : > { %v164_v21 = vadd.f32 %v163_v19, %v162_v18 }
  0x22   : > { %v165_v22 = vrot.slane %v164_v21, 2 }
  0x24   : > { %v166_v24 = vadd.f32 %v165_v22, %v164_v21 }
  0x26   : > { %v167_v25 = vrot.slane %v166_v24, 1 }
  0x28   : > { %v168_v27 = vadd.f32 %v167_v25, %v166_v24 }
  0x2a   : > { %v176_v28 = vmul.f32 %v175_v26, %v168_v27 }
  0x2c   : > { %v177_v29 = vsub.f32 %v148_v1, %v176_v28  ;;  %v178_v30 = vsub.f32 %v149_v2, %v176_v28  ;;  %v179_v31 = vsub.f32 %v150_v3, %v176_v28  ;;  %v180_v32 = vsub.f32 %v151_v5, %v176_v28 }
  0x2d   : > { %v181_v33 = vsub.f32 %v152_v7, %v176_v28  ;;  %v182_v37 = vsub.f32 %v153_v10, %v176_v28  ;;  %v183_v40 = vsub.f32 %v154_v12, %v176_v28  ;;  %v184_v43 = vsub.f32 %v155_v15, %v176_v28 }
  0x2e   : > { %v185_v34 = vmul.f32 %v177_v29, %v177_v29  ;;  %v186_v35 = vmul.f32 %v178_v30, %v178_v30  ;;  %v187_v36 = vmul.f32 %v179_v31, %v179_v31  ;;  %v188_v38 = vmul.f32 %v180_v32, %v180_v32 }
  0x2f   : > { %v189_v41 = vmul.f32 %v181_v33, %v181_v33  ;;  %v190_v44 = vmul.f32 %v182_v37, %v182_v37  ;;  %v191_v46 = vmul.f32 %v183_v40, %v183_v40  ;;  %v192_v48 = vmul.f32 %v184_v43, %v184_v43 }
  0x30   : > { %v193_v39 = vadd.f32 %v186_v35, %v185_v34 }
  0x32   : > { %v194_v42 = vadd.f32 %v193_v39, %v187_v36 }
  0x34   : > { %v195_v45 = vadd.f32 %v194_v42, %v188_v38 }
  0x36   : > { %v196_v47 = vadd.f32 %v195_v45, %v189_v41 }
  0x38   : > { %v197_v49 = vadd.f32 %v196_v47, %v190_v44 }
  0x3a   : > { %v198_v50 = vadd.f32 %v197_v49, %v191_v46 }
  0x3c   : > { %v199_v51 = vadd.f32 %v198_v50, %v192_v48 }
  0x3e   : > { %v200_v52 = vrot.slane %v199_v51, 4 }
  0x40   : > { %v201_v53 = vadd.f32 %v200_v52, %v199_v51 }
  0x42   : > { %v202_v54 = vrot.slane %v201_v53, 2 }
  0x44   : > { %v203_v55 = vadd.f32 %v202_v54, %v201_v53 }
  0x46   : > { %v204_v56 = vrot.slane %v203_v55, 1 }
  0x48   : > { %v205_v57 = vadd.f32 %v204_v56, %v203_v55 }
  0x4a   : > { %v206_v58 = vmul.f32 %v205_v57, %v175_v26 }
  0x4c   : > { %v207_v59 = vadd.f32 1e-05, %v206_v58 }
  0x4e   : > { %381 = vrsqrt.f32 %v207_v59  ;;  %vm214_vm1 = vweird.f32 %v207_v59 }
  0x54   : > { %v382_v60 = vpop.eup %381 }
  0x55   : > { %v209_v61 = vmul.f32 %v382_v60, %v207_v59  ;;  %vm215_vm2 = vweird.f32 %v382_v60 }
  0x56   : > { %vm216_vm3 = vmor %vm214_vm1, %vm215_vm2 }
  0x57   : > { %v210_v62 = vmul.f32 %v382_v60, %v209_v61 }
  0x59   : > { %v211_v63 = vmul.f32 0.5, %v210_v62 }
  0x5b   : > { %v212_v0 = vsub.f32 1.5, %v211_v63 }
  0x5d   : > { %v213_v1 = vmul.f32 %v382_v60, %v212_v0 }
  0x5f   : > { %v217_v2 = vsel %vm216_vm3, %v382_v60, %v213_v1 }
  0x60   : > { %v218_v3 = vmul.f32 %v217_v2, %v177_v29  ;;  %v219_v4 = vmul.f32 %v217_v2, %v178_v30  ;;  %v220_v5 = vmul.f32 %v217_v2, %v179_v31  ;;  %v221_v6 = vmul.f32 %v217_v2, %v180_v32 }
  0x61   : > { %v222_v7 = vmul.f32 %v217_v2, %v181_v33  ;;  %v223_v8 = vmul.f32 %v217_v2, %v182_v37  ;;  %v224_v9 = vmul.f32 %v217_v2, %v183_v40  ;;  %v225_v10 = vmul.f32 %v217_v2, %v184_v43 }
  0x62   : > { %vm226_vm4 = vcmp.ge.f32.partialorder %v218_v3, 0.0  ;;  %v234_v11 = vmul.f32 0.2, %v218_v3  ;;  %vm227_vm5 = vcmp.ge.f32.partialorder %v219_v4, 0.0  ;;  %v235_v12 = vmul.f32 0.2, %v219_v4 }
  0x63   : > { %vm228_vm6 = vcmp.ge.f32.partialorder %v220_v5, 0.0  ;;  %v236_v13 = vmul.f32 0.2, %v220_v5  ;;  %vm229_vm7 = vcmp.ge.f32.partialorder %v221_v6, 0.0  ;;  %v237_v14 = vmul.f32 0.2, %v221_v6 }
  0x64   : > { %v242_v15 = vsel %vm226_vm4, %v218_v3, %v234_v11  ;;  %v243_v16 = vsel %vm227_vm5, %v219_v4, %v235_v12  ;;  %vm230_vm8 = vcmp.ge.f32.partialorder %v222_v7, 0.0  ;;  %v238_v17 = vmul.f32 0.2, %v222_v7 }
  0x65   : > { %250 = vst [vmem:[%s449_s16] sm:$0xff] %v242_v15  ;;  %v244_v18 = vsel %vm228_vm6, %v220_v5, %v236_v13  ;;  %v245_v19 = vsel %vm229_vm7, %v221_v6, %v237_v14  ;;  %vm231_vm9 = vcmp.ge.f32.partialorder %v223_v8, 0.0  ;;  %v239_v20 = vmul.f32 0.2, %v223_v8 }
  0x66   : > { %251 = vst [vmem:[%s449_s16 + $0x8] sm:$0xff] %v243_v16  ;;  %v246_v21 = vsel %vm230_vm8, %v222_v7, %v238_v17  ;;  %vm232_vm10 = vcmp.ge.f32.partialorder %v224_v9, 0.0  ;;  %v240_v22 = vmul.f32 0.2, %v224_v9  ;;  %vm233_vm11 = vcmp.ge.f32.partialorder %v225_v10, 0.0 }
  0x67   : > { %252 = vst [vmem:[%s449_s16 + $0x10] sm:$0xff] %v244_v18  ;;  %v247_v23 = vsel %vm231_vm9, %v223_v8, %v239_v20  ;;  %v241_v24 = vmul.f32 0.2, %v225_v10 }
  0x68   : > { %253 = vst [vmem:[%s449_s16 + $0x18] sm:$0xff] %v245_v19  ;;  %v248_v25 = vsel %vm232_vm10, %v224_v9, %v240_v22 }
  0x69   : > { %254 = vst [vmem:[%s449_s16 + $0x20] sm:$0xff] %v246_v21  ;;  %v249_v26 = vsel %vm233_vm11, %v225_v10, %v241_v24 }
  0x6a   : > { %255 = vst [vmem:[%s449_s16 + $0x28] sm:$0xff] %v247_v23 }
  0x6b   : > { %256 = vst [vmem:[%s449_s16 + $0x30] sm:$0xff] %v248_v25 }
  0x6c   : > { %257 = vst [vmem:[%s449_s16 + $0x38] sm:$0xff] %v249_v26 }
  0x6d PF: > { %s11_s8 = sadd.s32 1, %s405_s8   ;;  %s470_s6 = smov %s401_s7 }
  0x6e   : > { %p8_p5 = scmp.ge.s32.totalorder %s11_s8, 4   ;;  %s471_s7 = smov %s473_s9 }
  0x70   :  { %10 = sbr.rel (!%p8_p5) target bundleno = 2 (0x2), region = 54 }

// kernel: generator_forward.57
= control target key start
LH: loop header
LB: loop body
LE: loop exit
PB: predicated region body
PF: predicated region fallthrough
CT: control target
= control target key end

     0   :  { %s1187_s0 = inlined_call_operand.vmem [shape: bf16[32,1152], index: 0, kind: input, shape index: {}]   ;;  %s1188_s1 = inlined_call_operand.vmem [shape: bf16[1152,256], index: 1, kind: input, shape index: {}]   ;;  %s1189_s2 = inlined_call_operand.vmem [shape: f32[1,256], index: 2, kind: input, shape index: {}]   ;;  %s1190_s3 = inlined_call_operand.vmem [shape: f32[32,256], index: 3, kind: output, shape index: {}]  }
   0x1   :  { %1192 = sst [smem:[#allocation7_spill]] %s1187_s0 }
   0x2   :  { %1193 = sst [smem:[#allocation8_spill]] %s1188_s1 }
   0x3   :  { %s969_s12 = smov 0   ;;  %s971_s13 = smov 0  }
   0x4   :  { %s973_s14 = smov 0   ;;  %s975_s15 = smov 0  }
   0x5   :  { %s977_s16 = smov 0   ;;  %s979_s17 = smov 0  }
   0x6   :  { %s981_s18 = smov 0   ;;  %s983_s19 = smov 0  }
   0x7   :  { %s985_s20 = smov 0   ;;  %s987_s21 = smov 0  }
   0x8   :  { %s989_s22 = smov 0  }
   0x9 LB: > { %s691_s23 = sadd.s32 4294967295, %s946_s22   ;;  %s25_s24 = sadd.s32 1, %s938_s20  ;;  %s946_s22 = sphi %s989_s22, %s13_s22   ;;  %s942_s21 = sphi %s987_s21, %s1210_s21   ;;  %s938_s20 = sphi %s985_s20, %s1209_s20   ;;  %s934_s19 = sphi %s983_s19, %s1208_s19   ;;  %s930_s18 = sphi %s981_s18, %s1207_s18   ;;  %s926_s17 = sphi %s979_s17, %s1206_s17   ;;  %s922_s16 = sphi %s977_s16, %s1205_s16   ;;  %s918_s15 = sphi %s975_s15, %s1204_s15   ;;  %s914_s14 = sphi %s973_s14, %s1203_s14   ;;  %s910_s13 = sphi %s971_s13, %s1202_s13   ;;  %s906_s12 = sphi %s969_s12, %s1201_s12  }
   0xa   : > { %p26_p0 = scmp.ge.s32.totalorder %s25_s24, 9  ;;  %s28_s25 = sadd.s32 1, %s942_s21 }
   0xb   : > { %s41_s26 = sadd.s32 1, %s926_s17  ;;  %p48_p1 = scmp.ne.s32.totalorder %s926_s17, %s922_s16 }
   0xc   : > { %s1212_s24 = smov (%p26_p0, %s25_s24), 0  ;;  %s1214_s25 = smov (!%p26_p0, %s28_s25), %s942_s21 }
   0xd   : > { %s37_s27 = ssub.s32 %s938_s20, %s1212_s24  ;;  %p49_p2 = scmp.eq.s32.totalorder %s946_s22, 0 }
   0xe   : > { %p30_p3 = scmp.ge.s32.totalorder %s1214_s25, 2  ;;  %p39_p4 = scmp.eq.s32.totalorder %s37_s27, 0 }
   0xf   : > { %p1036_p5 = por %p49_p2, %p48_p1  ;;  %s69_s29 = sadd.s32 1, %s918_s15 }
  0x10   : > { %s1216_s25 = smov (%p30_p3, %s1214_s25), 0  ;;  %p76_p6 = scmp.ne.s32.totalorder %s918_s15, %s914_s14 }
  0x11   : > { %1195 = sst [smem:[#allocation6_spill]] %s1216_s25  ;;  %s65_s4 = ssub.s32 %s942_s21, %s1216_s25 }
  0x12   : > { %s1044_s30 = scalar_select %p39_p4, %s926_s17, %s41_s26  }
  0x13   : > { %s66_s5 = sor.u32 %s65_s4, %s37_s27  ;;  %p121_p7 = scmp.eq.s32.totalorder %s65_s4, 0 }
  0x14   : > { %p67_p8 = scmp.eq.s32.totalorder %s66_s5, 0  ;;  %p1050_p9 = por %p76_p6, %p49_p2 }
  0x15   : > { %s123_s7 = sadd.s32 1, %s910_s13  ;;  %p133_p10 = scmp.ne.s32.totalorder %s910_s13, %s906_s12 }
  0x16   : > { %s1058_s8 = scalar_select %p67_p8, %s918_s15, %s69_s29  }
  0x17   : > { %s1061_s9 = scalar_select %p121_p7, %s910_s13, %s123_s7  }
  0x18   : > { %p134_p11 = scmp.eq.s32.totalorder %s691_s23, 17  ;;  %p694_p13 = scmp.ge.s32.totalorder %s946_s22, 18 }
  0x1a   : > { %p1063_p12 = por %p134_p11, %p133_p10  ;;  %156 = sbr.rel (%p694_p13) target bundleno = 71 (0x47), region = 16 }
  0x1f   : > { %159 = sbr.rel (!%p1036_p5) target bundleno = 45 (0x2d), region = 20  ;;  %s161_s11 = sand.u32 (%p1036_p5), 1, %s926_s17  }
  0x20   : > { %s696_s26 = sshll.u32 (%p1036_p5), %s938_s20, 2  ;;  %s695_s27 = sshll.u32 (%p1036_p5), %s161_s11, 4 }
  0x21   : > { %s1198_s0 = sld [smem:[#allocation7_spill]] (%p1036_p5)  ;;  %s163_s23 = scalar_lea.vmem (%p1036_p5), [#allocation3], %s695_s27 }
  0x27   : > { %s168_s5 = scalar_lea.vmem %s1198_s0, %s696_s26 }
  0x28   : > { %v185_v0 = vld [vmem:[%s168_s5] sm:$0xf]  ;;  %v187_v1 = vld [vmem:[%s168_s5 + $0x24] sm:$0xf]  ;;  %v189_v2 = vld [vmem:[%s168_s5 + $0x48] sm:$0xf] }
  0x29   : > { %186 = vst [vmem:[%s163_s23] sm:$0xf] %v185_v0  ;;  %v191_v3 = vld [vmem:[%s168_s5 + $0x6c] sm:$0xf] }
  0x2a   : > { %188 = vst [vmem:[%s163_s23 + $0x4] sm:$0xf] %v187_v1 }
  0x2b   : > { %190 = vst [vmem:[%s163_s23 + $0x8] sm:$0xf] %v189_v2 }
  0x2c   : > { %192 = vst [vmem:[%s163_s23 + $0xc] sm:$0xf] %v191_v3 }
  0x2d PF: > { %224 = sbr.rel (!%p1050_p9) target bundleno = 71 (0x47), region = 61  ;;  %s226_s28 = sand.u32 (%p1050_p9), 1, %s918_s15  }
  0x2e   : > { %s751_s7 = sshll.u32 (%p1050_p9), %s938_s20, 5  ;;  %s697_s11 = sshll.u32 (%p1050_p9), %s226_s28, 6 }
  0x2f   : > { %s231_s26 = sadd.s32 (%p1050_p9), %s942_s21, %s751_s7  ;;  %s1199_s1 = sld [smem:[#allocation8_spill]] (%p1050_p9) }
  0x30   : > { %s700_s29 = sshll.u32 (%p1050_p9), %s231_s26, 2  ;;  %s228_s6 = scalar_lea.vmem (%p1050_p9), [#allocation4], %s697_s11 }
  0x35   : > { %s1083_s0 = scalar_lea.vmem %s1199_s1, %s700_s29 }
  0x36   : > { %v250_v4 = vld [vmem:[%s1083_s0] sm:$0xf]  ;;  %v252_v5 = vld [vmem:[%s1083_s0 + $0x8] sm:$0xf]  ;;  %v254_v6 = vld [vmem:[%s1083_s0 + $0x10] sm:$0xf] }
  0x37   : > { %251 = vst [vmem:[%s228_s6] sm:$0xf] %v250_v4  ;;  %v256_v7 = vld [vmem:[%s1083_s0 + $0x18] sm:$0xf]  ;;  %v258_v8 = vld [vmem:[%s1083_s0 + $0x20] sm:$0xf] }
  0x38   : > { %253 = vst [vmem:[%s228_s6 + $0x4] sm:$0xf] %v252_v5  ;;  %v260_v9 = vld [vmem:[%s1083_s0 + $0x28] sm:$0xf]  ;;  %v262_v10 = vld [vmem:[%s1083_s0 + $0x30] sm:$0xf] }
  0x39   : > { %255 = vst [vmem:[%s228_s6 + $0x8] sm:$0xf] %v254_v6  ;;  %v264_v11 = vld [vmem:[%s1083_s0 + $0x38] sm:$0xf]  ;;  %v266_v12 = vld [vmem:[%s1083_s0 + $0x40] sm:$0xf] }
  0x3a   : > { %257 = vst [vmem:[%s228_s6 + $0xc] sm:$0xf] %v256_v7  ;;  %v268_v13 = vld [vmem:[%s1083_s0 + $0x48] sm:$0xf]  ;;  %v270_v14 = vld [vmem:[%s1083_s0 + $0x50] sm:$0xf] }
  0x3b   : > { %259 = vst [vmem:[%s228_s6 + $0x10] sm:$0xf] %v258_v8  ;;  %v272_v15 = vld [vmem:[%s1083_s0 + $0x58] sm:$0xf]  ;;  %v274_v16 = vld [vmem:[%s1083_s0 + $0x60] sm:$0xf] }
  0x3c   : > { %261 = vst [vmem:[%s228_s6 + $0x14] sm:$0xf] %v260_v9  ;;  %v276_v17 = vld [vmem:[%s1083_s0 + $0x68] sm:$0xf]  ;;  %v278_v18 = vld [vmem:[%s1083_s0 + $0x70] sm:$0xf] }
  0x3d   : > { %263 = vst [vmem:[%s228_s6 + $0x18] sm:$0xf] %v262_v10  ;;  %v280_v19 = vld [vmem:[%s1083_s0 + $0x78] sm:$0xf] }
  0x3e   : > { %265 = vst [vmem:[%s228_s6 + $0x1c] sm:$0xf] %v264_v11 }
  0x3f   : > { %267 = vst [vmem:[%s228_s6 + $0x20] sm:$0xf] %v266_v12 }
  0x40   : > { %269 = vst [vmem:[%s228_s6 + $0x24] sm:$0xf] %v268_v13 }
  0x41   : > { %271 = vst [vmem:[%s228_s6 + $0x28] sm:$0xf] %v270_v14 }
  0x42   : > { %273 = vst [vmem:[%s228_s6 + $0x2c] sm:$0xf] %v272_v15 }
  0x43   : > { %275 = vst [vmem:[%s228_s6 + $0x30] sm:$0xf] %v274_v16 }
  0x44   : > { %277 = vst [vmem:[%s228_s6 + $0x34] sm:$0xf] %v276_v17 }
  0x45   : > { %279 = vst [vmem:[%s228_s6 + $0x38] sm:$0xf] %v278_v18 }
  0x46   : > { %281 = vst [vmem:[%s228_s6 + $0x3c] sm:$0xf] %v280_v19 }
  0x47 PF: > { %p701_p0 = scmp.ge.s32.totalorder %s946_s22, 1  ;;  %p342_p1 = scmp.lt.s32.totalorder %s946_s22, 19 }
  0x49   : > { %p343_p2 = pnand %p701_p0, %p342_p1 }
  0x4a   : > { %s349_s5 = sand.u32 (!%p343_p2), 1, %s922_s16   ;;  %s356_s23 = sand.u32 (!%p343_p2), 1, %s914_s14  }
  0x4b   : > { %346 = sbr.rel (%p343_p2) target bundleno = 279 (0x117), region = 106  ;;  %s1105_s28 = sshll.u32 (!%p343_p2), %s349_s5, 4 }
  0x4c   : > { %s703_s0 = sshll.u32 (!%p343_p2), %s356_s23, 6  ;;  %s382_s7 = sand.u32 (!%p343_p2), 1, %s906_s12  }
  0x4d   : > { %p387_p3 = scmp.lt.s32.totalorder (!%p343_p2), %s934_s19, 1  ;;  %s704_s11 = sshll.u32 (!%p343_p2), %s382_s7, 5 }
  0x4e   : > { %s351_s6 = scalar_lea.vmem (!%p343_p2), [#allocation3], %s1105_s28  ;;  %s1117_s1 = scalar_lea.vmem (!%p343_p2), [#allocation4], %s703_s0 }
  0x4f   : > { %s1119_s25 = scalar_lea.vmem (!%p343_p2), [#allocation5], %s704_s11  ;;  %p705_p4 = scmp.ne.s32.totalorder (!%p343_p2), %s930_s18, 0 }
  0x50   : > { %s1110_s26 = scalar_select %p387_p3, %s934_s19, 1 }
  0x51   : > { %394 = sbr.rel (%p705_p4) target bundleno = 91 (0x5b), region = 118 }
  0x52   : > { %s389_s27 = scalar_lea.vmem %s1189_s2, %s1110_s26 }
  0x56   : > { %v948_v20 = vmov 0.0  }
  0x57   : > { %395 = vst [vmem:[#allocation2 + $0x10] sm:$0xff] %v948_v20 }
  0x58   : > { %396 = vst [vmem:[#allocation2] sm:$0xff] %v948_v20 }
  0x59   : > { %397 = vst [vmem:[#allocation2 + $0x18] sm:$0xff] %v948_v20 }
  0x5a   : > { %398 = vst [vmem:[#allocation2 + $0x8] sm:$0xff] %v948_v20 }
  0x5b PF: > { %v761_v21 = vld [vmem:[%s1117_s1 + $0x38] sm:$0xff]  ;;  %v760_v22 = vld [vmem:[%s1117_s1 + $0x30] sm:$0xff]  ;;  %v759_v23 = vld [vmem:[%s1117_s1 + $0x28] sm:$0xff]  ;;  %p746_p5 = scmp.ne.s32.totalorder %s930_s18, 8 }
  0x5c   : > { %483 = vmatpush.bf16.msra.mxu0 %v761_v21  ;;  %762 = vmatpush.bf16.msra.mxu1 %v761_v21  ;;  %v758_v24 = vld [vmem:[%s1117_s1 + $0x20] sm:$0xff]  ;;  %v757_v25 = vld [vmem:[%s1117_s1 + $0x18] sm:$0xff]  ;;  %v756_v26 = vld [vmem:[%s1117_s1 + $0x10] sm:$0xff] }
  0x5d   : > { %v755_v27 = vld [vmem:[%s1117_s1 + $0x8] sm:$0xff]  ;;  %v754_v28 = vld [vmem:[%s1117_s1] sm:$0xff] }
  0x5e   : > { %v752_v29 = vld [vmem:[%s351_s6] sm:$0xff]  ;;  %v753_v30 = vld [vmem:[%s351_s6 + $0x8] sm:$0xff] }
  0x5f   : > { %v399_v31 = vld [vmem:[#allocation2 + $0x10] sm:$0xff]  ;;  %v400_v37 = vld [vmem:[#allocation2] sm:$0xff] }
  0x60   : > { %484 = vmatpush.bf16.msra.mxu0 %v760_v22  ;;  %763 = vmatpush.bf16.msra.mxu1 %v760_v22  ;;  %v401_v32 = vld [vmem:[#allocation2 + $0x18] sm:$0xff] }
  0x61   : > { %v402_v38 = vld [vmem:[#allocation2 + $0x8] sm:$0xff] }
  0x64   : > { %485 = vmatpush.bf16.msra.mxu0 %v759_v23  ;;  %764 = vmatpush.bf16.msra.mxu1 %v759_v23 }
  0x68   : > { %486 = vmatpush.bf16.msra.mxu0 %v758_v24  ;;  %765 = vmatpush.bf16.msra.mxu1 %v758_v24 }
  0x6c   : > { %487 = vmatpush.bf16.msra.mxu0 %v757_v25  ;;  %766 = vmatpush.bf16.msra.mxu1 %v757_v25 }
  0x70   : > { %488 = vmatpush.bf16.msra.mxu0 %v756_v26  ;;  %767 = vmatpush.bf16.msra.mxu1 %v756_v26 }
  0x74   : > { %489 = vmatpush.bf16.msra.mxu0 %v755_v27  ;;  %768 = vmatpush.bf16.msra.mxu1 %v755_v27 }
  0x78   : > { %490 = vmatpush.bf16.msra.mxu0 %v754_v28  ;;  %769 = vmatpush.bf16.msra.mxu1 %v754_v28 }
  0x7b   : > { %491 = vmatmul.bf16.vlgmr.msra.gmra.mxu0 %v752_v29  ;;  %496 = vmatmul.bf16.vlgmr.msra.gmra.mxu1 %v753_v30 }
  0xf8   : > { %v492_v33 = vpop.f32.mrf.mxu0  ;;  %v497_v34 = vpop.f32.mrf.mxu1 }
  0xf9   : > { %v502_v35 = vadd.f32 %v492_v33, %v399_v31  ;;  %v504_v36 = vadd.f32 %v497_v34, %v401_v32 }
  0xfb   : > { %506 = vst [vmem:[#allocation2 + $0x10] sm:$0xff] %v502_v35 }
  0xfc   : > { %508 = vst [vmem:[#allocation2 + $0x18] sm:$0xff] %v504_v36 }
 0x100   : > { %v494_v39 = vpop.f32.mrf.mxu0  ;;  %v499_v40 = vpop.f32.mrf.mxu1  ;;  %513 = sbr.rel (%p746_p5) target bundleno = 271 (0x10f), region = 122 }
 0x101   : > { %v503_v41 = vadd.f32 %v494_v39, %v400_v37  ;;  %v505_v42 = vadd.f32 %v499_v40, %v402_v38 }
 0x103   : > { %507 = vst [vmem:[#allocation2] sm:$0xff] %v503_v41 }
 0x104   : > { %509 = vst [vmem:[#allocation2 + $0x8] sm:$0xff] %v505_v42 }
 0x105   : > { %v514_v43 = vld [vmem:[#allocation2 + $0x10] sm:$0xff]  ;;  %v859_v44 = vld [vmem:[%s389_s27] ss:$0 sm:$0xff]  ;;  %v516_v46 = vld [vmem:[#allocation2 + $0x18] sm:$0xff] }
 0x106   : > { %v522_v48 = vadd.f32 %v859_v44, %v514_v43  ;;  %v524_v50 = vadd.f32 %v859_v44, %v516_v46 }
 0x108   : > { %526 = vst [vmem:[%s1119_s25] sm:$0xff] %v522_v48 }
 0x109   : > { %528 = vst [vmem:[%s1119_s25 + $0x10] sm:$0xff] %v524_v50 }
 0x10a   : > { %v515_v45 = vld [vmem:[#allocation2] sm:$0xff] }
 0x10b   : > { %v517_v47 = vld [vmem:[#allocation2 + $0x8] sm:$0xff]  ;;  %v523_v49 = vadd.f32 %v859_v44, %v515_v45 }
 0x10c   : > { %v525_v51 = vadd.f32 %v859_v44, %v517_v47 }
 0x10d   : > { %527 = vst [vmem:[%s1119_s25 + $0x8] sm:$0xff] %v523_v49 }
 0x10e   : > { %529 = vst [vmem:[%s1119_s25 + $0x18] sm:$0xff] %v525_v51 }
 0x10f PF: > { %536 = sbr.rel (!%p1063_p12) target bundleno = 279 (0x117), region = 126  ;;  %s748_s14 = sshll.u32 (%p1063_p12), %s934_s19, 3  ;;  %v576_v52 = vld [vmem:[%s1119_s25] sm:$0xff] (%p1063_p12) }
 0x110   : > { %s541_s5 = scalar_lea.vmem (%p1063_p12), %s1190_s3, %s748_s14  ;;  %v580_v54 = vld [vmem:[%s1119_s25 + $0x10] sm:$0xff] (%p1063_p12) }
 0x111   : > { %577 = vst [vmem:[%s541_s5] sm:$0xff] (%p1063_p12), %v576_v52 }
 0x112   : > { %581 = vst [vmem:[%s541_s5 + $0x20] sm:$0xff] (%p1063_p12), %v580_v54 }
 0x114   : > { %v578_v53 = vld [vmem:[%s1119_s25 + $0x8] sm:$0xff] }
 0x115   : > { %v582_v55 = vld [vmem:[%s1119_s25 + $0x18] sm:$0xff]  ;;  %579 = vst [vmem:[%s541_s5 + $0x10] sm:$0xff] %v578_v53 }
 0x116   : > { %583 = vst [vmem:[%s541_s5 + $0x30] sm:$0xff] %v582_v55 }
 0x117 PF: > { %s13_s22 = sadd.s32 1, %s946_s22   ;;  %s1200_s10 = sld [smem:[#allocation6_spill]] }
 0x118   : > { %p10_p6 = scmp.ge.s32.totalorder %s13_s22, 20   ;;  %s1201_s12 = smov %s910_s13 }
 0x119   : > { %s1202_s13 = smov %s1061_s9  ;;  %s1203_s14 = smov %s918_s15 }
 0x11a   : > { %s1204_s15 = smov %s1058_s8  ;;  %s1205_s16 = smov %s926_s17 }
 0x11b   : > { %s1206_s17 = smov %s1044_s30  ;;  %s1207_s18 = smov %s938_s20 }
 0x11c   : > { %s1208_s19 = smov %s942_s21  ;;  %s1209_s20 = smov %s1212_s24 }
 0x11d   : > { %s1210_s21 = smov %s1200_s10  ;;  %12 = sbr.rel (!%p10_p6) target bundleno = 9 (0x9), region = 206 }

// kernel: generator_forward.58
= control target key start
LH: loop header
LB: loop body
LE: loop exit
PB: predicated region body
PF: predicated region fallthrough
CT: control target
= control target key end

     0   :  { %s481_s6 = smov 0   ;;  %s483_s7 = smov 0   ;;  %s581_s0 = inlined_call_operand.vmem [shape: f32[2,16,256], index: 0, kind: input, shape index: {}]   ;;  %s582_s1 = inlined_call_operand.vmem [shape: f32[2,16,256], index: 1, kind: output, shape index: {}]  }
   0x1   :  { %s485_s8 = smov 0   ;;  %s487_s9 = smov 0  }
   0x2   :  { %s489_s10 = smov 0   ;;  %s491_s11 = smov 0  }
   0x3   :  { %s493_s12 = smov 0  }
   0x4 LB: > { %s20_s13 = sadd.s32 1, %s460_s10  ;;  %s23_s14 = sadd.s32 1, %s464_s11  ;;  %s468_s12 = sphi %s493_s12, %s11_s12   ;;  %s464_s11 = sphi %s491_s11, %s589_s11   ;;  %s460_s10 = sphi %s489_s10, %s588_s10   ;;  %s456_s9 = sphi %s487_s9, %s587_s9   ;;  %s452_s8 = sphi %s485_s8, %s586_s8   ;;  %s448_s7 = sphi %s483_s7, %s585_s7   ;;  %s444_s6 = sphi %s481_s6, %s584_s6  }
   0x5   : > { %p21_p0 = scmp.ge.s32.totalorder %s20_s13, 2  ;;  %s338_s15 = sadd.s32 4294967295, %s468_s12  }
   0x6   : > { %p39_p1 = scmp.ne.s32.totalorder %s448_s7, %s444_s6  ;;  %p40_p2 = scmp.eq.s32.totalorder %s468_s12, 0 }
   0x7   : > { %s591_s13 = smov (%p21_p0, %s20_s13), 0  ;;  %s593_s14 = smov (!%p21_p0, %s23_s14), %s464_s11 }
   0x8   : > { %p25_p3 = scmp.ge.s32.totalorder %s593_s14, 2  ;;  %p71_p4 = scmp.eq.s32.totalorder %s338_s15, 3 }
   0x9   : > { %s28_s16 = ssub.s32 %s460_s10, %s591_s13  ;;  %p41_p5 = por %p40_p2, %p39_p1 }
   0xa   : > { %s595_s14 = smov (%p25_p3, %s593_s14), 0  ;;  %p529_p6 = por %p71_p4, %p39_p1 }
   0xb   : > { %s27_s18 = ssub.s32 %s464_s11, %s595_s14  ;;  %s32_s20 = sadd.s32 1, %s448_s7 }
   0xc   : > { %s29_s19 = sor.u32 %s28_s16, %s27_s18  ;;  %p341_p8 = scmp.ge.s32.totalorder %s468_s12, 4 }
   0xd   : > { %p30_p7 = scmp.eq.s32.totalorder %s29_s19, 0 }
   0xe   : > { %93 = sbr.rel (%p341_p8) target bundleno = 27 (0x1b), region = 16 }
   0xf   : > { %s537_s21 = scalar_select %p30_p7, %s448_s7, %s32_s20  }
  0x13   : > { %96 = sbr.rel (!%p41_p5) target bundleno = 27 (0x1b), region = 20  ;;  %s98_s22 = sand.u32 (%p41_p5), 1, %s448_s7  }
  0x14   : > { %s343_s23 = sshll.u32 (%p41_p5), %s464_s11, 2  ;;  %s342_s24 = sshll.u32 (%p41_p5), %s98_s22, 4 }
  0x15   : > { %s102_s25 = sadd.s32 (%p41_p5), %s460_s10, %s343_s23  ;;  %s100_s30 = scalar_lea.vmem (%p41_p5), [#allocation2], %s342_s24 }
  0x16   : > { %s344_s26 = sshll.u32 (%p41_p5), %s102_s25, 3 }
  0x17   : > { %s104_s29 = scalar_lea.vmem (%p41_p5), %s581_s0, %s344_s26 }
  0x18   : > { %v135_v0 = vld [vmem:[%s104_s29] sm:$0xff]  ;;  %v137_v1 = vld [vmem:[%s104_s29 + $0x10] sm:$0xff] }
  0x19   : > { %136 = vst [vmem:[%s100_s30] sm:$0xff] %v135_v0 }
  0x1a   : > { %138 = vst [vmem:[%s100_s30 + $0x8] sm:$0xff] %v137_v1 }
  0x1b PF: > { %p345_p9 = scmp.ge.s32.totalorder %s468_s12, 1  ;;  %p143_p10 = scmp.lt.s32.totalorder %s468_s12, 5 }
  0x1d   : > { %p144_p11 = pnand %p345_p9, %p143_p10 }
  0x1e   : > { %s150_s2 = sand.u32 (!%p144_p11), 1, %s444_s6  }
  0x1f   : > { %147 = sbr.rel (%p144_p11) target bundleno = 110 (0x6e), region = 58  ;;  %s549_s3 = sshll.u32 (!%p144_p11), %s150_s2, 4 }
  0x20   : > { %s152_s4 = scalar_lea.vmem (!%p144_p11), [#allocation2], %s549_s3  ;;  %s167_s5 = scalar_lea.vmem (!%p144_p11), [#allocation3], %s549_s3 }
  0x24   : > { %v470_v2 = vmov 16.0   ;;  %v168_v3 = vld [vmem:[%s152_s4] sm:$0xff]  ;;  %v169_v4 = vld [vmem:[%s152_s4 + $0x8] sm:$0xff]  ;;  %s349_s6 = sshll.u32 (%p529_p6), %s456_s9, 2 }
  0x25   : > { %410 = vrcp.f32 %v470_v2  ;;  %v170_v5 = vadd.f32 %v169_v4, %v168_v3  ;;  %s226_s15 = sadd.s32 (%p529_p6), %s452_s8, %s349_s6 }
  0x26   : > { %s350_s16 = sshll.u32 (%p529_p6), %s226_s15, 3 }
  0x27   : > { %v171_v6 = vrot.slane %v170_v5, 4  ;;  %s228_s20 = scalar_lea.vmem (%p529_p6), %s582_s1, %s350_s16 }
  0x29   : > { %v172_v8 = vadd.f32 %v171_v6, %v170_v5 }
  0x2b   : > { %v411_v7 = vpop.eup %410  ;;  %v173_v10 = vrot.slane %v172_v8, 2 }
  0x2c   : > { %v178_v9 = vmul.f32 16.0, %v411_v7  ;;  %vm182_vm0 = vweird.f32 %v411_v7 }
  0x2d   : > { %v174_v12 = vadd.f32 %v173_v10, %v172_v8 }
  0x2e   : > { %v179_v11 = vsub.f32 1.0, %v178_v9 }
  0x2f   : > { %v175_v14 = vrot.slane %v174_v12, 1 }
  0x30   : > { %v180_v13 = vmul.f32 %v411_v7, %v179_v11 }
  0x31   : > { %v176_v16 = vadd.f32 %v175_v14, %v174_v12 }
  0x32   : > { %v181_v15 = vadd.f32 %v411_v7, %v180_v13 }
  0x34   : > { %v183_v17 = vsel %vm182_vm0, %v411_v7, %v181_v15 }
  0x35   : > { %v184_v18 = vmul.f32 %v183_v17, %v176_v16 }
  0x37   : > { %v185_v19 = vsub.f32 %v168_v3, %v184_v18  ;;  %v186_v20 = vsub.f32 %v169_v4, %v184_v18 }
  0x39   : > { %v187_v21 = vmul.f32 %v185_v19, %v185_v19  ;;  %v188_v22 = vmul.f32 %v186_v20, %v186_v20 }
  0x3b   : > { %v189_v23 = vadd.f32 %v188_v22, %v187_v21 }
  0x3d   : > { %v190_v24 = vrot.slane %v189_v23, 4 }
  0x3f   : > { %v191_v25 = vadd.f32 %v190_v24, %v189_v23 }
  0x41   : > { %v192_v26 = vrot.slane %v191_v25, 2 }
  0x43   : > { %v193_v27 = vadd.f32 %v192_v26, %v191_v25 }
  0x45   : > { %v194_v28 = vrot.slane %v193_v27, 1 }
  0x47   : > { %v195_v29 = vadd.f32 %v194_v28, %v193_v27 }
  0x49   : > { %v196_v30 = vmul.f32 %v195_v29, %v183_v17 }
  0x4b   : > { %v197_v31 = vadd.f32 1e-05, %v196_v30 }
  0x4d   : > { %412 = vrsqrt.f32 %v197_v31  ;;  %vm204_vm1 = vweird.f32 %v197_v31 }
  0x53   : > { %v413_v32 = vpop.eup %412 }
  0x54   : > { %v199_v33 = vmul.f32 %v413_v32, %v197_v31  ;;  %vm205_vm2 = vweird.f32 %v413_v32 }
  0x55   : > { %vm206_vm3 = vmor %vm204_vm1, %vm205_vm2 }
  0x56   : > { %v200_v34 = vmul.f32 %v413_v32, %v199_v33 }
  0x58   : > { %v201_v35 = vmul.f32 0.5, %v200_v34 }
  0x5a   : > { %v202_v36 = vsub.f32 1.5, %v201_v35 }
  0x5c   : > { %v203_v37 = vmul.f32 %v413_v32, %v202_v36 }
  0x5e   : > { %v207_v38 = vsel %vm206_vm3, %v413_v32, %v203_v37 }
  0x5f   : > { %v208_v39 = vmul.f32 %v207_v38, %v185_v19  ;;  %v209_v40 = vmul.f32 %v207_v38, %v186_v20 }
  0x61   : > { %vm210_vm4 = vcmp.ge.f32.partialorder %v208_v39, 0.0  ;;  %v212_v41 = vmul.f32 0.2, %v208_v39  ;;  %vm211_vm5 = vcmp.ge.f32.partialorder %v209_v40, 0.0  ;;  %v213_v42 = vmul.f32 0.2, %v209_v40 }
  0x62   : > { %224 = sbr.rel (!%p529_p6) target bundleno = 110 (0x6e), region = 66 }
  0x63   : > { %v214_v43 = vsel %vm210_vm4, %v208_v39, %v212_v41  ;;  %v215_v44 = vsel %vm211_vm5, %v209_v40, %v213_v42 }
  0x64   : > { %216 = vst [vmem:[%s167_s5] sm:$0xff] %v214_v43 }
  0x65   : > { %217 = vst [vmem:[%s167_s5 + $0x8] sm:$0xff] %v215_v44 }
  0x6b   : > { %v259_v45 = vld [vmem:[%s167_s5] sm:$0xff] }
  0x6c   : > { %v261_v46 = vld [vmem:[%s167_s5 + $0x8] sm:$0xff]  ;;  %260 = vst [vmem:[%s228_s20] sm:$0xff] %v259_v45 }
  0x6d   : > { %262 = vst [vmem:[%s228_s20 + $0x10] sm:$0xff] %v261_v46 }
  0x6e PF: > { %s11_s12 = sadd.s32 1, %s468_s12   ;;  %s584_s6 = smov %s448_s7 }
  0x6f   : > { %p8_p12 = scmp.ge.s32.totalorder %s11_s12, 6   ;;  %s585_s7 = smov %s537_s21 }
  0x70   : > { %s586_s8 = smov %s460_s10  ;;  %s587_s9 = smov %s464_s11 }
  0x71   : > { %s588_s10 = smov %s591_s13  ;;  %s589_s11 = smov %s595_s14 }
  0x72   :  { %10 = sbr.rel (!%p8_p12) target bundleno = 4 (0x4), region = 135 }

// kernel: generator_forward.62
= control target key start
LH: loop header
LB: loop body
LE: loop exit
PB: predicated region body
PF: predicated region fallthrough
CT: control target
= control target key end

     0   :  { %s598_s9 = smov 0   ;;  %s600_s10 = smov 0   ;;  %s713_s0 = inlined_call_operand.vmem [shape: f32[2,16,256], index: 0, kind: input, shape index: {}]   ;;  %s714_s1 = inlined_call_operand.vmem [shape: f32[2,16,256], index: 1, kind: input, shape index: {}, may-alias: {1,2}]   ;;  %s715_s2 = inlined_call_operand.vmem [shape: f32[2,16,256], index: 2, kind: output, shape index: {}, may-alias: {1,2}]  }
   0x1   :  { %s602_s11 = smov 0   ;;  %s604_s12 = smov 0  }
   0x2   :  { %s606_s13 = smov 0   ;;  %s608_s14 = smov 0  }
   0x3   :  { %s610_s15 = smov 0  }
   0x4 LB: > { %s21_s16 = sadd.s32 1, %s572_s13  ;;  %s24_s17 = sadd.s32 1, %s576_s14  ;;  %s580_s15 = sphi %s610_s15, %s12_s15   ;;  %s576_s14 = sphi %s608_s14, %s723_s14   ;;  %s572_s13 = sphi %s606_s13, %s722_s13   ;;  %s568_s12 = sphi %s604_s12, %s721_s12   ;;  %s564_s11 = sphi %s602_s11, %s720_s11   ;;  %s560_s10 = sphi %s600_s10, %s719_s10   ;;  %s556_s9 = sphi %s598_s9, %s718_s9  }
   0x5   : > { %p22_p0 = scmp.ge.s32.totalorder %s21_s16, 2  ;;  %s446_s18 = sadd.s32 4294967295, %s580_s15  }
   0x6   : > { %p40_p1 = scmp.ne.s32.totalorder %s560_s10, %s556_s9  ;;  %p41_p2 = scmp.eq.s32.totalorder %s580_s15, 0 }
   0x7   : > { %s725_s16 = smov (%p22_p0, %s21_s16), 0  ;;  %s727_s17 = smov (!%p22_p0, %s24_s17), %s576_s14 }
   0x8   : > { %p26_p3 = scmp.ge.s32.totalorder %s727_s17, 2  ;;  %p100_p4 = scmp.eq.s32.totalorder %s446_s18, 3 }
   0x9   : > { %s29_s19 = ssub.s32 %s572_s13, %s725_s16  ;;  %p644_p5 = por %p41_p2, %p40_p1 }
   0xa   : > { %s729_s17 = smov (%p26_p3, %s727_s17), 0  ;;  %p650_p6 = por %p100_p4, %p40_p1 }
   0xb   : > { %s28_s22 = ssub.s32 %s576_s14, %s729_s17  ;;  %s33_s24 = sadd.s32 1, %s560_s10 }
   0xc   : > { %s30_s23 = sor.u32 %s29_s19, %s28_s22  ;;  %p449_p8 = scmp.ge.s32.totalorder %s580_s15, 4 }
   0xd   : > { %p31_p7 = scmp.eq.s32.totalorder %s30_s23, 0 }
   0xe   : > { %122 = sbr.rel (%p449_p8) target bundleno = 35 (0x23), region = 16 }
   0xf   : > { %s658_s25 = scalar_select %p31_p7, %s560_s10, %s33_s24  }
  0x13   : > { %125 = sbr.rel (!%p644_p5) target bundleno = 27 (0x1b), region = 20  ;;  %s127_s26 = sand.u32 (%p644_p5), 1, %s560_s10  }
  0x14   : > { %s451_s27 = sshll.u32 (%p644_p5), %s576_s14, 2  ;;  %s450_s28 = sshll.u32 (%p644_p5), %s127_s26, 4 }
  0x15   : > { %s131_s29 = sadd.s32 (%p644_p5), %s572_s13, %s451_s27  ;;  %s129_s6 = scalar_lea.vmem (%p644_p5), [#allocation2], %s450_s28 }
  0x16   : > { %s452_s30 = sshll.u32 (%p644_p5), %s131_s29, 3 }
  0x17   : > { %s133_s5 = scalar_lea.vmem (%p644_p5), %s713_s0, %s452_s30 }
  0x18   : > { %v164_v0 = vld [vmem:[%s133_s5] sm:$0xff]  ;;  %v166_v1 = vld [vmem:[%s133_s5 + $0x10] sm:$0xff] }
  0x19   : > { %165 = vst [vmem:[%s129_s6] sm:$0xff] %v164_v0 }
  0x1a   : > { %167 = vst [vmem:[%s129_s6 + $0x8] sm:$0xff] %v166_v1 }
  0x1b PF: > { %173 = sbr.rel (!%p644_p5) target bundleno = 35 (0x23), region = 58  ;;  %s175_s7 = sand.u32 (%p644_p5), 1, %s560_s10  }
  0x1c   : > { %s454_s8 = sshll.u32 (%p644_p5), %s576_s14, 2  ;;  %s453_s18 = sshll.u32 (%p644_p5), %s175_s7, 4 }
  0x1d   : > { %s179_s19 = sadd.s32 (%p644_p5), %s572_s13, %s454_s8  ;;  %s177_s27 = scalar_lea.vmem (%p644_p5), [#allocation3], %s453_s18 }
  0x1e   : > { %s455_s22 = sshll.u32 (%p644_p5), %s179_s19, 3 }
  0x1f   : > { %s181_s26 = scalar_lea.vmem (%p644_p5), %s714_s1, %s455_s22 }
  0x20   : > { %v212_v2 = vld [vmem:[%s181_s26] sm:$0xff]  ;;  %v214_v3 = vld [vmem:[%s181_s26 + $0x10] sm:$0xff] }
  0x21   : > { %213 = vst [vmem:[%s177_s27] sm:$0xff] %v212_v2 }
  0x22   : > { %215 = vst [vmem:[%s177_s27 + $0x8] sm:$0xff] %v214_v3 }
  0x23 PF: > { %p456_p9 = scmp.ge.s32.totalorder %s580_s15, 1  ;;  %p220_p10 = scmp.lt.s32.totalorder %s580_s15, 5 }
  0x25   : > { %p221_p11 = pnand %p456_p9, %p220_p10 }
  0x26   : > { %s227_s20 = sand.u32 (!%p221_p11), 1, %s556_s9  }
  0x27   : > { %224 = sbr.rel (%p221_p11) target bundleno = 117 (0x75), region = 96  ;;  %s680_s28 = sshll.u32 (!%p221_p11), %s227_s20, 4 }
  0x28   : > { %s229_s29 = scalar_lea.vmem (!%p221_p11), [#allocation2], %s680_s28  ;;  %s236_s9 = scalar_lea.vmem (!%p221_p11), [#allocation3], %s680_s28 }
  0x29   : > { %s257_s30 = scalar_lea.vmem (!%p221_p11), [#allocation4], %s680_s28 }
  0x2c   : > { %v582_v4 = vmov 16.0   ;;  %v258_v5 = vld [vmem:[%s229_s29] sm:$0xff]  ;;  %v259_v6 = vld [vmem:[%s229_s29 + $0x8] sm:$0xff]  ;;  %s461_s3 = sshll.u32 (%p650_p6), %s568_s12, 2 }
  0x2d   : > { %522 = vrcp.f32 %v582_v4  ;;  %v260_v7 = vadd.f32 %v259_v6, %v258_v5  ;;  %v300_v41 = vld [vmem:[%s236_s9] sm:$0xff]  ;;  %v301_v42 = vld [vmem:[%s236_s9 + $0x8] sm:$0xff]  ;;  %s314_s4 = sadd.s32 (%p650_p6), %s564_s11, %s461_s3 }
  0x2e   : > { %s462_s5 = sshll.u32 (%p650_p6), %s314_s4, 3 }
  0x2f   : > { %v261_v8 = vrot.slane %v260_v7, 4  ;;  %s316_s8 = scalar_lea.vmem (%p650_p6), %s715_s2, %s462_s5 }
  0x31   : > { %v262_v10 = vadd.f32 %v261_v8, %v260_v7 }
  0x33   : > { %v523_v9 = vpop.eup %522  ;;  %v263_v12 = vrot.slane %v262_v10, 2 }
  0x34   : > { %v268_v11 = vmul.f32 16.0, %v523_v9  ;;  %vm272_vm0 = vweird.f32 %v523_v9 }
  0x35   : > { %v264_v14 = vadd.f32 %v263_v12, %v262_v10 }
  0x36   : > { %v269_v13 = vsub.f32 1.0, %v268_v11 }
  0x37   : > { %v265_v16 = vrot.slane %v264_v14, 1 }
  0x38   : > { %v270_v15 = vmul.f32 %v523_v9, %v269_v13 }
  0x39   : > { %v266_v18 = vadd.f32 %v265_v16, %v264_v14 }
  0x3a   : > { %v271_v17 = vadd.f32 %v523_v9, %v270_v15 }
  0x3c   : > { %v273_v19 = vsel %vm272_vm0, %v523_v9, %v271_v17 }
  0x3d   : > { %v274_v20 = vmul.f32 %v273_v19, %v266_v18 }
  0x3f   : > { %v275_v21 = vsub.f32 %v258_v5, %v274_v20  ;;  %v276_v22 = vsub.f32 %v259_v6, %v274_v20 }
  0x41   : > { %v277_v23 = vmul.f32 %v275_v21, %v275_v21  ;;  %v278_v24 = vmul.f32 %v276_v22, %v276_v22 }
  0x43   : > { %v279_v25 = vadd.f32 %v278_v24, %v277_v23 }
  0x45   : > { %v280_v26 = vrot.slane %v279_v25, 4 }
  0x47   : > { %v281_v27 = vadd.f32 %v280_v26, %v279_v25 }
  0x49   : > { %v282_v28 = vrot.slane %v281_v27, 2 }
  0x4b   : > { %v283_v29 = vadd.f32 %v282_v28, %v281_v27 }
  0x4d   : > { %v284_v30 = vrot.slane %v283_v29, 1 }
  0x4f   : > { %v285_v31 = vadd.f32 %v284_v30, %v283_v29 }
  0x51   : > { %v286_v32 = vmul.f32 %v285_v31, %v273_v19 }
  0x53   : > { %v287_v33 = vadd.f32 1e-05, %v286_v32 }
  0x55   : > { %524 = vrsqrt.f32 %v287_v33  ;;  %vm294_vm1 = vweird.f32 %v287_v33 }
  0x5b   : > { %v525_v34 = vpop.eup %524 }
  0x5c   : > { %v289_v35 = vmul.f32 %v525_v34, %v287_v33  ;;  %vm295_vm2 = vweird.f32 %v525_v34 }
  0x5d   : > { %vm296_vm3 = vmor %vm294_vm1, %vm295_vm2 }
  0x5e   : > { %v290_v36 = vmul.f32 %v525_v34, %v289_v35 }
  0x60   : > { %v291_v37 = vmul.f32 0.5, %v290_v36 }
  0x62   : > { %v292_v38 = vsub.f32 1.5, %v291_v37 }
  0x64   : > { %v293_v39 = vmul.f32 %v525_v34, %v292_v38 }
  0x66   : > { %v297_v40 = vsel %vm296_vm3, %v525_v34, %v293_v39 }
  0x67   : > { %v298_v43 = vmul.f32 %v297_v40, %v275_v21  ;;  %v299_v44 = vmul.f32 %v297_v40, %v276_v22 }
  0x68   : > { %312 = sbr.rel (!%p650_p6) target bundleno = 117 (0x75), region = 108 }
  0x69   : > { %v302_v45 = vadd.f32 %v300_v41, %v298_v43  ;;  %v303_v46 = vadd.f32 %v301_v42, %v299_v44 }
  0x6b   : > { %304 = vst [vmem:[%s257_s30] sm:$0xff] %v302_v45 }
  0x6c   : > { %305 = vst [vmem:[%s257_s30 + $0x8] sm:$0xff] %v303_v46 }
  0x72   : > { %v347_v47 = vld [vmem:[%s257_s30] sm:$0xff] }
  0x73   : > { %v349_v48 = vld [vmem:[%s257_s30 + $0x8] sm:$0xff]  ;;  %348 = vst [vmem:[%s316_s8] sm:$0xff] %v347_v47 }
  0x74   : > { %350 = vst [vmem:[%s316_s8 + $0x10] sm:$0xff] %v349_v48 }
  0x75 PF: > { %s12_s15 = sadd.s32 1, %s580_s15   ;;  %s718_s9 = smov %s560_s10 }
  0x76   : > { %p9_p12 = scmp.ge.s32.totalorder %s12_s15, 6   ;;  %s719_s10 = smov %s658_s25 }
  0x77   : > { %s720_s11 = smov %s572_s13  ;;  %s721_s12 = smov %s576_s14 }
  0x78   : > { %s722_s13 = smov %s725_s16  ;;  %s723_s14 = smov %s729_s17 }
  0x79   :  { %11 = sbr.rel (!%p9_p12) target bundleno = 4 (0x4), region = 185 }

// kernel: generator_forward.59
= control target key start
LH: loop header
LB: loop body
LE: loop exit
PB: predicated region body
PF: predicated region fallthrough
CT: control target
= control target key end

     0   :  { %s5709_s12 = smov 0   ;;  %s5711_s13 = smov 0   ;;  %s6677_s0 = inlined_call_operand.vmem [shape: bf16[2,38,256], index: 0, kind: input, shape index: {}]   ;;  %s6678_s1 = inlined_call_operand.vmem [shape: bf16[2304,256], index: 1, kind: input, shape index: {}]   ;;  %s6679_s2 = inlined_call_operand.vmem [shape: f32[1,256], index: 2, kind: input, shape index: {}]   ;;  %s6680_s3 = inlined_call_operand.vmem [shape: f32[2,24,256], index: 3, kind: output, shape index: {}]  }
   0x1   :  { %s5713_s14 = smov 0   ;;  %s5715_s15 = smov 0  }
   0x2   :  { %s5717_s16 = smov 0   ;;  %s5719_s17 = smov 0  }
   0x3   :  { %s5721_s18 = smov 0   ;;  %s5723_s19 = smov 0  }
   0x4   :  { %s5725_s20 = smov 0  }
   0x5 LB: > { %s4633_s21 = sadd.s32 4294967295, %s5687_s20   ;;  %s22_s22 = sadd.s32 1, %s5679_s18  ;;  %s5687_s20 = sphi %s5725_s20, %s13_s20   ;;  %s5683_s19 = sphi %s5723_s19, %s6689_s19   ;;  %s5679_s18 = sphi %s5721_s18, %s6688_s18   ;;  %s5675_s17 = sphi %s5719_s17, %s6687_s17   ;;  %s5671_s16 = sphi %s5717_s16, %s6686_s16   ;;  %s5667_s15 = sphi %s5715_s15, %s6685_s15   ;;  %s5663_s14 = sphi %s5713_s14, %s6684_s14   ;;  %s5659_s13 = sphi %s5711_s13, %s6683_s13   ;;  %s5655_s12 = sphi %s5709_s12, %s6682_s12  }
   0x6   : > { %p23_p0 = scmp.ge.s32.totalorder %s22_s22, 2  ;;  %s25_s23 = sadd.s32 1, %s5683_s19 }
   0x7   : > { %s58_s24 = sadd.s32 1, %s5667_s15  ;;  %p65_p1 = scmp.ne.s32.totalorder %s5667_s15, %s5663_s14 }
   0x8   : > { %s6691_s22 = smov (%p23_p0, %s22_s22), 0  ;;  %s6693_s23 = smov (!%p23_p0, %s25_s23), %s5683_s19 }
   0x9   : > { %s55_s25 = ssub.s32 %s5679_s18, %s6691_s22  ;;  %p66_p2 = scmp.eq.s32.totalorder %s5687_s20, 0 }
   0xa   : > { %p27_p3 = scmp.ge.s32.totalorder %s6693_s23, 2  ;;  %p56_p4 = scmp.eq.s32.totalorder %s55_s25, 0 }
   0xb   : > { %p67_p5 = por %p66_p2, %p65_p1  ;;  %s112_s26 = sadd.s32 1, %s5659_s13 }
   0xc   : > { %s6695_s23 = smov (%p27_p3, %s6693_s23), 0  ;;  %p122_p6 = scmp.ne.s32.totalorder %s5659_s13, %s5655_s12 }
   0xd   : > { %s5770_s27 = scalar_select %p56_p4, %s5667_s15, %s58_s24  }
   0xe   : > { %s107_s28 = ssub.s32 %s5683_s19, %s6695_s23  ;;  %p123_p7 = scmp.eq.s32.totalorder %s4633_s21, 3 }
   0xf   : > { %s109_s29 = sor.u32 %s107_s28, %s55_s25  ;;  %p4636_p10 = scmp.ge.s32.totalorder %s5687_s20, 4 }
  0x10   : > { %p110_p8 = scmp.eq.s32.totalorder %s109_s29, 0  ;;  %p5776_p9 = por %p123_p7, %p122_p6 }
  0x11   : > { %145 = sbr.rel (%p4636_p10) target bundleno = 315 (0x13b), region = 16 }
  0x12   : > { %s5781_s4 = scalar_select %p110_p8, %s5659_s13, %s112_s26  }
  0x16   : > { %156 = sbr.rel (!%p67_p5) target bundleno = 315 (0x13b), region = 24  ;;  %s158_s5 = sand.u32 (%p67_p5), 1, %s5667_s15  }
  0x17   : > { %s4637_s6 = sshll.u32 (%p67_p5), %s5679_s18, 2  ;;  %s5539_s7 = smul.u32 (%p67_p5), 1152, %s158_s5 }
  0x18   : > { %s5789_s10 = scalar_lea.vmem (%p67_p5), %s6678_s1, %s4637_s6 }
  0x19   : > { %v179_v0 = vld [vmem:[%s5789_s10] sm:$0xf] (%p67_p5)  ;;  %v181_v1 = vld [vmem:[%s5789_s10 + $0x8] sm:$0xf] (%p67_p5)  ;;  %v183_v2 = vld [vmem:[%s5789_s10 + $0x10] sm:$0xf] (%p67_p5) }
  0x1a   : > { %s5794_s11 = scalar_lea.vmem (%p67_p5), [#allocation3], %s5539_s7  ;;  %v185_v3 = vld [vmem:[%s5789_s10 + $0x18] sm:$0xf] (%p67_p5)  ;;  %v187_v4 = vld [vmem:[%s5789_s10 + $0x20] sm:$0xf] (%p67_p5) }
  0x1b   : > { %180 = vst [vmem:[%s5794_s11] sm:$0xf] %v179_v0  ;;  %v189_v5 = vld [vmem:[%s5789_s10 + $0x28] sm:$0xf]  ;;  %v191_v6 = vld [vmem:[%s5789_s10 + $0x30] sm:$0xf] }
  0x1c   : > { %182 = vst [vmem:[%s5794_s11 + $0x4] sm:$0xf] %v181_v1  ;;  %v193_v7 = vld [vmem:[%s5789_s10 + $0x38] sm:$0xf]  ;;  %v195_v8 = vld [vmem:[%s5789_s10 + $0x40] sm:$0xf] }
  0x1d   : > { %184 = vst [vmem:[%s5794_s11 + $0x8] sm:$0xf] %v183_v2  ;;  %v197_v9 = vld [vmem:[%s5789_s10 + $0x48] sm:$0xf]  ;;  %v199_v10 = vld [vmem:[%s5789_s10 + $0x50] sm:$0xf] }
  0x1e   : > { %186 = vst [vmem:[%s5794_s11 + $0xc] sm:$0xf] %v185_v3  ;;  %v201_v11 = vld [vmem:[%s5789_s10 + $0x58] sm:$0xf]  ;;  %v203_v12 = vld [vmem:[%s5789_s10 + $0x60] sm:$0xf] }
  0x1f   : > { %188 = vst [vmem:[%s5794_s11 + $0x10] sm:$0xf] %v187_v4  ;;  %v205_v13 = vld [vmem:[%s5789_s10 + $0x68] sm:$0xf]  ;;  %v207_v14 = vld [vmem:[%s5789_s10 + $0x70] sm:$0xf] }
  0x20   : > { %190 = vst [vmem:[%s5794_s11 + $0x14] sm:$0xf] %v189_v5  ;;  %v209_v15 = vld [vmem:[%s5789_s10 + $0x78] sm:$0xf]  ;;  %v211_v16 = vld [vmem:[%s5789_s10 + $0x80] sm:$0xf] }
  0x21   : > { %192 = vst [vmem:[%s5794_s11 + $0x18] sm:$0xf] %v191_v6  ;;  %v213_v17 = vld [vmem:[%s5789_s10 + $0x88] sm:$0xf]  ;;  %v215_v18 = vld [vmem:[%s5789_s10 + $0x90] sm:$0xf] }
  0x22   : > { %194 = vst [vmem:[%s5794_s11 + $0x1c] sm:$0xf] %v193_v7  ;;  %v217_v19 = vld [vmem:[%s5789_s10 + $0x98] sm:$0xf]  ;;  %v219_v20 = vld [vmem:[%s5789_s10 + $0xa0] sm:$0xf] }
  0x23   : > { %196 = vst [vmem:[%s5794_s11 + $0x20] sm:$0xf] %v195_v8  ;;  %v221_v21 = vld [vmem:[%s5789_s10 + $0xa8] sm:$0xf]  ;;  %v223_v22 = vld [vmem:[%s5789_s10 + $0xb0] sm:$0xf] }
  0x24   : > { %198 = vst [vmem:[%s5794_s11 + $0x24] sm:$0xf] %v197_v9  ;;  %v225_v23 = vld [vmem:[%s5789_s10 + $0xb8] sm:$0xf]  ;;  %v227_v24 = vld [vmem:[%s5789_s10 + $0xc0] sm:$0xf] }
  0x25   : > { %200 = vst [vmem:[%s5794_s11 + $0x28] sm:$0xf] %v199_v10  ;;  %v229_v25 = vld [vmem:[%s5789_s10 + $0xc8] sm:$0xf]  ;;  %v231_v26 = vld [vmem:[%s5789_s10 + $0xd0] sm:$0xf] }
  0x26   : > { %202 = vst [vmem:[%s5794_s11 + $0x2c] sm:$0xf] %v201_v11  ;;  %v233_v27 = vld [vmem:[%s5789_s10 + $0xd8] sm:$0xf]  ;;  %v235_v28 = vld [vmem:[%s5789_s10 + $0xe0] sm:$0xf] }
  0x27   : > { %204 = vst [vmem:[%s5794_s11 + $0x30] sm:$0xf] %v203_v12  ;;  %v237_v29 = vld [vmem:[%s5789_s10 + $0xe8] sm:$0xf]  ;;  %v239_v30 = vld [vmem:[%s5789_s10 + $0xf0] sm:$0xf] }
  0x28   : > { %206 = vst [vmem:[%s5794_s11 + $0x34] sm:$0xf] %v205_v13  ;;  %v241_v31 = vld [vmem:[%s5789_s10 + $0xf8] sm:$0xf]  ;;  %v243_v32 = vld [vmem:[%s5789_s10 + $0x100] sm:$0xf] }
  0x29   : > { %208 = vst [vmem:[%s5794_s11 + $0x38] sm:$0xf] %v207_v14  ;;  %v245_v33 = vld [vmem:[%s5789_s10 + $0x108] sm:$0xf]  ;;  %v247_v34 = vld [vmem:[%s5789_s10 + $0x110] sm:$0xf] }
  0x2a   : > { %210 = vst [vmem:[%s5794_s11 + $0x3c] sm:$0xf] %v209_v15  ;;  %v249_v35 = vld [vmem:[%s5789_s10 + $0x118] sm:$0xf]  ;;  %v251_v36 = vld [vmem:[%s5789_s10 + $0x120] sm:$0xf] }
  0x2b   : > { %212 = vst [vmem:[%s5794_s11 + $0x40] sm:$0xf] %v211_v16  ;;  %v253_v37 = vld [vmem:[%s5789_s10 + $0x128] sm:$0xf]  ;;  %v255_v38 = vld [vmem:[%s5789_s10 + $0x130] sm:$0xf] }
  0x2c   : > { %214 = vst [vmem:[%s5794_s11 + $0x44] sm:$0xf] %v213_v17  ;;  %v257_v39 = vld [vmem:[%s5789_s10 + $0x138] sm:$0xf]  ;;  %v259_v40 = vld [vmem:[%s5789_s10 + $0x140] sm:$0xf] }
  0x2d   : > { %216 = vst [vmem:[%s5794_s11 + $0x48] sm:$0xf] %v215_v18  ;;  %v261_v41 = vld [vmem:[%s5789_s10 + $0x148] sm:$0xf]  ;;  %v263_v42 = vld [vmem:[%s5789_s10 + $0x150] sm:$0xf] }
  0x2e   : > { %218 = vst [vmem:[%s5794_s11 + $0x4c] sm:$0xf] %v217_v19  ;;  %v265_v43 = vld [vmem:[%s5789_s10 + $0x158] sm:$0xf]  ;;  %v267_v44 = vld [vmem:[%s5789_s10 + $0x160] sm:$0xf] }
  0x2f   : > { %220 = vst [vmem:[%s5794_s11 + $0x50] sm:$0xf] %v219_v20  ;;  %v269_v45 = vld [vmem:[%s5789_s10 + $0x168] sm:$0xf]  ;;  %v271_v46 = vld [vmem:[%s5789_s10 + $0x170] sm:$0xf] }
  0x30   : > { %222 = vst [vmem:[%s5794_s11 + $0x54] sm:$0xf] %v221_v21  ;;  %v273_v47 = vld [vmem:[%s5789_s10 + $0x178] sm:$0xf]  ;;  %v275_v48 = vld [vmem:[%s5789_s10 + $0x180] sm:$0xf] }
  0x31   : > { %224 = vst [vmem:[%s5794_s11 + $0x58] sm:$0xf] %v223_v22  ;;  %v277_v49 = vld [vmem:[%s5789_s10 + $0x188] sm:$0xf]  ;;  %v279_v50 = vld [vmem:[%s5789_s10 + $0x190] sm:$0xf] }
  0x32   : > { %226 = vst [vmem:[%s5794_s11 + $0x5c] sm:$0xf] %v225_v23  ;;  %v281_v51 = vld [vmem:[%s5789_s10 + $0x198] sm:$0xf]  ;;  %v283_v52 = vld [vmem:[%s5789_s10 + $0x1a0] sm:$0xf] }
  0x33   : > { %228 = vst [vmem:[%s5794_s11 + $0x60] sm:$0xf] %v227_v24  ;;  %v285_v53 = vld [vmem:[%s5789_s10 + $0x1a8] sm:$0xf]  ;;  %v287_v54 = vld [vmem:[%s5789_s10 + $0x1b0] sm:$0xf] }
  0x34   : > { %230 = vst [vmem:[%s5794_s11 + $0x64] sm:$0xf] %v229_v25  ;;  %v289_v55 = vld [vmem:[%s5789_s10 + $0x1b8] sm:$0xf]  ;;  %v291_v56 = vld [vmem:[%s5789_s10 + $0x1c0] sm:$0xf] }
  0x35   : > { %232 = vst [vmem:[%s5794_s11 + $0x68] sm:$0xf] %v231_v26  ;;  %v293_v57 = vld [vmem:[%s5789_s10 + $0x1c8] sm:$0xf]  ;;  %v295_v58 = vld [vmem:[%s5789_s10 + $0x1d0] sm:$0xf] }
  0x36   : > { %234 = vst [vmem:[%s5794_s11 + $0x6c] sm:$0xf] %v233_v27  ;;  %v297_v59 = vld [vmem:[%s5789_s10 + $0x1d8] sm:$0xf]  ;;  %v299_v60 = vld [vmem:[%s5789_s10 + $0x1e0] sm:$0xf] }
  0x37   : > { %236 = vst [vmem:[%s5794_s11 + $0x70] sm:$0xf] %v235_v28  ;;  %v301_v61 = vld [vmem:[%s5789_s10 + $0x1e8] sm:$0xf]  ;;  %v303_v62 = vld [vmem:[%s5789_s10 + $0x1f0] sm:$0xf] }
  0x38   : > { %238 = vst [vmem:[%s5794_s11 + $0x74] sm:$0xf] %v237_v29  ;;  %v305_v63 = vld [vmem:[%s5789_s10 + $0x1f8] sm:$0xf]  ;;  %v307_v0 = vld [vmem:[%s5789_s10 + $0x200] sm:$0xf] }
  0x39   : > { %240 = vst [vmem:[%s5794_s11 + $0x78] sm:$0xf] %v239_v30  ;;  %v309_v1 = vld [vmem:[%s5789_s10 + $0x208] sm:$0xf]  ;;  %v311_v2 = vld [vmem:[%s5789_s10 + $0x210] sm:$0xf] }
  0x3a   : > { %242 = vst [vmem:[%s5794_s11 + $0x7c] sm:$0xf] %v241_v31  ;;  %v313_v3 = vld [vmem:[%s5789_s10 + $0x218] sm:$0xf]  ;;  %v315_v4 = vld [vmem:[%s5789_s10 + $0x220] sm:$0xf] }
  0x3b   : > { %244 = vst [vmem:[%s5794_s11 + $0x80] sm:$0xf] %v243_v32  ;;  %v317_v5 = vld [vmem:[%s5789_s10 + $0x228] sm:$0xf]  ;;  %v319_v6 = vld [vmem:[%s5789_s10 + $0x230] sm:$0xf] }
  0x3c   : > { %246 = vst [vmem:[%s5794_s11 + $0x84] sm:$0xf] %v245_v33  ;;  %v321_v7 = vld [vmem:[%s5789_s10 + $0x238] sm:$0xf]  ;;  %v323_v8 = vld [vmem:[%s5789_s10 + $0x240] sm:$0xf] }
  0x3d   : > { %248 = vst [vmem:[%s5794_s11 + $0x88] sm:$0xf] %v247_v34  ;;  %v325_v9 = vld [vmem:[%s5789_s10 + $0x248] sm:$0xf]  ;;  %v327_v10 = vld [vmem:[%s5789_s10 + $0x250] sm:$0xf] }
  0x3e   : > { %250 = vst [vmem:[%s5794_s11 + $0x8c] sm:$0xf] %v249_v35  ;;  %v329_v11 = vld [vmem:[%s5789_s10 + $0x258] sm:$0xf]  ;;  %v331_v12 = vld [vmem:[%s5789_s10 + $0x260] sm:$0xf] }
  0x3f   : > { %252 = vst [vmem:[%s5794_s11 + $0x90] sm:$0xf] %v251_v36  ;;  %v333_v13 = vld [vmem:[%s5789_s10 + $0x268] sm:$0xf]  ;;  %v335_v14 = vld [vmem:[%s5789_s10 + $0x270] sm:$0xf] }
  0x40   : > { %254 = vst [vmem:[%s5794_s11 + $0x94] sm:$0xf] %v253_v37  ;;  %v337_v15 = vld [vmem:[%s5789_s10 + $0x278] sm:$0xf]  ;;  %v339_v16 = vld [vmem:[%s5789_s10 + $0x280] sm:$0xf] }
  0x41   : > { %256 = vst [vmem:[%s5794_s11 + $0x98] sm:$0xf] %v255_v38  ;;  %v341_v17 = vld [vmem:[%s5789_s10 + $0x288] sm:$0xf]  ;;  %v343_v18 = vld [vmem:[%s5789_s10 + $0x290] sm:$0xf] }
  0x42   : > { %258 = vst [vmem:[%s5794_s11 + $0x9c] sm:$0xf] %v257_v39  ;;  %v345_v19 = vld [vmem:[%s5789_s10 + $0x298] sm:$0xf]  ;;  %v347_v20 = vld [vmem:[%s5789_s10 + $0x2a0] sm:$0xf] }
  0x43   : > { %260 = vst [vmem:[%s5794_s11 + $0xa0] sm:$0xf] %v259_v40  ;;  %v349_v21 = vld [vmem:[%s5789_s10 + $0x2a8] sm:$0xf]  ;;  %v351_v22 = vld [vmem:[%s5789_s10 + $0x2b0] sm:$0xf] }
  0x44   : > { %262 = vst [vmem:[%s5794_s11 + $0xa4] sm:$0xf] %v261_v41  ;;  %v353_v23 = vld [vmem:[%s5789_s10 + $0x2b8] sm:$0xf]  ;;  %v355_v24 = vld [vmem:[%s5789_s10 + $0x2c0] sm:$0xf] }
  0x45   : > { %264 = vst [vmem:[%s5794_s11 + $0xa8] sm:$0xf] %v263_v42  ;;  %v357_v25 = vld [vmem:[%s5789_s10 + $0x2c8] sm:$0xf]  ;;  %v359_v26 = vld [vmem:[%s5789_s10 + $0x2d0] sm:$0xf] }
  0x46   : > { %266 = vst [vmem:[%s5794_s11 + $0xac] sm:$0xf] %v265_v43  ;;  %v361_v27 = vld [vmem:[%s5789_s10 + $0x2d8] sm:$0xf]  ;;  %v363_v28 = vld [vmem:[%s5789_s10 + $0x2e0] sm:$0xf] }
  0x47   : > { %268 = vst [vmem:[%s5794_s11 + $0xb0] sm:$0xf] %v267_v44  ;;  %v365_v29 = vld [vmem:[%s5789_s10 + $0x2e8] sm:$0xf]  ;;  %v367_v30 = vld [vmem:[%s5789_s10 + $0x2f0] sm:$0xf] }
  0x48   : > { %270 = vst [vmem:[%s5794_s11 + $0xb4] sm:$0xf] %v269_v45  ;;  %v369_v31 = vld [vmem:[%s5789_s10 + $0x2f8] sm:$0xf]  ;;  %v371_v32 = vld [vmem:[%s5789_s10 + $0x300] sm:$0xf] }
  0x49   : > { %272 = vst [vmem:[%s5794_s11 + $0xb8] sm:$0xf] %v271_v46  ;;  %v373_v33 = vld [vmem:[%s5789_s10 + $0x308] sm:$0xf]  ;;  %v375_v34 = vld [vmem:[%s5789_s10 + $0x310] sm:$0xf] }
  0x4a   : > { %274 = vst [vmem:[%s5794_s11 + $0xbc] sm:$0xf] %v273_v47  ;;  %v377_v35 = vld [vmem:[%s5789_s10 + $0x318] sm:$0xf]  ;;  %v379_v36 = vld [vmem:[%s5789_s10 + $0x320] sm:$0xf] }
  0x4b   : > { %276 = vst [vmem:[%s5794_s11 + $0xc0] sm:$0xf] %v275_v48  ;;  %v381_v37 = vld [vmem:[%s5789_s10 + $0x328] sm:$0xf]  ;;  %v383_v38 = vld [vmem:[%s5789_s10 + $0x330] sm:$0xf] }
  0x4c   : > { %278 = vst [vmem:[%s5794_s11 + $0xc4] sm:$0xf] %v277_v49  ;;  %v385_v39 = vld [vmem:[%s5789_s10 + $0x338] sm:$0xf]  ;;  %v387_v40 = vld [vmem:[%s5789_s10 + $0x340] sm:$0xf] }
  0x4d   : > { %280 = vst [vmem:[%s5794_s11 + $0xc8] sm:$0xf] %v279_v50  ;;  %v389_v41 = vld [vmem:[%s5789_s10 + $0x348] sm:$0xf]  ;;  %v391_v42 = vld [vmem:[%s5789_s10 + $0x350] sm:$0xf] }
  0x4e   : > { %282 = vst [vmem:[%s5794_s11 + $0xcc] sm:$0xf] %v281_v51  ;;  %v393_v43 = vld [vmem:[%s5789_s10 + $0x358] sm:$0xf]  ;;  %v395_v44 = vld [vmem:[%s5789_s10 + $0x360] sm:$0xf] }
  0x4f   : > { %284 = vst [vmem:[%s5794_s11 + $0xd0] sm:$0xf] %v283_v52  ;;  %v397_v45 = vld [vmem:[%s5789_s10 + $0x368] sm:$0xf]  ;;  %v399_v46 = vld [vmem:[%s5789_s10 + $0x370] sm:$0xf] }
  0x50   : > { %286 = vst [vmem:[%s5794_s11 + $0xd4] sm:$0xf] %v285_v53  ;;  %v401_v47 = vld [vmem:[%s5789_s10 + $0x378] sm:$0xf]  ;;  %v403_v48 = vld [vmem:[%s5789_s10 + $0x380] sm:$0xf] }
  0x51   : > { %288 = vst [vmem:[%s5794_s11 + $0xd8] sm:$0xf] %v287_v54  ;;  %v405_v49 = vld [vmem:[%s5789_s10 + $0x388] sm:$0xf]  ;;  %v407_v50 = vld [vmem:[%s5789_s10 + $0x390] sm:$0xf] }
  0x52   : > { %290 = vst [vmem:[%s5794_s11 + $0xdc] sm:$0xf] %v289_v55  ;;  %v409_v51 = vld [vmem:[%s5789_s10 + $0x398] sm:$0xf]  ;;  %v411_v52 = vld [vmem:[%s5789_s10 + $0x3a0] sm:$0xf] }
  0x53   : > { %292 = vst [vmem:[%s5794_s11 + $0xe0] sm:$0xf] %v291_v56  ;;  %v413_v53 = vld [vmem:[%s5789_s10 + $0x3a8] sm:$0xf]  ;;  %v415_v54 = vld [vmem:[%s5789_s10 + $0x3b0] sm:$0xf] }
  0x54   : > { %294 = vst [vmem:[%s5794_s11 + $0xe4] sm:$0xf] %v293_v57  ;;  %v417_v55 = vld [vmem:[%s5789_s10 + $0x3b8] sm:$0xf]  ;;  %v419_v56 = vld [vmem:[%s5789_s10 + $0x3c0] sm:$0xf] }
  0x55   : > { %296 = vst [vmem:[%s5794_s11 + $0xe8] sm:$0xf] %v295_v58  ;;  %v421_v57 = vld [vmem:[%s5789_s10 + $0x3c8] sm:$0xf]  ;;  %v423_v58 = vld [vmem:[%s5789_s10 + $0x3d0] sm:$0xf] }
  0x56   : > { %298 = vst [vmem:[%s5794_s11 + $0xec] sm:$0xf] %v297_v59  ;;  %v425_v59 = vld [vmem:[%s5789_s10 + $0x3d8] sm:$0xf] }
  0x57   : > { %300 = vst [vmem:[%s5794_s11 + $0xf0] sm:$0xf] %v299_v60  ;;  %v427_v60 = vld [vmem:[%s5789_s10 + $0x3e0] sm:$0xf] }
  0x58   : > { %302 = vst [vmem:[%s5794_s11 + $0xf4] sm:$0xf] %v301_v61  ;;  %v429_v61 = vld [vmem:[%s5789_s10 + $0x3e8] sm:$0xf] }
  0x59   : > { %304 = vst [vmem:[%s5794_s11 + $0xf8] sm:$0xf] %v303_v62  ;;  %v431_v62 = vld [vmem:[%s5789_s10 + $0x3f0] sm:$0xf] }
  0x5a   : > { %306 = vst [vmem:[%s5794_s11 + $0xfc] sm:$0xf] %v305_v63  ;;  %v433_v63 = vld [vmem:[%s5789_s10 + $0x3f8] sm:$0xf] }
  0x5b   : > { %308 = vst [vmem:[%s5794_s11 + $0x100] sm:$0xf] %v307_v0  ;;  %v435_v0 = vld [vmem:[%s5789_s10 + $0x400] sm:$0xf] }
  0x5c   : > { %310 = vst [vmem:[%s5794_s11 + $0x104] sm:$0xf] %v309_v1  ;;  %v437_v1 = vld [vmem:[%s5789_s10 + $0x408] sm:$0xf] }
  0x5d   : > { %312 = vst [vmem:[%s5794_s11 + $0x108] sm:$0xf] %v311_v2  ;;  %v439_v2 = vld [vmem:[%s5789_s10 + $0x410] sm:$0xf] }
  0x5e   : > { %314 = vst [vmem:[%s5794_s11 + $0x10c] sm:$0xf] %v313_v3  ;;  %v441_v3 = vld [vmem:[%s5789_s10 + $0x418] sm:$0xf] }
  0x5f   : > { %316 = vst [vmem:[%s5794_s11 + $0x110] sm:$0xf] %v315_v4  ;;  %v443_v4 = vld [vmem:[%s5789_s10 + $0x420] sm:$0xf] }
  0x60   : > { %318 = vst [vmem:[%s5794_s11 + $0x114] sm:$0xf] %v317_v5  ;;  %v445_v5 = vld [vmem:[%s5789_s10 + $0x428] sm:$0xf] }
  0x61   : > { %320 = vst [vmem:[%s5794_s11 + $0x118] sm:$0xf] %v319_v6  ;;  %v447_v6 = vld [vmem:[%s5789_s10 + $0x430] sm:$0xf] }
  0x62   : > { %322 = vst [vmem:[%s5794_s11 + $0x11c] sm:$0xf] %v321_v7  ;;  %v449_v7 = vld [vmem:[%s5789_s10 + $0x438] sm:$0xf] }
  0x63   : > { %324 = vst [vmem:[%s5794_s11 + $0x120] sm:$0xf] %v323_v8  ;;  %v451_v8 = vld [vmem:[%s5789_s10 + $0x440] sm:$0xf] }
  0x64   : > { %326 = vst [vmem:[%s5794_s11 + $0x124] sm:$0xf] %v325_v9  ;;  %v453_v9 = vld [vmem:[%s5789_s10 + $0x448] sm:$0xf] }
  0x65   : > { %328 = vst [vmem:[%s5794_s11 + $0x128] sm:$0xf] %v327_v10  ;;  %v455_v10 = vld [vmem:[%s5789_s10 + $0x450] sm:$0xf] }
  0x66   : > { %330 = vst [vmem:[%s5794_s11 + $0x12c] sm:$0xf] %v329_v11  ;;  %v457_v11 = vld [vmem:[%s5789_s10 + $0x458] sm:$0xf] }
  0x67   : > { %332 = vst [vmem:[%s5794_s11 + $0x130] sm:$0xf] %v331_v12  ;;  %v459_v12 = vld [vmem:[%s5789_s10 + $0x460] sm:$0xf] }
  0x68   : > { %334 = vst [vmem:[%s5794_s11 + $0x134] sm:$0xf] %v333_v13  ;;  %v461_v13 = vld [vmem:[%s5789_s10 + $0x468] sm:$0xf] }
  0x69   : > { %336 = vst [vmem:[%s5794_s11 + $0x138] sm:$0xf] %v335_v14  ;;  %v463_v14 = vld [vmem:[%s5789_s10 + $0x470] sm:$0xf] }
  0x6a   : > { %338 = vst [vmem:[%s5794_s11 + $0x13c] sm:$0xf] %v337_v15  ;;  %v465_v15 = vld [vmem:[%s5789_s10 + $0x478] sm:$0xf] }
  0x6b   : > { %340 = vst [vmem:[%s5794_s11 + $0x140] sm:$0xf] %v339_v16  ;;  %v467_v16 = vld [vmem:[%s5789_s10 + $0x480] sm:$0xf] }
  0x6c   : > { %342 = vst [vmem:[%s5794_s11 + $0x144] sm:$0xf] %v341_v17  ;;  %v469_v17 = vld [vmem:[%s5789_s10 + $0x488] sm:$0xf] }
  0x6d   : > { %344 = vst [vmem:[%s5794_s11 + $0x148] sm:$0xf] %v343_v18  ;;  %v471_v18 = vld [vmem:[%s5789_s10 + $0x490] sm:$0xf] }
  0x6e   : > { %346 = vst [vmem:[%s5794_s11 + $0x14c] sm:$0xf] %v345_v19  ;;  %v473_v19 = vld [vmem:[%s5789_s10 + $0x498] sm:$0xf] }
  0x6f   : > { %348 = vst [vmem:[%s5794_s11 + $0x150] sm:$0xf] %v347_v20  ;;  %v475_v20 = vld [vmem:[%s5789_s10 + $0x4a0] sm:$0xf] }
  0x70   : > { %350 = vst [vmem:[%s5794_s11 + $0x154] sm:$0xf] %v349_v21  ;;  %v477_v21 = vld [vmem:[%s5789_s10 + $0x4a8] sm:$0xf] }
  0x71   : > { %352 = vst [vmem:[%s5794_s11 + $0x158] sm:$0xf] %v351_v22  ;;  %v479_v22 = vld [vmem:[%s5789_s10 + $0x4b0] sm:$0xf] }
  0x72   : > { %354 = vst [vmem:[%s5794_s11 + $0x15c] sm:$0xf] %v353_v23  ;;  %v481_v23 = vld [vmem:[%s5789_s10 + $0x4b8] sm:$0xf] }
  0x73   : > { %356 = vst [vmem:[%s5794_s11 + $0x160] sm:$0xf] %v355_v24  ;;  %v483_v24 = vld [vmem:[%s5789_s10 + $0x4c0] sm:$0xf] }
  0x74   : > { %358 = vst [vmem:[%s5794_s11 + $0x164] sm:$0xf] %v357_v25  ;;  %v485_v25 = vld [vmem:[%s5789_s10 + $0x4c8] sm:$0xf] }
  0x75   : > { %360 = vst [vmem:[%s5794_s11 + $0x168] sm:$0xf] %v359_v26  ;;  %v487_v26 = vld [vmem:[%s5789_s10 + $0x4d0] sm:$0xf] }
  0x76   : > { %362 = vst [vmem:[%s5794_s11 + $0x16c] sm:$0xf] %v361_v27  ;;  %v489_v27 = vld [vmem:[%s5789_s10 + $0x4d8] sm:$0xf] }
  0x77   : > { %364 = vst [vmem:[%s5794_s11 + $0x170] sm:$0xf] %v363_v28  ;;  %v491_v28 = vld [vmem:[%s5789_s10 + $0x4e0] sm:$0xf] }
  0x78   : > { %366 = vst [vmem:[%s5794_s11 + $0x174] sm:$0xf] %v365_v29  ;;  %v493_v29 = vld [vmem:[%s5789_s10 + $0x4e8] sm:$0xf] }
  0x79   : > { %368 = vst [vmem:[%s5794_s11 + $0x178] sm:$0xf] %v367_v30  ;;  %v495_v30 = vld [vmem:[%s5789_s10 + $0x4f0] sm:$0xf] }
  0x7a   : > { %370 = vst [vmem:[%s5794_s11 + $0x17c] sm:$0xf] %v369_v31  ;;  %v497_v31 = vld [vmem:[%s5789_s10 + $0x4f8] sm:$0xf] }
  0x7b   : > { %372 = vst [vmem:[%s5794_s11 + $0x180] sm:$0xf] %v371_v32  ;;  %v499_v32 = vld [vmem:[%s5789_s10 + $0x500] sm:$0xf] }
  0x7c   : > { %374 = vst [vmem:[%s5794_s11 + $0x184] sm:$0xf] %v373_v33  ;;  %v501_v33 = vld [vmem:[%s5789_s10 + $0x508] sm:$0xf] }
  0x7d   : > { %376 = vst [vmem:[%s5794_s11 + $0x188] sm:$0xf] %v375_v34  ;;  %v503_v34 = vld [vmem:[%s5789_s10 + $0x510] sm:$0xf] }
  0x7e   : > { %378 = vst [vmem:[%s5794_s11 + $0x18c] sm:$0xf] %v377_v35  ;;  %v505_v35 = vld [vmem:[%s5789_s10 + $0x518] sm:$0xf] }
  0x7f   : > { %380 = vst [vmem:[%s5794_s11 + $0x190] sm:$0xf] %v379_v36  ;;  %v507_v36 = vld [vmem:[%s5789_s10 + $0x520] sm:$0xf] }
  0x80   : > { %382 = vst [vmem:[%s5794_s11 + $0x194] sm:$0xf] %v381_v37  ;;  %v509_v37 = vld [vmem:[%s5789_s10 + $0x528] sm:$0xf] }
  0x81   : > { %384 = vst [vmem:[%s5794_s11 + $0x198] sm:$0xf] %v383_v38  ;;  %v511_v38 = vld [vmem:[%s5789_s10 + $0x530] sm:$0xf] }
  0x82   : > { %386 = vst [vmem:[%s5794_s11 + $0x19c] sm:$0xf] %v385_v39  ;;  %v513_v39 = vld [vmem:[%s5789_s10 + $0x538] sm:$0xf] }
  0x83   : > { %388 = vst [vmem:[%s5794_s11 + $0x1a0] sm:$0xf] %v387_v40  ;;  %v515_v40 = vld [vmem:[%s5789_s10 + $0x540] sm:$0xf] }
  0x84   : > { %390 = vst [vmem:[%s5794_s11 + $0x1a4] sm:$0xf] %v389_v41  ;;  %v517_v41 = vld [vmem:[%s5789_s10 + $0x548] sm:$0xf] }
  0x85   : > { %392 = vst [vmem:[%s5794_s11 + $0x1a8] sm:$0xf] %v391_v42  ;;  %v519_v42 = vld [vmem:[%s5789_s10 + $0x550] sm:$0xf] }
  0x86   : > { %394 = vst [vmem:[%s5794_s11 + $0x1ac] sm:$0xf] %v393_v43  ;;  %v521_v43 = vld [vmem:[%s5789_s10 + $0x558] sm:$0xf] }
  0x87   : > { %396 = vst [vmem:[%s5794_s11 + $0x1b0] sm:$0xf] %v395_v44  ;;  %v523_v44 = vld [vmem:[%s5789_s10 + $0x560] sm:$0xf] }
  0x88   : > { %398 = vst [vmem:[%s5794_s11 + $0x1b4] sm:$0xf] %v397_v45  ;;  %v525_v45 = vld [vmem:[%s5789_s10 + $0x568] sm:$0xf] }
  0x89   : > { %400 = vst [vmem:[%s5794_s11 + $0x1b8] sm:$0xf] %v399_v46  ;;  %v527_v46 = vld [vmem:[%s5789_s10 + $0x570] sm:$0xf] }
  0x8a   : > { %402 = vst [vmem:[%s5794_s11 + $0x1bc] sm:$0xf] %v401_v47  ;;  %v529_v47 = vld [vmem:[%s5789_s10 + $0x578] sm:$0xf] }
  0x8b   : > { %404 = vst [vmem:[%s5794_s11 + $0x1c0] sm:$0xf] %v403_v48  ;;  %v531_v48 = vld [vmem:[%s5789_s10 + $0x580] sm:$0xf] }
  0x8c   : > { %406 = vst [vmem:[%s5794_s11 + $0x1c4] sm:$0xf] %v405_v49  ;;  %v533_v49 = vld [vmem:[%s5789_s10 + $0x588] sm:$0xf] }
  0x8d   : > { %408 = vst [vmem:[%s5794_s11 + $0x1c8] sm:$0xf] %v407_v50  ;;  %v535_v50 = vld [vmem:[%s5789_s10 + $0x590] sm:$0xf] }
  0x8e   : > { %410 = vst [vmem:[%s5794_s11 + $0x1cc] sm:$0xf] %v409_v51  ;;  %v537_v51 = vld [vmem:[%s5789_s10 + $0x598] sm:$0xf] }
  0x8f   : > { %412 = vst [vmem:[%s5794_s11 + $0x1d0] sm:$0xf] %v411_v52  ;;  %v539_v52 = vld [vmem:[%s5789_s10 + $0x5a0] sm:$0xf] }
  0x90   : > { %414 = vst [vmem:[%s5794_s11 + $0x1d4] sm:$0xf] %v413_v53  ;;  %v541_v53 = vld [vmem:[%s5789_s10 + $0x5a8] sm:$0xf] }
  0x91   : > { %416 = vst [vmem:[%s5794_s11 + $0x1d8] sm:$0xf] %v415_v54  ;;  %v543_v54 = vld [vmem:[%s5789_s10 + $0x5b0] sm:$0xf] }
  0x92   : > { %418 = vst [vmem:[%s5794_s11 + $0x1dc] sm:$0xf] %v417_v55  ;;  %v545_v55 = vld [vmem:[%s5789_s10 + $0x5b8] sm:$0xf] }
  0x93   : > { %420 = vst [vmem:[%s5794_s11 + $0x1e0] sm:$0xf] %v419_v56  ;;  %v547_v56 = vld [vmem:[%s5789_s10 + $0x5c0] sm:$0xf] }
  0x94   : > { %422 = vst [vmem:[%s5794_s11 + $0x1e4] sm:$0xf] %v421_v57  ;;  %v549_v57 = vld [vmem:[%s5789_s10 + $0x5c8] sm:$0xf] }
  0x95   : > { %424 = vst [vmem:[%s5794_s11 + $0x1e8] sm:$0xf] %v423_v58  ;;  %v551_v58 = vld [vmem:[%s5789_s10 + $0x5d0] sm:$0xf] }
  0x96   : > { %426 = vst [vmem:[%s5794_s11 + $0x1ec] sm:$0xf] %v425_v59  ;;  %v553_v59 = vld [vmem:[%s5789_s10 + $0x5d8] sm:$0xf] }
  0x97   : > { %428 = vst [vmem:[%s5794_s11 + $0x1f0] sm:$0xf] %v427_v60  ;;  %v555_v60 = vld [vmem:[%s5789_s10 + $0x5e0] sm:$0xf] }
  0x98   : > { %430 = vst [vmem:[%s5794_s11 + $0x1f4] sm:$0xf] %v429_v61  ;;  %v557_v61 = vld [vmem:[%s5789_s10 + $0x5e8] sm:$0xf] }
  0x99   : > { %432 = vst [vmem:[%s5794_s11 + $0x1f8] sm:$0xf] %v431_v62  ;;  %v559_v62 = vld [vmem:[%s5789_s10 + $0x5f0] sm:$0xf] }
  0x9a   : > { %434 = vst [vmem:[%s5794_s11 + $0x1fc] sm:$0xf] %v433_v63  ;;  %v561_v63 = vld [vmem:[%s5789_s10 + $0x5f8] sm:$0xf] }
  0x9b   : > { %436 = vst [vmem:[%s5794_s11 + $0x200] sm:$0xf] %v435_v0  ;;  %v563_v0 = vld [vmem:[%s5789_s10 + $0x600] sm:$0xf] }
  0x9c   : > { %438 = vst [vmem:[%s5794_s11 + $0x204] sm:$0xf] %v437_v1  ;;  %v565_v1 = vld [vmem:[%s5789_s10 + $0x608] sm:$0xf] }
  0x9d   : > { %440 = vst [vmem:[%s5794_s11 + $0x208] sm:$0xf] %v439_v2  ;;  %v567_v2 = vld [vmem:[%s5789_s10 + $0x610] sm:$0xf] }
  0x9e   : > { %442 = vst [vmem:[%s5794_s11 + $0x20c] sm:$0xf] %v441_v3  ;;  %v569_v3 = vld [vmem:[%s5789_s10 + $0x618] sm:$0xf] }
  0x9f   : > { %444 = vst [vmem:[%s5794_s11 + $0x210] sm:$0xf] %v443_v4  ;;  %v571_v4 = vld [vmem:[%s5789_s10 + $0x620] sm:$0xf] }
  0xa0   : > { %446 = vst [vmem:[%s5794_s11 + $0x214] sm:$0xf] %v445_v5  ;;  %v573_v5 = vld [vmem:[%s5789_s10 + $0x628] sm:$0xf] }
  0xa1   : > { %448 = vst [vmem:[%s5794_s11 + $0x218] sm:$0xf] %v447_v6  ;;  %v575_v6 = vld [vmem:[%s5789_s10 + $0x630] sm:$0xf] }
  0xa2   : > { %450 = vst [vmem:[%s5794_s11 + $0x21c] sm:$0xf] %v449_v7  ;;  %v577_v7 = vld [vmem:[%s5789_s10 + $0x638] sm:$0xf] }
  0xa3   : > { %452 = vst [vmem:[%s5794_s11 + $0x220] sm:$0xf] %v451_v8  ;;  %v579_v8 = vld [vmem:[%s5789_s10 + $0x640] sm:$0xf] }
  0xa4   : > { %454 = vst [vmem:[%s5794_s11 + $0x224] sm:$0xf] %v453_v9  ;;  %v581_v9 = vld [vmem:[%s5789_s10 + $0x648] sm:$0xf] }
  0xa5   : > { %456 = vst [vmem:[%s5794_s11 + $0x228] sm:$0xf] %v455_v10  ;;  %v583_v10 = vld [vmem:[%s5789_s10 + $0x650] sm:$0xf] }
  0xa6   : > { %458 = vst [vmem:[%s5794_s11 + $0x22c] sm:$0xf] %v457_v11  ;;  %v585_v11 = vld [vmem:[%s5789_s10 + $0x658] sm:$0xf] }
  0xa7   : > { %460 = vst [vmem:[%s5794_s11 + $0x230] sm:$0xf] %v459_v12  ;;  %v587_v12 = vld [vmem:[%s5789_s10 + $0x660] sm:$0xf] }
  0xa8   : > { %462 = vst [vmem:[%s5794_s11 + $0x234] sm:$0xf] %v461_v13  ;;  %v589_v13 = vld [vmem:[%s5789_s10 + $0x668] sm:$0xf] }
  0xa9   : > { %464 = vst [vmem:[%s5794_s11 + $0x238] sm:$0xf] %v463_v14  ;;  %v591_v14 = vld [vmem:[%s5789_s10 + $0x670] sm:$0xf] }
  0xaa   : > { %466 = vst [vmem:[%s5794_s11 + $0x23c] sm:$0xf] %v465_v15  ;;  %v593_v15 = vld [vmem:[%s5789_s10 + $0x678] sm:$0xf] }
  0xab   : > { %468 = vst [vmem:[%s5794_s11 + $0x240] sm:$0xf] %v467_v16  ;;  %v595_v16 = vld [vmem:[%s5789_s10 + $0x680] sm:$0xf] }
  0xac   : > { %470 = vst [vmem:[%s5794_s11 + $0x244] sm:$0xf] %v469_v17  ;;  %v597_v17 = vld [vmem:[%s5789_s10 + $0x688] sm:$0xf] }
  0xad   : > { %472 = vst [vmem:[%s5794_s11 + $0x248] sm:$0xf] %v471_v18  ;;  %v599_v18 = vld [vmem:[%s5789_s10 + $0x690] sm:$0xf] }
  0xae   : > { %474 = vst [vmem:[%s5794_s11 + $0x24c] sm:$0xf] %v473_v19  ;;  %v601_v19 = vld [vmem:[%s5789_s10 + $0x698] sm:$0xf] }
  0xaf   : > { %476 = vst [vmem:[%s5794_s11 + $0x250] sm:$0xf] %v475_v20  ;;  %v603_v20 = vld [vmem:[%s5789_s10 + $0x6a0] sm:$0xf] }
  0xb0   : > { %478 = vst [vmem:[%s5794_s11 + $0x254] sm:$0xf] %v477_v21  ;;  %v605_v21 = vld [vmem:[%s5789_s10 + $0x6a8] sm:$0xf] }
  0xb1   : > { %480 = vst [vmem:[%s5794_s11 + $0x258] sm:$0xf] %v479_v22  ;;  %v607_v22 = vld [vmem:[%s5789_s10 + $0x6b0] sm:$0xf] }
  0xb2   : > { %482 = vst [vmem:[%s5794_s11 + $0x25c] sm:$0xf] %v481_v23  ;;  %v609_v23 = vld [vmem:[%s5789_s10 + $0x6b8] sm:$0xf] }
  0xb3   : > { %484 = vst [vmem:[%s5794_s11 + $0x260] sm:$0xf] %v483_v24  ;;  %v611_v24 = vld [vmem:[%s5789_s10 + $0x6c0] sm:$0xf] }
  0xb4   : > { %486 = vst [vmem:[%s5794_s11 + $0x264] sm:$0xf] %v485_v25  ;;  %v613_v25 = vld [vmem:[%s5789_s10 + $0x6c8] sm:$0xf] }
  0xb5   : > { %488 = vst [vmem:[%s5794_s11 + $0x268] sm:$0xf] %v487_v26  ;;  %v615_v26 = vld [vmem:[%s5789_s10 + $0x6d0] sm:$0xf] }
  0xb6   : > { %490 = vst [vmem:[%s5794_s11 + $0x26c] sm:$0xf] %v489_v27  ;;  %v617_v27 = vld [vmem:[%s5789_s10 + $0x6d8] sm:$0xf] }
  0xb7   : > { %492 = vst [vmem:[%s5794_s11 + $0x270] sm:$0xf] %v491_v28  ;;  %v619_v28 = vld [vmem:[%s5789_s10 + $0x6e0] sm:$0xf] }
  0xb8   : > { %494 = vst [vmem:[%s5794_s11 + $0x274] sm:$0xf] %v493_v29  ;;  %v621_v29 = vld [vmem:[%s5789_s10 + $0x6e8] sm:$0xf] }
  0xb9   : > { %496 = vst [vmem:[%s5794_s11 + $0x278] sm:$0xf] %v495_v30  ;;  %v623_v30 = vld [vmem:[%s5789_s10 + $0x6f0] sm:$0xf] }
  0xba   : > { %498 = vst [vmem:[%s5794_s11 + $0x27c] sm:$0xf] %v497_v31  ;;  %v625_v31 = vld [vmem:[%s5789_s10 + $0x6f8] sm:$0xf] }
  0xbb   : > { %500 = vst [vmem:[%s5794_s11 + $0x280] sm:$0xf] %v499_v32  ;;  %v627_v32 = vld [vmem:[%s5789_s10 + $0x700] sm:$0xf] }
  0xbc   : > { %502 = vst [vmem:[%s5794_s11 + $0x284] sm:$0xf] %v501_v33  ;;  %v629_v33 = vld [vmem:[%s5789_s10 + $0x708] sm:$0xf] }
  0xbd   : > { %504 = vst [vmem:[%s5794_s11 + $0x288] sm:$0xf] %v503_v34  ;;  %v631_v34 = vld [vmem:[%s5789_s10 + $0x710] sm:$0xf] }
  0xbe   : > { %506 = vst [vmem:[%s5794_s11 + $0x28c] sm:$0xf] %v505_v35  ;;  %v633_v35 = vld [vmem:[%s5789_s10 + $0x718] sm:$0xf] }
  0xbf   : > { %508 = vst [vmem:[%s5794_s11 + $0x290] sm:$0xf] %v507_v36  ;;  %v635_v36 = vld [vmem:[%s5789_s10 + $0x720] sm:$0xf] }
  0xc0   : > { %510 = vst [vmem:[%s5794_s11 + $0x294] sm:$0xf] %v509_v37  ;;  %v637_v37 = vld [vmem:[%s5789_s10 + $0x728] sm:$0xf] }
  0xc1   : > { %512 = vst [vmem:[%s5794_s11 + $0x298] sm:$0xf] %v511_v38  ;;  %v639_v38 = vld [vmem:[%s5789_s10 + $0x730] sm:$0xf] }
  0xc2   : > { %514 = vst [vmem:[%s5794_s11 + $0x29c] sm:$0xf] %v513_v39  ;;  %v641_v39 = vld [vmem:[%s5789_s10 + $0x738] sm:$0xf] }
  0xc3   : > { %516 = vst [vmem:[%s5794_s11 + $0x2a0] sm:$0xf] %v515_v40  ;;  %v643_v40 = vld [vmem:[%s5789_s10 + $0x740] sm:$0xf] }
  0xc4   : > { %518 = vst [vmem:[%s5794_s11 + $0x2a4] sm:$0xf] %v517_v41  ;;  %v645_v41 = vld [vmem:[%s5789_s10 + $0x748] sm:$0xf] }
  0xc5   : > { %520 = vst [vmem:[%s5794_s11 + $0x2a8] sm:$0xf] %v519_v42  ;;  %v647_v42 = vld [vmem:[%s5789_s10 + $0x750] sm:$0xf] }
  0xc6   : > { %522 = vst [vmem:[%s5794_s11 + $0x2ac] sm:$0xf] %v521_v43  ;;  %v649_v43 = vld [vmem:[%s5789_s10 + $0x758] sm:$0xf] }
  0xc7   : > { %524 = vst [vmem:[%s5794_s11 + $0x2b0] sm:$0xf] %v523_v44  ;;  %v651_v44 = vld [vmem:[%s5789_s10 + $0x760] sm:$0xf] }
  0xc8   : > { %526 = vst [vmem:[%s5794_s11 + $0x2b4] sm:$0xf] %v525_v45  ;;  %v653_v45 = vld [vmem:[%s5789_s10 + $0x768] sm:$0xf] }
  0xc9   : > { %528 = vst [vmem:[%s5794_s11 + $0x2b8] sm:$0xf] %v527_v46  ;;  %v655_v46 = vld [vmem:[%s5789_s10 + $0x770] sm:$0xf] }
  0xca   : > { %530 = vst [vmem:[%s5794_s11 + $0x2bc] sm:$0xf] %v529_v47  ;;  %v657_v47 = vld [vmem:[%s5789_s10 + $0x778] sm:$0xf] }
  0xcb   : > { %532 = vst [vmem:[%s5794_s11 + $0x2c0] sm:$0xf] %v531_v48  ;;  %v659_v48 = vld [vmem:[%s5789_s10 + $0x780] sm:$0xf] }
  0xcc   : > { %534 = vst [vmem:[%s5794_s11 + $0x2c4] sm:$0xf] %v533_v49  ;;  %v661_v49 = vld [vmem:[%s5789_s10 + $0x788] sm:$0xf] }
  0xcd   : > { %536 = vst [vmem:[%s5794_s11 + $0x2c8] sm:$0xf] %v535_v50  ;;  %v663_v50 = vld [vmem:[%s5789_s10 + $0x790] sm:$0xf] }
  0xce   : > { %538 = vst [vmem:[%s5794_s11 + $0x2cc] sm:$0xf] %v537_v51  ;;  %v665_v51 = vld [vmem:[%s5789_s10 + $0x798] sm:$0xf] }
  0xcf   : > { %540 = vst [vmem:[%s5794_s11 + $0x2d0] sm:$0xf] %v539_v52  ;;  %v667_v52 = vld [vmem:[%s5789_s10 + $0x7a0] sm:$0xf] }
  0xd0   : > { %542 = vst [vmem:[%s5794_s11 + $0x2d4] sm:$0xf] %v541_v53  ;;  %v669_v53 = vld [vmem:[%s5789_s10 + $0x7a8] sm:$0xf] }
  0xd1   : > { %544 = vst [vmem:[%s5794_s11 + $0x2d8] sm:$0xf] %v543_v54  ;;  %v671_v54 = vld [vmem:[%s5789_s10 + $0x7b0] sm:$0xf] }
  0xd2   : > { %546 = vst [vmem:[%s5794_s11 + $0x2dc] sm:$0xf] %v545_v55  ;;  %v673_v55 = vld [vmem:[%s5789_s10 + $0x7b8] sm:$0xf] }
  0xd3   : > { %548 = vst [vmem:[%s5794_s11 + $0x2e0] sm:$0xf] %v547_v56  ;;  %v675_v56 = vld [vmem:[%s5789_s10 + $0x7c0] sm:$0xf] }
  0xd4   : > { %550 = vst [vmem:[%s5794_s11 + $0x2e4] sm:$0xf] %v549_v57  ;;  %v677_v57 = vld [vmem:[%s5789_s10 + $0x7c8] sm:$0xf] }
  0xd5   : > { %552 = vst [vmem:[%s5794_s11 + $0x2e8] sm:$0xf] %v551_v58  ;;  %v679_v58 = vld [vmem:[%s5789_s10 + $0x7d0] sm:$0xf] }
  0xd6   : > { %554 = vst [vmem:[%s5794_s11 + $0x2ec] sm:$0xf] %v553_v59  ;;  %v681_v59 = vld [vmem:[%s5789_s10 + $0x7d8] sm:$0xf] }
  0xd7   : > { %556 = vst [vmem:[%s5794_s11 + $0x2f0] sm:$0xf] %v555_v60  ;;  %v683_v60 = vld [vmem:[%s5789_s10 + $0x7e0] sm:$0xf] }
  0xd8   : > { %558 = vst [vmem:[%s5794_s11 + $0x2f4] sm:$0xf] %v557_v61  ;;  %v685_v61 = vld [vmem:[%s5789_s10 + $0x7e8] sm:$0xf] }
  0xd9   : > { %560 = vst [vmem:[%s5794_s11 + $0x2f8] sm:$0xf] %v559_v62  ;;  %v687_v62 = vld [vmem:[%s5789_s10 + $0x7f0] sm:$0xf] }
  0xda   : > { %562 = vst [vmem:[%s5794_s11 + $0x2fc] sm:$0xf] %v561_v63  ;;  %v689_v63 = vld [vmem:[%s5789_s10 + $0x7f8] sm:$0xf] }
  0xdb   : > { %564 = vst [vmem:[%s5794_s11 + $0x300] sm:$0xf] %v563_v0  ;;  %v691_v0 = vld [vmem:[%s5789_s10 + $0x800] sm:$0xf] }
  0xdc   : > { %566 = vst [vmem:[%s5794_s11 + $0x304] sm:$0xf] %v565_v1  ;;  %v693_v1 = vld [vmem:[%s5789_s10 + $0x808] sm:$0xf] }
  0xdd   : > { %568 = vst [vmem:[%s5794_s11 + $0x308] sm:$0xf] %v567_v2  ;;  %v695_v2 = vld [vmem:[%s5789_s10 + $0x810] sm:$0xf] }
  0xde   : > { %570 = vst [vmem:[%s5794_s11 + $0x30c] sm:$0xf] %v569_v3  ;;  %v697_v3 = vld [vmem:[%s5789_s10 + $0x818] sm:$0xf] }
  0xdf   : > { %572 = vst [vmem:[%s5794_s11 + $0x310] sm:$0xf] %v571_v4  ;;  %v699_v4 = vld [vmem:[%s5789_s10 + $0x820] sm:$0xf] }
  0xe0   : > { %574 = vst [vmem:[%s5794_s11 + $0x314] sm:$0xf] %v573_v5  ;;  %v701_v5 = vld [vmem:[%s5789_s10 + $0x828] sm:$0xf] }
  0xe1   : > { %576 = vst [vmem:[%s5794_s11 + $0x318] sm:$0xf] %v575_v6  ;;  %v703_v6 = vld [vmem:[%s5789_s10 + $0x830] sm:$0xf] }
  0xe2   : > { %578 = vst [vmem:[%s5794_s11 + $0x31c] sm:$0xf] %v577_v7  ;;  %v705_v7 = vld [vmem:[%s5789_s10 + $0x838] sm:$0xf] }
  0xe3   : > { %580 = vst [vmem:[%s5794_s11 + $0x320] sm:$0xf] %v579_v8  ;;  %v707_v8 = vld [vmem:[%s5789_s10 + $0x840] sm:$0xf] }
  0xe4   : > { %582 = vst [vmem:[%s5794_s11 + $0x324] sm:$0xf] %v581_v9  ;;  %v709_v9 = vld [vmem:[%s5789_s10 + $0x848] sm:$0xf] }
  0xe5   : > { %584 = vst [vmem:[%s5794_s11 + $0x328] sm:$0xf] %v583_v10  ;;  %v711_v10 = vld [vmem:[%s5789_s10 + $0x850] sm:$0xf] }
  0xe6   : > { %586 = vst [vmem:[%s5794_s11 + $0x32c] sm:$0xf] %v585_v11  ;;  %v713_v11 = vld [vmem:[%s5789_s10 + $0x858] sm:$0xf] }
  0xe7   : > { %588 = vst [vmem:[%s5794_s11 + $0x330] sm:$0xf] %v587_v12  ;;  %v715_v12 = vld [vmem:[%s5789_s10 + $0x860] sm:$0xf] }
  0xe8   : > { %590 = vst [vmem:[%s5794_s11 + $0x334] sm:$0xf] %v589_v13  ;;  %v717_v13 = vld [vmem:[%s5789_s10 + $0x868] sm:$0xf] }
  0xe9   : > { %592 = vst [vmem:[%s5794_s11 + $0x338] sm:$0xf] %v591_v14  ;;  %v719_v14 = vld [vmem:[%s5789_s10 + $0x870] sm:$0xf] }
  0xea   : > { %594 = vst [vmem:[%s5794_s11 + $0x33c] sm:$0xf] %v593_v15  ;;  %v721_v15 = vld [vmem:[%s5789_s10 + $0x878] sm:$0xf] }
  0xeb   : > { %596 = vst [vmem:[%s5794_s11 + $0x340] sm:$0xf] %v595_v16  ;;  %v723_v16 = vld [vmem:[%s5789_s10 + $0x880] sm:$0xf] }
  0xec   : > { %598 = vst [vmem:[%s5794_s11 + $0x344] sm:$0xf] %v597_v17  ;;  %v725_v17 = vld [vmem:[%s5789_s10 + $0x888] sm:$0xf] }
  0xed   : > { %600 = vst [vmem:[%s5794_s11 + $0x348] sm:$0xf] %v599_v18  ;;  %v727_v18 = vld [vmem:[%s5789_s10 + $0x890] sm:$0xf] }
  0xee   : > { %602 = vst [vmem:[%s5794_s11 + $0x34c] sm:$0xf] %v601_v19  ;;  %v729_v19 = vld [vmem:[%s5789_s10 + $0x898] sm:$0xf] }
  0xef   : > { %604 = vst [vmem:[%s5794_s11 + $0x350] sm:$0xf] %v603_v20  ;;  %v731_v20 = vld [vmem:[%s5789_s10 + $0x8a0] sm:$0xf] }
  0xf0   : > { %606 = vst [vmem:[%s5794_s11 + $0x354] sm:$0xf] %v605_v21  ;;  %v733_v21 = vld [vmem:[%s5789_s10 + $0x8a8] sm:$0xf] }
  0xf1   : > { %608 = vst [vmem:[%s5794_s11 + $0x358] sm:$0xf] %v607_v22  ;;  %v735_v22 = vld [vmem:[%s5789_s10 + $0x8b0] sm:$0xf] }
  0xf2   : > { %610 = vst [vmem:[%s5794_s11 + $0x35c] sm:$0xf] %v609_v23  ;;  %v737_v23 = vld [vmem:[%s5789_s10 + $0x8b8] sm:$0xf] }
  0xf3   : > { %612 = vst [vmem:[%s5794_s11 + $0x360] sm:$0xf] %v611_v24  ;;  %v739_v24 = vld [vmem:[%s5789_s10 + $0x8c0] sm:$0xf] }
  0xf4   : > { %614 = vst [vmem:[%s5794_s11 + $0x364] sm:$0xf] %v613_v25  ;;  %v741_v25 = vld [vmem:[%s5789_s10 + $0x8c8] sm:$0xf] }
  0xf5   : > { %616 = vst [vmem:[%s5794_s11 + $0x368] sm:$0xf] %v615_v26  ;;  %v743_v26 = vld [vmem:[%s5789_s10 + $0x8d0] sm:$0xf] }
  0xf6   : > { %618 = vst [vmem:[%s5794_s11 + $0x36c] sm:$0xf] %v617_v27  ;;  %v745_v27 = vld [vmem:[%s5789_s10 + $0x8d8] sm:$0xf] }
  0xf7   : > { %620 = vst [vmem:[%s5794_s11 + $0x370] sm:$0xf] %v619_v28  ;;  %v747_v28 = vld [vmem:[%s5789_s10 + $0x8e0] sm:$0xf] }
  0xf8   : > { %622 = vst [vmem:[%s5794_s11 + $0x374] sm:$0xf] %v621_v29  ;;  %v749_v29 = vld [vmem:[%s5789_s10 + $0x8e8] sm:$0xf] }
  0xf9   : > { %624 = vst [vmem:[%s5794_s11 + $0x378] sm:$0xf] %v623_v30  ;;  %v751_v30 = vld [vmem:[%s5789_s10 + $0x8f0] sm:$0xf] }
  0xfa   : > { %626 = vst [vmem:[%s5794_s11 + $0x37c] sm:$0xf] %v625_v31  ;;  %v753_v31 = vld [vmem:[%s5789_s10 + $0x8f8] sm:$0xf] }
  0xfb   : > { %628 = vst [vmem:[%s5794_s11 + $0x380] sm:$0xf] %v627_v32 }
  0xfc   : > { %630 = vst [vmem:[%s5794_s11 + $0x384] sm:$0xf] %v629_v33 }
  0xfd   : > { %632 = vst [vmem:[%s5794_s11 + $0x388] sm:$0xf] %v631_v34 }
  0xfe   : > { %634 = vst [vmem:[%s5794_s11 + $0x38c] sm:$0xf] %v633_v35 }
  0xff   : > { %636 = vst [vmem:[%s5794_s11 + $0x390] sm:$0xf] %v635_v36 }
 0x100   : > { %638 = vst [vmem:[%s5794_s11 + $0x394] sm:$0xf] %v637_v37 }
 0x101   : > { %640 = vst [vmem:[%s5794_s11 + $0x398] sm:$0xf] %v639_v38 }
 0x102   : > { %642 = vst [vmem:[%s5794_s11 + $0x39c] sm:$0xf] %v641_v39 }
 0x103   : > { %644 = vst [vmem:[%s5794_s11 + $0x3a0] sm:$0xf] %v643_v40 }
 0x104   : > { %646 = vst [vmem:[%s5794_s11 + $0x3a4] sm:$0xf] %v645_v41 }
 0x105   : > { %648 = vst [vmem:[%s5794_s11 + $0x3a8] sm:$0xf] %v647_v42 }
 0x106   : > { %650 = vst [vmem:[%s5794_s11 + $0x3ac] sm:$0xf] %v649_v43 }
 0x107   : > { %652 = vst [vmem:[%s5794_s11 + $0x3b0] sm:$0xf] %v651_v44 }
 0x108   : > { %654 = vst [vmem:[%s5794_s11 + $0x3b4] sm:$0xf] %v653_v45 }
 0x109   : > { %656 = vst [vmem:[%s5794_s11 + $0x3b8] sm:$0xf] %v655_v46 }
 0x10a   : > { %658 = vst [vmem:[%s5794_s11 + $0x3bc] sm:$0xf] %v657_v47 }
 0x10b   : > { %660 = vst [vmem:[%s5794_s11 + $0x3c0] sm:$0xf] %v659_v48 }
 0x10c   : > { %662 = vst [vmem:[%s5794_s11 + $0x3c4] sm:$0xf] %v661_v49 }
 0x10d   : > { %664 = vst [vmem:[%s5794_s11 + $0x3c8] sm:$0xf] %v663_v50 }
 0x10e   : > { %666 = vst [vmem:[%s5794_s11 + $0x3cc] sm:$0xf] %v665_v51 }
 0x10f   : > { %668 = vst [vmem:[%s5794_s11 + $0x3d0] sm:$0xf] %v667_v52 }
 0x110   : > { %670 = vst [vmem:[%s5794_s11 + $0x3d4] sm:$0xf] %v669_v53 }
 0x111   : > { %672 = vst [vmem:[%s5794_s11 + $0x3d8] sm:$0xf] %v671_v54 }
 0x112   : > { %674 = vst [vmem:[%s5794_s11 + $0x3dc] sm:$0xf] %v673_v55 }
 0x113   : > { %676 = vst [vmem:[%s5794_s11 + $0x3e0] sm:$0xf] %v675_v56 }
 0x114   : > { %678 = vst [vmem:[%s5794_s11 + $0x3e4] sm:$0xf] %v677_v57 }
 0x115   : > { %680 = vst [vmem:[%s5794_s11 + $0x3e8] sm:$0xf] %v679_v58 }
 0x116   : > { %682 = vst [vmem:[%s5794_s11 + $0x3ec] sm:$0xf] %v681_v59 }
 0x117   : > { %684 = vst [vmem:[%s5794_s11 + $0x3f0] sm:$0xf] %v683_v60 }
 0x118   : > { %686 = vst [vmem:[%s5794_s11 + $0x3f4] sm:$0xf] %v685_v61 }
 0x119   : > { %688 = vst [vmem:[%s5794_s11 + $0x3f8] sm:$0xf] %v687_v62 }
 0x11a   : > { %690 = vst [vmem:[%s5794_s11 + $0x3fc] sm:$0xf] %v689_v63 }
 0x11b   : > { %692 = vst [vmem:[%s5794_s11 + $0x400] sm:$0xf] %v691_v0 }
 0x11c   : > { %694 = vst [vmem:[%s5794_s11 + $0x404] sm:$0xf] %v693_v1 }
 0x11d   : > { %696 = vst [vmem:[%s5794_s11 + $0x408] sm:$0xf] %v695_v2 }
 0x11e   : > { %698 = vst [vmem:[%s5794_s11 + $0x40c] sm:$0xf] %v697_v3 }
 0x11f   : > { %700 = vst [vmem:[%s5794_s11 + $0x410] sm:$0xf] %v699_v4 }
 0x120   : > { %702 = vst [vmem:[%s5794_s11 + $0x414] sm:$0xf] %v701_v5 }
 0x121   : > { %704 = vst [vmem:[%s5794_s11 + $0x418] sm:$0xf] %v703_v6 }
 0x122   : > { %706 = vst [vmem:[%s5794_s11 + $0x41c] sm:$0xf] %v705_v7 }
 0x123   : > { %708 = vst [vmem:[%s5794_s11 + $0x420] sm:$0xf] %v707_v8 }
 0x124   : > { %710 = vst [vmem:[%s5794_s11 + $0x424] sm:$0xf] %v709_v9 }
 0x125   : > { %712 = vst [vmem:[%s5794_s11 + $0x428] sm:$0xf] %v711_v10 }
 0x126   : > { %714 = vst [vmem:[%s5794_s11 + $0x42c] sm:$0xf] %v713_v11 }
 0x127   : > { %716 = vst [vmem:[%s5794_s11 + $0x430] sm:$0xf] %v715_v12 }
 0x128   : > { %718 = vst [vmem:[%s5794_s11 + $0x434] sm:$0xf] %v717_v13 }
 0x129   : > { %720 = vst [vmem:[%s5794_s11 + $0x438] sm:$0xf] %v719_v14 }
 0x12a   : > { %722 = vst [vmem:[%s5794_s11 + $0x43c] sm:$0xf] %v721_v15 }
 0x12b   : > { %724 = vst [vmem:[%s5794_s11 + $0x440] sm:$0xf] %v723_v16 }
 0x12c   : > { %726 = vst [vmem:[%s5794_s11 + $0x444] sm:$0xf] %v725_v17 }
 0x12d   : > { %728 = vst [vmem:[%s5794_s11 + $0x448] sm:$0xf] %v727_v18 }
 0x12e   : > { %730 = vst [vmem:[%s5794_s11 + $0x44c] sm:$0xf] %v729_v19 }
 0x12f   : > { %732 = vst [vmem:[%s5794_s11 + $0x450] sm:$0xf] %v731_v20 }
 0x130   : > { %734 = vst [vmem:[%s5794_s11 + $0x454] sm:$0xf] %v733_v21 }
 0x131   : > { %736 = vst [vmem:[%s5794_s11 + $0x458] sm:$0xf] %v735_v22 }
 0x132   : > { %738 = vst [vmem:[%s5794_s11 + $0x45c] sm:$0xf] %v737_v23 }
 0x133   : > { %740 = vst [vmem:[%s5794_s11 + $0x460] sm:$0xf] %v739_v24 }
 0x134   : > { %742 = vst [vmem:[%s5794_s11 + $0x464] sm:$0xf] %v741_v25 }
 0x135   : > { %744 = vst [vmem:[%s5794_s11 + $0x468] sm:$0xf] %v743_v26 }
 0x136   : > { %746 = vst [vmem:[%s5794_s11 + $0x46c] sm:$0xf] %v745_v27 }
 0x137   : > { %748 = vst [vmem:[%s5794_s11 + $0x470] sm:$0xf] %v747_v28 }
 0x138   : > { %750 = vst [vmem:[%s5794_s11 + $0x474] sm:$0xf] %v749_v29 }
 0x139   : > { %752 = vst [vmem:[%s5794_s11 + $0x478] sm:$0xf] %v751_v30 }
 0x13a   : > { %754 = vst [vmem:[%s5794_s11 + $0x47c] sm:$0xf] %v753_v31 }
 0x13b PF: > { %p4638_p11 = scmp.ge.s32.totalorder %s5687_s20, 1  ;;  %p2537_p12 = scmp.lt.s32.totalorder %s5687_s20, 5 }
 0x13d   : > { %p2538_p13 = pnand %p4638_p11, %p2537_p12 }
 0x13e   : > { %s2544_s21 = sand.u32 (!%p2538_p13), 1, %s5663_s14   ;;  %p2574_p0 = scmp.lt.s32.totalorder (!%p2538_p13), %s5675_s17, 1 }
 0x13f   : > { %2541 = sbr.rel (%p2538_p13) target bundleno = 635 (0x27b), region = 80  ;;  %p2579_p1 = scmp.lt.s32.totalorder (!%p2538_p13), %s5671_s16, 1 }
 0x140   : > { %s5540_s24 = smul.u32 (!%p2538_p13), 1152, %s2544_s21  ;;  %s2571_s10 = sand.u32 (!%p2538_p13), 1, %s5655_s12  }
 0x141   : > { %s5541_s11 = smul.u32 (!%p2538_p13), 24, %s2571_s10 }
 0x142   : > { %s6373_s25 = scalar_lea.vmem (!%p2538_p13), [#allocation3], %s5540_s24 }
 0x143   : > { %s2573_s12 = scalar_lea.vmem (!%p2538_p13), [#allocation4], %s5541_s11 }
 0x144   : > { %v5356_v32 = vld [vmem:[%s6373_s25 + $0x38] sm:$0xff]  ;;  %s2575_s26 = scalar_select %p2574_p0, %s5675_s17, 1  ;;  %v5355_v36 = vld [vmem:[%s6373_s25 + $0x30] sm:$0xff]  ;;  %v5354_v40 = vld [vmem:[%s6373_s25 + $0x28] sm:$0xff]  ;;  %vm2821_vm0 = vsmask.f32 7424 }
 0x145   : > { %v5364_v33 = vld [vmem:[%s6373_s25 + $0x78] sm:$0xff]  ;;  %2730 = vmatpush.bf16.msra.mxu0 %v5356_v32  ;;  %v5363_v37 = vld [vmem:[%s6373_s25 + $0x70] sm:$0xff]  ;;  %v5362_v41 = vld [vmem:[%s6373_s25 + $0x68] sm:$0xff]  ;;  %vm3049_vm1 = vcmask 1046528   ;;  %vm3253_vm2 = vcmask 1044480   ;;  %vm3882_vm4 = vcmask 1045504  }
 0x146   : > { %v5376_v34 = vld [vmem:[%s6373_s25 + $0xb8] sm:$0xff]  ;;  %2748 = vmatpush.bf16.msra.mxu1 %v5364_v33  ;;  %v5375_v38 = vld [vmem:[%s6373_s25 + $0xb0] sm:$0xff]  ;;  %s5542_s14 = smul.u32 40, %s2575_s26  ;;  %v5374_v42 = vld [vmem:[%s6373_s25 + $0xa8] sm:$0xff]  ;;  %vm3457_vm3 = vsmask.f32 4352 }
 0x147   : > { %v5384_v35 = vld [vmem:[%s6373_s25 + $0xf8] sm:$0xff]  ;;  %2952 = vmatpush.bf16.msra.mxu2 %v5376_v34  ;;  %v5383_v39 = vld [vmem:[%s6373_s25 + $0xf0] sm:$0xff]  ;;  %v5382_v43 = vld [vmem:[%s6373_s25 + $0xe8] sm:$0xff]  ;;  %vm4086_vm5 = vsmask.f32 5376  ;;  %s6631_s6 = scalar_select %p2579_p1, %s5671_s16, 1 }
 0x148   : > { %2970 = vmatpush.bf16.msra.mxu3 %v5384_v35  ;;  %s6391_s5 = scalar_lea.vmem %s6677_s0, %s5542_s14  ;;  %v5353_v44 = vld [vmem:[%s6373_s25 + $0x20] sm:$0xff]  ;;  %v5352_v52 = vld [vmem:[%s6373_s25 + $0x18] sm:$0xff]  ;;  %v5351_v62 = vld [vmem:[%s6373_s25 + $0x10] sm:$0xff] }
 0x149   : > { %2731 = vmatpush.bf16.msra.mxu0 %v5355_v36  ;;  %v5361_v45 = vld [vmem:[%s6373_s25 + $0x60] sm:$0xff]  ;;  %v5366_v49 = vld [vmem:[%s6391_s5 + $0x4] sm:$0xf0]  ;;  %v4716_v51 = vld [vmem:[%s6391_s5 + $0x8] sm:$0xf0]  ;;  %s2581_s9 = scalar_lea.vmem %s6679_s2, %s6631_s6 }
 0x14a   : > { %2749 = vmatpush.bf16.msra.mxu1 %v5363_v37  ;;  %v5373_v46 = vld [vmem:[%s6373_s25 + $0xa0] sm:$0xff]  ;;  %v5360_v53 = vld [vmem:[%s6373_s25 + $0x58] sm:$0xff]  ;;  %v4722_v56 = vld [vmem:[%s6391_s5 + $0x10] sm:$0xf] }
 0x14b   : > { %2953 = vmatpush.bf16.msra.mxu2 %v5375_v38  ;;  %v5381_v47 = vld [vmem:[%s6373_s25 + $0xe0] sm:$0xff]  ;;  %v5372_v54 = vld [vmem:[%s6373_s25 + $0x98] sm:$0xff]  ;;  %v5367_v60 = vld [vmem:[%s6391_s5 + $0x14] sm:$0xf] }
 0x14c   : > { %2971 = vmatpush.bf16.msra.mxu3 %v5383_v39  ;;  %v4714_v48 = vld [vmem:[%s6391_s5] sm:$0xf]  ;;  %v5365_v50 = vld [vmem:[%s6391_s5 + $0x4] sm:$0xf]  ;;  %v5380_v55 = vld [vmem:[%s6373_s25 + $0xd8] sm:$0xff] }
 0x14d   : > { %2732 = vmatpush.bf16.msra.mxu0 %v5354_v40  ;;  %v5368_v57 = vld [vmem:[%s6391_s5 + $0x14] sm:$0x10]  ;;  %v4715_v58 = vor.u32 %v5366_v49, %v4714_v48  ;;  %v4719_v59 = vor.u32 %v5365_v50, %v4716_v51  ;;  %v4724_v61 = vld [vmem:[%s6391_s5 + $0x18] sm:$0x10]  ;;  %v5359_v63 = vld [vmem:[%s6373_s25 + $0x50] sm:$0xff] }
 0x14e   : > { %2750 = vmatpush.bf16.msra.mxu1 %v5362_v41  ;;  %v6411_v0 = vor.u32 %v5368_v57, %v4722_v56  ;;  %v5371_v1 = vld [vmem:[%s6373_s25 + $0x90] sm:$0xff]  ;;  %v6415_v4 = vor.u32 %v5367_v60, %v4724_v61  ;;  %v5350_v6 = vld [vmem:[%s6373_s25 + $0x8] sm:$0xff]  ;;  %v5349_v16 = vld [vmem:[%s6373_s25] sm:$0xff] }
 0x14f   : > { %2954 = vmatpush.bf16.msra.mxu2 %v5374_v42  ;;  %v5379_v2 = vld [vmem:[%s6373_s25 + $0xd0] sm:$0xff]  ;;  %v2825_v3 = vshll.u32 %v4715_v58, 16  ;;  %v2837_v5 = vshll.u32 %v4719_v59, 16  ;;  %v5358_v7 = vld [vmem:[%s6373_s25 + $0x48] sm:$0xff]  ;;  %v2823_v8 = vshrl.u32 %v4715_v58, 16  ;;  %v2835_v13 = vshrl.u32 %v4719_v59, 16 }
 0x150   : > { %2972 = vmatpush.bf16.msra.mxu3 %v5382_v43  ;;  %v2830_v9 = vshll.u32 %v6411_v0, 16  ;;  %v5370_v10 = vld [vmem:[%s6373_s25 + $0x88] sm:$0xff]  ;;  %v2842_v15 = vshll.u32 %v6415_v4, 16  ;;  %v5357_v17 = vld [vmem:[%s6373_s25 + $0x40] sm:$0xff]  ;;  %v5396_v28 = vld [vmem:[%s6373_s25 + $0x138] sm:$0xff]  ;;  %v2846_v49 = vshrl.u32 %v6411_v0, 16 }
 0x151   : > { %2733 = vmatpush.bf16.msra.mxu0 %v5353_v44  ;;  %v5378_v11 = vld [vmem:[%s6373_s25 + $0xc8] sm:$0xff]  ;;  %v2827_v12 = vrot.slane %v2825_v3, 1  ;;  %v2839_v14 = vrot.slane %v2837_v5, 1  ;;  %v4642_v18 = vld [vmem:[%s6391_s5] sm:$0xf]  ;;  %v5404_v29 = vld [vmem:[%s6373_s25 + $0x178] sm:$0xff] }
 0x152   : > { %2751 = vmatpush.bf16.msra.mxu1 %v5361_v45  ;;  %v5348_v19 = vld [vmem:[%s6391_s5 + $0x4] sm:$0xf0]  ;;  %v5347_v20 = vld [vmem:[%s6391_s5 + $0x4] sm:$0xf]  ;;  %v4644_v21 = vld [vmem:[%s6391_s5 + $0x8] sm:$0xf0] }
 0x153   : > { %2955 = vmatpush.bf16.msra.mxu2 %v5373_v46  ;;  %v5369_v22 = vld [vmem:[%s6373_s25 + $0x80] sm:$0xff]  ;;  %v2828_v24 = vor.u32 %v2827_v12, %v2823_v8  ;;  %v2832_v25 = vrot.slane %v2830_v9, 1  ;;  %v2840_v26 = vor.u32 %v2839_v14, %v2835_v13  ;;  %v2844_v27 = vrot.slane %v2842_v15, 1  ;;  %v5416_v34 = vld [vmem:[%s6373_s25 + $0x1b8] sm:$0xff]  ;;  %v5395_v36 = vld [vmem:[%s6373_s25 + $0x130] sm:$0xff] }
 0x154   : > { %2973 = vmatpush.bf16.msra.mxu3 %v5381_v47  ;;  %v5377_v23 = vld [vmem:[%s6373_s25 + $0xc0] sm:$0xff]  ;;  %v4643_v30 = vor.u32 %v5348_v19, %v4642_v18  ;;  %v4647_v31 = vor.u32 %v5347_v20, %v4644_v21  ;;  %v5424_v35 = vld [vmem:[%s6373_s25 + $0x1f8] sm:$0xff]  ;;  %v5403_v37 = vld [vmem:[%s6373_s25 + $0x170] sm:$0xff]  ;;  %v2849_v50 = vshrl.u32 %v6415_v4, 16 }
 0x155   : > { %2734 = vmatpush.bf16.msra.mxu0 %v5352_v52  ;;  %v2833_v32 = vsel %vm2821_vm0, %v2828_v24, %v2832_v25  ;;  %v2845_v33 = vsel %vm2821_vm0, %v2840_v26, %v2844_v27  ;;  %v5415_v38 = vld [vmem:[%s6373_s25 + $0x1b0] sm:$0xff]  ;;  %v5394_v40 = vld [vmem:[%s6373_s25 + $0x128] sm:$0xff]  ;;  %v5393_v45 = vld [vmem:[%s6373_s25 + $0x120] sm:$0xff]  ;;  %v2848_v57 = vor.u32 %v2846_v49, %v2832_v25 }
 0x156   : > { %2752 = vmatpush.bf16.msra.mxu1 %v5360_v53  ;;  %v5423_v39 = vld [vmem:[%s6373_s25 + $0x1f0] sm:$0xff]  ;;  %v5402_v41 = vld [vmem:[%s6373_s25 + $0x168] sm:$0xff]  ;;  %v5401_v46 = vld [vmem:[%s6373_s25 + $0x160] sm:$0xff]  ;;  %v2851_v58 = vor.u32 %v2849_v50, %v2844_v27 }
 0x157   : > { %2956 = vmatpush.bf16.msra.mxu2 %v5372_v54  ;;  %v2584_v42 = vld [vmem:[%s6391_s5 + $0x10] sm:$0xff]  ;;  %v5414_v43 = vld [vmem:[%s6373_s25 + $0x1a8] sm:$0xff]  ;;  %v5413_v51 = vld [vmem:[%s6373_s25 + $0x1a0] sm:$0xff] }
 0x158   : > { %2974 = vmatpush.bf16.msra.mxu3 %v5380_v55  ;;  %v5422_v44 = vld [vmem:[%s6373_s25 + $0x1e8] sm:$0xff]  ;;  %v2624_v47 = vunpack.c.l.b16 %v2584_v42  ;;  %v2625_v48 = vunpack.c.h.b16 %v2584_v42  ;;  %v5421_v52 = vld [vmem:[%s6373_s25 + $0x1e0] sm:$0xff]  ;;  %v5392_v53 = vld [vmem:[%s6373_s25 + $0x118] sm:$0xff] }
 0x159   : > { %2735 = vmatpush.bf16.msra.mxu0 %v5351_v62  ;;  %v5400_v54 = vld [vmem:[%s6373_s25 + $0x158] sm:$0xff]  ;;  %v5391_v61 = vld [vmem:[%s6373_s25 + $0x110] sm:$0xff]  ;;  %v5386_v0 = vld [vmem:[%s6391_s5 + $0x4] sm:$0xf0] }
 0x15a   : > { %2753 = vmatpush.bf16.msra.mxu1 %v5359_v63  ;;  %v2628_v55 = vpack.c.b16 %v2624_v47, %v2624_v47  ;;  %v2629_v56 = vpack.c.b16 %v2625_v48, %v2625_v48  ;;  %v5412_v59 = vld [vmem:[%s6373_s25 + $0x198] sm:$0xff]  ;;  %v5399_v62 = vld [vmem:[%s6373_s25 + $0x150] sm:$0xff]  ;;  %v4794_v63 = vld [vmem:[%s6391_s5] sm:$0xe] }
 0x15b   : > { %2957 = vmatpush.bf16.msra.mxu2 %v5371_v1  ;;  %v5420_v60 = vld [vmem:[%s6373_s25 + $0x1d8] sm:$0xff]  ;;  %v5411_v1 = vld [vmem:[%s6373_s25 + $0x190] sm:$0xff]  ;;  %v5385_v5 = vld [vmem:[%s6391_s5 + $0x4] sm:$0xe]  ;;  %v4795_v19 = vor.u32 %v5386_v0, %v4794_v63 }
 0x15c   : > { %2975 = vmatpush.bf16.msra.mxu3 %v5379_v2  ;;  %v5419_v2 = vld [vmem:[%s6373_s25 + $0x1d0] sm:$0xff]  ;;  %v5388_v4 = vld [vmem:[%s6391_s5 + $0x14] sm:$0x10]  ;;  %v5390_v8 = vld [vmem:[%s6373_s25 + $0x108] sm:$0xff] }
 0x15d   : > { %2736 = vmatpush.bf16.msra.mxu0 %v5350_v6  ;;  %v4802_v3 = vld [vmem:[%s6391_s5 + $0x10] sm:$0xf]  ;;  %v4796_v6 = vld [vmem:[%s6391_s5 + $0x8] sm:$0xf0]  ;;  %v5406_v12 = vld [vmem:[%s6391_s5 + $0x4] sm:$0xf0] }
 0x15e   : > { %2754 = vmatpush.bf16.msra.mxu1 %v5358_v7  ;;  %v5387_v7 = vld [vmem:[%s6391_s5 + $0x14] sm:$0xf]  ;;  %v5398_v9 = vld [vmem:[%s6373_s25 + $0x148] sm:$0xff]  ;;  %v4882_v13 = vld [vmem:[%s6391_s5 + $0x10] sm:$0xf]  ;;  %v4803_v20 = vor.u32 %v5388_v4, %v4802_v3  ;;  %v4799_v21 = vor.u32 %v5385_v5, %v4796_v6 }
 0x15f   : > { %2958 = vmatpush.bf16.msra.mxu2 %v5370_v10  ;;  %v4804_v10 = vld [vmem:[%s6391_s5 + $0x18] sm:$0x10]  ;;  %v5408_v14 = vld [vmem:[%s6391_s5 + $0x14] sm:$0x70]  ;;  %v5405_v15 = vld [vmem:[%s6391_s5 + $0x4] sm:$0x8] }
 0x160   : > { %2976 = vmatpush.bf16.msra.mxu3 %v5378_v11  ;;  %v4874_v11 = vld [vmem:[%s6391_s5] sm:$0x8]  ;;  %v4884_v18 = vld [vmem:[%s6391_s5 + $0x18] sm:$0x70]  ;;  %v5410_v24 = vld [vmem:[%s6373_s25 + $0x188] sm:$0xff]  ;;  %v4883_v26 = vor.u32 %v5408_v14, %v4882_v13 }
 0x161   : > { %2737 = vmatpush.bf16.msra.mxu0 %v5349_v16  ;;  %v4876_v16 = vld [vmem:[%s6391_s5 + $0x8] sm:$0xf0]  ;;  %v5435_v49 = vld [vmem:[%s6373_s25 + $0x230] sm:$0xff]  ;;  %v4954_v63 = vld [vmem:[%s6391_s5] sm:$0x8] }
 0x162   : > { %2755 = vmatpush.bf16.msra.mxu1 %v5357_v17  ;;  %v5407_v17 = vld [vmem:[%s6391_s5 + $0x14] sm:$0xf]  ;;  %v5418_v25 = vld [vmem:[%s6373_s25 + $0x1c8] sm:$0xff]  ;;  %v4879_v27 = vor.u32 %v5405_v15, %v4876_v16  ;;  %v5425_v3 = vld [vmem:[%s6391_s5 + $0x4] sm:$0x8] }
 0x163   : > { %2959 = vmatpush.bf16.msra.mxu2 %v5369_v22  ;;  %v4807_v22 = vor.u32 %v5387_v7, %v4804_v10  ;;  %v5443_v50 = vld [vmem:[%s6373_s25 + $0x270] sm:$0xff]  ;;  %v5426_v0 = vld [vmem:[%s6391_s5 + $0x4] sm:$0xf0]  ;;  %v4956_v4 = vld [vmem:[%s6391_s5 + $0x8] sm:$0xf0] }
 0x164   : > { %2977 = vmatpush.bf16.msra.mxu3 %v5377_v23  ;;  %2738 = vmatmul.bf16.vlgmr.msra.gmra.mxu0 %v4643_v30  ;;  %v4875_v23 = vor.u32 %v5406_v12, %v4874_v11  ;;  %v5397_v30 = vld [vmem:[%s6373_s25 + $0x140] sm:$0xff]  ;;  %v5427_v5 = vld [vmem:[%s6391_s5 + $0x14] sm:$0xf]  ;;  %v4964_v6 = vld [vmem:[%s6391_s5 + $0x18] sm:$0xf0]  ;;  %v4959_v11 = vor.u32 %v5425_v3, %v4956_v4 }
 0x165   : > { %3156 = vmatpush.bf16.msrb.mxu0 %v5396_v28  ;;  %2756 = vmatmul.bf16.vlgmr.msra.gmra.mxu1 %v4647_v31  ;;  %v4887_v28 = vor.u32 %v5407_v17, %v4884_v18  ;;  %v5436_v31 = vld [vmem:[%s6373_s25 + $0x238] sm:$0xff]  ;;  %v4967_v12 = vor.u32 %v5427_v5, %v4964_v6  ;;  %v5431_v13 = vld [vmem:[%s6373_s25 + $0x210] sm:$0xff]  ;;  %v5491_v4 = vld [vmem:[%s6373_s25 + $0x3a0] sm:$0xff] }
 0x166   : > { %3174 = vmatpush.bf16.msrb.mxu1 %v5404_v29  ;;  %2960 = vmatmul.bf16.vlgmr.msra.gmra.mxu2 %v2833_v32  ;;  %v5389_v29 = vld [vmem:[%s6373_s25 + $0x100] sm:$0xff]  ;;  %v5444_v32 = vld [vmem:[%s6373_s25 + $0x278] sm:$0xff]  ;;  %v5439_v14 = vld [vmem:[%s6373_s25 + $0x250] sm:$0xff] }
 0x167   : > { %2978 = vmatmul.bf16.vlgmr.msra.gmra.mxu3 %v2845_v33  ;;  %3360 = vmatpush.bf16.msrb.mxu2 %v5416_v34  ;;  %v3050_v33 = vrot.slane %v4795_v19, 1  ;;  %v6482_v34 = vrot.slane %v4803_v20, 1  ;;  %v6490_v42 = vrot.slane %v4887_v28, 3  ;;  %v5450_v7 = vld [vmem:[%s6373_s25 + $0x298] sm:$0xff]  ;;  %v5449_v15 = vld [vmem:[%s6373_s25 + $0x290] sm:$0xff]  ;;  %v5456_v28 = vld [vmem:[%s6373_s25 + $0x2c8] sm:$0xff] }
 0x168   : > { %3378 = vmatpush.bf16.msrb.mxu3 %v5424_v35  ;;  %v3053_v35 = vrot.slane %v4799_v21, 1  ;;  %v5457_v16 = vld [vmem:[%s6373_s25 + $0x2d0] sm:$0xff]  ;;  %v3476_v21 = vshrl.u32 %v4959_v11, 16  ;;  %v3639_v3 = vld [vmem:[%s6391_s5 + $0x18] sm:$0xff]  ;;  %v5499_v5 = vld [vmem:[%s6373_s25 + $0x3e0] sm:$0xff] }
 0x169   : > { %3157 = vmatpush.bf16.msrb.mxu0 %v5395_v36  ;;  %v6484_v36 = vrot.slane %v4807_v22, 1  ;;  %v3479_v22 = vshll.u32 %v4959_v11, 16  ;;  %v5470_v6 = vld [vmem:[%s6373_s25 + $0x318] sm:$0xff] }
 0x16a   : > { %3175 = vmatpush.bf16.msrb.mxu1 %v5403_v37  ;;  %v5409_v37 = vld [vmem:[%s6373_s25 + $0x180] sm:$0xff]  ;;  %v5498_v11 = vld [vmem:[%s6373_s25 + $0x3d8] sm:$0xff] }
 0x16b   : > { %3361 = vmatpush.bf16.msrb.mxu2 %v5415_v38  ;;  %v5417_v38 = vld [vmem:[%s6373_s25 + $0x1c0] sm:$0xff] }
 0x16c   : > { %3379 = vmatpush.bf16.msrb.mxu3 %v5423_v39  ;;  %v3254_v39 = vrot.slane %v4875_v23, 3  ;;  %v3484_v23 = vshrl.u32 %v4967_v12, 16 }
 0x16d   : > { %3158 = vmatpush.bf16.msrb.mxu0 %v5394_v40  ;;  %v6488_v40 = vrot.slane %v4883_v26, 3  ;;  %v5438_v26 = vld [vmem:[%s6373_s25 + $0x248] sm:$0xff] }
 0x16e   : > { %3176 = vmatpush.bf16.msrb.mxu1 %v5402_v41  ;;  %v3257_v41 = vrot.slane %v4879_v27, 3  ;;  %v5448_v27 = vld [vmem:[%s6373_s25 + $0x288] sm:$0xff] }
 0x16f   : > { %3362 = vmatpush.bf16.msrb.mxu2 %v5414_v43  ;;  %v5454_v43 = vld [vmem:[%s6373_s25 + $0x2b8] sm:$0xff]  ;;  %v3256_v47 = vsel %vm3253_vm2, %v3254_v39, %v6488_v40  ;;  %v5447_v39 = vld [vmem:[%s6373_s25 + $0x280] sm:$0xff] }
 0x170   : > { %3380 = vmatpush.bf16.msrb.mxu3 %v5422_v44  ;;  %v5462_v44 = vld [vmem:[%s6373_s25 + $0x2f8] sm:$0xff]  ;;  %v3259_v48 = vsel %vm3253_vm2, %v3257_v41, %v6490_v42  ;;  %v5034_v41 = vld [vmem:[%s6391_s5 + $0x8] sm:$0xf] }
 0x171   : > { %3159 = vmatpush.bf16.msrb.mxu0 %v5393_v45  ;;  %v3052_v45 = vsel %vm3049_vm1, %v3050_v33, %v6482_v34  ;;  %v3478_v33 = vrot.slane %v3476_v21, 3 }
 0x172   : > { %3177 = vmatpush.bf16.msrb.mxu1 %v5401_v46  ;;  %v3055_v46 = vsel %vm3049_vm1, %v3053_v35, %v6484_v36  ;;  %v3486_v35 = vrot.slane %v3484_v23, 3 }
 0x173   : > { %3363 = vmatpush.bf16.msrb.mxu2 %v5413_v51  ;;  %v5453_v51 = vld [vmem:[%s6373_s25 + $0x2b0] sm:$0xff] }
 0x174   : > { %3381 = vmatpush.bf16.msrb.mxu3 %v5421_v52  ;;  %2743 = vmatmul.bf16.gmra.mxu0 %v2628_v55  ;;  %v5461_v52 = vld [vmem:[%s6373_s25 + $0x2f0] sm:$0xff]  ;;  %v5452_v55 = vld [vmem:[%s6373_s25 + $0x2a8] sm:$0xff] }
 0x175   : > { %3160 = vmatpush.bf16.msrb.mxu0 %v5392_v53  ;;  %2761 = vmatmul.bf16.gmra.mxu1 %v2629_v56  ;;  %v5434_v53 = vld [vmem:[%s6373_s25 + $0x228] sm:$0xff] }
 0x176   : > { %3178 = vmatpush.bf16.msrb.mxu1 %v5400_v54  ;;  %2965 = vmatmul.bf16.gmra.mxu2 %v2848_v57  ;;  %v5442_v54 = vld [vmem:[%s6373_s25 + $0x268] sm:$0xff]  ;;  %v5433_v57 = vld [vmem:[%s6373_s25 + $0x220] sm:$0xff] }
 0x177   : > { %2983 = vmatmul.bf16.gmra.mxu3 %v2851_v58  ;;  %3364 = vmatpush.bf16.msrb.mxu2 %v5412_v59  ;;  %v5460_v56 = vld [vmem:[%s6373_s25 + $0x2e8] sm:$0xff]  ;;  %v5441_v58 = vld [vmem:[%s6373_s25 + $0x260] sm:$0xff] }
 0x178   : > { %3382 = vmatpush.bf16.msrb.mxu3 %v5420_v60  ;;  %v5451_v59 = vld [vmem:[%s6373_s25 + $0x2a0] sm:$0xff] }
 0x179   : > { %3161 = vmatpush.bf16.msrb.mxu0 %v5391_v61  ;;  %v5459_v60 = vld [vmem:[%s6373_s25 + $0x2e0] sm:$0xff]  ;;  %v5432_v61 = vld [vmem:[%s6373_s25 + $0x218] sm:$0xff] }
 0x17a   : > { %3179 = vmatpush.bf16.msrb.mxu1 %v5399_v62  ;;  %v5440_v62 = vld [vmem:[%s6373_s25 + $0x258] sm:$0xff] }
 0x17b   : > { %3365 = vmatpush.bf16.msrb.mxu2 %v5411_v1  ;;  %v4962_v1 = vld [vmem:[%s6391_s5 + $0x10] sm:$0xf] }
 0x17c   : > { %3383 = vmatpush.bf16.msrb.mxu3 %v5419_v2  ;;  %v5428_v2 = vld [vmem:[%s6391_s5 + $0x14] sm:$0xf0] }
 0x17d   : > { %3162 = vmatpush.bf16.msrb.mxu0 %v5390_v8  ;;  %v5458_v8 = vld [vmem:[%s6373_s25 + $0x2d8] sm:$0xff]  ;;  %v4963_v10 = vor.u32 %v5428_v2, %v4962_v1  ;;  %v5471_v1 = vld [vmem:[%s6373_s25 + $0x320] sm:$0xff] }
 0x17e   : > { %3180 = vmatpush.bf16.msrb.mxu1 %v5398_v9  ;;  %v4955_v9 = vor.u32 %v5426_v0, %v4954_v63  ;;  %v5492_v63 = vld [vmem:[%s6373_s25 + $0x3a8] sm:$0xff]  ;;  %v5479_v2 = vld [vmem:[%s6373_s25 + $0x360] sm:$0xff] }
 0x17f   : > { %3366 = vmatpush.bf16.msrb.mxu2 %v5410_v24  ;;  %v3467_v19 = vshrl.u32 %v4963_v10, 16  ;;  %v3470_v20 = vshll.u32 %v4963_v10, 16  ;;  %v3487_v24 = vshll.u32 %v4967_v12, 16  ;;  %v5500_v0 = vld [vmem:[%s6373_s25 + $0x3e8] sm:$0xff]  ;;  %v5490_v10 = vld [vmem:[%s6373_s25 + $0x398] sm:$0xff] }
 0x180   : > { %3384 = vmatpush.bf16.msrb.mxu3 %v5418_v25  ;;  %v3459_v17 = vshrl.u32 %v4955_v9, 16  ;;  %v3462_v18 = vshll.u32 %v4955_v9, 16  ;;  %v5430_v25 = vld [vmem:[%s6373_s25 + $0x208] sm:$0xff]  ;;  %v3680_v9 = vunpack.c.h.b16 %v3639_v3 }
 0x181   : > { %3163 = vmatpush.bf16.msrb.mxu0 %v5389_v29  ;;  %v5186_v12 = vld [vmem:[%s6391_s5 + $0x8] sm:$0xc] }
 0x182   : > { %3181 = vmatpush.bf16.msrb.mxu1 %v5397_v30  ;;  %v3461_v29 = vrot.slane %v3459_v17, 3  ;;  %v3464_v30 = vrot.slane %v3462_v18, 4  ;;  %v5188_v17 = vld [vmem:[%s6391_s5 + $0x10] sm:$0xf0]  ;;  %v5485_v18 = vld [vmem:[%s6391_s5 + $0x1c] sm:$0xf]  ;;  %v3684_v21 = vpack.c.b16 %v3680_v9, %v3680_v9 }
 0x183   : > { %3367 = vmatpush.bf16.msrb.mxu2 %v5409_v37  ;;  %v5429_v37 = vld [vmem:[%s6373_s25 + $0x200] sm:$0xff] }
 0x184   : > { %3385 = vmatpush.bf16.msrb.mxu3 %v5417_v38  ;;  %3164 = vmatmul.bf16.vlgmr.msrb.gmra.mxu0 %v3052_v45  ;;  %v5437_v38 = vld [vmem:[%s6373_s25 + $0x240] sm:$0xff] }
 0x185   : > { %3592 = vmatpush.bf16.msra.mxu0 %v5436_v31  ;;  %3182 = vmatmul.bf16.vlgmr.msrb.gmra.mxu1 %v3055_v46  ;;  %v3469_v31 = vrot.slane %v3467_v19, 3  ;;  %v5196_v19 = vld [vmem:[%s6391_s5 + $0x20] sm:$0x70] }
 0x186   : > { %3610 = vmatpush.bf16.msra.mxu1 %v5444_v32  ;;  %3368 = vmatmul.bf16.vlgmr.msrb.gmra.mxu2 %v3256_v47  ;;  %v3472_v32 = vrot.slane %v3470_v20, 4 }
 0x187   : > { %3785 = vmatpush.bf16.msra.mxu2 %v5454_v43  ;;  %3386 = vmatmul.bf16.vlgmr.msrb.gmra.mxu3 %v3259_v48  ;;  %v5482_v43 = vld [vmem:[%s6373_s25 + $0x378] sm:$0xff]  ;;  %v5446_v48 = vld [vmem:[%s6391_s5 + $0xc] sm:$0xf0] }
 0x188   : > { %3803 = vmatpush.bf16.msra.mxu3 %v5462_v44  ;;  %v3465_v44 = vor.u32 %v3464_v30, %v3461_v29  ;;  %v6545_v45 = vor.u32 %v3472_v32, %v3469_v31  ;;  %v5199_v29 = vor.u32 %v5485_v18, %v5196_v19  ;;  %v5106_v30 = vld [vmem:[%s6391_s5 + $0x8] sm:$0xc]  ;;  %v5464_v31 = vld [vmem:[%s6391_s5 + $0xc] sm:$0xf0]  ;;  %v5114_v32 = vld [vmem:[%s6391_s5 + $0x18] sm:$0xf] }
 0x189   : > { %3593 = vmatpush.bf16.msra.mxu0 %v5435_v49  ;;  %v5494_v49 = vld [vmem:[%s6373_s25 + $0x3b8] sm:$0xff]  ;;  %v5512_v18 = vld [vmem:[%s6373_s25 + $0x428] sm:$0xff] }
 0x18a   : > { %3611 = vmatpush.bf16.msra.mxu1 %v5443_v50  ;;  %v5502_v50 = vld [vmem:[%s6373_s25 + $0x3f8] sm:$0xff]  ;;  %v5520_v19 = vld [vmem:[%s6373_s25 + $0x468] sm:$0xff] }
 0x18b   : > { %3786 = vmatpush.bf16.msra.mxu2 %v5453_v51  ;;  %v5445_v51 = vld [vmem:[%s6391_s5 + $0xc] sm:$0xf] }
 0x18c   : > { %3804 = vmatpush.bf16.msra.mxu3 %v5461_v52  ;;  %v5036_v52 = vld [vmem:[%s6391_s5 + $0x10] sm:$0xf0] }
 0x18d   : > { %3594 = vmatpush.bf16.msra.mxu0 %v5434_v53  ;;  %v5035_v53 = vor.u32 %v5446_v48, %v5034_v41  ;;  %v5488_v48 = vld [vmem:[%s6373_s25 + $0x388] sm:$0xff] }
 0x18e   : > { %3612 = vmatpush.bf16.msra.mxu1 %v5442_v54  ;;  %v3474_v54 = vsel %vm3457_vm3, %v3465_v44, %v6545_v45 }
 0x18f   : > { %3787 = vmatpush.bf16.msra.mxu2 %v5452_v55 }
 0x190   : > { %3805 = vmatpush.bf16.msra.mxu3 %v5460_v56  ;;  %v5039_v56 = vor.u32 %v5445_v51, %v5036_v52 }
 0x191   : > { %3595 = vmatpush.bf16.msra.mxu0 %v5433_v57  ;;  %v5473_v57 = vld [vmem:[%s6373_s25 + $0x330] sm:$0xff] }
 0x192   : > { %3613 = vmatpush.bf16.msra.mxu1 %v5441_v58  ;;  %v5481_v58 = vld [vmem:[%s6373_s25 + $0x370] sm:$0xff] }
 0x193   : > { %3788 = vmatpush.bf16.msra.mxu2 %v5451_v59  ;;  %v5493_v59 = vld [vmem:[%s6373_s25 + $0x3b0] sm:$0xff] }
 0x194   : > { %3806 = vmatpush.bf16.msra.mxu3 %v5459_v60  ;;  %3169 = vmatmul.bf16.gmra.mxu0 %v6482_v34  ;;  %v3481_v34 = vrot.slane %v3479_v22, 4  ;;  %v5501_v60 = vld [vmem:[%s6373_s25 + $0x3f0] sm:$0xff] }
 0x195   : > { %3596 = vmatpush.bf16.msra.mxu0 %v5432_v61  ;;  %3187 = vmatmul.bf16.gmra.mxu1 %v6484_v36  ;;  %v3489_v36 = vrot.slane %v3487_v24, 4  ;;  %v5472_v61 = vld [vmem:[%s6373_s25 + $0x328] sm:$0xff]  ;;  %v5469_v22 = vld [vmem:[%s6373_s25 + $0x310] sm:$0xff] }
 0x196   : > { %3614 = vmatpush.bf16.msra.mxu1 %v5440_v62  ;;  %3373 = vmatmul.bf16.gmra.mxu2 %v6488_v40  ;;  %v5455_v40 = vld [vmem:[%s6373_s25 + $0x2c0] sm:$0xff]  ;;  %v3482_v46 = vor.u32 %v3481_v34, %v3478_v33  ;;  %v5480_v62 = vld [vmem:[%s6373_s25 + $0x368] sm:$0xff] }
 0x197   : > { %3789 = vmatpush.bf16.msra.mxu2 %v5450_v7  ;;  %3391 = vmatmul.bf16.gmra.mxu3 %v6490_v42  ;;  %v5474_v42 = vld [vmem:[%s6373_s25 + $0x338] sm:$0xff]  ;;  %v6547_v47 = vor.u32 %v3489_v36, %v3486_v35  ;;  %v5466_v33 = vld [vmem:[%s6391_s5 + $0x1c] sm:$0x30]  ;;  %v5463_v34 = vld [vmem:[%s6391_s5 + $0xc] sm:$0xc] }
 0x198   : > { %3807 = vmatpush.bf16.msra.mxu3 %v5458_v8  ;;  %v5478_v7 = vld [vmem:[%s6373_s25 + $0x358] sm:$0xff]  ;;  %v3679_v8 = vunpack.c.l.b16 %v3639_v3  ;;  %v5108_v35 = vld [vmem:[%s6391_s5 + $0x10] sm:$0xf0]  ;;  %v5115_v51 = vor.u32 %v5466_v33, %v5114_v32  ;;  %v5503_v32 = vld [vmem:[%s6391_s5 + $0xc] sm:$0x8] }
 0x199   : > { %3597 = vmatpush.bf16.msra.mxu0 %v5431_v13  ;;  %v3491_v55 = vsel %vm3457_vm3, %v3482_v46, %v6547_v47  ;;  %v5484_v13 = vld [vmem:[%s6391_s5 + $0xc] sm:$0xf0]  ;;  %v5465_v36 = vld [vmem:[%s6391_s5 + $0x1c] sm:$0xf]  ;;  %v4113_v46 = vshrl.u32 %v5199_v29, 16  ;;  %v5111_v52 = vor.u32 %v5463_v34, %v5108_v35 }
 0x19a   : > { %3615 = vmatpush.bf16.msra.mxu1 %v5439_v14  ;;  %v5194_v14 = vld [vmem:[%s6391_s5 + $0x18] sm:$0xf]  ;;  %v3683_v20 = vpack.c.b16 %v3679_v8, %v3679_v8  ;;  %v5187_v23 = vor.u32 %v5484_v13, %v5186_v12  ;;  %v5268_v33 = vld [vmem:[%s6391_s5 + $0x10] sm:$0xf0]  ;;  %v5505_v34 = vld [vmem:[%s6391_s5 + $0x1c] sm:$0xf] }
 0x19b   : > { %3790 = vmatpush.bf16.msra.mxu2 %v5449_v15  ;;  %v5486_v15 = vld [vmem:[%s6391_s5 + $0x1c] sm:$0x70]  ;;  %v5514_v3 = vld [vmem:[%s6373_s25 + $0x438] sm:$0xff]  ;;  %v5276_v35 = vld [vmem:[%s6391_s5 + $0x20] sm:$0x70] }
 0x19c   : > { %3808 = vmatpush.bf16.msra.mxu3 %v5457_v16  ;;  %v5483_v16 = vld [vmem:[%s6391_s5 + $0xc] sm:$0xc]  ;;  %v5195_v24 = vor.u32 %v5486_v15, %v5194_v14 }
 0x19d   : > { %3598 = vmatpush.bf16.msra.mxu0 %v5430_v25  ;;  %v5477_v25 = vld [vmem:[%s6373_s25 + $0x350] sm:$0xff] }
 0x19e   : > { %3616 = vmatpush.bf16.msra.mxu1 %v5438_v26  ;;  %v5489_v26 = vld [vmem:[%s6373_s25 + $0x390] sm:$0xff]  ;;  %v4099_v41 = vshll.u32 %v5195_v24, 16 }
 0x19f   : > { %3791 = vmatpush.bf16.msra.mxu2 %v5448_v27  ;;  %v5497_v27 = vld [vmem:[%s6373_s25 + $0x3d0] sm:$0xff] }
 0x1a0   : > { %3809 = vmatpush.bf16.msra.mxu3 %v5456_v28  ;;  %v5191_v28 = vor.u32 %v5483_v16, %v5188_v17  ;;  %v5513_v16 = vld [vmem:[%s6373_s25 + $0x430] sm:$0xff] }
 0x1a1   : > { %3599 = vmatpush.bf16.msra.mxu0 %v5429_v37  ;;  %v5116_v37 = vld [vmem:[%s6391_s5 + $0x20] sm:$0x30]  ;;  %v5521_v17 = vld [vmem:[%s6373_s25 + $0x470] sm:$0xff] }
 0x1a2   : > { %3617 = vmatpush.bf16.msra.mxu1 %v5437_v38  ;;  %v4088_v38 = vshrl.u32 %v5187_v23, 16  ;;  %v4105_v44 = vshrl.u32 %v5191_v28, 16 }
 0x1a3   : > { %3792 = vmatpush.bf16.msra.mxu2 %v5447_v39  ;;  %v4091_v39 = vshll.u32 %v5187_v23, 16  ;;  %v5518_v23 = vld [vmem:[%s6373_s25 + $0x458] sm:$0xff] }
 0x1a4   : > { %3810 = vmatpush.bf16.msra.mxu3 %v5455_v40  ;;  %3600 = vmatmul.bf16.vlgmr.msra.gmra.mxu0 %v3474_v54  ;;  %v4096_v40 = vshrl.u32 %v5195_v24, 16  ;;  %v4090_v54 = vrot.slane %v4088_v38, 2  ;;  %v5509_v24 = vld [vmem:[%s6373_s25 + $0x410] sm:$0xff]  ;;  %v5271_v38 = vor.u32 %v5503_v32, %v5268_v33 }
 0x1a5   : > { %3989 = vmatpush.bf16.msrb.mxu0 %v5474_v42  ;;  %3618 = vmatmul.bf16.vlgmr.msra.gmra.mxu1 %v3491_v55  ;;  %v5468_v42 = vld [vmem:[%s6373_s25 + $0x308] sm:$0xff]  ;;  %v4093_v55 = vrot.slane %v4091_v39, 3  ;;  %v5279_v39 = vor.u32 %v5505_v34, %v5276_v35 }
 0x1a6   : > { %4007 = vmatpush.bf16.msrb.mxu1 %v5482_v43  ;;  %3793 = vmatmul.bf16.vlgmr.msra.gmra.mxu2 %v5035_v53  ;;  %v5476_v43 = vld [vmem:[%s6373_s25 + $0x348] sm:$0xff]  ;;  %v5119_v53 = vor.u32 %v5465_v36, %v5116_v37 }
 0x1a7   : > { %4221 = vmatpush.bf16.msrb.mxu2 %v5494_v49  ;;  %3811 = vmatmul.bf16.vlgmr.msra.gmra.mxu3 %v5039_v56  ;;  %v5496_v49 = vld [vmem:[%s6373_s25 + $0x3c8] sm:$0xff]  ;;  %v4098_v56 = vrot.slane %v4096_v40, 2  ;;  %v4094_v8 = vor.u32 %v4093_v55, %v4090_v54  ;;  %v5507_v40 = vld [vmem:[%s6373_s25 + $0x400] sm:$0xff] }
 0x1a8   : > { %4239 = vmatpush.bf16.msrb.mxu3 %v5502_v50  ;;  %v5107_v50 = vor.u32 %v5464_v31, %v5106_v30  ;;  %v5274_v30 = vld [vmem:[%s6391_s5 + $0x18] sm:$0xf]  ;;  %v5506_v31 = vld [vmem:[%s6391_s5 + $0x1c] sm:$0x70] }
 0x1a9   : > { %3990 = vmatpush.bf16.msrb.mxu0 %v5473_v57  ;;  %v4101_v57 = vrot.slane %v4099_v41, 3  ;;  %v5275_v37 = vor.u32 %v5506_v31, %v5274_v30  ;;  %v5515_v41 = vld [vmem:[%s6373_s25 + $0x440] sm:$0xff] }
 0x1aa   : > { %4008 = vmatpush.bf16.msrb.mxu1 %v5481_v58  ;;  %v5467_v58 = vld [vmem:[%s6373_s25 + $0x300] sm:$0xff] }
 0x1ab   : > { %4222 = vmatpush.bf16.msrb.mxu2 %v5493_v59  ;;  %v5475_v59 = vld [vmem:[%s6373_s25 + $0x340] sm:$0xff]  ;;  %v4102_v9 = vor.u32 %v4101_v57, %v4098_v56 }
 0x1ac   : > { %4240 = vmatpush.bf16.msrb.mxu3 %v5501_v60  ;;  %v4107_v60 = vrot.slane %v4105_v44, 2  ;;  %v4321_v44 = vrot.slane %v5271_v38, 3 }
 0x1ad   : > { %3991 = vmatpush.bf16.msrb.mxu0 %v5472_v61  ;;  %v4103_v14 = vsel %vm4086_vm5, %v4094_v8, %v4102_v9 }
 0x1ae   : > { %4009 = vmatpush.bf16.msrb.mxu1 %v5480_v62  ;;  %v4115_v62 = vrot.slane %v4113_v46, 2 }
 0x1af   : > { %4223 = vmatpush.bf16.msrb.mxu2 %v5492_v63 }
 0x1b0   : > { %4241 = vmatpush.bf16.msrb.mxu3 %v5500_v0  ;;  %v5487_v0 = vld [vmem:[%s6373_s25 + $0x380] sm:$0xff] }
 0x1b1   : > { %3992 = vmatpush.bf16.msrb.mxu0 %v5471_v1  ;;  %v5495_v1 = vld [vmem:[%s6373_s25 + $0x3c0] sm:$0xff] }
 0x1b2   : > { %4010 = vmatpush.bf16.msrb.mxu1 %v5479_v2  ;;  %v3883_v2 = vrot.slane %v5107_v50, 2 }
 0x1b3   : > { %4224 = vmatpush.bf16.msrb.mxu2 %v5491_v4  ;;  %v5522_v4 = vld [vmem:[%s6373_s25 + $0x478] sm:$0xff] }
 0x1b4   : > { %4242 = vmatpush.bf16.msrb.mxu3 %v5499_v5  ;;  %3605 = vmatmul.bf16.gmra.mxu0 %v6545_v45  ;;  %v4108_v45 = vshll.u32 %v5191_v28, 16  ;;  %v3884_v5 = vrot.slane %v5115_v51, 2  ;;  %v5266_v28 = vld [vmem:[%s6391_s5 + $0x8] sm:$0x8] }
 0x1b5   : > { %3993 = vmatpush.bf16.msrb.mxu0 %v5470_v6  ;;  %3623 = vmatmul.bf16.gmra.mxu1 %v6547_v47  ;;  %v4116_v47 = vshll.u32 %v5199_v29, 16  ;;  %v3886_v6 = vrot.slane %v5111_v52, 2  ;;  %v5504_v29 = vld [vmem:[%s6391_s5 + $0xc] sm:$0xf0] }
 0x1b6   : > { %4011 = vmatpush.bf16.msrb.mxu1 %v5478_v7  ;;  %3798 = vmatmul.bf16.gmra.mxu2 %v3683_v20  ;;  %v4110_v61 = vrot.slane %v4108_v45, 3  ;;  %v3887_v7 = vrot.slane %v5119_v53, 2  ;;  %v3885_v12 = vsel %vm3882_vm4, %v3883_v2, %v3884_v5  ;;  %v5511_v20 = vld [vmem:[%s6373_s25 + $0x420] sm:$0xff]  ;;  %v5267_v36 = vor.u32 %v5504_v29, %v5266_v28 }
 0x1b7   : > { %4225 = vmatpush.bf16.msrb.mxu2 %v5490_v10  ;;  %3816 = vmatmul.bf16.gmra.mxu3 %v3684_v21  ;;  %v4118_v63 = vrot.slane %v4116_v47, 3  ;;  %v5519_v21 = vld [vmem:[%s6373_s25 + $0x460] sm:$0xff]  ;;  %v4322_v45 = vrot.slane %v5279_v39, 3 }
 0x1b8   : > { %4243 = vmatpush.bf16.msrb.mxu3 %v5498_v11  ;;  %v4111_v10 = vor.u32 %v4110_v61, %v4107_v60  ;;  %v3888_v13 = vsel %vm3882_vm4, %v3886_v6, %v3887_v7 }
 0x1b9   : > { %3994 = vmatpush.bf16.msrb.mxu0 %v5469_v22  ;;  %v4119_v11 = vor.u32 %v4118_v63, %v4115_v62  ;;  %v5510_v22 = vld [vmem:[%s6373_s25 + $0x418] sm:$0xff] }
 0x1ba   : > { %4012 = vmatpush.bf16.msrb.mxu1 %v5477_v25  ;;  %v5517_v25 = vld [vmem:[%s6373_s25 + $0x450] sm:$0xff] }
 0x1bb   : > { %4226 = vmatpush.bf16.msrb.mxu2 %v5489_v26  ;;  %v4120_v15 = vsel %vm4086_vm5, %v4111_v10, %v4119_v11  ;;  %v5508_v26 = vld [vmem:[%s6373_s25 + $0x408] sm:$0xff] }
 0x1bc   : > { %4244 = vmatpush.bf16.msrb.mxu3 %v5497_v27  ;;  %v5516_v27 = vld [vmem:[%s6373_s25 + $0x448] sm:$0xff]  ;;  %s5543_s25 = smul.u32 (%p5776_p9), 6, %s5675_s17 }
 0x1bd   : > { %3995 = vmatpush.bf16.msrb.mxu0 %v5468_v42  ;;  %v4318_v42 = vrot.slane %v5267_v36, 3 }
 0x1be   : > { %4013 = vmatpush.bf16.msrb.mxu1 %v5476_v43  ;;  %v4319_v43 = vrot.slane %v5275_v37, 3  ;;  %s4490_s26 = sadd.s32 (%p5776_p9), %s5671_s16, %s5543_s25 }
 0x1bf   : > { %4227 = vmatpush.bf16.msrb.mxu2 %v5488_v48  ;;  %s5344_s14 = sshll.u32 (%p5776_p9), %s4490_s26, 3 }
 0x1c0   : > { %4245 = vmatpush.bf16.msrb.mxu3 %v5496_v49  ;;  %v4320_v48 = vsel %vm3253_vm2, %v4318_v42, %v4319_v43  ;;  %v4323_v49 = vsel %vm3253_vm2, %v4321_v44, %v4322_v45  ;;  %s4492_s5 = scalar_lea.vmem (%p5776_p9), %s6680_s3, %s5344_s14 }
 0x1c1   : > { %3996 = vmatpush.bf16.msrb.mxu0 %v5467_v58 }
 0x1c2   : > { %4014 = vmatpush.bf16.msrb.mxu1 %v5475_v59 }
 0x1c3   : > { %4228 = vmatpush.bf16.msrb.mxu2 %v5487_v0 }
 0x1c4   : > { %4246 = vmatpush.bf16.msrb.mxu3 %v5495_v1  ;;  %3997 = vmatmul.bf16.vlgmr.msrb.gmra.mxu0 %v3885_v12 }
 0x1c5   : > { %4424 = vmatpush.bf16.msra.mxu0 %v5514_v3  ;;  %4015 = vmatmul.bf16.vlgmr.msrb.gmra.mxu1 %v3888_v13 }
 0x1c6   : > { %4442 = vmatpush.bf16.msra.mxu1 %v5522_v4  ;;  %4229 = vmatmul.bf16.vlgmr.msrb.gmra.mxu2 %v4103_v14 }
 0x1c7   : > { %5523 = vmatpush.bf16.msra.mxu2 %v5514_v3  ;;  %4247 = vmatmul.bf16.vlgmr.msrb.gmra.mxu3 %v4120_v15 }
 0x1c8   : > { %5531 = vmatpush.bf16.msra.mxu3 %v5522_v4 }
 0x1c9   : > { %4425 = vmatpush.bf16.msra.mxu0 %v5513_v16 }
 0x1ca   : > { %4443 = vmatpush.bf16.msra.mxu1 %v5521_v17 }
 0x1cb   : > { %5524 = vmatpush.bf16.msra.mxu2 %v5513_v16 }
 0x1cc   : > { %5532 = vmatpush.bf16.msra.mxu3 %v5521_v17 }
 0x1cd   : > { %4426 = vmatpush.bf16.msra.mxu0 %v5512_v18 }
 0x1ce   : > { %4444 = vmatpush.bf16.msra.mxu1 %v5520_v19 }
 0x1cf   : > { %5525 = vmatpush.bf16.msra.mxu2 %v5512_v18 }
 0x1d0   : > { %5533 = vmatpush.bf16.msra.mxu3 %v5520_v19 }
 0x1d1   : > { %4427 = vmatpush.bf16.msra.mxu0 %v5511_v20 }
 0x1d2   : > { %4445 = vmatpush.bf16.msra.mxu1 %v5519_v21 }
 0x1d3   : > { %5526 = vmatpush.bf16.msra.mxu2 %v5511_v20 }
 0x1d4   : > { %5534 = vmatpush.bf16.msra.mxu3 %v5519_v21  ;;  %4002 = vmatmul.bf16.gmra.mxu0 %v3884_v5 }
 0x1d5   : > { %4428 = vmatpush.bf16.msra.mxu0 %v5510_v22  ;;  %4020 = vmatmul.bf16.gmra.mxu1 %v3887_v7 }
 0x1d6   : > { %4446 = vmatpush.bf16.msra.mxu1 %v5518_v23  ;;  %4234 = vmatmul.bf16.gmra.mxu2 %v4102_v9 }
 0x1d7   : > { %5527 = vmatpush.bf16.msra.mxu2 %v5510_v22  ;;  %4252 = vmatmul.bf16.gmra.mxu3 %v4119_v11 }
 0x1d8   : > { %5535 = vmatpush.bf16.msra.mxu3 %v5518_v23 }
 0x1d9   : > { %4429 = vmatpush.bf16.msra.mxu0 %v5509_v24 }
 0x1da   : > { %4447 = vmatpush.bf16.msra.mxu1 %v5517_v25 }
 0x1db   : > { %5528 = vmatpush.bf16.msra.mxu2 %v5509_v24 }
 0x1dc   : > { %5536 = vmatpush.bf16.msra.mxu3 %v5517_v25 }
 0x1dd   : > { %4430 = vmatpush.bf16.msra.mxu0 %v5508_v26 }
 0x1de   : > { %4448 = vmatpush.bf16.msra.mxu1 %v5516_v27 }
 0x1df   : > { %5529 = vmatpush.bf16.msra.mxu2 %v5508_v26 }
 0x1e0   : > { %5537 = vmatpush.bf16.msra.mxu3 %v5516_v27 }
 0x1e1   : > { %4431 = vmatpush.bf16.msra.mxu0 %v5507_v40  ;;  %v2739_v46 = vpop.f32.mrf.mxu0 }
 0x1e2   : > { %4449 = vmatpush.bf16.msra.mxu1 %v5515_v41  ;;  %v2757_v47 = vpop.f32.mrf.mxu1 }
 0x1e3   : > { %5530 = vmatpush.bf16.msra.mxu2 %v5507_v40  ;;  %v2758_v50 = vadd.f32 %v2757_v47, %v2739_v46 }
 0x1e4   : > { %5538 = vmatpush.bf16.msra.mxu3 %v5515_v41  ;;  %4432 = vmatmul.bf16.vlgmr.msra.gmra.mxu0 %v4320_v48 }
 0x1e5   : > { %4450 = vmatmul.bf16.vlgmr.msra.gmra.mxu1 %v4323_v49 }
 0x1e6   : > { %4437 = vmatmul.bf16.vlgmr.msra.gmra.mxu2 %v4319_v43 }
 0x1e7   : > { %4455 = vmatmul.bf16.vlgmr.msra.gmra.mxu3 %v4322_v45 }
 0x1e9   : > { %v2961_v51 = vpop.f32.mrf.mxu2  ;;  %v2741_v54 = vpop.f32.mrf.mxu0 }
 0x1ea   : > { %v2979_v52 = vpop.f32.mrf.mxu3  ;;  %v2759_v55 = vpop.f32.mrf.mxu1 }
 0x1eb   : > { %v2980_v53 = vadd.f32 %v2979_v52, %v2961_v51  ;;  %v2760_v56 = vadd.f32 %v2759_v55, %v2741_v54 }
 0x1ed   : > { %v2991_v57 = vadd.f32 %v2980_v53, %v2758_v50 }
 0x1f1   : > { %v2963_v58 = vpop.f32.mrf.mxu2  ;;  %v2744_v61 = vpop.f32.mrf.mxu0 }
 0x1f2   : > { %v2981_v59 = vpop.f32.mrf.mxu3  ;;  %v2762_v62 = vpop.f32.mrf.mxu1 }
 0x1f3   : > { %v2982_v60 = vadd.f32 %v2981_v59, %v2963_v58  ;;  %v2763_v63 = vadd.f32 %v2762_v62, %v2744_v61 }
 0x1f5   : > { %v2992_v0 = vadd.f32 %v2982_v60, %v2760_v56 }
 0x1f9   : > { %v2966_v1 = vpop.f32.mrf.mxu2  ;;  %v2746_v4 = vpop.f32.mrf.mxu0 }
 0x1fa   : > { %v2984_v2 = vpop.f32.mrf.mxu3  ;;  %v2764_v5 = vpop.f32.mrf.mxu1 }
 0x1fb   : > { %v2985_v3 = vadd.f32 %v2984_v2, %v2966_v1 }
 0x1fd   : > { %v2993_v6 = vadd.f32 %v2985_v3, %v2763_v63 }
 0x201   : > { %v2968_v7 = vpop.f32.mrf.mxu2  ;;  %v3165_v9 = vpop.f32.mrf.mxu0 }
 0x202   : > { %v2986_v8 = vpop.f32.mrf.mxu3  ;;  %v3183_v10 = vpop.f32.mrf.mxu1 }
 0x203   : > { %v3184_v11 = vadd.f32 %v3183_v10, %v3165_v9 }
 0x205   : > { %v3195_v12 = vadd.f32 %v3184_v11, %v2991_v57 }
 0x209   : > { %v3369_v13 = vpop.f32.mrf.mxu2  ;;  %v3167_v16 = vpop.f32.mrf.mxu0 }
 0x20a   : > { %v3387_v14 = vpop.f32.mrf.mxu3  ;;  %v3185_v17 = vpop.f32.mrf.mxu1 }
 0x20b   : > { %v3388_v15 = vadd.f32 %v3387_v14, %v3369_v13  ;;  %v3186_v18 = vadd.f32 %v3185_v17, %v3167_v16 }
 0x20d   : > { %v3399_v19 = vadd.f32 %v3388_v15, %v3195_v12  ;;  %v3196_v20 = vadd.f32 %v3186_v18, %v2992_v0 }
 0x211   : > { %v3371_v21 = vpop.f32.mrf.mxu2  ;;  %v3170_v24 = vpop.f32.mrf.mxu0 }
 0x212   : > { %v3389_v22 = vpop.f32.mrf.mxu3  ;;  %v3188_v25 = vpop.f32.mrf.mxu1 }
 0x213   : > { %v3390_v23 = vadd.f32 %v3389_v22, %v3371_v21  ;;  %v3189_v26 = vadd.f32 %v3188_v25, %v3170_v24 }
 0x215   : > { %v3400_v27 = vadd.f32 %v3390_v23, %v3196_v20  ;;  %v3197_v28 = vadd.f32 %v3189_v26, %v2993_v6 }
 0x219   : > { %v3374_v29 = vpop.f32.mrf.mxu2  ;;  %v3172_v32 = vpop.f32.mrf.mxu0 }
 0x21a   : > { %v3392_v30 = vpop.f32.mrf.mxu3  ;;  %v3190_v33 = vpop.f32.mrf.mxu1 }
 0x21b   : > { %v3393_v31 = vadd.f32 %v3392_v30, %v3374_v29 }
 0x21d   : > { %v3401_v34 = vadd.f32 %v3393_v31, %v3197_v28 }
 0x221   : > { %v3376_v35 = vpop.f32.mrf.mxu2  ;;  %v3601_v37 = vpop.f32.mrf.mxu0 }
 0x222   : > { %v3394_v36 = vpop.f32.mrf.mxu3  ;;  %v3619_v38 = vpop.f32.mrf.mxu1 }
 0x223   : > { %v3620_v63 = vadd.f32 %v3619_v38, %v3601_v37 }
 0x225   : > { %v3631_v5 = vadd.f32 %v3620_v63, %v3399_v19  ;;  %v5616_v19 = vld [vmem:[%s2581_s9] ss:$0 sm:$0xff] }
 0x229   : > { %v3794_v39 = vpop.f32.mrf.mxu2  ;;  %v3603_v41 = vpop.f32.mrf.mxu0 }
 0x22a   : > { %v3812_v40 = vpop.f32.mrf.mxu3  ;;  %v3621_v42 = vpop.f32.mrf.mxu1 }
 0x22b   : > { %v3813_v4 = vadd.f32 %v3812_v40, %v3794_v39  ;;  %v3622_v10 = vadd.f32 %v3621_v42, %v3603_v41 }
 0x22d   : > { %v3824_v7 = vadd.f32 %v3813_v4, %v3631_v5  ;;  %v3632_v23 = vadd.f32 %v3622_v10, %v3400_v27 }
 0x231   : > { %v3796_v43 = vpop.f32.mrf.mxu2  ;;  %v3606_v45 = vpop.f32.mrf.mxu0 }
 0x232   : > { %v3814_v44 = vpop.f32.mrf.mxu3  ;;  %v3624_v46 = vpop.f32.mrf.mxu1 }
 0x233   : > { %v3625_v9 = vadd.f32 %v3624_v46, %v3606_v45  ;;  %v3815_v17 = vadd.f32 %v3814_v44, %v3796_v43 }
 0x235   : > { %v3633_v21 = vadd.f32 %v3625_v9, %v3401_v34  ;;  %v3825_v29 = vadd.f32 %v3815_v17, %v3632_v23 }
 0x239   : > { %v3799_v47 = vpop.f32.mrf.mxu2  ;;  %v3608_v49 = vpop.f32.mrf.mxu0 }
 0x23a   : > { %v3817_v48 = vpop.f32.mrf.mxu3  ;;  %v3626_v50 = vpop.f32.mrf.mxu1 }
 0x23b   : > { %v3818_v14 = vadd.f32 %v3817_v48, %v3799_v47 }
 0x23d   : > { %v3826_v26 = vadd.f32 %v3818_v14, %v3633_v21 }
 0x241   : > { %v3801_v51 = vpop.f32.mrf.mxu2  ;;  %v3998_v53 = vpop.f32.mrf.mxu0 }
 0x242   : > { %v3819_v52 = vpop.f32.mrf.mxu3  ;;  %v4016_v54 = vpop.f32.mrf.mxu1 }
 0x243   : > { %v4017_v6 = vadd.f32 %v4016_v54, %v3998_v53 }
 0x245   : > { %v4028_v11 = vadd.f32 %v4017_v6, %v3824_v7 }
 0x249   : > { %v4230_v55 = vpop.f32.mrf.mxu2  ;;  %v4000_v57 = vpop.f32.mrf.mxu0 }
 0x24a   : > { %v4248_v56 = vpop.f32.mrf.mxu3  ;;  %v4018_v58 = vpop.f32.mrf.mxu1 }
 0x24b   : > { %v4249_v8 = vadd.f32 %v4248_v56, %v4230_v55  ;;  %v4019_v24 = vadd.f32 %v4018_v58, %v4000_v57 }
 0x24d   : > { %v4260_v18 = vadd.f32 %v4249_v8, %v4028_v11  ;;  %v4029_v33 = vadd.f32 %v4019_v24, %v3825_v29 }
 0x251   : > { %v4232_v59 = vpop.f32.mrf.mxu2  ;;  %v4003_v61 = vpop.f32.mrf.mxu0 }
 0x252   : > { %v4250_v60 = vpop.f32.mrf.mxu3  ;;  %v4021_v62 = vpop.f32.mrf.mxu1 }
 0x253   : > { %v4022_v22 = vadd.f32 %v4021_v62, %v4003_v61  ;;  %v4251_v30 = vadd.f32 %v4250_v60, %v4232_v59 }
 0x255   : > { %v4030_v32 = vadd.f32 %v4022_v22, %v3826_v26  ;;  %v4261_v34 = vadd.f32 %v4251_v30, %v4029_v33 }
 0x259   : > { %v4235_v0 = vpop.f32.mrf.mxu2  ;;  %v4005_v2 = vpop.f32.mrf.mxu0 }
 0x25a   : > { %v4253_v1 = vpop.f32.mrf.mxu3  ;;  %v4023_v3 = vpop.f32.mrf.mxu1 }
 0x25b   : > { %v4254_v28 = vadd.f32 %v4253_v1, %v4235_v0 }
 0x25d   : > { %v4262_v37 = vadd.f32 %v4254_v28, %v4030_v32 }
 0x261   : > { %v4237_v12 = vpop.f32.mrf.mxu2  ;;  %v4433_v15 = vpop.f32.mrf.mxu0 }
 0x262   : > { %v4255_v13 = vpop.f32.mrf.mxu3  ;;  %v4451_v16 = vpop.f32.mrf.mxu1 }
 0x263   : > { %v4452_v20 = vadd.f32 %v4451_v16, %v4433_v15 }
 0x265   : > { %v4463_v25 = vadd.f32 %v4452_v20, %v4260_v18 }
 0x267   : > { %v4476_v31 = vadd.f32 %v5616_v19, %v4463_v25 }
 0x269   : > { %4479 = vst [vmem:[%s2573_s12] sm:$0xff] %v4476_v31  ;;  %v4438_v35 = vpop.f32.mrf.mxu2  ;;  %v4435_v39 = vpop.f32.mrf.mxu0 }
 0x26a   : > { %v4456_v36 = vpop.f32.mrf.mxu3  ;;  %v4453_v40 = vpop.f32.mrf.mxu1 }
 0x26b   : > { %v4457_v38 = vadd.f32 %v4456_v36, %v4438_v35  ;;  %v4454_v41 = vadd.f32 %v4453_v40, %v4435_v39 }
 0x26d   : > { %v4465_v27 = vadd.f32 %v4457_v38, %v4262_v37  ;;  %v4464_v42 = vadd.f32 %v4454_v41, %v4261_v34 }
 0x26e   : > { %4488 = sbr.rel (!%p5776_p9) target bundleno = 635 (0x27b), region = 88 }
 0x26f   : > { %v4478_v43 = vadd.f32 %v5616_v19, %v4465_v27  ;;  %v4477_v44 = vadd.f32 %v5616_v19, %v4464_v42 }
 0x270   : > { %v4525_v47 = vld [vmem:[%s2573_s12] sm:$0xff] (%p5776_p9) }
 0x271   : > { %4481 = vst [vmem:[%s2573_s12 + $0x10] sm:$0xff] %v4478_v43  ;;  %v4440_v45 = vpop.f32.mrf.mxu2 }
 0x272   : > { %4480 = vst [vmem:[%s2573_s12 + $0x8] sm:$0xff] %v4477_v44  ;;  %v4458_v46 = vpop.f32.mrf.mxu3 }
 0x273   : > { %4526 = vst [vmem:[%s4492_s5] sm:$0xff] %v4525_v47 }
 0x278   : > { %v4529_v49 = vld [vmem:[%s2573_s12 + $0x10] sm:$0xff] }
 0x279   : > { %v4527_v48 = vld [vmem:[%s2573_s12 + $0x8] sm:$0xff]  ;;  %4530 = vst [vmem:[%s4492_s5 + $0x20] sm:$0xff] %v4529_v49 }
 0x27a   : > { %4528 = vst [vmem:[%s4492_s5 + $0x10] sm:$0xff] %v4527_v48 }
 0x27b PF: > { %s13_s20 = sadd.s32 1, %s5687_s20   ;;  %s6682_s12 = smov %s5659_s13 }
 0x27c   : > { %p10_p2 = scmp.ge.s32.totalorder %s13_s20, 6   ;;  %s6683_s13 = smov %s5781_s4 }
 0x27d   : > { %s6684_s14 = smov %s5667_s15  ;;  %s6685_s15 = smov %s5770_s27 }
 0x27e   : > { %s6686_s16 = smov %s5679_s18  ;;  %s6687_s17 = smov %s5683_s19 }
 0x27f   : > { %s6688_s18 = smov %s6691_s22  ;;  %s6689_s19 = smov %s6695_s23 }
 0x280   :  { %12 = sbr.rel (!%p10_p2) target bundleno = 5 (0x5), region = 167 }

// kernel: generator_forward.96
= control target key start
LH: loop header
LB: loop body
LE: loop exit
PB: predicated region body
PF: predicated region fallthrough
CT: control target
= control target key end

     0   :  { %s1012_s12 = smov 0   ;;  %s1014_s13 = smov 0   ;;  %s1163_s0 = inlined_call_operand.vmem [shape: bf16[2,21,256], index: 0, kind: input, shape index: {}]   ;;  %s1164_s1 = inlined_call_operand.vmem [shape: bf16[512,128], index: 1, kind: input, shape index: {}]   ;;  %s1165_s2 = inlined_call_operand.vmem [shape: f32[1,128], index: 2, kind: input, shape index: {}]   ;;  %s1166_s3 = inlined_call_operand.vmem [shape: f32[2,20,128], index: 3, kind: output, shape index: {}]  }
   0x1   :  { %s1016_s14 = smov 0  }
   0x2 LB: > { %s25_s15 = sadd.s32 1, %s986_s13  ;;  %p757_p0 = scmp.ge.s32.totalorder %s990_s14, 1  ;;  %s990_s14 = sphi %s1016_s14, %s13_s14   ;;  %s986_s13 = sphi %s1014_s13, %s1168_s13   ;;  %s982_s12 = sphi %s1012_s12, %s1167_s12  }
   0x3   : > { %p27_p1 = scmp.ge.s32.totalorder %s25_s15, 2  ;;  %p168_p2 = scmp.lt.s32.totalorder %s990_s14, 3 }
   0x5   : > { %s1170_s15 = smov (%p27_p1, %s25_s15), 0  ;;  %p169_p3 = pnand %p757_p0, %p168_p2 }
   0x6   : > { %p202_p4 = scmp.lt.s32.totalorder (!%p169_p3), %s982_s12, 1 }
   0x7   : > { %172 = sbr.rel (%p169_p3) target bundleno = 210 (0xd2), region = 32 }
   0xc   : > { %v915_v0 = vld [vmem:[%s1164_s1 + $0x38] sm:$0xff]  ;;  %v914_v4 = vld [vmem:[%s1164_s1 + $0x30] sm:$0xff]  ;;  %s1172_s12 = smov (!%p202_p4, %s982_s12), 1  ;;  %v913_v8 = vld [vmem:[%s1164_s1 + $0x28] sm:$0xff]  ;;  %vm457_vm0 = vsmask.f32 7424 }
   0xd   : > { %v923_v1 = vld [vmem:[%s1164_s1 + $0x78] sm:$0xff]  ;;  %370 = vmatpush.bf16.msra.mxu0 %v915_v0  ;;  %v922_v5 = vld [vmem:[%s1164_s1 + $0x70] sm:$0xff]  ;;  %s942_s5 = smul.u32 24, %s1172_s12  ;;  %v921_v9 = vld [vmem:[%s1164_s1 + $0x68] sm:$0xff] }
   0xe   : > { %v933_v2 = vld [vmem:[%s1164_s1 + $0xb8] sm:$0xff]  ;;  %388 = vmatpush.bf16.msra.mxu1 %v923_v1  ;;  %v932_v6 = vld [vmem:[%s1164_s1 + $0xb0] sm:$0xff]  ;;  %v931_v10 = vld [vmem:[%s1164_s1 + $0xa8] sm:$0xff] }
   0xf   : > { %v941_v3 = vld [vmem:[%s1164_s1 + $0xf8] sm:$0xff]  ;;  %588 = vmatpush.bf16.msra.mxu2 %v933_v2  ;;  %v940_v7 = vld [vmem:[%s1164_s1 + $0xf0] sm:$0xff]  ;;  %v939_v11 = vld [vmem:[%s1164_s1 + $0xe8] sm:$0xff]  ;;  %s1074_s20 = scalar_lea.vmem %s1163_s0, %s942_s5  ;;  %s221_s22 = scalar_lea.vmem %s1166_s3, %s942_s5 }
  0x10   : > { %606 = vmatpush.bf16.msra.mxu3 %v941_v3  ;;  %v912_v12 = vld [vmem:[%s1164_s1 + $0x20] sm:$0xff]  ;;  %v925_v17 = vld [vmem:[%s1074_s20 + $0x4] sm:$0xf0]  ;;  %v411_v18 = vld [vmem:[%s1074_s20 + $0x10] sm:$0x77] }
  0x11   : > { %371 = vmatpush.bf16.msra.mxu0 %v914_v4  ;;  %v920_v13 = vld [vmem:[%s1164_s1 + $0x60] sm:$0xff]  ;;  %v836_v20 = vld [vmem:[%s1074_s20 + $0x8] sm:$0xf0]  ;;  %v911_v21 = vld [vmem:[%s1164_s1 + $0x18] sm:$0xff]  ;;  %v451_v25 = vunpack.c.l.b16 %v411_v18  ;;  %v452_v27 = vunpack.c.h.b16 %v411_v18 }
  0x12   : > { %389 = vmatpush.bf16.msra.mxu1 %v922_v5  ;;  %v930_v14 = vld [vmem:[%s1164_s1 + $0xa0] sm:$0xff]  ;;  %v919_v22 = vld [vmem:[%s1164_s1 + $0x58] sm:$0xff]  ;;  %v910_v29 = vld [vmem:[%s1164_s1 + $0x10] sm:$0xff] }
  0x13   : > { %589 = vmatpush.bf16.msra.mxu2 %v932_v6  ;;  %v938_v15 = vld [vmem:[%s1164_s1 + $0xe0] sm:$0xff]  ;;  %v929_v23 = vld [vmem:[%s1164_s1 + $0x98] sm:$0xff]  ;;  %v918_v30 = vld [vmem:[%s1164_s1 + $0x50] sm:$0xff]  ;;  %v455_v33 = vpack.c.b16 %v451_v25, %v451_v25  ;;  %v456_v35 = vpack.c.b16 %v452_v27, %v452_v27 }
  0x14   : > { %607 = vmatpush.bf16.msra.mxu3 %v940_v7  ;;  %v834_v16 = vld [vmem:[%s1074_s20] sm:$0xf]  ;;  %v924_v19 = vld [vmem:[%s1074_s20 + $0x4] sm:$0xf]  ;;  %v937_v24 = vld [vmem:[%s1164_s1 + $0xd8] sm:$0xff] }
  0x15   : > { %372 = vmatpush.bf16.msra.mxu0 %v913_v8  ;;  %v835_v26 = vor.u32 %v925_v17, %v834_v16  ;;  %v839_v28 = vor.u32 %v924_v19, %v836_v20  ;;  %v928_v31 = vld [vmem:[%s1164_s1 + $0x90] sm:$0xff]  ;;  %v909_v37 = vld [vmem:[%s1164_s1 + $0x8] sm:$0xff]  ;;  %v466_v44 = vshll.u32 %v455_v33, 16  ;;  %v478_v46 = vshll.u32 %v456_v35, 16  ;;  %v908_v47 = vld [vmem:[%s1164_s1] sm:$0xff] }
  0x16   : > { %390 = vmatpush.bf16.msra.mxu1 %v921_v9  ;;  %v936_v32 = vld [vmem:[%s1164_s1 + $0xd0] sm:$0xff]  ;;  %v917_v38 = vld [vmem:[%s1164_s1 + $0x48] sm:$0xff]  ;;  %v916_v48 = vld [vmem:[%s1164_s1 + $0x40] sm:$0xff]  ;;  %v482_v2 = vshrl.u32 %v455_v33, 16  ;;  %v485_v3 = vshrl.u32 %v456_v35, 16 }
  0x17   : > { %590 = vmatpush.bf16.msra.mxu2 %v931_v10  ;;  %v461_v34 = vshll.u32 %v835_v26, 16  ;;  %v473_v36 = vshll.u32 %v839_v28, 16  ;;  %v459_v39 = vshrl.u32 %v835_v26, 16  ;;  %v471_v40 = vshrl.u32 %v839_v28, 16  ;;  %v927_v41 = vld [vmem:[%s1164_s1 + $0x88] sm:$0xff]  ;;  %v926_v53 = vld [vmem:[%s1164_s1 + $0x80] sm:$0xff] }
  0x18   : > { %608 = vmatpush.bf16.msra.mxu3 %v939_v11  ;;  %v935_v42 = vld [vmem:[%s1164_s1 + $0xc8] sm:$0xff]  ;;  %v762_v49 = vld [vmem:[%s1074_s20] sm:$0xf]  ;;  %v906_v51 = vld [vmem:[%s1074_s20 + $0x4] sm:$0xf]  ;;  %v468_v56 = vrot.slane %v466_v44, 1 }
  0x19   : > { %373 = vmatpush.bf16.msra.mxu0 %v912_v12  ;;  %v463_v43 = vrot.slane %v461_v34, 1  ;;  %v475_v45 = vrot.slane %v473_v36, 1  ;;  %v907_v50 = vld [vmem:[%s1074_s20 + $0x4] sm:$0xf0]  ;;  %v764_v52 = vld [vmem:[%s1074_s20 + $0x8] sm:$0xf0] }
  0x1a   : > { %391 = vmatpush.bf16.msra.mxu1 %v920_v13  ;;  %v934_v54 = vld [vmem:[%s1164_s1 + $0xc0] sm:$0xff]  ;;  %v480_v58 = vrot.slane %v478_v46, 1  ;;  %v763_v59 = vor.u32 %v907_v50, %v762_v49  ;;  %v767_v60 = vor.u32 %v906_v51, %v764_v52  ;;  %v224_v63 = vld [vmem:[%s1074_s20 + $0x10] sm:$0x33]  ;;  %v484_v6 = vor.u32 %v482_v2, %v468_v56 }
  0x1b   : > { %591 = vmatpush.bf16.msra.mxu2 %v930_v14  ;;  %v464_v55 = vor.u32 %v463_v43, %v459_v39  ;;  %v476_v57 = vor.u32 %v475_v45, %v471_v40  ;;  %v264_v0 = vunpack.c.l.b16 %v224_v63  ;;  %v265_v1 = vunpack.c.h.b16 %v224_v63  ;;  %v967_v14 = vld [vmem:[%s1165_s2] ss:$0 sm:$0xff] }
  0x1c   : > { %609 = vmatpush.bf16.msra.mxu3 %v938_v15  ;;  %v487_v7 = vor.u32 %v485_v3, %v480_v58 }
  0x1d   : > { %374 = vmatpush.bf16.msra.mxu0 %v911_v21  ;;  %v469_v61 = vsel %vm457_vm0, %v464_v55, %v468_v56  ;;  %v481_v62 = vsel %vm457_vm0, %v476_v57, %v480_v58  ;;  %v268_v4 = vpack.c.b16 %v264_v0, %v264_v0  ;;  %v269_v5 = vpack.c.b16 %v265_v1, %v265_v1 }
  0x1e   : > { %392 = vmatpush.bf16.msra.mxu1 %v919_v22 }
  0x1f   : > { %592 = vmatpush.bf16.msra.mxu2 %v929_v23 }
  0x20   : > { %610 = vmatpush.bf16.msra.mxu3 %v937_v24 }
  0x21   : > { %375 = vmatpush.bf16.msra.mxu0 %v910_v29 }
  0x22   : > { %393 = vmatpush.bf16.msra.mxu1 %v918_v30 }
  0x23   : > { %593 = vmatpush.bf16.msra.mxu2 %v928_v31 }
  0x24   : > { %611 = vmatpush.bf16.msra.mxu3 %v936_v32 }
  0x25   : > { %376 = vmatpush.bf16.msra.mxu0 %v909_v37 }
  0x26   : > { %394 = vmatpush.bf16.msra.mxu1 %v917_v38 }
  0x27   : > { %594 = vmatpush.bf16.msra.mxu2 %v927_v41 }
  0x28   : > { %612 = vmatpush.bf16.msra.mxu3 %v935_v42 }
  0x29   : > { %377 = vmatpush.bf16.msra.mxu0 %v908_v47 }
  0x2a   : > { %395 = vmatpush.bf16.msra.mxu1 %v916_v48 }
  0x2b   : > { %595 = vmatpush.bf16.msra.mxu2 %v926_v53 }
  0x2c   : > { %613 = vmatpush.bf16.msra.mxu3 %v934_v54  ;;  %378 = vmatmul.bf16.vlgmr.msra.gmra.mxu0 %v763_v59 }
  0x2d   : > { %396 = vmatmul.bf16.vlgmr.msra.gmra.mxu1 %v767_v60 }
  0x2e   : > { %596 = vmatmul.bf16.vlgmr.msra.gmra.mxu2 %v469_v61 }
  0x2f   : > { %614 = vmatmul.bf16.vlgmr.msra.gmra.mxu3 %v481_v62 }
  0x3c   : > { %383 = vmatmul.bf16.gmra.mxu0 %v268_v4 }
  0x3d   : > { %401 = vmatmul.bf16.gmra.mxu1 %v269_v5 }
  0x3e   : > { %601 = vmatmul.bf16.gmra.mxu2 %v484_v6 }
  0x3f   : > { %619 = vmatmul.bf16.gmra.mxu3 %v487_v7 }
  0xa9   : > { %v379_v8 = vpop.f32.mrf.mxu0 }
  0xaa   : > { %v397_v9 = vpop.f32.mrf.mxu1 }
  0xab   : > { %v398_v12 = vadd.f32 %v397_v9, %v379_v8 }
  0xb1   : > { %v597_v10 = vpop.f32.mrf.mxu2  ;;  %v381_v15 = vpop.f32.mrf.mxu0 }
  0xb2   : > { %v615_v11 = vpop.f32.mrf.mxu3  ;;  %v399_v16 = vpop.f32.mrf.mxu1 }
  0xb3   : > { %v616_v13 = vadd.f32 %v615_v11, %v597_v10  ;;  %v400_v21 = vadd.f32 %v399_v16, %v381_v15 }
  0xb5   : > { %v627_v17 = vadd.f32 %v616_v13, %v398_v12 }
  0xb7   : > { %v640_v18 = vadd.f32 %v967_v14, %v627_v17 }
  0xb9   : > { %643 = vst [vmem:[%s221_s22] sm:$0xff] %v640_v18  ;;  %v599_v19 = vpop.f32.mrf.mxu2  ;;  %v384_v23 = vpop.f32.mrf.mxu0 }
  0xba   : > { %v617_v20 = vpop.f32.mrf.mxu3  ;;  %v402_v24 = vpop.f32.mrf.mxu1 }
  0xbb   : > { %v618_v22 = vadd.f32 %v617_v20, %v599_v19  ;;  %v403_v25 = vadd.f32 %v402_v24, %v384_v23 }
  0xbd   : > { %v628_v26 = vadd.f32 %v618_v22, %v400_v21  ;;  %408 = vst [vmem:[#allocation2 + $0x8] sm:$0xf] %v403_v25 }
  0xbf   : > { %v641_v27 = vadd.f32 %v967_v14, %v628_v26 }
  0xc1   : > { %644 = vst [vmem:[%s221_s22 + $0x8] sm:$0xff] %v641_v27  ;;  %v602_v28 = vpop.f32.mrf.mxu2  ;;  %v386_v31 = vpop.f32.mrf.mxu0 }
  0xc2   : > { %v620_v29 = vpop.f32.mrf.mxu3  ;;  %v404_v32 = vpop.f32.mrf.mxu1 }
  0xc3   : > { %v621_v30 = vadd.f32 %v620_v29, %v602_v28 }
  0xc4   : > { %v626_v33 = vld [vmem:[#allocation2 + $0x8] sm:$0xf] }
  0xc5   : > { %v629_v34 = vadd.f32 %v626_v33, %v621_v30 }
  0xc7   : > { %632 = vst [vmem:[#allocation2 + $0x8] sm:$0xf] %v629_v34 }
  0xc9   : > { %v604_v35 = vpop.f32.mrf.mxu2 }
  0xca   : > { %v622_v36 = vpop.f32.mrf.mxu3 }
  0xce   : > { %v635_v37 = vld [vmem:[#allocation2 + $0x8] sm:$0xf] }
  0xcf   : > { %v642_v38 = vadd.f32 %v967_v14, %v635_v37 }
  0xd1   : > { %645 = vst [vmem:[%s221_s22 + $0x10] sm:$0xf] %v642_v38 }
  0xd2 PF: > { %s13_s14 = sadd.s32 1, %s990_s14   ;;  %s1167_s12 = smov %s986_s13 }
  0xd3   : > { %p10_p5 = scmp.ge.s32.totalorder %s13_s14, 4   ;;  %s1168_s13 = smov %s1170_s15 }
  0xd5   :  { %12 = sbr.rel (!%p10_p5) target bundleno = 2 (0x2), region = 68 }

// kernel: generator_forward.95
= control target key start
LH: loop header
LB: loop body
LE: loop exit
PB: predicated region body
PF: predicated region fallthrough
CT: control target
= control target key end

     0   :  { %s681_s12 = smov 0   ;;  %s683_s13 = smov 0   ;;  %s768_s0 = inlined_call_operand.vmem [shape: bf16[2,16,256], index: 0, kind: input, shape index: {}]   ;;  %s769_s1 = inlined_call_operand.vmem [shape: bf16[256,128], index: 1, kind: input, shape index: {}]   ;;  %s770_s2 = inlined_call_operand.vmem [shape: f32[1,128], index: 2, kind: input, shape index: {}]   ;;  %s771_s3 = inlined_call_operand.vmem [shape: f32[2,16,128], index: 3, kind: output, shape index: {}]  }
   0x1   :  { %s685_s14 = smov 0  }
   0x2 LB: > { %s25_s15 = sadd.s32 1, %s655_s13  ;;  %p513_p0 = scmp.ge.s32.totalorder %s659_s14, 1  ;;  %s659_s14 = sphi %s685_s14, %s13_s14   ;;  %s655_s13 = sphi %s683_s13, %s773_s13   ;;  %s651_s12 = sphi %s681_s12, %s772_s12  }
   0x3   : > { %p27_p1 = scmp.ge.s32.totalorder %s25_s15, 2  ;;  %p168_p2 = scmp.lt.s32.totalorder %s659_s14, 3 }
   0x5   : > { %s775_s15 = smov (%p27_p1, %s25_s15), 0  ;;  %p169_p3 = pnand %p513_p0, %p168_p2 }
   0x6   : > { %p202_p4 = scmp.lt.s32.totalorder (!%p169_p3), %s651_s12, 1 }
   0x7   : > { %172 = sbr.rel (%p169_p3) target bundleno = 184 (0xb8), region = 32 }
   0xc   : > { %v603_v0 = vld [vmem:[%s769_s1 + $0x38] sm:$0xff]  ;;  %v602_v2 = vld [vmem:[%s769_s1 + $0x30] sm:$0xff]  ;;  %v601_v4 = vld [vmem:[%s769_s1 + $0x28] sm:$0xff]  ;;  %s777_s12 = smov (!%p202_p4, %s651_s12), 1 }
   0xd   : > { %v611_v1 = vld [vmem:[%s769_s1 + $0x78] sm:$0xff]  ;;  %362 = vmatpush.bf16.msra.mxu0 %v603_v0  ;;  %v610_v3 = vld [vmem:[%s769_s1 + $0x70] sm:$0xff]  ;;  %v609_v5 = vld [vmem:[%s769_s1 + $0x68] sm:$0xff]  ;;  %s592_s17 = sshll.u32 %s777_s12, 4 }
   0xe   : > { %376 = vmatpush.bf16.msra.mxu1 %v611_v1  ;;  %v600_v6 = vld [vmem:[%s769_s1 + $0x20] sm:$0xff]  ;;  %v599_v8 = vld [vmem:[%s769_s1 + $0x18] sm:$0xff]  ;;  %v598_v10 = vld [vmem:[%s769_s1 + $0x10] sm:$0xff]  ;;  %s206_s24 = scalar_lea.vmem %s768_s0, %s592_s17  ;;  %s221_s5 = scalar_lea.vmem %s771_s3, %s592_s17 }
   0xf   : > { %v608_v7 = vld [vmem:[%s769_s1 + $0x60] sm:$0xff]  ;;  %v607_v9 = vld [vmem:[%s769_s1 + $0x58] sm:$0xff]  ;;  %v606_v11 = vld [vmem:[%s769_s1 + $0x50] sm:$0xff] }
  0x10   : > { %v597_v12 = vld [vmem:[%s769_s1 + $0x8] sm:$0xff]  ;;  %v596_v14 = vld [vmem:[%s769_s1] sm:$0xff] }
  0x11   : > { %363 = vmatpush.bf16.msra.mxu0 %v602_v2  ;;  %v605_v13 = vld [vmem:[%s769_s1 + $0x48] sm:$0xff]  ;;  %v604_v15 = vld [vmem:[%s769_s1 + $0x40] sm:$0xff] }
  0x12   : > { %377 = vmatpush.bf16.msra.mxu1 %v610_v3  ;;  %v520_v16 = vld [vmem:[%s206_s24] sm:$0xf]  ;;  %v595_v17 = vld [vmem:[%s206_s24 + $0x4] sm:$0xf0]  ;;  %v594_v18 = vld [vmem:[%s206_s24 + $0x4] sm:$0xf] }
  0x13   : > { %v522_v19 = vld [vmem:[%s206_s24 + $0x8] sm:$0xf0]  ;;  %v521_v20 = vor.u32 %v595_v17, %v520_v16  ;;  %v636_v22 = vld [vmem:[%s770_s2] ss:$0 sm:$0xff] }
  0x14   : > { %v525_v21 = vor.u32 %v594_v18, %v522_v19 }
  0x15   : > { %364 = vmatpush.bf16.msra.mxu0 %v601_v4 }
  0x16   : > { %378 = vmatpush.bf16.msra.mxu1 %v609_v5 }
  0x19   : > { %365 = vmatpush.bf16.msra.mxu0 %v600_v6 }
  0x1a   : > { %379 = vmatpush.bf16.msra.mxu1 %v608_v7 }
  0x1d   : > { %366 = vmatpush.bf16.msra.mxu0 %v599_v8 }
  0x1e   : > { %380 = vmatpush.bf16.msra.mxu1 %v607_v9 }
  0x21   : > { %367 = vmatpush.bf16.msra.mxu0 %v598_v10 }
  0x22   : > { %381 = vmatpush.bf16.msra.mxu1 %v606_v11 }
  0x25   : > { %368 = vmatpush.bf16.msra.mxu0 %v597_v12 }
  0x26   : > { %382 = vmatpush.bf16.msra.mxu1 %v605_v13 }
  0x29   : > { %369 = vmatpush.bf16.msra.mxu0 %v596_v14 }
  0x2a   : > { %383 = vmatpush.bf16.msra.mxu1 %v604_v15 }
  0x2c   : > { %370 = vmatmul.bf16.vlgmr.msra.gmra.mxu0 %v521_v20 }
  0x2d   : > { %384 = vmatmul.bf16.vlgmr.msra.gmra.mxu1 %v525_v21 }
  0xa9   : > { %v371_v23 = vpop.f32.mrf.mxu0 }
  0xaa   : > { %v385_v24 = vpop.f32.mrf.mxu1 }
  0xab   : > { %v386_v25 = vadd.f32 %v385_v24, %v371_v23 }
  0xad   : > { %v398_v26 = vadd.f32 %v636_v22, %v386_v25 }
  0xaf   : > { %400 = vst [vmem:[%s221_s5] sm:$0xff] %v398_v26 }
  0xb1   : > { %v373_v27 = vpop.f32.mrf.mxu0 }
  0xb2   : > { %v387_v28 = vpop.f32.mrf.mxu1 }
  0xb3   : > { %v388_v29 = vadd.f32 %v387_v28, %v373_v27 }
  0xb5   : > { %v399_v30 = vadd.f32 %v636_v22, %v388_v29 }
  0xb7   : > { %401 = vst [vmem:[%s221_s5 + $0x8] sm:$0xff] %v399_v30 }
  0xb8 PF: > { %s13_s14 = sadd.s32 1, %s659_s14   ;;  %s772_s12 = smov %s655_s13 }
  0xb9   : > { %p10_p5 = scmp.ge.s32.totalorder %s13_s14, 4   ;;  %s773_s13 = smov %s775_s15 }
  0xbb   :  { %12 = sbr.rel (!%p10_p5) target bundleno = 2 (0x2), region = 68 }

// kernel: generator_forward.97
= control target key start
LH: loop header
LB: loop body
LE: loop exit
PB: predicated region body
PF: predicated region fallthrough
CT: control target
= control target key end

     0   :  { %s957_s12 = smov 0   ;;  %s959_s13 = smov 0   ;;  %s1104_s0 = inlined_call_operand.vmem [shape: bf16[2,20,256], index: 0, kind: input, shape index: {}]   ;;  %s1105_s1 = inlined_call_operand.vmem [shape: bf16[512,128], index: 1, kind: input, shape index: {}]   ;;  %s1106_s2 = inlined_call_operand.vmem [shape: f32[1,128], index: 2, kind: input, shape index: {}]   ;;  %s1107_s3 = inlined_call_operand.vmem [shape: f32[2,16,128], index: 3, kind: output, shape index: {}]  }
   0x1   :  { %s961_s14 = smov 0  }
   0x2 LB: > { %s25_s15 = sadd.s32 1, %s931_s13  ;;  %p700_p0 = scmp.ge.s32.totalorder %s935_s14, 1  ;;  %s935_s14 = sphi %s961_s14, %s13_s14   ;;  %s931_s13 = sphi %s959_s13, %s1109_s13   ;;  %s927_s12 = sphi %s957_s12, %s1108_s12  }
   0x3   : > { %p27_p1 = scmp.ge.s32.totalorder %s25_s15, 2  ;;  %p168_p2 = scmp.lt.s32.totalorder %s935_s14, 3 }
   0x5   : > { %s1111_s15 = smov (%p27_p1, %s25_s15), 0  ;;  %p169_p3 = pnand %p700_p0, %p168_p2 }
   0x6   : > { %p202_p4 = scmp.lt.s32.totalorder (!%p169_p3), %s927_s12, 1 }
   0x7   : > { %172 = sbr.rel (%p169_p3) target bundleno = 194 (0xc2), region = 32 }
   0xc   : > { %v860_v0 = vld [vmem:[%s1105_s1 + $0x38] sm:$0xff]  ;;  %v859_v4 = vld [vmem:[%s1105_s1 + $0x30] sm:$0xff]  ;;  %s1113_s12 = smov (!%p202_p4, %s927_s12), 1  ;;  %v858_v8 = vld [vmem:[%s1105_s1 + $0x28] sm:$0xff]  ;;  %vm440_vm0 = vcmask 1045504  }
   0xd   : > { %v868_v1 = vld [vmem:[%s1105_s1 + $0x78] sm:$0xff]  ;;  %362 = vmatpush.bf16.msra.mxu0 %v860_v0  ;;  %v867_v5 = vld [vmem:[%s1105_s1 + $0x70] sm:$0xff]  ;;  %v866_v9 = vld [vmem:[%s1105_s1 + $0x68] sm:$0xff]  ;;  %s887_s17 = smul.u32 24, %s1113_s12 }
   0xe   : > { %v878_v2 = vld [vmem:[%s1105_s1 + $0xb8] sm:$0xff]  ;;  %376 = vmatpush.bf16.msra.mxu1 %v868_v1  ;;  %v877_v6 = vld [vmem:[%s1105_s1 + $0xb0] sm:$0xff]  ;;  %v876_v10 = vld [vmem:[%s1105_s1 + $0xa8] sm:$0xff] }
   0xf   : > { %v886_v3 = vld [vmem:[%s1105_s1 + $0xf8] sm:$0xff]  ;;  %545 = vmatpush.bf16.msra.mxu2 %v878_v2  ;;  %v885_v7 = vld [vmem:[%s1105_s1 + $0xf0] sm:$0xff]  ;;  %v884_v11 = vld [vmem:[%s1105_s1 + $0xe8] sm:$0xff]  ;;  %s1029_s28 = scalar_lea.vmem %s1104_s0, %s887_s17 }
  0x10   : > { %559 = vmatpush.bf16.msra.mxu3 %v886_v3  ;;  %v857_v12 = vld [vmem:[%s1105_s1 + $0x20] sm:$0xff]  ;;  %v856_v16 = vld [vmem:[%s1105_s1 + $0x18] sm:$0xff]  ;;  %v394_v20 = vld [vmem:[%s1029_s28 + $0x10] sm:$0x33] }
  0x11   : > { %363 = vmatpush.bf16.msra.mxu0 %v859_v4  ;;  %v865_v13 = vld [vmem:[%s1105_s1 + $0x60] sm:$0xff]  ;;  %v864_v17 = vld [vmem:[%s1105_s1 + $0x58] sm:$0xff]  ;;  %v855_v21 = vld [vmem:[%s1105_s1 + $0x10] sm:$0xff]  ;;  %v434_v27 = vunpack.c.l.b16 %v394_v20  ;;  %v435_v28 = vunpack.c.h.b16 %v394_v20 }
  0x12   : > { %377 = vmatpush.bf16.msra.mxu1 %v867_v5  ;;  %v875_v14 = vld [vmem:[%s1105_s1 + $0xa0] sm:$0xff]  ;;  %v874_v18 = vld [vmem:[%s1105_s1 + $0x98] sm:$0xff]  ;;  %v863_v22 = vld [vmem:[%s1105_s1 + $0x50] sm:$0xff] }
  0x13   : > { %546 = vmatpush.bf16.msra.mxu2 %v877_v6  ;;  %v883_v15 = vld [vmem:[%s1105_s1 + $0xe0] sm:$0xff]  ;;  %v882_v19 = vld [vmem:[%s1105_s1 + $0xd8] sm:$0xff]  ;;  %v873_v23 = vld [vmem:[%s1105_s1 + $0x90] sm:$0xff]  ;;  %v438_v36 = vpack.c.b16 %v434_v27, %v434_v27  ;;  %v439_v38 = vpack.c.b16 %v435_v28, %v435_v28 }
  0x14   : > { %560 = vmatpush.bf16.msra.mxu3 %v885_v7  ;;  %v881_v24 = vld [vmem:[%s1105_s1 + $0xd0] sm:$0xff]  ;;  %v778_v25 = vld [vmem:[%s1029_s28] sm:$0xc]  ;;  %v870_v26 = vld [vmem:[%s1029_s28 + $0x4] sm:$0xf0] }
  0x15   : > { %364 = vmatpush.bf16.msra.mxu0 %v858_v8  ;;  %v869_v29 = vld [vmem:[%s1029_s28 + $0x4] sm:$0xc]  ;;  %v780_v30 = vld [vmem:[%s1029_s28 + $0x8] sm:$0xf0]  ;;  %v779_v33 = vor.u32 %v870_v26, %v778_v25  ;;  %v706_v41 = vld [vmem:[%s1029_s28] sm:$0xf] }
  0x16   : > { %378 = vmatpush.bf16.msra.mxu1 %v866_v9  ;;  %v854_v31 = vld [vmem:[%s1105_s1 + $0x8] sm:$0xff]  ;;  %v783_v37 = vor.u32 %v869_v29, %v780_v30  ;;  %v853_v39 = vld [vmem:[%s1105_s1] sm:$0xff]  ;;  %v442_v48 = vrot.slane %v438_v36, 2  ;;  %v445_v50 = vrot.slane %v439_v38, 2 }
  0x17   : > { %547 = vmatpush.bf16.msra.mxu2 %v876_v10  ;;  %v862_v32 = vld [vmem:[%s1105_s1 + $0x48] sm:$0xff]  ;;  %v861_v40 = vld [vmem:[%s1105_s1 + $0x40] sm:$0xff]  ;;  %v441_v47 = vrot.slane %v779_v33, 2 }
  0x18   : > { %561 = vmatpush.bf16.msra.mxu3 %v884_v11  ;;  %v872_v34 = vld [vmem:[%s1105_s1 + $0x88] sm:$0xff]  ;;  %v851_v43 = vld [vmem:[%s1029_s28 + $0x4] sm:$0xf]  ;;  %v444_v49 = vrot.slane %v783_v37, 2  ;;  %v912_v61 = vld [vmem:[%s1106_s2] ss:$0 sm:$0xff] }
  0x19   : > { %365 = vmatpush.bf16.msra.mxu0 %v857_v12  ;;  %v880_v35 = vld [vmem:[%s1105_s1 + $0xc8] sm:$0xff]  ;;  %v871_v45 = vld [vmem:[%s1105_s1 + $0x80] sm:$0xff]  ;;  %v443_v53 = vsel %vm440_vm0, %v441_v47, %v442_v48 }
  0x1a   : > { %379 = vmatpush.bf16.msra.mxu1 %v865_v13  ;;  %v852_v42 = vld [vmem:[%s1029_s28 + $0x4] sm:$0xf0]  ;;  %v708_v44 = vld [vmem:[%s1029_s28 + $0x8] sm:$0xf0]  ;;  %v879_v46 = vld [vmem:[%s1105_s1 + $0xc0] sm:$0xff]  ;;  %v446_v54 = vsel %vm440_vm0, %v444_v49, %v445_v50  ;;  %s850_s28 = sshll.u32 %s1113_s12, 4 }
  0x1b   : > { %548 = vmatpush.bf16.msra.mxu2 %v875_v14  ;;  %v707_v51 = vor.u32 %v852_v42, %v706_v41  ;;  %v711_v52 = vor.u32 %v851_v43, %v708_v44  ;;  %s221_s20 = scalar_lea.vmem %s1107_s3, %s850_s28 }
  0x1c   : > { %562 = vmatpush.bf16.msra.mxu3 %v883_v15 }
  0x1d   : > { %366 = vmatpush.bf16.msra.mxu0 %v856_v16 }
  0x1e   : > { %380 = vmatpush.bf16.msra.mxu1 %v864_v17 }
  0x1f   : > { %549 = vmatpush.bf16.msra.mxu2 %v874_v18 }
  0x20   : > { %563 = vmatpush.bf16.msra.mxu3 %v882_v19 }
  0x21   : > { %367 = vmatpush.bf16.msra.mxu0 %v855_v21 }
  0x22   : > { %381 = vmatpush.bf16.msra.mxu1 %v863_v22 }
  0x23   : > { %550 = vmatpush.bf16.msra.mxu2 %v873_v23 }
  0x24   : > { %564 = vmatpush.bf16.msra.mxu3 %v881_v24 }
  0x25   : > { %368 = vmatpush.bf16.msra.mxu0 %v854_v31 }
  0x26   : > { %382 = vmatpush.bf16.msra.mxu1 %v862_v32 }
  0x27   : > { %551 = vmatpush.bf16.msra.mxu2 %v872_v34 }
  0x28   : > { %565 = vmatpush.bf16.msra.mxu3 %v880_v35 }
  0x29   : > { %369 = vmatpush.bf16.msra.mxu0 %v853_v39 }
  0x2a   : > { %383 = vmatpush.bf16.msra.mxu1 %v861_v40 }
  0x2b   : > { %552 = vmatpush.bf16.msra.mxu2 %v871_v45 }
  0x2c   : > { %566 = vmatpush.bf16.msra.mxu3 %v879_v46  ;;  %370 = vmatmul.bf16.vlgmr.msra.gmra.mxu0 %v707_v51 }
  0x2d   : > { %384 = vmatmul.bf16.vlgmr.msra.gmra.mxu1 %v711_v52 }
  0x2e   : > { %553 = vmatmul.bf16.vlgmr.msra.gmra.mxu2 %v443_v53 }
  0x2f   : > { %567 = vmatmul.bf16.vlgmr.msra.gmra.mxu3 %v446_v54 }
  0xa9   : > { %v371_v55 = vpop.f32.mrf.mxu0 }
  0xaa   : > { %v385_v56 = vpop.f32.mrf.mxu1 }
  0xab   : > { %v386_v57 = vadd.f32 %v385_v56, %v371_v55 }
  0xb1   : > { %v554_v58 = vpop.f32.mrf.mxu2  ;;  %v373_v0 = vpop.f32.mrf.mxu0 }
  0xb2   : > { %v568_v59 = vpop.f32.mrf.mxu3  ;;  %v387_v1 = vpop.f32.mrf.mxu1 }
  0xb3   : > { %v569_v60 = vadd.f32 %v568_v59, %v554_v58  ;;  %v388_v4 = vadd.f32 %v387_v1, %v373_v0 }
  0xb5   : > { %v575_v62 = vadd.f32 %v569_v60, %v386_v57 }
  0xb7   : > { %v585_v63 = vadd.f32 %v912_v61, %v575_v62 }
  0xb9   : > { %587 = vst [vmem:[%s221_s20] sm:$0xff] %v585_v63  ;;  %v556_v2 = vpop.f32.mrf.mxu2 }
  0xba   : > { %v570_v3 = vpop.f32.mrf.mxu3 }
  0xbb   : > { %v571_v5 = vadd.f32 %v570_v3, %v556_v2 }
  0xbd   : > { %v576_v6 = vadd.f32 %v571_v5, %v388_v4 }
  0xbf   : > { %v586_v7 = vadd.f32 %v912_v61, %v576_v6 }
  0xc1   : > { %588 = vst [vmem:[%s221_s20 + $0x8] sm:$0xff] %v586_v7 }
  0xc2 PF: > { %s13_s14 = sadd.s32 1, %s935_s14   ;;  %s1108_s12 = smov %s931_s13 }
  0xc3   : > { %p10_p5 = scmp.ge.s32.totalorder %s13_s14, 4   ;;  %s1109_s13 = smov %s1111_s15 }
  0xc5   :  { %12 = sbr.rel (!%p10_p5) target bundleno = 2 (0x2), region = 68 }

// kernel: generator_forward.98
= control target key start
LH: loop header
LB: loop body
LE: loop exit
PB: predicated region body
PF: predicated region fallthrough
CT: control target
= control target key end

     0   :  { %s1650_s12 = smov 0   ;;  %s1652_s13 = smov 0   ;;  %s1933_s0 = inlined_call_operand.vmem [shape: bf16[2,26,256], index: 0, kind: input, shape index: {}]   ;;  %s1934_s1 = inlined_call_operand.vmem [shape: bf16[1024,128], index: 1, kind: input, shape index: {}]   ;;  %s1935_s2 = inlined_call_operand.vmem [shape: f32[1,128], index: 2, kind: input, shape index: {}]   ;;  %s1936_s3 = inlined_call_operand.vmem [shape: f32[2,20,128], index: 3, kind: output, shape index: {}]  }
   0x1   :  { %s1654_s14 = smov 0  }
   0x2 LB: > { %s25_s15 = sadd.s32 1, %s1624_s13  ;;  %p1193_p0 = scmp.ge.s32.totalorder %s1628_s14, 1  ;;  %s1628_s14 = sphi %s1654_s14, %s13_s14   ;;  %s1624_s13 = sphi %s1652_s13, %s1938_s13   ;;  %s1620_s12 = sphi %s1650_s12, %s1937_s12  }
   0x3   : > { %p27_p1 = scmp.ge.s32.totalorder %s25_s15, 2  ;;  %p168_p2 = scmp.lt.s32.totalorder %s1628_s14, 3 }
   0x5   : > { %s1940_s15 = smov (%p27_p1, %s25_s15), 0  ;;  %p169_p3 = pnand %p1193_p0, %p168_p2 }
   0x6   : > { %p202_p4 = scmp.lt.s32.totalorder (!%p169_p3), %s1620_s12, 1 }
   0x7   : > { %172 = sbr.rel (%p169_p3) target bundleno = 244 (0xf4), region = 32 }
   0xc   : > { %v1513_v0 = vld [vmem:[%s1934_s1 + $0x38] sm:$0xff]  ;;  %v1512_v4 = vld [vmem:[%s1934_s1 + $0x30] sm:$0xff]  ;;  %s1942_s12 = smov (!%p202_p4, %s1620_s12), 1  ;;  %v1511_v8 = vld [vmem:[%s1934_s1 + $0x28] sm:$0xff]  ;;  %vm457_vm0 = vsmask.f32 7424 }
   0xd   : > { %v1521_v1 = vld [vmem:[%s1934_s1 + $0x78] sm:$0xff]  ;;  %370 = vmatpush.bf16.msra.mxu0 %v1513_v0  ;;  %v1520_v5 = vld [vmem:[%s1934_s1 + $0x70] sm:$0xff]  ;;  %v1519_v9 = vld [vmem:[%s1934_s1 + $0x68] sm:$0xff]  ;;  %s1503_s9 = sshll.u32 %s1942_s12, 5  ;;  %vm685_vm1 = vsmask.f32 5376 }
   0xe   : > { %v1531_v2 = vld [vmem:[%s1934_s1 + $0xb8] sm:$0xff]  ;;  %388 = vmatpush.bf16.msra.mxu1 %v1521_v1  ;;  %v1530_v6 = vld [vmem:[%s1934_s1 + $0xb0] sm:$0xff]  ;;  %v1529_v10 = vld [vmem:[%s1934_s1 + $0xa8] sm:$0xff]  ;;  %s1710_s20 = scalar_lea.vmem %s1933_s0, %s1503_s9  ;;  %vm917_vm2 = vcmask 1044480   ;;  %s1580_s9 = smul.u32 24, %s1942_s12 }
   0xf   : > { %v1539_v3 = vld [vmem:[%s1934_s1 + $0xf8] sm:$0xff]  ;;  %588 = vmatpush.bf16.msra.mxu2 %v1531_v2  ;;  %v1538_v7 = vld [vmem:[%s1934_s1 + $0xf0] sm:$0xff]  ;;  %v1537_v11 = vld [vmem:[%s1934_s1 + $0xe8] sm:$0xff] }
  0x10   : > { %606 = vmatpush.bf16.msra.mxu3 %v1539_v3  ;;  %v1510_v12 = vld [vmem:[%s1934_s1 + $0x20] sm:$0xff]  ;;  %v1523_v17 = vld [vmem:[%s1710_s20 + $0x4] sm:$0xf0]  ;;  %v411_v18 = vld [vmem:[%s1710_s20 + $0x10] sm:$0x77]  ;;  %s1919_s18 = scalar_lea.vmem %s1936_s3, %s1580_s9 }
  0x11   : > { %371 = vmatpush.bf16.msra.mxu0 %v1512_v4  ;;  %v1518_v13 = vld [vmem:[%s1934_s1 + $0x60] sm:$0xff]  ;;  %v1273_v20 = vld [vmem:[%s1710_s20 + $0x8] sm:$0xf0]  ;;  %v1509_v21 = vld [vmem:[%s1934_s1 + $0x18] sm:$0xff]  ;;  %v451_v25 = vunpack.c.l.b16 %v411_v18  ;;  %v452_v27 = vunpack.c.h.b16 %v411_v18 }
  0x12   : > { %389 = vmatpush.bf16.msra.mxu1 %v1520_v5  ;;  %v1528_v14 = vld [vmem:[%s1934_s1 + $0xa0] sm:$0xff]  ;;  %v1517_v22 = vld [vmem:[%s1934_s1 + $0x58] sm:$0xff]  ;;  %v1508_v29 = vld [vmem:[%s1934_s1 + $0x10] sm:$0xff] }
  0x13   : > { %589 = vmatpush.bf16.msra.mxu2 %v1530_v6  ;;  %v1536_v15 = vld [vmem:[%s1934_s1 + $0xe0] sm:$0xff]  ;;  %v1527_v23 = vld [vmem:[%s1934_s1 + $0x98] sm:$0xff]  ;;  %v1516_v30 = vld [vmem:[%s1934_s1 + $0x50] sm:$0xff]  ;;  %v1753_v33 = vpack.c.b16 %v451_v25, %v451_v25  ;;  %v1755_v35 = vpack.c.b16 %v452_v27, %v452_v27 }
  0x14   : > { %607 = vmatpush.bf16.msra.mxu3 %v1538_v7  ;;  %v1271_v16 = vld [vmem:[%s1710_s20] sm:$0xf]  ;;  %v1522_v19 = vld [vmem:[%s1710_s20 + $0x4] sm:$0xf]  ;;  %v1535_v24 = vld [vmem:[%s1934_s1 + $0xd8] sm:$0xff] }
  0x15   : > { %372 = vmatpush.bf16.msra.mxu0 %v1511_v8  ;;  %v1272_v26 = vor.u32 %v1523_v17, %v1271_v16  ;;  %v1276_v28 = vor.u32 %v1522_v19, %v1273_v20  ;;  %v1526_v31 = vld [vmem:[%s1934_s1 + $0x90] sm:$0xff]  ;;  %v1507_v37 = vld [vmem:[%s1934_s1 + $0x8] sm:$0xff]  ;;  %v466_v44 = vshll.u32 %v1753_v33, 16  ;;  %v478_v46 = vshll.u32 %v1755_v35, 16  ;;  %v1506_v47 = vld [vmem:[%s1934_s1] sm:$0xff] }
  0x16   : > { %390 = vmatpush.bf16.msra.mxu1 %v1519_v9  ;;  %v1534_v32 = vld [vmem:[%s1934_s1 + $0xd0] sm:$0xff]  ;;  %v1515_v38 = vld [vmem:[%s1934_s1 + $0x48] sm:$0xff]  ;;  %v1514_v48 = vld [vmem:[%s1934_s1 + $0x40] sm:$0xff]  ;;  %v482_v19 = vshrl.u32 %v1753_v33, 16  ;;  %v485_v20 = vshrl.u32 %v1755_v35, 16 }
  0x17   : > { %590 = vmatpush.bf16.msra.mxu2 %v1529_v10  ;;  %v461_v34 = vshll.u32 %v1272_v26, 16  ;;  %v473_v36 = vshll.u32 %v1276_v28, 16  ;;  %v459_v39 = vshrl.u32 %v1272_v26, 16  ;;  %v471_v40 = vshrl.u32 %v1276_v28, 16  ;;  %v1525_v41 = vld [vmem:[%s1934_s1 + $0x88] sm:$0xff]  ;;  %v1524_v53 = vld [vmem:[%s1934_s1 + $0x80] sm:$0xff] }
  0x18   : > { %608 = vmatpush.bf16.msra.mxu3 %v1537_v11  ;;  %v1533_v42 = vld [vmem:[%s1934_s1 + $0xc8] sm:$0xff]  ;;  %v1199_v49 = vld [vmem:[%s1710_s20] sm:$0xf]  ;;  %v1504_v51 = vld [vmem:[%s1710_s20 + $0x4] sm:$0xf]  ;;  %v1787_v56 = vrot.slane %v466_v44, 1 }
  0x19   : > { %373 = vmatpush.bf16.msra.mxu0 %v1510_v12  ;;  %v463_v43 = vrot.slane %v461_v34, 1  ;;  %v475_v45 = vrot.slane %v473_v36, 1  ;;  %v1505_v50 = vld [vmem:[%s1710_s20 + $0x4] sm:$0xf0]  ;;  %v1201_v52 = vld [vmem:[%s1710_s20 + $0x8] sm:$0xf0] }
  0x1a   : > { %391 = vmatpush.bf16.msra.mxu1 %v1518_v13  ;;  %v1532_v54 = vld [vmem:[%s1934_s1 + $0xc0] sm:$0xff]  ;;  %v1789_v58 = vrot.slane %v478_v46, 1  ;;  %v1551_v59 = vld [vmem:[%s1934_s1 + $0x138] sm:$0xff]  ;;  %v1200_v61 = vor.u32 %v1505_v50, %v1199_v49  ;;  %v1204_v62 = vor.u32 %v1504_v51, %v1201_v52  ;;  %v1550_v3 = vld [vmem:[%s1934_s1 + $0x130] sm:$0xff]  ;;  %v484_v35 = vor.u32 %v482_v19, %v1787_v56 }
  0x1b   : > { %591 = vmatpush.bf16.msra.mxu2 %v1528_v14  ;;  %v464_v55 = vor.u32 %v463_v43, %v459_v39  ;;  %v476_v57 = vor.u32 %v475_v45, %v471_v40  ;;  %v1559_v60 = vld [vmem:[%s1934_s1 + $0x178] sm:$0xff]  ;;  %v1558_v4 = vld [vmem:[%s1934_s1 + $0x170] sm:$0xff]  ;;  %v1549_v7 = vld [vmem:[%s1934_s1 + $0x128] sm:$0xff] }
  0x1c   : > { %609 = vmatpush.bf16.msra.mxu3 %v1536_v15  ;;  %v1571_v1 = vld [vmem:[%s1934_s1 + $0x1b8] sm:$0xff]  ;;  %v1570_v5 = vld [vmem:[%s1934_s1 + $0x1b0] sm:$0xff]  ;;  %v1557_v8 = vld [vmem:[%s1934_s1 + $0x168] sm:$0xff]  ;;  %v487_v36 = vor.u32 %v485_v20, %v1789_v58 }
  0x1d   : > { %374 = vmatpush.bf16.msra.mxu0 %v1509_v21  ;;  %v469_v63 = vsel %vm457_vm0, %v464_v55, %v1787_v56  ;;  %v481_v0 = vsel %vm457_vm0, %v476_v57, %v1789_v58  ;;  %v1579_v2 = vld [vmem:[%s1934_s1 + $0x1f8] sm:$0xff]  ;;  %v1578_v6 = vld [vmem:[%s1934_s1 + $0x1f0] sm:$0xff]  ;;  %v1569_v9 = vld [vmem:[%s1934_s1 + $0x1a8] sm:$0xff] }
  0x1e   : > { %392 = vmatpush.bf16.msra.mxu1 %v1517_v22  ;;  %v224_v10 = vld [vmem:[%s1710_s20 + $0x10] sm:$0x33]  ;;  %v1577_v11 = vld [vmem:[%s1934_s1 + $0x1e8] sm:$0xff]  ;;  %v1343_v12 = vld [vmem:[%s1710_s20] sm:$0xc] }
  0x1f   : > { %592 = vmatpush.bf16.msra.mxu2 %v1527_v23  ;;  %v1541_v13 = vld [vmem:[%s1710_s20 + $0x4] sm:$0xf0]  ;;  %v1548_v14 = vld [vmem:[%s1934_s1 + $0x120] sm:$0xff]  ;;  %v264_v17 = vunpack.c.l.b16 %v224_v10  ;;  %v265_v18 = vunpack.c.h.b16 %v224_v10  ;;  %v1351_v21 = vld [vmem:[%s1710_s20 + $0x10] sm:$0xf] }
  0x20   : > { %610 = vmatpush.bf16.msra.mxu3 %v1535_v24  ;;  %v1556_v15 = vld [vmem:[%s1934_s1 + $0x160] sm:$0xff]  ;;  %v1543_v22 = vld [vmem:[%s1710_s20 + $0x14] sm:$0x10]  ;;  %v1344_v23 = vor.u32 %v1541_v13, %v1343_v12  ;;  %v1345_v25 = vld [vmem:[%s1710_s20 + $0x8] sm:$0xf0] }
  0x21   : > { %375 = vmatpush.bf16.msra.mxu0 %v1508_v29  ;;  %v1568_v16 = vld [vmem:[%s1934_s1 + $0x1a0] sm:$0xff]  ;;  %v1542_v27 = vld [vmem:[%s1710_s20 + $0x14] sm:$0xf]  ;;  %v1353_v28 = vld [vmem:[%s1710_s20 + $0x18] sm:$0x10]  ;;  %v1352_v33 = vor.u32 %v1543_v22, %v1351_v21 }
  0x22   : > { %393 = vmatpush.bf16.msra.mxu1 %v1516_v30  ;;  %v1540_v24 = vld [vmem:[%s1710_s20 + $0x4] sm:$0xc]  ;;  %v1547_v29 = vld [vmem:[%s1934_s1 + $0x118] sm:$0xff]  ;;  %v1566_v43 = vld [vmem:[%s1934_s1 + $0x190] sm:$0xff]  ;;  %v690_v45 = vshll.u32 %v1344_v23, 16 }
  0x23   : > { %593 = vmatpush.bf16.msra.mxu2 %v1526_v31  ;;  %v1576_v26 = vld [vmem:[%s1934_s1 + $0x1e0] sm:$0xff]  ;;  %v1555_v30 = vld [vmem:[%s1934_s1 + $0x158] sm:$0xff]  ;;  %v268_v31 = vpack.c.b16 %v264_v17, %v264_v17  ;;  %v1348_v34 = vor.u32 %v1540_v24, %v1345_v25  ;;  %v1574_v44 = vld [vmem:[%s1934_s1 + $0x1d0] sm:$0xff]  ;;  %v695_v46 = vshrl.u32 %v1352_v33, 16 }
  0x24   : > { %611 = vmatpush.bf16.msra.mxu3 %v1534_v32  ;;  %v269_v32 = vpack.c.b16 %v265_v18, %v265_v18  ;;  %v1567_v39 = vld [vmem:[%s1934_s1 + $0x198] sm:$0xff]  ;;  %v1423_v49 = vld [vmem:[%s1710_s20] sm:$0x8]  ;;  %v1545_v50 = vld [vmem:[%s1934_s1 + $0x108] sm:$0xff] }
  0x25   : > { %376 = vmatpush.bf16.msra.mxu0 %v1507_v37  ;;  %v687_v37 = vshrl.u32 %v1344_v23, 16  ;;  %v1575_v40 = vld [vmem:[%s1934_s1 + $0x1d8] sm:$0xff]  ;;  %v1553_v51 = vld [vmem:[%s1934_s1 + $0x148] sm:$0xff]  ;;  %v1431_v57 = vld [vmem:[%s1710_s20 + $0x10] sm:$0xf] }
  0x26   : > { %394 = vmatpush.bf16.msra.mxu1 %v1515_v38  ;;  %v1356_v38 = vor.u32 %v1542_v27, %v1353_v28  ;;  %v1561_v56 = vld [vmem:[%s1710_s20 + $0x4] sm:$0xf0]  ;;  %v1563_v58 = vld [vmem:[%s1710_s20 + $0x14] sm:$0x10]  ;;  %v1544_v12 = vld [vmem:[%s1934_s1 + $0x100] sm:$0xff] }
  0x27   : > { %594 = vmatpush.bf16.msra.mxu2 %v1525_v41  ;;  %v1546_v41 = vld [vmem:[%s1934_s1 + $0x110] sm:$0xff]  ;;  %v689_v52 = vrot.slane %v687_v37, 2  ;;  %v1552_v13 = vld [vmem:[%s1934_s1 + $0x140] sm:$0xff] }
  0x28   : > { %612 = vmatpush.bf16.msra.mxu3 %v1533_v42  ;;  %v1554_v42 = vld [vmem:[%s1934_s1 + $0x150] sm:$0xff]  ;;  %v715_v55 = vshll.u32 %v1356_v38, 16  ;;  %v1564_v18 = vld [vmem:[%s1934_s1 + $0x180] sm:$0xff] }
  0x29   : > { %377 = vmatpush.bf16.msra.mxu0 %v1506_v47  ;;  %v698_v47 = vshll.u32 %v1352_v33, 16  ;;  %v1572_v19 = vld [vmem:[%s1934_s1 + $0x1c0] sm:$0xff] }
  0x2a   : > { %395 = vmatpush.bf16.msra.mxu1 %v1514_v48  ;;  %v704_v48 = vshrl.u32 %v1348_v34, 16 }
  0x2b   : > { %595 = vmatpush.bf16.msra.mxu2 %v1524_v53  ;;  %v707_v53 = vshll.u32 %v1348_v34, 16 }
  0x2c   : > { %613 = vmatpush.bf16.msra.mxu3 %v1532_v54  ;;  %378 = vmatmul.bf16.vlgmr.msra.gmra.mxu0 %v1200_v61  ;;  %v712_v54 = vshrl.u32 %v1356_v38, 16  ;;  %v1562_v61 = vld [vmem:[%s1710_s20 + $0x14] sm:$0xf] }
  0x2d   : > { %820 = vmatpush.bf16.msrb.mxu0 %v1551_v59  ;;  %396 = vmatmul.bf16.vlgmr.msra.gmra.mxu1 %v1204_v62  ;;  %v1560_v59 = vld [vmem:[%s1710_s20 + $0x4] sm:$0x8]  ;;  %v1433_v62 = vld [vmem:[%s1710_s20 + $0x18] sm:$0x10] }
  0x2e   : > { %838 = vmatpush.bf16.msrb.mxu1 %v1559_v60  ;;  %596 = vmatmul.bf16.vlgmr.msra.gmra.mxu2 %v469_v63  ;;  %v1425_v60 = vld [vmem:[%s1710_s20 + $0x8] sm:$0xf0]  ;;  %v692_v63 = vrot.slane %v690_v45, 3 }
  0x2f   : > { %614 = vmatmul.bf16.vlgmr.msra.gmra.mxu3 %v481_v0  ;;  %1024 = vmatpush.bf16.msrb.mxu2 %v1571_v1  ;;  %v697_v0 = vrot.slane %v695_v46, 2  ;;  %v700_v1 = vrot.slane %v698_v47, 3  ;;  %v1428_v10 = vor.u32 %v1560_v59, %v1425_v60 }
  0x30   : > { %1042 = vmatpush.bf16.msrb.mxu3 %v1579_v2  ;;  %v706_v2 = vrot.slane %v704_v48, 2 }
  0x31   : > { %821 = vmatpush.bf16.msrb.mxu0 %v1550_v3  ;;  %v709_v3 = vrot.slane %v707_v53, 3  ;;  %v921_v22 = vrot.slane %v1428_v10, 3 }
  0x32   : > { %839 = vmatpush.bf16.msrb.mxu1 %v1558_v4  ;;  %v714_v4 = vrot.slane %v712_v54, 2 }
  0x33   : > { %1025 = vmatpush.bf16.msrb.mxu2 %v1570_v5  ;;  %v717_v5 = vrot.slane %v715_v55, 3 }
  0x34   : > { %1043 = vmatpush.bf16.msrb.mxu3 %v1578_v6  ;;  %v1424_v6 = vor.u32 %v1561_v56, %v1423_v49 }
  0x35   : > { %822 = vmatpush.bf16.msrb.mxu0 %v1549_v7  ;;  %v1565_v7 = vld [vmem:[%s1934_s1 + $0x188] sm:$0xff]  ;;  %v718_v17 = vor.u32 %v717_v5, %v714_v4 }
  0x36   : > { %840 = vmatpush.bf16.msrb.mxu1 %v1557_v8  ;;  %v1573_v8 = vld [vmem:[%s1934_s1 + $0x1c8] sm:$0xff]  ;;  %v918_v20 = vrot.slane %v1424_v6, 3 }
  0x37   : > { %1026 = vmatpush.bf16.msrb.mxu2 %v1569_v9  ;;  %v1432_v9 = vor.u32 %v1563_v58, %v1431_v57  ;;  %v1605_v58 = vld [vmem:[%s1935_s2] ss:$0 sm:$0xff] }
  0x38   : > { %1044 = vmatpush.bf16.msrb.mxu3 %v1577_v11  ;;  %v1436_v11 = vor.u32 %v1562_v61, %v1433_v62 }
  0x39   : > { %823 = vmatpush.bf16.msrb.mxu0 %v1548_v14  ;;  %v693_v14 = vor.u32 %v692_v63, %v689_v52  ;;  %v919_v21 = vrot.slane %v1432_v9, 3 }
  0x3a   : > { %841 = vmatpush.bf16.msrb.mxu1 %v1556_v15  ;;  %v701_v15 = vor.u32 %v700_v1, %v697_v0  ;;  %v922_v23 = vrot.slane %v1436_v11, 3 }
  0x3b   : > { %1027 = vmatpush.bf16.msrb.mxu2 %v1568_v16  ;;  %v710_v16 = vor.u32 %v709_v3, %v706_v2 }
  0x3c   : > { %1045 = vmatpush.bf16.msrb.mxu3 %v1576_v26  ;;  %383 = vmatmul.bf16.gmra.mxu0 %v268_v31  ;;  %v702_v24 = vsel %vm685_vm1, %v693_v14, %v701_v15  ;;  %v920_v26 = vsel %vm917_vm2, %v918_v20, %v919_v21  ;;  %v923_v27 = vsel %vm917_vm2, %v921_v22, %v922_v23 }
  0x3d   : > { %824 = vmatpush.bf16.msrb.mxu0 %v1547_v29  ;;  %401 = vmatmul.bf16.gmra.mxu1 %v269_v32  ;;  %v719_v25 = vsel %vm685_vm1, %v710_v16, %v718_v17 }
  0x3e   : > { %842 = vmatpush.bf16.msrb.mxu1 %v1555_v30  ;;  %601 = vmatmul.bf16.gmra.mxu2 %v484_v35 }
  0x3f   : > { %619 = vmatmul.bf16.gmra.mxu3 %v487_v36  ;;  %1028 = vmatpush.bf16.msrb.mxu2 %v1567_v39 }
  0x40   : > { %1046 = vmatpush.bf16.msrb.mxu3 %v1575_v40 }
  0x41   : > { %825 = vmatpush.bf16.msrb.mxu0 %v1546_v41 }
  0x42   : > { %843 = vmatpush.bf16.msrb.mxu1 %v1554_v42 }
  0x43   : > { %1029 = vmatpush.bf16.msrb.mxu2 %v1566_v43 }
  0x44   : > { %1047 = vmatpush.bf16.msrb.mxu3 %v1574_v44 }
  0x45   : > { %826 = vmatpush.bf16.msrb.mxu0 %v1545_v50 }
  0x46   : > { %844 = vmatpush.bf16.msrb.mxu1 %v1553_v51 }
  0x47   : > { %1030 = vmatpush.bf16.msrb.mxu2 %v1565_v7 }
  0x48   : > { %1048 = vmatpush.bf16.msrb.mxu3 %v1573_v8 }
  0x49   : > { %827 = vmatpush.bf16.msrb.mxu0 %v1544_v12 }
  0x4a   : > { %845 = vmatpush.bf16.msrb.mxu1 %v1552_v13 }
  0x4b   : > { %1031 = vmatpush.bf16.msrb.mxu2 %v1564_v18 }
  0x4c   : > { %1049 = vmatpush.bf16.msrb.mxu3 %v1572_v19  ;;  %828 = vmatmul.bf16.vlgmr.msrb.gmra.mxu0 %v702_v24 }
  0x4d   : > { %846 = vmatmul.bf16.vlgmr.msrb.gmra.mxu1 %v719_v25 }
  0x4e   : > { %1032 = vmatmul.bf16.vlgmr.msrb.gmra.mxu2 %v920_v26 }
  0x4f   : > { %1050 = vmatmul.bf16.vlgmr.msrb.gmra.mxu3 %v923_v27 }
  0x5c   : > { %833 = vmatmul.bf16.gmra.mxu0 %v701_v15 }
  0x5d   : > { %851 = vmatmul.bf16.gmra.mxu1 %v718_v17 }
  0x5e   : > { %1037 = vmatmul.bf16.gmra.mxu2 %v919_v21 }
  0x5f   : > { %1055 = vmatmul.bf16.gmra.mxu3 %v922_v23 }
  0xa9   : > { %v379_v28 = vpop.f32.mrf.mxu0 }
  0xaa   : > { %v397_v29 = vpop.f32.mrf.mxu1 }
  0xab   : > { %v398_v51 = vadd.f32 %v397_v29, %v379_v28 }
  0xb1   : > { %v597_v30 = vpop.f32.mrf.mxu2  ;;  %v381_v32 = vpop.f32.mrf.mxu0 }
  0xb2   : > { %v615_v31 = vpop.f32.mrf.mxu3  ;;  %v399_v33 = vpop.f32.mrf.mxu1 }
  0xb3   : > { %v616_v50 = vadd.f32 %v615_v31, %v597_v30  ;;  %v400_v63 = vadd.f32 %v399_v33, %v381_v32 }
  0xb5   : > { %v627_v53 = vadd.f32 %v616_v50, %v398_v51 }
  0xb9   : > { %v599_v34 = vpop.f32.mrf.mxu2  ;;  %v384_v36 = vpop.f32.mrf.mxu0 }
  0xba   : > { %v617_v35 = vpop.f32.mrf.mxu3  ;;  %v402_v37 = vpop.f32.mrf.mxu1 }
  0xbb   : > { %v403_v38 = vadd.f32 %v402_v37, %v384_v36  ;;  %v618_v61 = vadd.f32 %v617_v35, %v599_v34 }
  0xbd   : > { %408 = vst [vmem:[#allocation2 + $0x8] sm:$0xf] %v403_v38  ;;  %v628_v2 = vadd.f32 %v618_v61, %v400_v63 }
  0xc1   : > { %v602_v39 = vpop.f32.mrf.mxu2  ;;  %v386_v42 = vpop.f32.mrf.mxu0 }
  0xc2   : > { %v620_v40 = vpop.f32.mrf.mxu3  ;;  %v404_v43 = vpop.f32.mrf.mxu1 }
  0xc3   : > { %v621_v41 = vadd.f32 %v620_v40, %v602_v39 }
  0xc4   : > { %v626_v44 = vld [vmem:[#allocation2 + $0x8] sm:$0xf] }
  0xc5   : > { %v629_v45 = vadd.f32 %v626_v44, %v621_v41 }
  0xc7   : > { %632 = vst [vmem:[#allocation2 + $0x8] sm:$0xf] %v629_v45 }
  0xc9   : > { %v604_v46 = vpop.f32.mrf.mxu2  ;;  %v829_v48 = vpop.f32.mrf.mxu0 }
  0xca   : > { %v622_v47 = vpop.f32.mrf.mxu3  ;;  %v847_v49 = vpop.f32.mrf.mxu1 }
  0xcb   : > { %v848_v52 = vadd.f32 %v847_v49, %v829_v48 }
  0xcd   : > { %v859_v56 = vadd.f32 %v848_v52, %v627_v53 }
  0xce   : > { %v858_v11 = vld [vmem:[#allocation2 + $0x8] sm:$0xf] }
  0xd1   : > { %v1033_v54 = vpop.f32.mrf.mxu2  ;;  %v831_v59 = vpop.f32.mrf.mxu0 }
  0xd2   : > { %v1051_v55 = vpop.f32.mrf.mxu3  ;;  %v849_v60 = vpop.f32.mrf.mxu1 }
  0xd3   : > { %v1052_v57 = vadd.f32 %v1051_v55, %v1033_v54  ;;  %v850_v1 = vadd.f32 %v849_v60, %v831_v59 }
  0xd5   : > { %v1063_v62 = vadd.f32 %v1052_v57, %v859_v56  ;;  %v860_v5 = vadd.f32 %v850_v1, %v628_v2 }
  0xd7   : > { %v1076_v0 = vadd.f32 %v1605_v58, %v1063_v62 }
  0xd9   : > { %1079 = vst [vmem:[%s1919_s18] sm:$0xff] %v1076_v0  ;;  %v1035_v3 = vpop.f32.mrf.mxu2  ;;  %v834_v7 = vpop.f32.mrf.mxu0 }
  0xda   : > { %v1053_v4 = vpop.f32.mrf.mxu3  ;;  %v852_v8 = vpop.f32.mrf.mxu1 }
  0xdb   : > { %v1054_v6 = vadd.f32 %v1053_v4, %v1035_v3  ;;  %v853_v9 = vadd.f32 %v852_v8, %v834_v7 }
  0xdd   : > { %v1064_v10 = vadd.f32 %v1054_v6, %v860_v5  ;;  %v861_v12 = vadd.f32 %v858_v11, %v853_v9 }
  0xdf   : > { %v1077_v13 = vadd.f32 %v1605_v58, %v1064_v10  ;;  %864 = vst [vmem:[#allocation2 + $0x8] sm:$0xf] %v861_v12 }
  0xe1   : > { %1080 = vst [vmem:[%s1919_s18 + $0x8] sm:$0xff] %v1077_v13  ;;  %v1038_v14 = vpop.f32.mrf.mxu2  ;;  %v836_v16 = vpop.f32.mrf.mxu0 }
  0xe2   : > { %v1056_v15 = vpop.f32.mrf.mxu3  ;;  %v854_v17 = vpop.f32.mrf.mxu1 }
  0xe3   : > { %v1057_v18 = vadd.f32 %v1056_v15, %v1038_v14 }
  0xe6   : > { %v1062_v19 = vld [vmem:[#allocation2 + $0x8] sm:$0xf] }
  0xe7   : > { %v1065_v20 = vadd.f32 %v1062_v19, %v1057_v18 }
  0xe9   : > { %1068 = vst [vmem:[#allocation2 + $0x8] sm:$0xf] %v1065_v20  ;;  %v1040_v21 = vpop.f32.mrf.mxu2 }
  0xea   : > { %v1058_v22 = vpop.f32.mrf.mxu3 }
  0xf0   : > { %v1071_v23 = vld [vmem:[#allocation2 + $0x8] sm:$0xf] }
  0xf1   : > { %v1078_v24 = vadd.f32 %v1605_v58, %v1071_v23 }
  0xf3   : > { %1081 = vst [vmem:[%s1919_s18 + $0x10] sm:$0xf] %v1078_v24 }
  0xf4 PF: > { %s13_s14 = sadd.s32 1, %s1628_s14   ;;  %s1937_s12 = smov %s1624_s13 }
  0xf5   : > { %p10_p5 = scmp.ge.s32.totalorder %s13_s14, 4   ;;  %s1938_s13 = smov %s1940_s15 }
  0xf7   :  { %12 = sbr.rel (!%p10_p5) target bundleno = 2 (0x2), region = 68 }

// kernel: generator_forward.101
= control target key start
LH: loop header
LB: loop body
LE: loop exit
PB: predicated region body
PF: predicated region fallthrough
CT: control target
= control target key end

     0   :  { %s929_s12 = smov 0   ;;  %s931_s13 = smov 0   ;;  %s1083_s0 = inlined_call_operand.vmem [shape: bf16[2,73,128], index: 0, kind: input, shape index: {}]   ;;  %s1084_s1 = inlined_call_operand.vmem [shape: bf16[256,64], index: 1, kind: input, shape index: {}]   ;;  %s1085_s2 = inlined_call_operand.vmem [shape: f32[1,64], index: 2, kind: input, shape index: {}]   ;;  %s1086_s3 = inlined_call_operand.vmem [shape: f32[2,72,64], index: 3, kind: output, shape index: {}]  }
   0x1   :  { %s933_s14 = smov 0  }
   0x2 LB: > { %s25_s15 = sadd.s32 1, %s903_s13  ;;  %p712_p0 = scmp.ge.s32.totalorder %s907_s14, 1  ;;  %s907_s14 = sphi %s933_s14, %s13_s14   ;;  %s903_s13 = sphi %s931_s13, %s1088_s13   ;;  %s899_s12 = sphi %s929_s12, %s1087_s12  }
   0x3   : > { %p27_p1 = scmp.ge.s32.totalorder %s25_s15, 2  ;;  %p168_p2 = scmp.lt.s32.totalorder %s907_s14, 3 }
   0x5   : > { %s1090_s15 = smov (%p27_p1, %s25_s15), 0  ;;  %p169_p3 = pnand %p712_p0, %p168_p2 }
   0x6   : > { %p202_p4 = scmp.lt.s32.totalorder (!%p169_p3), %s899_s12, 1 }
   0x7   : > { %172 = sbr.rel (%p169_p3) target bundleno = 229 (0xe5), region = 32 }
   0xc   : > { %v828_v0 = vld [vmem:[%s1084_s1 + $0x38] sm:$0xff]  ;;  %v827_v2 = vld [vmem:[%s1084_s1 + $0x30] sm:$0xff]  ;;  %s1092_s12 = smov (!%p202_p4, %s899_s12), 1  ;;  %v826_v4 = vld [vmem:[%s1084_s1 + $0x28] sm:$0xff]  ;;  %vm417_vm0 = vsmask.f32 7424 }
   0xd   : > { %v841_v1 = vld [vmem:[%s1084_s1 + $0x78] sm:$0xff]  ;;  %323 = vmatpush.bf16.msra.mxu0 %v828_v0  ;;  %842 = vmatpush.bf16.msra.mxu2 %v828_v0  ;;  %v840_v3 = vld [vmem:[%s1084_s1 + $0x70] sm:$0xff]  ;;  %v839_v5 = vld [vmem:[%s1084_s1 + $0x68] sm:$0xff]  ;;  %s858_s28 = smul.u32 40, %s1092_s12  ;;  %vm356_vm1 = vcmask 523264  }
   0xe   : > { %510 = vmatpush.bf16.msra.mxu1 %v841_v1  ;;  %850 = vmatpush.bf16.msra.mxu3 %v841_v1  ;;  %v825_v6 = vld [vmem:[%s1084_s1 + $0x20] sm:$0xff]  ;;  %v824_v8 = vld [vmem:[%s1084_s1 + $0x18] sm:$0xff]  ;;  %v823_v14 = vld [vmem:[%s1084_s1 + $0x10] sm:$0xff]  ;;  %s859_s29 = smul.u32 72, %s1092_s12 }
   0xf   : > { %v838_v7 = vld [vmem:[%s1084_s1 + $0x60] sm:$0xff]  ;;  %s977_s8 = scalar_lea.vmem %s1083_s0, %s858_s28  ;;  %v837_v9 = vld [vmem:[%s1084_s1 + $0x58] sm:$0xff]  ;;  %v836_v16 = vld [vmem:[%s1084_s1 + $0x50] sm:$0xff] }
  0x10   : > { %v829_v10 = vld [vmem:[%s977_s8] sm:$0xff]  ;;  %v832_v11 = vld [vmem:[%s977_s8 + $0x18] sm:$0xff]  ;;  %v830_v15 = vld [vmem:[%s977_s8 + $0x8] sm:$0xff]  ;;  %s1033_s7 = scalar_lea.vmem %s1086_s3, %s859_s29 }
  0x11   : > { %324 = vmatpush.bf16.msra.mxu0 %v827_v2  ;;  %843 = vmatpush.bf16.msra.mxu2 %v827_v2  ;;  %v781_v12 = vld [vmem:[%s977_s8 + $0x20] sm:$0xf]  ;;  %v833_v13 = vld [vmem:[%s977_s8 + $0x20] sm:$0x10]  ;;  %v421_v17 = vshll.u32 %v829_v10, 16  ;;  %v442_v19 = vshll.u32 %v832_v11, 16 }
  0x12   : > { %511 = vmatpush.bf16.msra.mxu1 %v840_v3  ;;  %851 = vmatpush.bf16.msra.mxu3 %v840_v3  ;;  %v782_v18 = vor.u32 %v833_v13, %v781_v12  ;;  %v822_v20 = vld [vmem:[%s1084_s1 + $0x8] sm:$0xff]  ;;  %v419_v21 = vshrl.u32 %v829_v10, 16  ;;  %v426_v22 = vshll.u32 %v830_v15, 16  ;;  %v446_v26 = vshrl.u32 %v832_v11, 16  ;;  %v821_v28 = vld [vmem:[%s1084_s1] sm:$0xff]  ;;  %v819_v35 = vld [vmem:[%s977_s8 + $0x10] sm:$0xff] }
  0x13   : > { %v835_v23 = vld [vmem:[%s1084_s1 + $0x48] sm:$0xff]  ;;  %v423_v24 = vrot.slane %v421_v17, 1  ;;  %v444_v25 = vrot.slane %v442_v19, 1  ;;  %v834_v29 = vld [vmem:[%s1084_s1 + $0x40] sm:$0xff]  ;;  %v831_v38 = vld [vmem:[%s977_s8 + $0x10] sm:$0xff]  ;;  %v430_v39 = vshrl.u32 %v830_v15, 16 }
  0x14   : > { %v450_v27 = vshll.u32 %v782_v18, 16  ;;  %v428_v31 = vrot.slane %v426_v22, 1  ;;  %v817_v34 = vld [vmem:[%s977_s8] sm:$0xff]  ;;  %v434_v40 = vshll.u32 %v831_v38, 16  ;;  %v454_v41 = vshrl.u32 %v782_v18, 16  ;;  %v818_v44 = vld [vmem:[%s977_s8 + $0x8] sm:$0xff] }
  0x15   : > { %325 = vmatpush.bf16.msra.mxu0 %v826_v4  ;;  %844 = vmatpush.bf16.msra.mxu2 %v826_v4  ;;  %v424_v30 = vor.u32 %v423_v24, %v419_v21  ;;  %v448_v32 = vor.u32 %v446_v26, %v444_v25  ;;  %v820_v45 = vld [vmem:[%s977_s8 + $0x18] sm:$0xff]  ;;  %v230_v48 = vld [vmem:[%s977_s8 + $0x20] sm:$0xf]  ;;  %v438_v49 = vshrl.u32 %v831_v38, 16 }
  0x16   : > { %512 = vmatpush.bf16.msra.mxu1 %v839_v5  ;;  %852 = vmatpush.bf16.msra.mxu3 %v839_v5  ;;  %v452_v33 = vrot.slane %v450_v27, 1  ;;  %v432_v42 = vor.u32 %v430_v39, %v428_v31  ;;  %v436_v43 = vrot.slane %v434_v40, 1  ;;  %v264_v50 = vunpack.c.l.b16 %v230_v48  ;;  %v1026_v63 = vld [vmem:[%s1085_s2] ss:$0 sm:$0xff] }
  0x17   : > { %v429_v36 = vsel %vm417_vm0, %v424_v30, %v428_v31 }
  0x18   : > { %v453_v37 = vsel %vm417_vm0, %v448_v32, %v452_v33  ;;  %v456_v46 = vor.u32 %v454_v41, %v452_v33  ;;  %v437_v47 = vsel %vm417_vm0, %v432_v42, %v436_v43  ;;  %v440_v51 = vor.u32 %v438_v49, %v436_v43 }
  0x19   : > { %326 = vmatpush.bf16.msra.mxu0 %v825_v6  ;;  %845 = vmatpush.bf16.msra.mxu2 %v825_v6  ;;  %v269_v52 = vpack.c.b16 %v264_v50, %v264_v50 }
  0x1a   : > { %513 = vmatpush.bf16.msra.mxu1 %v838_v7  ;;  %853 = vmatpush.bf16.msra.mxu3 %v838_v7  ;;  %v445_v53 = vsel %vm417_vm0, %v440_v51, %v444_v25 }
  0x1d   : > { %327 = vmatpush.bf16.msra.mxu0 %v824_v8  ;;  %846 = vmatpush.bf16.msra.mxu2 %v824_v8 }
  0x1e   : > { %514 = vmatpush.bf16.msra.mxu1 %v837_v9  ;;  %854 = vmatpush.bf16.msra.mxu3 %v837_v9 }
  0x21   : > { %328 = vmatpush.bf16.msra.mxu0 %v823_v14  ;;  %847 = vmatpush.bf16.msra.mxu2 %v823_v14 }
  0x22   : > { %515 = vmatpush.bf16.msra.mxu1 %v836_v16  ;;  %855 = vmatpush.bf16.msra.mxu3 %v836_v16 }
  0x25   : > { %329 = vmatpush.bf16.msra.mxu0 %v822_v20  ;;  %848 = vmatpush.bf16.msra.mxu2 %v822_v20 }
  0x26   : > { %516 = vmatpush.bf16.msra.mxu1 %v835_v23  ;;  %856 = vmatpush.bf16.msra.mxu3 %v835_v23 }
  0x29   : > { %330 = vmatpush.bf16.msra.mxu0 %v821_v28  ;;  %849 = vmatpush.bf16.msra.mxu2 %v821_v28 }
  0x2a   : > { %517 = vmatpush.bf16.msra.mxu1 %v834_v29  ;;  %857 = vmatpush.bf16.msra.mxu3 %v834_v29 }
  0x2c   : > { %331 = vmatmul.bf16.vlgmr.msra.gmra.mxu0 %v817_v34  ;;  %341 = vmatmul.bf16.vlgmr.msra.gmra.mxu2 %v819_v35 }
  0x2d   : > { %518 = vmatmul.bf16.vlgmr.msra.gmra.mxu1 %v429_v36  ;;  %533 = vmatmul.bf16.vlgmr.msra.gmra.mxu3 %v453_v37 }
  0x3c   : > { %336 = vmatmul.bf16.gmra.mxu0 %v818_v44  ;;  %346 = vmatmul.bf16.gmra.mxu2 %v820_v45 }
  0x3d   : > { %523 = vmatmul.bf16.gmra.mxu1 %v437_v47  ;;  %538 = vmatmul.bf16.gmra.mxu3 %v456_v46 }
  0x4c   : > { %351 = vmatmul.bf16.gmra.mxu2 %v269_v52 }
  0x4d   : > { %528 = vmatmul.bf16.gmra.mxu1 %v445_v53 }
  0xa9   : > { %v332_v54 = vpop.f32.mrf.mxu0 }
  0xaa   : > { %357 = vst.msk [vmem:[#allocation2] sm:$0xff] %vm356_vm1, %v332_v54  ;;  %v519_v55 = vpop.f32.mrf.mxu1 }
  0xaf   : > { %v342_v56 = vpop.f32.mrf.mxu2 }
  0xb0   : > { %361 = vst.msk [vmem:[#allocation2 + $0x20] sm:$0xff] %vm356_vm1, %v342_v56  ;;  %v534_v57 = vpop.f32.mrf.mxu3 }
  0xb1   : > { %v543_v58 = vld [vmem:[#allocation2] sm:$0xff]  ;;  %v334_v59 = vpop.f32.mrf.mxu0 }
  0xb2   : > { %v552_v60 = vadd.f32 %v543_v58, %v519_v55  ;;  %358 = vst.msk [vmem:[#allocation2 + $0x8] sm:$0xff] %vm356_vm1, %v334_v59  ;;  %v521_v61 = vpop.f32.mrf.mxu1 }
  0xb4   : > { %561 = vst.msk [vmem:[#allocation2] sm:$0xff] %vm356_vm1, %v552_v60 }
  0xb7   : > { %v344_v62 = vpop.f32.mrf.mxu2  ;;  %v547_v22 = vld [vmem:[#allocation2 + $0x20] sm:$0xff] }
  0xb8   : > { %362 = vst.msk [vmem:[#allocation2 + $0x28] sm:$0xff] %vm356_vm1, %v344_v62  ;;  %v536_v0 = vpop.f32.mrf.mxu3 }
  0xb9   : > { %v544_v1 = vld [vmem:[#allocation2 + $0x8] sm:$0xff]  ;;  %v337_v2 = vpop.f32.mrf.mxu0 }
  0xba   : > { %v553_v3 = vadd.f32 %v544_v1, %v521_v61  ;;  %359 = vst.msk [vmem:[#allocation2 + $0x10] sm:$0xff] %vm356_vm1, %v337_v2  ;;  %v524_v4 = vpop.f32.mrf.mxu1 }
  0xbb   : > { %v570_v5 = vld [vmem:[#allocation2] sm:$0xff] }
  0xbc   : > { %v583_v6 = vadd.f32 %v1026_v63, %v570_v5  ;;  %562 = vst.msk [vmem:[#allocation2 + $0x8] sm:$0xff] %vm356_vm1, %v553_v3 }
  0xbe   : > { %592 = vst.msk [vmem:[%s1033_s7] sm:$0xff] %vm356_vm1, %v583_v6 }
  0xbf   : > { %v347_v7 = vpop.f32.mrf.mxu2  ;;  %v548_v32 = vld [vmem:[#allocation2 + $0x28] sm:$0xff] }
  0xc0   : > { %363 = vst.msk [vmem:[#allocation2 + $0x30] sm:$0xff] %vm356_vm1, %v347_v7  ;;  %v539_v8 = vpop.f32.mrf.mxu3 }
  0xc1   : > { %v545_v9 = vld [vmem:[#allocation2 + $0x10] sm:$0xff]  ;;  %v339_v10 = vpop.f32.mrf.mxu0 }
  0xc2   : > { %v554_v11 = vadd.f32 %v545_v9, %v524_v4  ;;  %360 = vst.msk [vmem:[#allocation2 + $0x18] sm:$0xff] %vm356_vm1, %v339_v10  ;;  %v526_v12 = vpop.f32.mrf.mxu1 }
  0xc3   : > { %v571_v13 = vld [vmem:[#allocation2 + $0x8] sm:$0xff] }
  0xc4   : > { %v584_v14 = vadd.f32 %v1026_v63, %v571_v13  ;;  %563 = vst.msk [vmem:[#allocation2 + $0x10] sm:$0xff] %vm356_vm1, %v554_v11 }
  0xc6   : > { %593 = vst.msk [vmem:[%s1033_s7 + $0x8] sm:$0xff] %vm356_vm1, %v584_v14 }
  0xc7   : > { %v549_v15 = vld [vmem:[#allocation2 + $0x30] sm:$0xff]  ;;  %v349_v16 = vpop.f32.mrf.mxu2 }
  0xc8   : > { %v558_v17 = vadd.f32 %v549_v15, %v534_v57  ;;  %364 = vst.msk [vmem:[#allocation2 + $0x38] sm:$0xff] %vm356_vm1, %v349_v16  ;;  %v541_v18 = vpop.f32.mrf.mxu3 }
  0xc9   : > { %v546_v19 = vld [vmem:[#allocation2 + $0x18] sm:$0xff] }
  0xca   : > { %567 = vst.msk [vmem:[#allocation2 + $0x30] sm:$0xff] %vm356_vm1, %v558_v17  ;;  %v555_v20 = vadd.f32 %v546_v19, %v526_v12  ;;  %v529_v21 = vpop.f32.mrf.mxu1 }
  0xcb   : > { %v572_v23 = vld [vmem:[#allocation2 + $0x10] sm:$0xff]  ;;  %v556_v24 = vadd.f32 %v547_v22, %v529_v21 }
  0xcc   : > { %v585_v25 = vadd.f32 %v1026_v63, %v572_v23  ;;  %564 = vst.msk [vmem:[#allocation2 + $0x18] sm:$0xff] %vm356_vm1, %v555_v20 }
  0xcd   : > { %565 = vst.msk [vmem:[#allocation2 + $0x20] sm:$0xff] %vm356_vm1, %v556_v24 }
  0xce   : > { %594 = vst.msk [vmem:[%s1033_s7 + $0x10] sm:$0xff] %vm356_vm1, %v585_v25 }
  0xcf   : > { %v550_v26 = vld [vmem:[#allocation2 + $0x38] sm:$0xff]  ;;  %v352_v27 = vpop.f32.mrf.mxu2 }
  0xd0   : > { %v559_v28 = vadd.f32 %v550_v26, %v536_v0  ;;  %365 = vst.msk [vmem:[#allocation2 + $0x40] sm:$0xff] %vm356_vm1, %v352_v27 }
  0xd1   : > { %v576_v29 = vld [vmem:[#allocation2 + $0x30] sm:$0xff] }
  0xd2   : > { %v589_v30 = vadd.f32 %v1026_v63, %v576_v29  ;;  %568 = vst.msk [vmem:[#allocation2 + $0x38] sm:$0xff] %vm356_vm1, %v559_v28  ;;  %v531_v31 = vpop.f32.mrf.mxu1 }
  0xd3   : > { %v573_v33 = vld [vmem:[#allocation2 + $0x18] sm:$0xff]  ;;  %v557_v34 = vadd.f32 %v548_v32, %v531_v31 }
  0xd4   : > { %598 = vst.msk [vmem:[%s1033_s7 + $0x30] sm:$0xff] %vm356_vm1, %v589_v30  ;;  %v586_v35 = vadd.f32 %v1026_v63, %v573_v33  ;;  %v574_v36 = vld [vmem:[#allocation2 + $0x20] sm:$0xff] }
  0xd5   : > { %v587_v37 = vadd.f32 %v1026_v63, %v574_v36  ;;  %566 = vst.msk [vmem:[#allocation2 + $0x28] sm:$0xff] %vm356_vm1, %v557_v34 }
  0xd6   : > { %595 = vst.msk [vmem:[%s1033_s7 + $0x18] sm:$0xff] %vm356_vm1, %v586_v35 }
  0xd7   : > { %596 = vst.msk [vmem:[%s1033_s7 + $0x20] sm:$0xff] %vm356_vm1, %v587_v37  ;;  %v551_v38 = vld [vmem:[#allocation2 + $0x40] sm:$0xff]  ;;  %v354_v39 = vpop.f32.mrf.mxu2 }
  0xd8   : > { %v560_v40 = vadd.f32 %v551_v38, %v539_v8 }
  0xd9   : > { %v577_v41 = vld [vmem:[#allocation2 + $0x38] sm:$0xff] }
  0xda   : > { %v590_v42 = vadd.f32 %v1026_v63, %v577_v41  ;;  %569 = vst.msk [vmem:[#allocation2 + $0x40] sm:$0xff] %vm356_vm1, %v560_v40 }
  0xdc   : > { %599 = vst.msk [vmem:[%s1033_s7 + $0x38] sm:$0xff] %vm356_vm1, %v590_v42  ;;  %v575_v43 = vld [vmem:[#allocation2 + $0x28] sm:$0xff] }
  0xdd   : > { %v588_v44 = vadd.f32 %v1026_v63, %v575_v43 }
  0xdf   : > { %597 = vst.msk [vmem:[%s1033_s7 + $0x28] sm:$0xff] %vm356_vm1, %v588_v44 }
  0xe1   : > { %v578_v45 = vld [vmem:[#allocation2 + $0x40] sm:$0xff] }
  0xe2   : > { %v591_v46 = vadd.f32 %v1026_v63, %v578_v45 }
  0xe4   : > { %600 = vst.msk [vmem:[%s1033_s7 + $0x40] sm:$0xff] %vm356_vm1, %v591_v46 }
  0xe5 PF: > { %s13_s14 = sadd.s32 1, %s907_s14   ;;  %s1087_s12 = smov %s903_s13 }
  0xe6   : > { %p10_p5 = scmp.ge.s32.totalorder %s13_s14, 4   ;;  %s1088_s13 = smov %s1090_s15 }
  0xe8   :  { %12 = sbr.rel (!%p10_p5) target bundleno = 2 (0x2), region = 68 }

// kernel: generator_forward.100
= control target key start
LH: loop header
LB: loop body
LE: loop exit
PB: predicated region body
PF: predicated region fallthrough
CT: control target
= control target key end

     0   :  { %s657_s12 = smov 0   ;;  %s659_s13 = smov 0   ;;  %s751_s0 = inlined_call_operand.vmem [shape: bf16[2,64,128], index: 0, kind: input, shape index: {}]   ;;  %s752_s1 = inlined_call_operand.vmem [shape: bf16[128,64], index: 1, kind: input, shape index: {}]   ;;  %s753_s2 = inlined_call_operand.vmem [shape: f32[1,64], index: 2, kind: input, shape index: {}]   ;;  %s754_s3 = inlined_call_operand.vmem [shape: f32[2,64,64], index: 3, kind: output, shape index: {}]  }
   0x1   :  { %s661_s14 = smov 0  }
   0x2 LB: > { %s25_s15 = sadd.s32 1, %s631_s13  ;;  %p495_p0 = scmp.ge.s32.totalorder %s635_s14, 1  ;;  %s635_s14 = sphi %s661_s14, %s13_s14   ;;  %s631_s13 = sphi %s659_s13, %s756_s13   ;;  %s627_s12 = sphi %s657_s12, %s755_s12  }
   0x3   : > { %p27_p1 = scmp.ge.s32.totalorder %s25_s15, 2  ;;  %p168_p2 = scmp.lt.s32.totalorder %s635_s14, 3 }
   0x5   : > { %s758_s15 = smov (%p27_p1, %s25_s15), 0  ;;  %p169_p3 = pnand %p495_p0, %p168_p2 }
   0x6   : > { %p202_p4 = scmp.lt.s32.totalorder (!%p169_p3), %s627_s12, 1 }
   0x7   : > { %172 = sbr.rel (%p169_p3) target bundleno = 197 (0xc5), region = 32 }
   0xc   : > { %v563_v0 = vld [vmem:[%s752_s1 + $0x38] sm:$0xff]  ;;  %v562_v1 = vld [vmem:[%s752_s1 + $0x30] sm:$0xff]  ;;  %v561_v2 = vld [vmem:[%s752_s1 + $0x28] sm:$0xff]  ;;  %s760_s12 = smov (!%p202_p4, %s627_s12), 1  ;;  %vm347_vm0 = vcmask 523264  }
   0xd   : > { %318 = vmatpush.bf16.msra.mxu0 %v563_v0  ;;  %564 = vmatpush.bf16.msra.mxu1 %v563_v0  ;;  %v560_v3 = vld [vmem:[%s752_s1 + $0x20] sm:$0xff]  ;;  %v559_v4 = vld [vmem:[%s752_s1 + $0x18] sm:$0xff]  ;;  %v558_v5 = vld [vmem:[%s752_s1 + $0x10] sm:$0xff]  ;;  %s550_s30 = sshll.u32 %s760_s12, 5  ;;  %s551_s9 = sshll.u32 %s760_s12, 6 }
   0xe   : > { %565 = vmatpush.bf16.msra.mxu2 %v563_v0  ;;  %566 = vmatpush.bf16.msra.mxu3 %v563_v0  ;;  %v557_v6 = vld [vmem:[%s752_s1 + $0x8] sm:$0xff]  ;;  %v556_v7 = vld [vmem:[%s752_s1] sm:$0xff]  ;;  %s206_s8 = scalar_lea.vmem %s751_s0, %s550_s30  ;;  %s718_s18 = scalar_lea.vmem %s754_s3, %s551_s9 }
   0xf   : > { %v552_v8 = vld [vmem:[%s206_s8] sm:$0xff]  ;;  %v553_v9 = vld [vmem:[%s206_s8 + $0x8] sm:$0xff]  ;;  %v554_v10 = vld [vmem:[%s206_s8 + $0x10] sm:$0xff] }
  0x10   : > { %v555_v11 = vld [vmem:[%s206_s8 + $0x18] sm:$0xff]  ;;  %v612_v14 = vld [vmem:[%s753_s2] ss:$0 sm:$0xff] }
  0x11   : > { %319 = vmatpush.bf16.msra.mxu0 %v562_v1  ;;  %567 = vmatpush.bf16.msra.mxu1 %v562_v1 }
  0x12   : > { %568 = vmatpush.bf16.msra.mxu2 %v562_v1  ;;  %569 = vmatpush.bf16.msra.mxu3 %v562_v1 }
  0x15   : > { %320 = vmatpush.bf16.msra.mxu0 %v561_v2  ;;  %570 = vmatpush.bf16.msra.mxu1 %v561_v2 }
  0x16   : > { %571 = vmatpush.bf16.msra.mxu2 %v561_v2  ;;  %572 = vmatpush.bf16.msra.mxu3 %v561_v2 }
  0x19   : > { %321 = vmatpush.bf16.msra.mxu0 %v560_v3  ;;  %573 = vmatpush.bf16.msra.mxu1 %v560_v3 }
  0x1a   : > { %574 = vmatpush.bf16.msra.mxu2 %v560_v3  ;;  %575 = vmatpush.bf16.msra.mxu3 %v560_v3 }
  0x1d   : > { %322 = vmatpush.bf16.msra.mxu0 %v559_v4  ;;  %576 = vmatpush.bf16.msra.mxu1 %v559_v4 }
  0x1e   : > { %577 = vmatpush.bf16.msra.mxu2 %v559_v4  ;;  %578 = vmatpush.bf16.msra.mxu3 %v559_v4 }
  0x21   : > { %323 = vmatpush.bf16.msra.mxu0 %v558_v5  ;;  %579 = vmatpush.bf16.msra.mxu1 %v558_v5 }
  0x22   : > { %580 = vmatpush.bf16.msra.mxu2 %v558_v5  ;;  %581 = vmatpush.bf16.msra.mxu3 %v558_v5 }
  0x25   : > { %324 = vmatpush.bf16.msra.mxu0 %v557_v6  ;;  %582 = vmatpush.bf16.msra.mxu1 %v557_v6 }
  0x26   : > { %583 = vmatpush.bf16.msra.mxu2 %v557_v6  ;;  %584 = vmatpush.bf16.msra.mxu3 %v557_v6 }
  0x29   : > { %325 = vmatpush.bf16.msra.mxu0 %v556_v7  ;;  %585 = vmatpush.bf16.msra.mxu1 %v556_v7 }
  0x2a   : > { %586 = vmatpush.bf16.msra.mxu2 %v556_v7  ;;  %587 = vmatpush.bf16.msra.mxu3 %v556_v7 }
  0x2c   : > { %326 = vmatmul.bf16.vlgmr.msra.gmra.mxu0 %v552_v8  ;;  %331 = vmatmul.bf16.vlgmr.msra.gmra.mxu1 %v553_v9 }
  0x2d   : > { %336 = vmatmul.bf16.vlgmr.msra.gmra.mxu2 %v554_v10  ;;  %341 = vmatmul.bf16.vlgmr.msra.gmra.mxu3 %v555_v11 }
  0xa9   : > { %v327_v12 = vpop.f32.mrf.mxu0  ;;  %v332_v13 = vpop.f32.mrf.mxu1 }
  0xaa   : > { %348 = vst.msk [vmem:[#allocation2] sm:$0xff] %vm347_vm0, %v327_v12 }
  0xab   : > { %350 = vst.msk [vmem:[#allocation2 + $0x10] sm:$0xff] %vm347_vm0, %v332_v13 }
  0xb0   : > { %v337_v15 = vpop.f32.mrf.mxu2  ;;  %v342_v16 = vpop.f32.mrf.mxu3 }
  0xb1   : > { %v356_v17 = vld [vmem:[#allocation2] sm:$0xff]  ;;  %352 = vst.msk [vmem:[#allocation2 + $0x20] sm:$0xff] %vm347_vm0, %v337_v15  ;;  %v329_v18 = vpop.f32.mrf.mxu0  ;;  %v334_v22 = vpop.f32.mrf.mxu1 }
  0xb2   : > { %v368_v19 = vadd.f32 %v612_v14, %v356_v17  ;;  %v358_v20 = vld [vmem:[#allocation2 + $0x10] sm:$0xff]  ;;  %354 = vst.msk [vmem:[#allocation2 + $0x30] sm:$0xff] %vm347_vm0, %v342_v16 }
  0xb3   : > { %v370_v21 = vadd.f32 %v612_v14, %v358_v20  ;;  %349 = vst.msk [vmem:[#allocation2 + $0x8] sm:$0xff] %vm347_vm0, %v329_v18 }
  0xb4   : > { %376 = vst.msk [vmem:[%s718_s18] sm:$0xff] %vm347_vm0, %v368_v19 }
  0xb5   : > { %378 = vst.msk [vmem:[%s718_s18 + $0x10] sm:$0xff] %vm347_vm0, %v370_v21 }
  0xb6   : > { %351 = vst.msk [vmem:[#allocation2 + $0x18] sm:$0xff] %vm347_vm0, %v334_v22 }
  0xb8   : > { %v360_v23 = vld [vmem:[#allocation2 + $0x20] sm:$0xff]  ;;  %v339_v24 = vpop.f32.mrf.mxu2  ;;  %v344_v25 = vpop.f32.mrf.mxu3 }
  0xb9   : > { %v372_v26 = vadd.f32 %v612_v14, %v360_v23  ;;  %v362_v27 = vld [vmem:[#allocation2 + $0x30] sm:$0xff]  ;;  %353 = vst.msk [vmem:[#allocation2 + $0x28] sm:$0xff] %vm347_vm0, %v339_v24 }
  0xba   : > { %v374_v28 = vadd.f32 %v612_v14, %v362_v27  ;;  %v357_v29 = vld [vmem:[#allocation2 + $0x8] sm:$0xff]  ;;  %355 = vst.msk [vmem:[#allocation2 + $0x38] sm:$0xff] %vm347_vm0, %v344_v25 }
  0xbb   : > { %380 = vst.msk [vmem:[%s718_s18 + $0x20] sm:$0xff] %vm347_vm0, %v372_v26  ;;  %v369_v30 = vadd.f32 %v612_v14, %v357_v29 }
  0xbc   : > { %382 = vst.msk [vmem:[%s718_s18 + $0x30] sm:$0xff] %vm347_vm0, %v374_v28 }
  0xbd   : > { %377 = vst.msk [vmem:[%s718_s18 + $0x8] sm:$0xff] %vm347_vm0, %v369_v30  ;;  %v359_v31 = vld [vmem:[#allocation2 + $0x18] sm:$0xff] }
  0xbe   : > { %v371_v32 = vadd.f32 %v612_v14, %v359_v31 }
  0xc0   : > { %379 = vst.msk [vmem:[%s718_s18 + $0x18] sm:$0xff] %vm347_vm0, %v371_v32  ;;  %v361_v33 = vld [vmem:[#allocation2 + $0x28] sm:$0xff] }
  0xc1   : > { %v373_v34 = vadd.f32 %v612_v14, %v361_v33  ;;  %v363_v35 = vld [vmem:[#allocation2 + $0x38] sm:$0xff] }
  0xc2   : > { %v375_v36 = vadd.f32 %v612_v14, %v363_v35 }
  0xc3   : > { %381 = vst.msk [vmem:[%s718_s18 + $0x28] sm:$0xff] %vm347_vm0, %v373_v34 }
  0xc4   : > { %383 = vst.msk [vmem:[%s718_s18 + $0x38] sm:$0xff] %vm347_vm0, %v375_v36 }
  0xc5 PF: > { %s13_s14 = sadd.s32 1, %s635_s14   ;;  %s755_s12 = smov %s631_s13 }
  0xc6   : > { %p10_p5 = scmp.ge.s32.totalorder %s13_s14, 4   ;;  %s756_s13 = smov %s758_s15 }
  0xc8   :  { %12 = sbr.rel (!%p10_p5) target bundleno = 2 (0x2), region = 68 }

// kernel: generator_forward.102
= control target key start
LH: loop header
LB: loop body
LE: loop exit
PB: predicated region body
PF: predicated region fallthrough
CT: control target
= control target key end

     0   :  { %s857_s12 = smov 0   ;;  %s859_s13 = smov 0   ;;  %s983_s0 = inlined_call_operand.vmem [shape: bf16[2,72,128], index: 0, kind: input, shape index: {}]   ;;  %s984_s1 = inlined_call_operand.vmem [shape: bf16[256,64], index: 1, kind: input, shape index: {}]   ;;  %s985_s2 = inlined_call_operand.vmem [shape: f32[1,64], index: 2, kind: input, shape index: {}]   ;;  %s986_s3 = inlined_call_operand.vmem [shape: f32[2,64,64], index: 3, kind: output, shape index: {}]  }
   0x1   :  { %s861_s14 = smov 0  }
   0x2 LB: > { %s25_s15 = sadd.s32 1, %s831_s13  ;;  %p644_p0 = scmp.ge.s32.totalorder %s835_s14, 1  ;;  %s835_s14 = sphi %s861_s14, %s13_s14   ;;  %s831_s13 = sphi %s859_s13, %s988_s13   ;;  %s827_s12 = sphi %s857_s12, %s987_s12  }
   0x3   : > { %p27_p1 = scmp.ge.s32.totalorder %s25_s15, 2  ;;  %p168_p2 = scmp.lt.s32.totalorder %s835_s14, 3 }
   0x5   : > { %s990_s15 = smov (%p27_p1, %s25_s15), 0  ;;  %p169_p3 = pnand %p644_p0, %p168_p2 }
   0x6   : > { %p202_p4 = scmp.lt.s32.totalorder (!%p169_p3), %s827_s12, 1 }
   0x7   : > { %172 = sbr.rel (%p169_p3) target bundleno = 221 (0xdd), region = 32 }
   0xc   : > { %v758_v0 = vld [vmem:[%s984_s1 + $0x38] sm:$0xff]  ;;  %v757_v2 = vld [vmem:[%s984_s1 + $0x30] sm:$0xff]  ;;  %v756_v4 = vld [vmem:[%s984_s1 + $0x28] sm:$0xff]  ;;  %s992_s12 = smov (!%p202_p4, %s827_s12), 1  ;;  %vm347_vm0 = vcmask 523264  }
   0xd   : > { %v770_v1 = vld [vmem:[%s984_s1 + $0x78] sm:$0xff]  ;;  %318 = vmatpush.bf16.msra.mxu0 %v758_v0  ;;  %771 = vmatpush.bf16.msra.mxu2 %v758_v0  ;;  %v769_v3 = vld [vmem:[%s984_s1 + $0x70] sm:$0xff]  ;;  %v768_v5 = vld [vmem:[%s984_s1 + $0x68] sm:$0xff]  ;;  %s787_s19 = smul.u32 36, %s992_s12  ;;  %s746_s29 = sshll.u32 %s992_s12, 6 }
   0xe   : > { %779 = vmatpush.bf16.msra.mxu3 %v770_v1  ;;  %452 = vmatpush.bf16.msra.mxu1 %v770_v1  ;;  %v755_v6 = vld [vmem:[%s984_s1 + $0x20] sm:$0xff]  ;;  %v754_v8 = vld [vmem:[%s984_s1 + $0x18] sm:$0xff]  ;;  %v753_v10 = vld [vmem:[%s984_s1 + $0x10] sm:$0xff]  ;;  %s946_s7 = scalar_lea.vmem %s986_s3, %s746_s29 }
   0xf   : > { %v767_v7 = vld [vmem:[%s984_s1 + $0x60] sm:$0xff]  ;;  %v766_v9 = vld [vmem:[%s984_s1 + $0x58] sm:$0xff]  ;;  %v765_v11 = vld [vmem:[%s984_s1 + $0x50] sm:$0xff]  ;;  %s206_s26 = scalar_lea.vmem %s983_s0, %s787_s19 }
  0x10   : > { %v752_v12 = vld [vmem:[%s984_s1 + $0x8] sm:$0xff]  ;;  %v751_v14 = vld [vmem:[%s984_s1] sm:$0xff]  ;;  %v749_v17 = vld [vmem:[%s206_s26 + $0x10] sm:$0xff] }
  0x11   : > { %319 = vmatpush.bf16.msra.mxu0 %v757_v2  ;;  %772 = vmatpush.bf16.msra.mxu2 %v757_v2  ;;  %v764_v13 = vld [vmem:[%s984_s1 + $0x48] sm:$0xff]  ;;  %v763_v15 = vld [vmem:[%s984_s1 + $0x40] sm:$0xff]  ;;  %v761_v18 = vld [vmem:[%s206_s26 + $0x14] sm:$0xff] }
  0x12   : > { %780 = vmatpush.bf16.msra.mxu3 %v769_v3  ;;  %453 = vmatpush.bf16.msra.mxu1 %v769_v3  ;;  %v747_v16 = vld [vmem:[%s206_s26] sm:$0xff]  ;;  %v748_v20 = vld [vmem:[%s206_s26 + $0x8] sm:$0xff]  ;;  %v750_v21 = vld [vmem:[%s206_s26 + $0x18] sm:$0xff] }
  0x13   : > { %v759_v19 = vld [vmem:[%s206_s26 + $0x4] sm:$0xff]  ;;  %v762_v22 = vld [vmem:[%s206_s26 + $0x1c] sm:$0xff]  ;;  %v760_v23 = vld [vmem:[%s206_s26 + $0xc] sm:$0xff] }
  0x14   : > { %v812_v34 = vld [vmem:[%s985_s2] ss:$0 sm:$0xff] }
  0x15   : > { %320 = vmatpush.bf16.msra.mxu0 %v756_v4  ;;  %773 = vmatpush.bf16.msra.mxu2 %v756_v4 }
  0x16   : > { %781 = vmatpush.bf16.msra.mxu3 %v768_v5  ;;  %454 = vmatpush.bf16.msra.mxu1 %v768_v5 }
  0x19   : > { %321 = vmatpush.bf16.msra.mxu0 %v755_v6  ;;  %774 = vmatpush.bf16.msra.mxu2 %v755_v6 }
  0x1a   : > { %782 = vmatpush.bf16.msra.mxu3 %v767_v7  ;;  %455 = vmatpush.bf16.msra.mxu1 %v767_v7 }
  0x1d   : > { %322 = vmatpush.bf16.msra.mxu0 %v754_v8  ;;  %775 = vmatpush.bf16.msra.mxu2 %v754_v8 }
  0x1e   : > { %783 = vmatpush.bf16.msra.mxu3 %v766_v9  ;;  %456 = vmatpush.bf16.msra.mxu1 %v766_v9 }
  0x21   : > { %323 = vmatpush.bf16.msra.mxu0 %v753_v10  ;;  %776 = vmatpush.bf16.msra.mxu2 %v753_v10 }
  0x22   : > { %784 = vmatpush.bf16.msra.mxu3 %v765_v11  ;;  %457 = vmatpush.bf16.msra.mxu1 %v765_v11 }
  0x25   : > { %324 = vmatpush.bf16.msra.mxu0 %v752_v12  ;;  %777 = vmatpush.bf16.msra.mxu2 %v752_v12 }
  0x26   : > { %785 = vmatpush.bf16.msra.mxu3 %v764_v13  ;;  %458 = vmatpush.bf16.msra.mxu1 %v764_v13 }
  0x29   : > { %325 = vmatpush.bf16.msra.mxu0 %v751_v14  ;;  %778 = vmatpush.bf16.msra.mxu2 %v751_v14 }
  0x2a   : > { %786 = vmatpush.bf16.msra.mxu3 %v763_v15  ;;  %459 = vmatpush.bf16.msra.mxu1 %v763_v15 }
  0x2c   : > { %326 = vmatmul.bf16.vlgmr.msra.gmra.mxu0 %v747_v16  ;;  %336 = vmatmul.bf16.vlgmr.msra.gmra.mxu2 %v749_v17 }
  0x2d   : > { %470 = vmatmul.bf16.vlgmr.msra.gmra.mxu3 %v761_v18  ;;  %460 = vmatmul.bf16.vlgmr.msra.gmra.mxu1 %v759_v19 }
  0x3c   : > { %331 = vmatmul.bf16.gmra.mxu0 %v748_v20  ;;  %341 = vmatmul.bf16.gmra.mxu2 %v750_v21 }
  0x3d   : > { %475 = vmatmul.bf16.gmra.mxu3 %v762_v22  ;;  %465 = vmatmul.bf16.gmra.mxu1 %v760_v23 }
  0xa9   : > { %v327_v24 = vpop.f32.mrf.mxu0 }
  0xaa   : > { %348 = vst.msk [vmem:[#allocation2] sm:$0xff] %vm347_vm0, %v327_v24  ;;  %v461_v25 = vpop.f32.mrf.mxu1 }
  0xaf   : > { %v337_v26 = vpop.f32.mrf.mxu2 }
  0xb0   : > { %352 = vst.msk [vmem:[#allocation2 + $0x20] sm:$0xff] %vm347_vm0, %v337_v26  ;;  %v471_v28 = vpop.f32.mrf.mxu3 }
  0xb1   : > { %v481_v27 = vld [vmem:[#allocation2] sm:$0xff]  ;;  %v329_v29 = vpop.f32.mrf.mxu0 }
  0xb2   : > { %v489_v30 = vadd.f32 %v481_v27, %v461_v25  ;;  %349 = vst.msk [vmem:[#allocation2 + $0x8] sm:$0xff] %vm347_vm0, %v329_v29  ;;  %v463_v31 = vpop.f32.mrf.mxu1 }
  0xb4   : > { %497 = vst.msk [vmem:[#allocation2] sm:$0xff] %vm347_vm0, %v489_v30 }
  0xb7   : > { %v485_v32 = vld [vmem:[#allocation2 + $0x20] sm:$0xff]  ;;  %v339_v33 = vpop.f32.mrf.mxu2 }
  0xb8   : > { %v493_v35 = vadd.f32 %v485_v32, %v471_v28  ;;  %353 = vst.msk [vmem:[#allocation2 + $0x28] sm:$0xff] %vm347_vm0, %v339_v33  ;;  %v473_v40 = vpop.f32.mrf.mxu3 }
  0xb9   : > { %v482_v36 = vld [vmem:[#allocation2 + $0x8] sm:$0xff]  ;;  %v332_v37 = vpop.f32.mrf.mxu0 }
  0xba   : > { %501 = vst.msk [vmem:[#allocation2 + $0x20] sm:$0xff] %vm347_vm0, %v493_v35  ;;  %v490_v38 = vadd.f32 %v482_v36, %v463_v31  ;;  %v466_v45 = vpop.f32.mrf.mxu1 }
  0xbb   : > { %v505_v39 = vld [vmem:[#allocation2] sm:$0xff]  ;;  %350 = vst.msk [vmem:[#allocation2 + $0x10] sm:$0xff] %vm347_vm0, %v332_v37 }
  0xbc   : > { %v517_v41 = vadd.f32 %v812_v34, %v505_v39  ;;  %498 = vst.msk [vmem:[#allocation2 + $0x8] sm:$0xff] %vm347_vm0, %v490_v38 }
  0xbe   : > { %525 = vst.msk [vmem:[%s946_s7] sm:$0xff] %vm347_vm0, %v517_v41 }
  0xbf   : > { %v486_v42 = vld [vmem:[#allocation2 + $0x28] sm:$0xff]  ;;  %v342_v43 = vpop.f32.mrf.mxu2 }
  0xc0   : > { %v494_v44 = vadd.f32 %v486_v42, %v473_v40  ;;  %354 = vst.msk [vmem:[#allocation2 + $0x30] sm:$0xff] %vm347_vm0, %v342_v43  ;;  %v476_v53 = vpop.f32.mrf.mxu3 }
  0xc1   : > { %v509_v46 = vld [vmem:[#allocation2 + $0x20] sm:$0xff]  ;;  %v334_v47 = vpop.f32.mrf.mxu0 }
  0xc2   : > { %v521_v48 = vadd.f32 %v812_v34, %v509_v46  ;;  %502 = vst.msk [vmem:[#allocation2 + $0x28] sm:$0xff] %vm347_vm0, %v494_v44  ;;  %v483_v49 = vld [vmem:[#allocation2 + $0x10] sm:$0xff]  ;;  %v468_v59 = vpop.f32.mrf.mxu1 }
  0xc3   : > { %v506_v50 = vld [vmem:[#allocation2 + $0x8] sm:$0xff]  ;;  %v491_v51 = vadd.f32 %v483_v49, %v466_v45  ;;  %351 = vst.msk [vmem:[#allocation2 + $0x18] sm:$0xff] %vm347_vm0, %v334_v47 }
  0xc4   : > { %529 = vst.msk [vmem:[%s946_s7 + $0x20] sm:$0xff] %vm347_vm0, %v521_v48  ;;  %v518_v52 = vadd.f32 %v812_v34, %v506_v50 }
  0xc5   : > { %499 = vst.msk [vmem:[#allocation2 + $0x10] sm:$0xff] %vm347_vm0, %v491_v51 }
  0xc6   : > { %526 = vst.msk [vmem:[%s946_s7 + $0x8] sm:$0xff] %vm347_vm0, %v518_v52 }
  0xc7   : > { %v487_v54 = vld [vmem:[#allocation2 + $0x30] sm:$0xff]  ;;  %v344_v55 = vpop.f32.mrf.mxu2 }
  0xc8   : > { %v495_v56 = vadd.f32 %v487_v54, %v476_v53  ;;  %355 = vst.msk [vmem:[#allocation2 + $0x38] sm:$0xff] %vm347_vm0, %v344_v55  ;;  %v478_v0 = vpop.f32.mrf.mxu3 }
  0xc9   : > { %v510_v57 = vld [vmem:[#allocation2 + $0x28] sm:$0xff] }
  0xca   : > { %v522_v58 = vadd.f32 %v812_v34, %v510_v57  ;;  %503 = vst.msk [vmem:[#allocation2 + $0x30] sm:$0xff] %vm347_vm0, %v495_v56  ;;  %v484_v60 = vld [vmem:[#allocation2 + $0x18] sm:$0xff] }
  0xcb   : > { %v492_v61 = vadd.f32 %v484_v60, %v468_v59 }
  0xcc   : > { %530 = vst.msk [vmem:[%s946_s7 + $0x28] sm:$0xff] %vm347_vm0, %v522_v58  ;;  %v507_v62 = vld [vmem:[#allocation2 + $0x10] sm:$0xff] }
  0xcd   : > { %v519_v63 = vadd.f32 %v812_v34, %v507_v62  ;;  %500 = vst.msk [vmem:[#allocation2 + $0x18] sm:$0xff] %vm347_vm0, %v492_v61 }
  0xcf   : > { %527 = vst.msk [vmem:[%s946_s7 + $0x10] sm:$0xff] %vm347_vm0, %v519_v63  ;;  %v488_v1 = vld [vmem:[#allocation2 + $0x38] sm:$0xff] }
  0xd0   : > { %v496_v2 = vadd.f32 %v488_v1, %v478_v0 }
  0xd1   : > { %v511_v3 = vld [vmem:[#allocation2 + $0x30] sm:$0xff] }
  0xd2   : > { %v523_v4 = vadd.f32 %v812_v34, %v511_v3  ;;  %504 = vst.msk [vmem:[#allocation2 + $0x38] sm:$0xff] %vm347_vm0, %v496_v2 }
  0xd4   : > { %531 = vst.msk [vmem:[%s946_s7 + $0x30] sm:$0xff] %vm347_vm0, %v523_v4  ;;  %v508_v5 = vld [vmem:[#allocation2 + $0x18] sm:$0xff] }
  0xd5   : > { %v520_v6 = vadd.f32 %v812_v34, %v508_v5 }
  0xd7   : > { %528 = vst.msk [vmem:[%s946_s7 + $0x18] sm:$0xff] %vm347_vm0, %v520_v6 }
  0xd9   : > { %v512_v7 = vld [vmem:[#allocation2 + $0x38] sm:$0xff] }
  0xda   : > { %v524_v8 = vadd.f32 %v812_v34, %v512_v7 }
  0xdc   : > { %532 = vst.msk [vmem:[%s946_s7 + $0x38] sm:$0xff] %vm347_vm0, %v524_v8 }
  0xdd PF: > { %s13_s14 = sadd.s32 1, %s835_s14   ;;  %s987_s12 = smov %s831_s13 }
  0xde   : > { %p10_p5 = scmp.ge.s32.totalorder %s13_s14, 4   ;;  %s988_s13 = smov %s990_s15 }
  0xe0   :  { %12 = sbr.rel (!%p10_p5) target bundleno = 2 (0x2), region = 68 }

// kernel: generator_forward.103
= control target key start
LH: loop header
LB: loop body
LE: loop exit
PB: predicated region body
PF: predicated region fallthrough
CT: control target
= control target key end

     0   :  { %s1420_s12 = smov 0   ;;  %s1422_s13 = smov 0   ;;  %s1661_s0 = inlined_call_operand.vmem [shape: bf16[2,82,128], index: 0, kind: input, shape index: {}]   ;;  %s1662_s1 = inlined_call_operand.vmem [shape: bf16[512,64], index: 1, kind: input, shape index: {}]   ;;  %s1663_s2 = inlined_call_operand.vmem [shape: f32[1,64], index: 2, kind: input, shape index: {}]   ;;  %s1664_s3 = inlined_call_operand.vmem [shape: f32[2,72,64], index: 3, kind: output, shape index: {}]  }
   0x1   :  { %s1424_s14 = smov 0  }
   0x2 LB: > { %s25_s15 = sadd.s32 1, %s1394_s13  ;;  %p1089_p0 = scmp.ge.s32.totalorder %s1398_s14, 1  ;;  %s1398_s14 = sphi %s1424_s14, %s13_s14   ;;  %s1394_s13 = sphi %s1422_s13, %s1666_s13   ;;  %s1390_s12 = sphi %s1420_s12, %s1665_s12  }
   0x3   : > { %p27_p1 = scmp.ge.s32.totalorder %s25_s15, 2  ;;  %p168_p2 = scmp.lt.s32.totalorder %s1398_s14, 3 }
   0x5   : > { %s1668_s15 = smov (%p27_p1, %s25_s15), 0  ;;  %p169_p3 = pnand %p1089_p0, %p168_p2 }
   0x6   : > { %p202_p4 = scmp.lt.s32.totalorder (!%p169_p3), %s1390_s12, 1 }
   0x7   : > { %172 = sbr.rel (%p169_p3) target bundleno = 276 (0x114), region = 32 }
   0xc   : > { %v1309_v0 = vld [vmem:[%s1662_s1 + $0x38] sm:$0xff]  ;;  %v1308_v3 = vld [vmem:[%s1662_s1 + $0x30] sm:$0xff]  ;;  %s1670_s12 = smov (!%p202_p4, %s1390_s12), 1  ;;  %v1307_v8 = vld [vmem:[%s1662_s1 + $0x28] sm:$0xff]  ;;  %vm417_vm0 = vsmask.f32 7424 }
   0xd   : > { %v1322_v1 = vld [vmem:[%s1662_s1 + $0x78] sm:$0xff]  ;;  %323 = vmatpush.bf16.msra.mxu0 %v1309_v0  ;;  %v1321_v4 = vld [vmem:[%s1662_s1 + $0x70] sm:$0xff]  ;;  %v1320_v9 = vld [vmem:[%s1662_s1 + $0x68] sm:$0xff]  ;;  %s1349_s11 = smul.u32 44, %s1670_s12  ;;  %vm824_vm1 = vcmask 1046528   ;;  %vm356_vm2 = vcmask 523264  }
   0xe   : > { %v1335_v2 = vld [vmem:[%s1662_s1 + $0xb8] sm:$0xff]  ;;  %510 = vmatpush.bf16.msra.mxu1 %v1322_v1  ;;  %v1334_v5 = vld [vmem:[%s1662_s1 + $0xb0] sm:$0xff]  ;;  %v1333_v10 = vld [vmem:[%s1662_s1 + $0xa8] sm:$0xff] }
   0xf   : > { %713 = vmatpush.bf16.msra.mxu2 %v1335_v2  ;;  %v1348_v6 = vld [vmem:[%s1662_s1 + $0xf8] sm:$0xff]  ;;  %v1347_v7 = vld [vmem:[%s1662_s1 + $0xf0] sm:$0xff]  ;;  %v1346_v11 = vld [vmem:[%s1662_s1 + $0xe8] sm:$0xff]  ;;  %s1489_s26 = scalar_lea.vmem %s1661_s0, %s1349_s11 }
  0x10   : > { %887 = vmatpush.bf16.msra.mxu3 %v1348_v6  ;;  %v1306_v12 = vld [vmem:[%s1662_s1 + $0x20] sm:$0xff]  ;;  %v1305_v15 = vld [vmem:[%s1662_s1 + $0x18] sm:$0xff]  ;;  %v1304_v22 = vld [vmem:[%s1662_s1 + $0x10] sm:$0xff] }
  0x11   : > { %324 = vmatpush.bf16.msra.mxu0 %v1308_v3  ;;  %v1319_v13 = vld [vmem:[%s1662_s1 + $0x60] sm:$0xff]  ;;  %v1318_v17 = vld [vmem:[%s1662_s1 + $0x58] sm:$0xff]  ;;  %v1317_v23 = vld [vmem:[%s1662_s1 + $0x50] sm:$0xff] }
  0x12   : > { %511 = vmatpush.bf16.msra.mxu1 %v1321_v4  ;;  %v1332_v14 = vld [vmem:[%s1662_s1 + $0xa0] sm:$0xff]  ;;  %v1331_v19 = vld [vmem:[%s1662_s1 + $0x98] sm:$0xff]  ;;  %v1311_v24 = vld [vmem:[%s1489_s26 + $0x8] sm:$0xff] }
  0x13   : > { %714 = vmatpush.bf16.msra.mxu2 %v1334_v5  ;;  %v1345_v16 = vld [vmem:[%s1662_s1 + $0xe0] sm:$0xff]  ;;  %v1344_v21 = vld [vmem:[%s1662_s1 + $0xd8] sm:$0xff]  ;;  %v1330_v26 = vld [vmem:[%s1662_s1 + $0x90] sm:$0xff]  ;;  %v426_v34 = vshll.u32 %v1311_v24, 16  ;;  %v430_v60 = vshrl.u32 %v1311_v24, 16 }
  0x14   : > { %888 = vmatpush.bf16.msra.mxu3 %v1347_v7  ;;  %v1310_v18 = vld [vmem:[%s1489_s26] sm:$0xff]  ;;  %v1324_v27 = vld [vmem:[%s1489_s26 + $0xc] sm:$0xff]  ;;  %v1336_v40 = vld [vmem:[%s1489_s26 + $0x4] sm:$0xf0] }
  0x15   : > { %325 = vmatpush.bf16.msra.mxu0 %v1307_v8  ;;  %v1323_v20 = vld [vmem:[%s1489_s26 + $0x4] sm:$0xff]  ;;  %v421_v25 = vshll.u32 %v1310_v18, 16  ;;  %v1343_v30 = vld [vmem:[%s1662_s1 + $0xd0] sm:$0xff]  ;;  %v419_v32 = vshrl.u32 %v1310_v18, 16  ;;  %v629_v39 = vshll.u32 %v1324_v27, 16  ;;  %v428_v45 = vrot.slane %v426_v34, 1 }
  0x16   : > { %512 = vmatpush.bf16.msra.mxu1 %v1320_v9  ;;  %v624_v28 = vshll.u32 %v1323_v20, 16  ;;  %v1303_v29 = vld [vmem:[%s1662_s1 + $0x8] sm:$0xff]  ;;  %v1246_v35 = vld [vmem:[%s1489_s26 + $0x4] sm:$0xe]  ;;  %v622_v37 = vshrl.u32 %v1323_v20, 16  ;;  %v1312_v58 = vld [vmem:[%s1489_s26 + $0x10] sm:$0xff] }
  0x17   : > { %715 = vmatpush.bf16.msra.mxu2 %v1333_v10  ;;  %v1316_v31 = vld [vmem:[%s1662_s1 + $0x48] sm:$0xff]  ;;  %v423_v33 = vrot.slane %v421_v25, 1  ;;  %v1302_v42 = vld [vmem:[%s1662_s1] sm:$0xff]  ;;  %v1247_v47 = vor.u32 %v1336_v40, %v1246_v35  ;;  %v631_v50 = vrot.slane %v629_v39, 1  ;;  %v1325_v59 = vld [vmem:[%s1489_s26 + $0x14] sm:$0xff]  ;;  %v434_v61 = vshll.u32 %v1312_v58, 16 }
  0x18   : > { %889 = vmatpush.bf16.msra.mxu3 %v1346_v11  ;;  %v1329_v36 = vld [vmem:[%s1662_s1 + $0x88] sm:$0xff]  ;;  %v626_v38 = vrot.slane %v624_v28, 1  ;;  %v1315_v43 = vld [vmem:[%s1662_s1 + $0x40] sm:$0xff]  ;;  %v633_v62 = vshrl.u32 %v1324_v27, 16  ;;  %v637_v63 = vshll.u32 %v1325_v59, 16  ;;  %v432_v0 = vor.u32 %v430_v60, %v428_v45  ;;  %v1338_v2 = vld [vmem:[%s1489_s26 + $0x14] sm:$0xff] }
  0x19   : > { %326 = vmatpush.bf16.msra.mxu0 %v1306_v12  ;;  %v1342_v41 = vld [vmem:[%s1662_s1 + $0xc8] sm:$0xff]  ;;  %v424_v44 = vor.u32 %v423_v33, %v419_v32  ;;  %v1328_v48 = vld [vmem:[%s1662_s1 + $0x80] sm:$0xff]  ;;  %v825_v54 = vrot.slane %v1247_v47, 1  ;;  %v436_v1 = vrot.slane %v434_v61, 1  ;;  %v828_v7 = vrot.slane %v1338_v2, 1  ;;  %v1313_v10 = vld [vmem:[%s1489_s26 + $0x18] sm:$0xff] }
  0x1a   : > { %513 = vmatpush.bf16.msra.mxu1 %v1319_v13  ;;  %v1337_v46 = vld [vmem:[%s1489_s26 + $0xc] sm:$0xff]  ;;  %v627_v49 = vor.u32 %v626_v38, %v622_v37  ;;  %v1298_v51 = vld [vmem:[%s1489_s26] sm:$0xff]  ;;  %v635_v3 = vor.u32 %v633_v62, %v631_v50  ;;  %v639_v4 = vrot.slane %v637_v63, 1  ;;  %v438_v12 = vshrl.u32 %v1312_v58, 16  ;;  %v1327_v28 = vld [vmem:[%s1489_s26 + $0x24] sm:$0x10] }
  0x1b   : > { %716 = vmatpush.bf16.msra.mxu2 %v1332_v14  ;;  %v429_v52 = vsel %vm417_vm0, %v424_v44, %v428_v45  ;;  %v1341_v53 = vld [vmem:[%s1662_s1 + $0xc0] sm:$0xff]  ;;  %v826_v55 = vrot.slane %v1337_v46, 1  ;;  %v1299_v5 = vld [vmem:[%s1489_s26 + $0x8] sm:$0xff]  ;;  %v437_v6 = vsel %vm417_vm0, %v432_v0, %v436_v1  ;;  %v442_v13 = vshll.u32 %v1313_v10, 16 }
  0x1c   : > { %890 = vmatpush.bf16.msra.mxu3 %v1345_v16  ;;  %v632_v56 = vsel %vm417_vm0, %v627_v49, %v631_v50  ;;  %v640_v8 = vsel %vm417_vm0, %v635_v3, %v639_v4  ;;  %v1326_v11 = vld [vmem:[%s1489_s26 + $0x1c] sm:$0xff]  ;;  %v641_v14 = vshrl.u32 %v1325_v59, 16  ;;  %v440_v16 = vor.u32 %v438_v12, %v436_v1  ;;  %v1210_v27 = vld [vmem:[%s1489_s26 + $0x24] sm:$0xf]  ;;  %v1340_v37 = vld [vmem:[%s1489_s26 + $0x24] sm:$0x10] }
  0x1d   : > { %327 = vmatpush.bf16.msra.mxu0 %v1305_v15  ;;  %v827_v57 = vsel %vm824_vm1, %v825_v54, %v826_v55  ;;  %v829_v9 = vsel %vm824_vm1, %v826_v55, %v828_v7  ;;  %v645_v15 = vshll.u32 %v1326_v11, 16  ;;  %v1339_v18 = vld [vmem:[%s1489_s26 + $0x1c] sm:$0xff]  ;;  %v446_v32 = vshrl.u32 %v1313_v10, 16 }
  0x1e   : > { %514 = vmatpush.bf16.msra.mxu1 %v1318_v17  ;;  %v444_v17 = vrot.slane %v442_v13, 1  ;;  %v1158_v25 = vld [vmem:[%s1489_s26 + $0x20] sm:$0xf]  ;;  %v649_v34 = vshrl.u32 %v1326_v11, 16 }
  0x1f   : > { %717 = vmatpush.bf16.msra.mxu2 %v1331_v19  ;;  %v643_v19 = vor.u32 %v641_v14, %v639_v4  ;;  %v647_v20 = vrot.slane %v645_v15, 1 }
  0x20   : > { %891 = vmatpush.bf16.msra.mxu3 %v1344_v21  ;;  %v1300_v21 = vld [vmem:[%s1489_s26 + $0x10] sm:$0xff]  ;;  %v448_v38 = vor.u32 %v446_v32, %v444_v17 }
  0x21   : > { %328 = vmatpush.bf16.msra.mxu0 %v1304_v22  ;;  %v445_v22 = vsel %vm417_vm0, %v440_v16, %v444_v17  ;;  %v648_v24 = vsel %vm417_vm0, %v643_v19, %v647_v20 }
  0x22   : > { %515 = vmatpush.bf16.msra.mxu1 %v1317_v23  ;;  %v830_v23 = vrot.slane %v1339_v18, 1 }
  0x23   : > { %718 = vmatpush.bf16.msra.mxu2 %v1330_v26  ;;  %v1314_v26 = vld [vmem:[%s1489_s26 + $0x20] sm:$0x10] }
  0x24   : > { %892 = vmatpush.bf16.msra.mxu3 %v1343_v30  ;;  %v1159_v30 = vor.u32 %v1314_v26, %v1158_v25 }
  0x25   : > { %329 = vmatpush.bf16.msra.mxu0 %v1303_v29  ;;  %v831_v29 = vsel %vm824_vm1, %v828_v7, %v830_v23 }
  0x26   : > { %516 = vmatpush.bf16.msra.mxu1 %v1316_v31  ;;  %v1211_v31 = vor.u32 %v1327_v28, %v1210_v27  ;;  %v450_v33 = vshll.u32 %v1159_v30, 16  ;;  %v454_v50 = vshrl.u32 %v1159_v30, 16 }
  0x27   : > { %719 = vmatpush.bf16.msra.mxu2 %v1329_v36  ;;  %v1262_v36 = vld [vmem:[%s1489_s26 + $0x24] sm:$0xf] }
  0x28   : > { %893 = vmatpush.bf16.msra.mxu3 %v1342_v41  ;;  %v653_v35 = vshll.u32 %v1211_v31, 16  ;;  %v452_v39 = vrot.slane %v450_v33, 1  ;;  %v1263_v40 = vor.u32 %v1340_v37, %v1262_v36  ;;  %v651_v41 = vor.u32 %v649_v34, %v647_v20 }
  0x29   : > { %330 = vmatpush.bf16.msra.mxu0 %v1302_v42 }
  0x2a   : > { %517 = vmatpush.bf16.msra.mxu1 %v1315_v43  ;;  %v655_v42 = vrot.slane %v653_v35, 1  ;;  %v1301_v43 = vld [vmem:[%s1489_s26 + $0x18] sm:$0xff]  ;;  %v453_v44 = vsel %vm417_vm0, %v448_v38, %v452_v39  ;;  %v832_v45 = vrot.slane %v1263_v40, 1 }
  0x2b   : > { %720 = vmatpush.bf16.msra.mxu2 %v1328_v48  ;;  %v230_v48 = vld [vmem:[%s1489_s26 + $0x20] sm:$0xf]  ;;  %s1350_s26 = smul.u32 72, %s1670_s12 }
  0x2c   : > { %331 = vmatmul.bf16.vlgmr.msra.gmra.mxu0 %v1298_v51  ;;  %894 = vmatpush.bf16.msra.mxu3 %v1341_v53  ;;  %v656_v46 = vsel %vm417_vm0, %v651_v41, %v655_v42  ;;  %v833_v47 = vsel %vm824_vm1, %v830_v23, %v832_v45  ;;  %v264_v49 = vunpack.c.l.b16 %v230_v48  ;;  %v657_v51 = vshrl.u32 %v1211_v31, 16 }
  0x2d   : > { %518 = vmatmul.bf16.vlgmr.msra.gmra.mxu1 %v429_v52  ;;  %v456_v53 = vor.u32 %v454_v50, %v452_v39  ;;  %s1600_s20 = scalar_lea.vmem %s1664_s3, %s1350_s26 }
  0x2e   : > { %721 = vmatmul.bf16.vlgmr.msra.gmra.mxu2 %v632_v56  ;;  %v269_v52 = vpack.c.b16 %v264_v49, %v264_v49  ;;  %v659_v54 = vor.u32 %v657_v51, %v655_v42 }
  0x2f   : > { %895 = vmatmul.bf16.vlgmr.msra.gmra.mxu3 %v827_v57 }
  0x3c   : > { %336 = vmatmul.bf16.gmra.mxu0 %v1299_v5 }
  0x3d   : > { %523 = vmatmul.bf16.gmra.mxu1 %v437_v6 }
  0x3e   : > { %726 = vmatmul.bf16.gmra.mxu2 %v640_v8 }
  0x3f   : > { %900 = vmatmul.bf16.gmra.mxu3 %v829_v9 }
  0x4c   : > { %341 = vmatmul.bf16.gmra.mxu0 %v1300_v21 }
  0x4d   : > { %528 = vmatmul.bf16.gmra.mxu1 %v445_v22 }
  0x4e   : > { %731 = vmatmul.bf16.gmra.mxu2 %v648_v24  ;;  %v1593_v24 = vld [vmem:[%s1663_s2] ss:$0 sm:$0xff] }
  0x4f   : > { %905 = vmatmul.bf16.gmra.mxu3 %v831_v29 }
  0x5c   : > { %346 = vmatmul.bf16.gmra.mxu0 %v1301_v43 }
  0x5d   : > { %533 = vmatmul.bf16.gmra.mxu1 %v453_v44 }
  0x5e   : > { %736 = vmatmul.bf16.gmra.mxu2 %v656_v46 }
  0x5f   : > { %910 = vmatmul.bf16.gmra.mxu3 %v833_v47 }
  0x6c   : > { %351 = vmatmul.bf16.gmra.mxu0 %v269_v52 }
  0x6d   : > { %538 = vmatmul.bf16.gmra.mxu1 %v456_v53 }
  0x6e   : > { %741 = vmatmul.bf16.gmra.mxu2 %v659_v54 }
  0x6f   : > { %915 = vmatmul.bf16.gmra.mxu3 %v832_v45 }
  0xa9   : > { %v332_v55 = vpop.f32.mrf.mxu0 }
  0xaa   : > { %v519_v56 = vpop.f32.mrf.mxu1  ;;  %357 = vst.msk [vmem:[#allocation2] sm:$0xff] %vm356_vm2, %v332_v55 }
  0xb1   : > { %v722_v57 = vpop.f32.mrf.mxu2  ;;  %v543_v58 = vld [vmem:[#allocation2] sm:$0xff]  ;;  %v334_v59 = vpop.f32.mrf.mxu0 }
  0xb2   : > { %v521_v60 = vpop.f32.mrf.mxu1  ;;  %v552_v61 = vadd.f32 %v543_v58, %v519_v56  ;;  %358 = vst.msk [vmem:[#allocation2 + $0x8] sm:$0xff] %vm356_vm2, %v334_v59  ;;  %v896_v62 = vpop.f32.mrf.mxu3 }
  0xb4   : > { %561 = vst.msk [vmem:[#allocation2] sm:$0xff] %vm356_vm2, %v552_v61 }
  0xb9   : > { %v724_v63 = vpop.f32.mrf.mxu2  ;;  %v544_v0 = vld [vmem:[#allocation2 + $0x8] sm:$0xff]  ;;  %v337_v1 = vpop.f32.mrf.mxu0 }
  0xba   : > { %v524_v2 = vpop.f32.mrf.mxu1  ;;  %v553_v3 = vadd.f32 %v544_v0, %v521_v60  ;;  %359 = vst.msk [vmem:[#allocation2 + $0x10] sm:$0xff] %vm356_vm2, %v337_v1  ;;  %v898_v5 = vpop.f32.mrf.mxu3 }
  0xbb   : > { %v746_v4 = vld [vmem:[#allocation2] sm:$0xff] }
  0xbc   : > { %562 = vst.msk [vmem:[#allocation2 + $0x8] sm:$0xff] %vm356_vm2, %v553_v3  ;;  %v755_v6 = vadd.f32 %v746_v4, %v722_v57 }
  0xbe   : > { %764 = vst.msk [vmem:[#allocation2] sm:$0xff] %vm356_vm2, %v755_v6 }
  0xc1   : > { %v727_v7 = vpop.f32.mrf.mxu2  ;;  %v545_v8 = vld [vmem:[#allocation2 + $0x10] sm:$0xff]  ;;  %v339_v9 = vpop.f32.mrf.mxu0 }
  0xc2   : > { %v526_v10 = vpop.f32.mrf.mxu1  ;;  %v554_v11 = vadd.f32 %v545_v8, %v524_v2  ;;  %360 = vst.msk [vmem:[#allocation2 + $0x18] sm:$0xff] %vm356_vm2, %v339_v9  ;;  %v901_v13 = vpop.f32.mrf.mxu3 }
  0xc3   : > { %v747_v12 = vld [vmem:[#allocation2 + $0x8] sm:$0xff] }
  0xc4   : > { %563 = vst.msk [vmem:[#allocation2 + $0x10] sm:$0xff] %vm356_vm2, %v554_v11  ;;  %v756_v14 = vadd.f32 %v747_v12, %v724_v63 }
  0xc5   : > { %v920_v15 = vld [vmem:[#allocation2] sm:$0xff] }
  0xc6   : > { %765 = vst.msk [vmem:[#allocation2 + $0x8] sm:$0xff] %vm356_vm2, %v756_v14  ;;  %v929_v16 = vadd.f32 %v920_v15, %v896_v62 }
  0xc8   : > { %938 = vst.msk [vmem:[#allocation2] sm:$0xff] %vm356_vm2, %v929_v16 }
  0xc9   : > { %v729_v17 = vpop.f32.mrf.mxu2  ;;  %v546_v18 = vld [vmem:[#allocation2 + $0x18] sm:$0xff]  ;;  %v342_v19 = vpop.f32.mrf.mxu0 }
  0xca   : > { %v529_v20 = vpop.f32.mrf.mxu1  ;;  %v555_v21 = vadd.f32 %v546_v18, %v526_v10  ;;  %361 = vst.msk [vmem:[#allocation2 + $0x20] sm:$0xff] %vm356_vm2, %v342_v19  ;;  %v903_v23 = vpop.f32.mrf.mxu3 }
  0xcb   : > { %v748_v22 = vld [vmem:[#allocation2 + $0x10] sm:$0xff] }
  0xcc   : > { %564 = vst.msk [vmem:[#allocation2 + $0x18] sm:$0xff] %vm356_vm2, %v555_v21  ;;  %v757_v25 = vadd.f32 %v748_v22, %v727_v7 }
  0xcd   : > { %v921_v26 = vld [vmem:[#allocation2 + $0x8] sm:$0xff] }
  0xce   : > { %766 = vst.msk [vmem:[#allocation2 + $0x10] sm:$0xff] %vm356_vm2, %v757_v25  ;;  %v930_v27 = vadd.f32 %v921_v26, %v898_v5 }
  0xcf   : > { %v947_v28 = vld [vmem:[#allocation2] sm:$0xff] }
  0xd0   : > { %v960_v29 = vadd.f32 %v1593_v24, %v947_v28  ;;  %939 = vst.msk [vmem:[#allocation2 + $0x8] sm:$0xff] %vm356_vm2, %v930_v27 }
  0xd1   : > { %v732_v30 = vpop.f32.mrf.mxu2  ;;  %v547_v31 = vld [vmem:[#allocation2 + $0x20] sm:$0xff]  ;;  %v344_v32 = vpop.f32.mrf.mxu0 }
  0xd2   : > { %v531_v33 = vpop.f32.mrf.mxu1  ;;  %969 = vst.msk [vmem:[%s1600_s20] sm:$0xff] %vm356_vm2, %v960_v29  ;;  %v556_v34 = vadd.f32 %v547_v31, %v529_v20  ;;  %v906_v36 = vpop.f32.mrf.mxu3 }
  0xd3   : > { %v749_v35 = vld [vmem:[#allocation2 + $0x18] sm:$0xff]  ;;  %362 = vst.msk [vmem:[#allocation2 + $0x28] sm:$0xff] %vm356_vm2, %v344_v32 }
  0xd4   : > { %565 = vst.msk [vmem:[#allocation2 + $0x20] sm:$0xff] %vm356_vm2, %v556_v34  ;;  %v758_v37 = vadd.f32 %v749_v35, %v729_v17 }
  0xd5   : > { %v922_v38 = vld [vmem:[#allocation2 + $0x10] sm:$0xff] }
  0xd6   : > { %767 = vst.msk [vmem:[#allocation2 + $0x18] sm:$0xff] %vm356_vm2, %v758_v37  ;;  %v931_v39 = vadd.f32 %v922_v38, %v901_v13 }
  0xd7   : > { %v948_v40 = vld [vmem:[#allocation2 + $0x8] sm:$0xff] }
  0xd8   : > { %v961_v41 = vadd.f32 %v1593_v24, %v948_v40  ;;  %940 = vst.msk [vmem:[#allocation2 + $0x10] sm:$0xff] %vm356_vm2, %v931_v39 }
  0xd9   : > { %v734_v42 = vpop.f32.mrf.mxu2  ;;  %v347_v43 = vpop.f32.mrf.mxu0 }
  0xda   : > { %v534_v44 = vpop.f32.mrf.mxu1  ;;  %970 = vst.msk [vmem:[%s1600_s20 + $0x8] sm:$0xff] %vm356_vm2, %v961_v41  ;;  %v548_v45 = vld [vmem:[#allocation2 + $0x28] sm:$0xff]  ;;  %v908_v48 = vpop.f32.mrf.mxu3 }
  0xdb   : > { %v557_v46 = vadd.f32 %v548_v45, %v531_v33  ;;  %v750_v47 = vld [vmem:[#allocation2 + $0x20] sm:$0xff]  ;;  %363 = vst.msk [vmem:[#allocation2 + $0x30] sm:$0xff] %vm356_vm2, %v347_v43 }
  0xdc   : > { %v759_v49 = vadd.f32 %v750_v47, %v732_v30 }
  0xdd   : > { %566 = vst.msk [vmem:[#allocation2 + $0x28] sm:$0xff] %vm356_vm2, %v557_v46  ;;  %v923_v50 = vld [vmem:[#allocation2 + $0x18] sm:$0xff] }
  0xde   : > { %768 = vst.msk [vmem:[#allocation2 + $0x20] sm:$0xff] %vm356_vm2, %v759_v49  ;;  %v932_v51 = vadd.f32 %v923_v50, %v903_v23 }
  0xdf   : > { %v949_v52 = vld [vmem:[#allocation2 + $0x10] sm:$0xff] }
  0xe0   : > { %v962_v53 = vadd.f32 %v1593_v24, %v949_v52  ;;  %941 = vst.msk [vmem:[#allocation2 + $0x18] sm:$0xff] %vm356_vm2, %v932_v51 }
  0xe1   : > { %v737_v54 = vpop.f32.mrf.mxu2  ;;  %v349_v55 = vpop.f32.mrf.mxu0 }
  0xe2   : > { %v536_v56 = vpop.f32.mrf.mxu1  ;;  %971 = vst.msk [vmem:[%s1600_s20 + $0x10] sm:$0xff] %vm356_vm2, %v962_v53  ;;  %v549_v57 = vld [vmem:[#allocation2 + $0x30] sm:$0xff]  ;;  %v911_v59 = vpop.f32.mrf.mxu3 }
  0xe3   : > { %v558_v58 = vadd.f32 %v549_v57, %v534_v44  ;;  %364 = vst.msk [vmem:[#allocation2 + $0x38] sm:$0xff] %vm356_vm2, %v349_v55 }
  0xe4   : > { %v751_v60 = vld [vmem:[#allocation2 + $0x28] sm:$0xff] }
  0xe5   : > { %567 = vst.msk [vmem:[#allocation2 + $0x30] sm:$0xff] %vm356_vm2, %v558_v58  ;;  %v760_v61 = vadd.f32 %v751_v60, %v734_v42  ;;  %v924_v62 = vld [vmem:[#allocation2 + $0x20] sm:$0xff] }
  0xe6   : > { %v933_v63 = vadd.f32 %v924_v62, %v906_v36 }
  0xe7   : > { %v950_v0 = vld [vmem:[#allocation2 + $0x18] sm:$0xff]  ;;  %769 = vst.msk [vmem:[#allocation2 + $0x28] sm:$0xff] %vm356_vm2, %v760_v61 }
  0xe8   : > { %v963_v1 = vadd.f32 %v1593_v24, %v950_v0  ;;  %942 = vst.msk [vmem:[#allocation2 + $0x20] sm:$0xff] %vm356_vm2, %v933_v63 }
  0xe9   : > { %v739_v2 = vpop.f32.mrf.mxu2  ;;  %v352_v3 = vpop.f32.mrf.mxu0 }
  0xea   : > { %v539_v4 = vpop.f32.mrf.mxu1  ;;  %972 = vst.msk [vmem:[%s1600_s20 + $0x18] sm:$0xff] %vm356_vm2, %v963_v1  ;;  %v550_v5 = vld [vmem:[#allocation2 + $0x38] sm:$0xff]  ;;  %v913_v7 = vpop.f32.mrf.mxu3 }
  0xeb   : > { %v559_v6 = vadd.f32 %v550_v5, %v536_v56  ;;  %365 = vst.msk [vmem:[#allocation2 + $0x40] sm:$0xff] %vm356_vm2, %v352_v3 }
  0xec   : > { %v752_v8 = vld [vmem:[#allocation2 + $0x30] sm:$0xff] }
  0xed   : > { %568 = vst.msk [vmem:[#allocation2 + $0x38] sm:$0xff] %vm356_vm2, %v559_v6  ;;  %v761_v9 = vadd.f32 %v752_v8, %v737_v54 }
  0xee   : > { %v925_v10 = vld [vmem:[#allocation2 + $0x28] sm:$0xff] }
  0xef   : > { %v951_v11 = vld [vmem:[#allocation2 + $0x20] sm:$0xff]  ;;  %770 = vst.msk [vmem:[#allocation2 + $0x30] sm:$0xff] %vm356_vm2, %v761_v9  ;;  %v934_v12 = vadd.f32 %v925_v10, %v908_v48 }
  0xf0   : > { %v964_v13 = vadd.f32 %v1593_v24, %v951_v11 }
  0xf1   : > { %v742_v14 = vpop.f32.mrf.mxu2  ;;  %943 = vst.msk [vmem:[#allocation2 + $0x28] sm:$0xff] %vm356_vm2, %v934_v12  ;;  %v354_v15 = vpop.f32.mrf.mxu0 }
  0xf2   : > { %v541_v16 = vpop.f32.mrf.mxu1  ;;  %973 = vst.msk [vmem:[%s1600_s20 + $0x20] sm:$0xff] %vm356_vm2, %v964_v13  ;;  %v551_v17 = vld [vmem:[#allocation2 + $0x40] sm:$0xff]  ;;  %v916_v19 = vpop.f32.mrf.mxu3 }
  0xf3   : > { %v560_v18 = vadd.f32 %v551_v17, %v539_v4 }
  0xf4   : > { %v753_v20 = vld [vmem:[#allocation2 + $0x38] sm:$0xff] }
  0xf5   : > { %569 = vst.msk [vmem:[#allocation2 + $0x40] sm:$0xff] %vm356_vm2, %v560_v18  ;;  %v762_v21 = vadd.f32 %v753_v20, %v739_v2 }
  0xf6   : > { %v926_v22 = vld [vmem:[#allocation2 + $0x30] sm:$0xff] }
  0xf7   : > { %771 = vst.msk [vmem:[#allocation2 + $0x38] sm:$0xff] %vm356_vm2, %v762_v21  ;;  %v935_v23 = vadd.f32 %v926_v22, %v911_v59 }
  0xf8   : > { %v952_v25 = vld [vmem:[#allocation2 + $0x28] sm:$0xff] }
  0xf9   : > { %v744_v26 = vpop.f32.mrf.mxu2  ;;  %v965_v27 = vadd.f32 %v1593_v24, %v952_v25  ;;  %944 = vst.msk [vmem:[#allocation2 + $0x30] sm:$0xff] %vm356_vm2, %v935_v23 }
  0xfa   : > { %v918_v28 = vpop.f32.mrf.mxu3 }
  0xfb   : > { %974 = vst.msk [vmem:[%s1600_s20 + $0x28] sm:$0xff] %vm356_vm2, %v965_v27 }
  0xfc   : > { %v754_v29 = vld [vmem:[#allocation2 + $0x40] sm:$0xff] }
  0xfd   : > { %v763_v30 = vadd.f32 %v754_v29, %v742_v14 }
  0xfe   : > { %v927_v31 = vld [vmem:[#allocation2 + $0x38] sm:$0xff] }
  0xff   : > { %772 = vst.msk [vmem:[#allocation2 + $0x40] sm:$0xff] %vm356_vm2, %v763_v30  ;;  %v936_v32 = vadd.f32 %v927_v31, %v913_v7 }
 0x100   : > { %v953_v33 = vld [vmem:[#allocation2 + $0x30] sm:$0xff] }
 0x101   : > { %v966_v34 = vadd.f32 %v1593_v24, %v953_v33  ;;  %945 = vst.msk [vmem:[#allocation2 + $0x38] sm:$0xff] %vm356_vm2, %v936_v32 }
 0x103   : > { %975 = vst.msk [vmem:[%s1600_s20 + $0x30] sm:$0xff] %vm356_vm2, %v966_v34 }
 0x106   : > { %v928_v35 = vld [vmem:[#allocation2 + $0x40] sm:$0xff] }
 0x107   : > { %v937_v36 = vadd.f32 %v928_v35, %v916_v19 }
 0x108   : > { %v954_v37 = vld [vmem:[#allocation2 + $0x38] sm:$0xff] }
 0x109   : > { %v967_v38 = vadd.f32 %v1593_v24, %v954_v37  ;;  %946 = vst.msk [vmem:[#allocation2 + $0x40] sm:$0xff] %vm356_vm2, %v937_v36 }
 0x10b   : > { %976 = vst.msk [vmem:[%s1600_s20 + $0x38] sm:$0xff] %vm356_vm2, %v967_v38 }
 0x110   : > { %v955_v39 = vld [vmem:[#allocation2 + $0x40] sm:$0xff] }
 0x111   : > { %v968_v40 = vadd.f32 %v1593_v24, %v955_v39 }
 0x113   : > { %977 = vst.msk [vmem:[%s1600_s20 + $0x40] sm:$0xff] %vm356_vm2, %v968_v40 }
 0x114 PF: > { %s13_s14 = sadd.s32 1, %s1398_s14   ;;  %s1665_s12 = smov %s1394_s13 }
 0x115   : > { %p10_p5 = scmp.ge.s32.totalorder %s13_s14, 4   ;;  %s1666_s13 = smov %s1668_s15 }
 0x117   :  { %12 = sbr.rel (!%p10_p5) target bundleno = 2 (0x2), region = 68 }

// kernel: generator_forward.105
= control target key start
LH: loop header
LB: loop body
LE: loop exit
PB: predicated region body
PF: predicated region fallthrough
CT: control target
= control target key end

     0   :  { %s1447_s12 = smov 0   ;;  %s1449_s13 = smov 0   ;;  %s1708_s0 = inlined_call_operand.vmem [shape: bf16[512,3200], index: 0, kind: input, shape index: {}]   ;;  %s1709_s1 = inlined_call_operand.vmem [shape: bf16[3200,128], index: 1, kind: input, shape index: {}]   ;;  %s1710_s2 = inlined_call_operand.vmem [shape: f32[1,128], index: 2, kind: input, shape index: {}]   ;;  %s1711_s3 = inlined_call_operand.vmem [shape: f32[512,128], index: 3, kind: output, shape index: {}]  }
   0x1   :  { %s1451_s14 = smov 0   ;;  %s1453_s15 = smov 0  }
   0x2   :  { %s1455_s16 = smov 0   ;;  %s1457_s17 = smov 0  }
   0x3   :  { %s1459_s18 = smov 0  }
   0x4 LB: > { %s25_s19 = sadd.s32 1, %s1416_s16  ;;  %s32_s20 = sadd.s32 1, %s1420_s17  ;;  %s1424_s18 = sphi %s1459_s18, %s13_s18   ;;  %s1420_s17 = sphi %s1457_s17, %s1717_s17   ;;  %s1416_s16 = sphi %s1455_s16, %s1716_s16   ;;  %s1412_s15 = sphi %s1453_s15, %s1715_s15   ;;  %s1408_s14 = sphi %s1451_s14, %s1714_s14   ;;  %s1404_s13 = sphi %s1449_s13, %s1713_s13   ;;  %s1400_s12 = sphi %s1447_s12, %s1712_s12  }
   0x5   : > { %p26_p0 = scmp.ge.s32.totalorder %s25_s19, 25  ;;  %p48_p1 = scmp.ne.s32.totalorder %s1404_s13, %s1400_s12 }
   0x6   : > { %p49_p2 = scmp.eq.s32.totalorder %s1424_s18, 0  ;;  %s41_s24 = sadd.s32 1, %s1404_s13 }
   0x7   : > { %s1719_s19 = smov (%p26_p0, %s25_s19), 0  ;;  %s1721_s20 = smov (!%p26_p0, %s32_s20), %s1420_s17 }
   0x8   : > { %p50_p3 = por %p49_p2, %p48_p1  ;;  %p34_p4 = scmp.ge.s32.totalorder %s1721_s20, 2 }
   0x9   : > { %s37_s21 = ssub.s32 %s1416_s16, %s1719_s19  ;;  %p1088_p6 = scmp.ge.s32.totalorder %s1424_s18, 50 }
   0xa   : > { %s1723_s20 = smov (%p34_p4, %s1721_s20), 0 }
   0xb   : > { %s36_s22 = ssub.s32 %s1420_s17, %s1723_s20  ;;  %162 = sbr.rel (%p1088_p6) target bundleno = 55 (0x37), region = 20 }
   0xc   : > { %s38_s23 = sor.u32 %s37_s21, %s36_s22 }
   0xd   : > { %p39_p5 = scmp.eq.s32.totalorder %s38_s23, 0 }
   0xf   : > { %s1498_s25 = scalar_select %p39_p5, %s1404_s13, %s41_s24  }
  0x10   : > { %165 = sbr.rel (!%p50_p3) target bundleno = 55 (0x37), region = 24  ;;  %s167_s26 = sand.u32 (%p50_p3), 1, %s1404_s13  }
  0x11   : > { %s1247_s27 = smul.u32 (%p50_p3), 800, %s1420_s17  ;;  %s1089_s28 = sshll.u32 (%p50_p3), %s167_s26, 7 }
  0x12   : > { %s1512_s7 = scalar_lea.vmem (%p50_p3), [#allocation3], %s1089_s28 }
  0x13   : > { %s172_s29 = sadd.s32 (%p50_p3), %s1416_s16, %s1247_s27 }
  0x14   : > { %s1092_s30 = sshll.u32 (%p50_p3), %s172_s29, 2 }
  0x15   : > { %s1507_s6 = scalar_lea.vmem %s1708_s0, %s1092_s30 }
  0x16   : > { %v191_v0 = vld [vmem:[%s1507_s6] sm:$0xf]  ;;  %v193_v1 = vld [vmem:[%s1507_s6 + $0x64] sm:$0xf]  ;;  %v195_v2 = vld [vmem:[%s1507_s6 + $0xc8] sm:$0xf] }
  0x17   : > { %192 = vst [vmem:[%s1512_s7] sm:$0xf] %v191_v0  ;;  %v197_v3 = vld [vmem:[%s1507_s6 + $0x12c] sm:$0xf]  ;;  %v199_v4 = vld [vmem:[%s1507_s6 + $0x190] sm:$0xf] }
  0x18   : > { %194 = vst [vmem:[%s1512_s7 + $0x4] sm:$0xf] %v193_v1  ;;  %v201_v5 = vld [vmem:[%s1507_s6 + $0x1f4] sm:$0xf]  ;;  %v203_v6 = vld [vmem:[%s1507_s6 + $0x258] sm:$0xf] }
  0x19   : > { %196 = vst [vmem:[%s1512_s7 + $0x8] sm:$0xf] %v195_v2  ;;  %v205_v7 = vld [vmem:[%s1507_s6 + $0x2bc] sm:$0xf]  ;;  %v207_v8 = vld [vmem:[%s1507_s6 + $0x320] sm:$0xf] }
  0x1a   : > { %198 = vst [vmem:[%s1512_s7 + $0xc] sm:$0xf] %v197_v3  ;;  %v209_v9 = vld [vmem:[%s1507_s6 + $0x384] sm:$0xf]  ;;  %v211_v10 = vld [vmem:[%s1507_s6 + $0x3e8] sm:$0xf] }
  0x1b   : > { %200 = vst [vmem:[%s1512_s7 + $0x10] sm:$0xf] %v199_v4  ;;  %v213_v11 = vld [vmem:[%s1507_s6 + $0x44c] sm:$0xf]  ;;  %v215_v12 = vld [vmem:[%s1507_s6 + $0x4b0] sm:$0xf] }
  0x1c   : > { %202 = vst [vmem:[%s1512_s7 + $0x14] sm:$0xf] %v201_v5  ;;  %v217_v13 = vld [vmem:[%s1507_s6 + $0x514] sm:$0xf]  ;;  %v219_v14 = vld [vmem:[%s1507_s6 + $0x578] sm:$0xf] }
  0x1d   : > { %204 = vst [vmem:[%s1512_s7 + $0x18] sm:$0xf] %v203_v6  ;;  %v221_v15 = vld [vmem:[%s1507_s6 + $0x5dc] sm:$0xf]  ;;  %v223_v16 = vld [vmem:[%s1507_s6 + $0x640] sm:$0xf] }
  0x1e   : > { %206 = vst [vmem:[%s1512_s7 + $0x1c] sm:$0xf] %v205_v7  ;;  %v225_v17 = vld [vmem:[%s1507_s6 + $0x6a4] sm:$0xf]  ;;  %v227_v18 = vld [vmem:[%s1507_s6 + $0x708] sm:$0xf] }
  0x1f   : > { %208 = vst [vmem:[%s1512_s7 + $0x20] sm:$0xf] %v207_v8  ;;  %v229_v19 = vld [vmem:[%s1507_s6 + $0x76c] sm:$0xf]  ;;  %v231_v20 = vld [vmem:[%s1507_s6 + $0x7d0] sm:$0xf] }
  0x20   : > { %210 = vst [vmem:[%s1512_s7 + $0x24] sm:$0xf] %v209_v9  ;;  %v233_v21 = vld [vmem:[%s1507_s6 + $0x834] sm:$0xf]  ;;  %v235_v22 = vld [vmem:[%s1507_s6 + $0x898] sm:$0xf] }
  0x21   : > { %212 = vst [vmem:[%s1512_s7 + $0x28] sm:$0xf] %v211_v10  ;;  %v237_v23 = vld [vmem:[%s1507_s6 + $0x8fc] sm:$0xf]  ;;  %v239_v24 = vld [vmem:[%s1507_s6 + $0x960] sm:$0xf] }
  0x22   : > { %214 = vst [vmem:[%s1512_s7 + $0x2c] sm:$0xf] %v213_v11  ;;  %v241_v25 = vld [vmem:[%s1507_s6 + $0x9c4] sm:$0xf]  ;;  %v243_v26 = vld [vmem:[%s1507_s6 + $0xa28] sm:$0xf] }
  0x23   : > { %216 = vst [vmem:[%s1512_s7 + $0x30] sm:$0xf] %v215_v12  ;;  %v245_v27 = vld [vmem:[%s1507_s6 + $0xa8c] sm:$0xf]  ;;  %v247_v28 = vld [vmem:[%s1507_s6 + $0xaf0] sm:$0xf] }
  0x24   : > { %218 = vst [vmem:[%s1512_s7 + $0x34] sm:$0xf] %v217_v13  ;;  %v249_v29 = vld [vmem:[%s1507_s6 + $0xb54] sm:$0xf]  ;;  %v251_v30 = vld [vmem:[%s1507_s6 + $0xbb8] sm:$0xf] }
  0x25   : > { %220 = vst [vmem:[%s1512_s7 + $0x38] sm:$0xf] %v219_v14  ;;  %v253_v31 = vld [vmem:[%s1507_s6 + $0xc1c] sm:$0xf] }
  0x26   : > { %222 = vst [vmem:[%s1512_s7 + $0x3c] sm:$0xf] %v221_v15 }
  0x27   : > { %224 = vst [vmem:[%s1512_s7 + $0x40] sm:$0xf] %v223_v16 }
  0x28   : > { %226 = vst [vmem:[%s1512_s7 + $0x44] sm:$0xf] %v225_v17 }
  0x29   : > { %228 = vst [vmem:[%s1512_s7 + $0x48] sm:$0xf] %v227_v18 }
  0x2a   : > { %230 = vst [vmem:[%s1512_s7 + $0x4c] sm:$0xf] %v229_v19 }
  0x2b   : > { %232 = vst [vmem:[%s1512_s7 + $0x50] sm:$0xf] %v231_v20 }
  0x2c   : > { %234 = vst [vmem:[%s1512_s7 + $0x54] sm:$0xf] %v233_v21 }
  0x2d   : > { %236 = vst [vmem:[%s1512_s7 + $0x58] sm:$0xf] %v235_v22 }
  0x2e   : > { %238 = vst [vmem:[%s1512_s7 + $0x5c] sm:$0xf] %v237_v23 }
  0x2f   : > { %240 = vst [vmem:[%s1512_s7 + $0x60] sm:$0xf] %v239_v24 }
  0x30   : > { %242 = vst [vmem:[%s1512_s7 + $0x64] sm:$0xf] %v241_v25 }
  0x31   : > { %244 = vst [vmem:[%s1512_s7 + $0x68] sm:$0xf] %v243_v26 }
  0x32   : > { %246 = vst [vmem:[%s1512_s7 + $0x6c] sm:$0xf] %v245_v27 }
  0x33   : > { %248 = vst [vmem:[%s1512_s7 + $0x70] sm:$0xf] %v247_v28 }
  0x34   : > { %250 = vst [vmem:[%s1512_s7 + $0x74] sm:$0xf] %v249_v29 }
  0x35   : > { %252 = vst [vmem:[%s1512_s7 + $0x78] sm:$0xf] %v251_v30 }
  0x36   : > { %254 = vst [vmem:[%s1512_s7 + $0x7c] sm:$0xf] %v253_v31 }
  0x37 PF: > { %p1093_p7 = scmp.ge.s32.totalorder %s1424_s18, 1  ;;  %p353_p8 = scmp.lt.s32.totalorder %s1424_s18, 51 }
  0x39   : > { %p354_p9 = pnand %p1093_p7, %p353_p8 }
  0x3a   : > { %s360_s8 = sand.u32 (!%p354_p9), 1, %s1400_s12   ;;  %s1095_s9 = sshll.u32 (!%p354_p9), %s1408_s14, 4 }
  0x3b   : > { %357 = sbr.rel (%p354_p9) target bundleno = 372 (0x174), region = 69  ;;  %s1094_s10 = sshll.u32 (!%p354_p9), %s360_s8, 7 }
  0x3c   : > { %p399_p10 = scmp.lt.s32.totalorder (!%p354_p9), %s1095_s9, 399  ;;  %s1097_s11 = sshll.u32 (!%p354_p9), %s1412_s15, 5 }
  0x3d   : > { %p411_p11 = scmp.lt.s32.totalorder (!%p354_p9), %s1097_s11, 63  ;;  %s1590_s12 = scalar_lea.vmem (!%p354_p9), [#allocation3], %s1094_s10 }
  0x3e   : > { %p1099_p12 = scmp.ne.s32.totalorder (!%p354_p9), %s1408_s14, 0 }
  0x40   : > { %s1725_s9 = smov (!%p399_p10, %s1095_s9), 399  ;;  %s1727_s11 = smov (!%p411_p11, %s1097_s11), 63 }
  0x41   : > { %s1096_s21 = sshll.u32 %s1725_s9, 2  ;;  %s1098_s26 = sshll.u32 %s1727_s11, 3 }
  0x42   : > { %s1583_s24 = scalar_lea.vmem %s1709_s1, %s1096_s21  ;;  %s1588_s29 = scalar_lea.vmem %s1711_s3, %s1098_s26 }
  0x43   : > { %422 = sbr.rel (%p1099_p12) target bundleno = 105 (0x69), region = 77 }
  0x48   : > { %v1426_v32 = vmov 0.0  }
  0x49   : > { %423 = vst [vmem:[#allocation2 + $0xb0] sm:$0xff] %v1426_v32 }
  0x4a   : > { %424 = vst [vmem:[#allocation2] sm:$0xff] %v1426_v32 }
  0x4b   : > { %425 = vst [vmem:[#allocation2 + $0xd8] sm:$0xff] %v1426_v32 }
  0x4c   : > { %426 = vst [vmem:[#allocation2 + $0x18] sm:$0xff] %v1426_v32 }
  0x4d   : > { %427 = vst [vmem:[#allocation2 + $0x50] sm:$0xff] %v1426_v32 }
  0x4e   : > { %428 = vst [vmem:[#allocation2 + $0x68] sm:$0xff] %v1426_v32 }
  0x4f   : > { %429 = vst [vmem:[#allocation2 + $0x30] sm:$0xff] %v1426_v32 }
  0x50   : > { %430 = vst [vmem:[#allocation2 + $0x48] sm:$0xff] %v1426_v32 }
  0x51   : > { %431 = vst [vmem:[#allocation2 + $0x80] sm:$0xff] %v1426_v32 }
  0x52   : > { %432 = vst [vmem:[#allocation2 + $0x88] sm:$0xff] %v1426_v32 }
  0x53   : > { %433 = vst [vmem:[#allocation2 + $0xe8] sm:$0xff] %v1426_v32 }
  0x54   : > { %434 = vst [vmem:[#allocation2 + $0xb8] sm:$0xff] %v1426_v32 }
  0x55   : > { %435 = vst [vmem:[#allocation2 + $0x60] sm:$0xff] %v1426_v32 }
  0x56   : > { %436 = vst [vmem:[#allocation2 + $0xf0] sm:$0xff] %v1426_v32 }
  0x57   : > { %437 = vst [vmem:[#allocation2 + $0x8] sm:$0xff] %v1426_v32 }
  0x58   : > { %438 = vst [vmem:[#allocation2 + $0x78] sm:$0xff] %v1426_v32 }
  0x59   : > { %439 = vst [vmem:[#allocation2 + $0x38] sm:$0xff] %v1426_v32 }
  0x5a   : > { %440 = vst [vmem:[#allocation2 + $0x58] sm:$0xff] %v1426_v32 }
  0x5b   : > { %441 = vst [vmem:[#allocation2 + $0x40] sm:$0xff] %v1426_v32 }
  0x5c   : > { %442 = vst [vmem:[#allocation2 + $0xc8] sm:$0xff] %v1426_v32 }
  0x5d   : > { %443 = vst [vmem:[#allocation2 + $0xe0] sm:$0xff] %v1426_v32 }
  0x5e   : > { %444 = vst [vmem:[#allocation2 + $0x90] sm:$0xff] %v1426_v32 }
  0x5f   : > { %445 = vst [vmem:[#allocation2 + $0x70] sm:$0xff] %v1426_v32 }
  0x60   : > { %446 = vst [vmem:[#allocation2 + $0xc0] sm:$0xff] %v1426_v32 }
  0x61   : > { %447 = vst [vmem:[#allocation2 + $0xa8] sm:$0xff] %v1426_v32 }
  0x62   : > { %448 = vst [vmem:[#allocation2 + $0xd0] sm:$0xff] %v1426_v32 }
  0x63   : > { %449 = vst [vmem:[#allocation2 + $0x10] sm:$0xff] %v1426_v32 }
  0x64   : > { %450 = vst [vmem:[#allocation2 + $0x28] sm:$0xff] %v1426_v32 }
  0x65   : > { %451 = vst [vmem:[#allocation2 + $0xa0] sm:$0xff] %v1426_v32 }
  0x66   : > { %452 = vst [vmem:[#allocation2 + $0xf8] sm:$0xff] %v1426_v32 }
  0x67   : > { %453 = vst [vmem:[#allocation2 + $0x20] sm:$0xff] %v1426_v32 }
  0x68   : > { %454 = vst [vmem:[#allocation2 + $0x98] sm:$0xff] %v1426_v32 }
  0x69 PF: > { %v1222_v33 = vld [vmem:[%s1583_s24 + $0x38] sm:$0xff]  ;;  %v1221_v34 = vld [vmem:[%s1583_s24 + $0x30] sm:$0xff]  ;;  %v1220_v35 = vld [vmem:[%s1583_s24 + $0x28] sm:$0xff]  ;;  %p1196_p13 = scmp.ne.s32.totalorder %s1408_s14, 24 }
  0x6a   : > { %679 = vmatpush.bf16.msra.mxu0 %v1222_v33  ;;  %1223 = vmatpush.bf16.msra.mxu1 %v1222_v33  ;;  %v1219_v36 = vld [vmem:[%s1583_s24 + $0x20] sm:$0xff]  ;;  %v1218_v37 = vld [vmem:[%s1583_s24 + $0x18] sm:$0xff]  ;;  %v1217_v38 = vld [vmem:[%s1583_s24 + $0x10] sm:$0xff] }
  0x6b   : > { %1224 = vmatpush.bf16.msra.mxu2 %v1222_v33  ;;  %1225 = vmatpush.bf16.msra.mxu3 %v1222_v33  ;;  %v1216_v39 = vld [vmem:[%s1583_s24 + $0x8] sm:$0xff]  ;;  %v1215_v40 = vld [vmem:[%s1583_s24] sm:$0xff]  ;;  %v1201_v49 = vld [vmem:[%s1590_s12 + $0x10] sm:$0xff] }
  0x6c   : > { %v1199_v41 = vld [vmem:[%s1590_s12] sm:$0xff]  ;;  %v1200_v45 = vld [vmem:[%s1590_s12 + $0x8] sm:$0xff]  ;;  %v1205_v50 = vld [vmem:[%s1590_s12 + $0x30] sm:$0xff] }
  0x6d   : > { %v1203_v42 = vld [vmem:[%s1590_s12 + $0x20] sm:$0xff]  ;;  %v1204_v46 = vld [vmem:[%s1590_s12 + $0x28] sm:$0xff]  ;;  %v1209_v51 = vld [vmem:[%s1590_s12 + $0x50] sm:$0xff] }
  0x6e   : > { %680 = vmatpush.bf16.msra.mxu0 %v1221_v34  ;;  %1226 = vmatpush.bf16.msra.mxu1 %v1221_v34  ;;  %v1207_v43 = vld [vmem:[%s1590_s12 + $0x40] sm:$0xff]  ;;  %v1208_v47 = vld [vmem:[%s1590_s12 + $0x48] sm:$0xff]  ;;  %v1213_v52 = vld [vmem:[%s1590_s12 + $0x70] sm:$0xff] }
  0x6f   : > { %1227 = vmatpush.bf16.msra.mxu2 %v1221_v34  ;;  %1228 = vmatpush.bf16.msra.mxu3 %v1221_v34  ;;  %v1211_v44 = vld [vmem:[%s1590_s12 + $0x60] sm:$0xff]  ;;  %v1212_v48 = vld [vmem:[%s1590_s12 + $0x68] sm:$0xff]  ;;  %v1202_v53 = vld [vmem:[%s1590_s12 + $0x18] sm:$0xff] }
  0x70   : > { %v1206_v54 = vld [vmem:[%s1590_s12 + $0x38] sm:$0xff]  ;;  %v455_v57 = vld [vmem:[#allocation2 + $0xb0] sm:$0xff]  ;;  %v463_v58 = vld [vmem:[#allocation2 + $0x80] sm:$0xff] }
  0x71   : > { %v1210_v55 = vld [vmem:[%s1590_s12 + $0x58] sm:$0xff]  ;;  %v479_v0 = vld [vmem:[#allocation2 + $0xa8] sm:$0xff]  ;;  %v456_v1 = vld [vmem:[#allocation2] sm:$0xff] }
  0x72   : > { %681 = vmatpush.bf16.msra.mxu0 %v1220_v35  ;;  %1229 = vmatpush.bf16.msra.mxu1 %v1220_v35  ;;  %v1214_v56 = vld [vmem:[%s1590_s12 + $0x78] sm:$0xff]  ;;  %v464_v2 = vld [vmem:[#allocation2 + $0x88] sm:$0xff]  ;;  %v480_v12 = vld [vmem:[#allocation2 + $0xd0] sm:$0xff] }
  0x73   : > { %1230 = vmatpush.bf16.msra.mxu2 %v1220_v35  ;;  %1231 = vmatpush.bf16.msra.mxu3 %v1220_v35  ;;  %v471_v63 = vld [vmem:[#allocation2 + $0x38] sm:$0xff]  ;;  %v465_v14 = vld [vmem:[#allocation2 + $0xe8] sm:$0xff]  ;;  %v473_v23 = vld [vmem:[#allocation2 + $0x40] sm:$0xff] }
  0x74   : > { %v472_v11 = vld [vmem:[#allocation2 + $0x58] sm:$0xff]  ;;  %v481_v24 = vld [vmem:[#allocation2 + $0x10] sm:$0xff]  ;;  %v474_v35 = vld [vmem:[#allocation2 + $0xc8] sm:$0xff] }
  0x75   : > { %v457_v13 = vld [vmem:[#allocation2 + $0xd8] sm:$0xff] }
  0x76   : > { %682 = vmatpush.bf16.msra.mxu0 %v1219_v36  ;;  %1232 = vmatpush.bf16.msra.mxu1 %v1219_v36  ;;  %v458_v25 = vld [vmem:[#allocation2 + $0x18] sm:$0xff] }
  0x77   : > { %1233 = vmatpush.bf16.msra.mxu2 %v1219_v36  ;;  %1234 = vmatpush.bf16.msra.mxu3 %v1219_v36  ;;  %v466_v26 = vld [vmem:[#allocation2 + $0xb8] sm:$0xff]  ;;  %v482_v36 = vld [vmem:[#allocation2 + $0x28] sm:$0xff] }
  0x7a   : > { %683 = vmatpush.bf16.msra.mxu0 %v1218_v37  ;;  %1235 = vmatpush.bf16.msra.mxu1 %v1218_v37 }
  0x7b   : > { %1236 = vmatpush.bf16.msra.mxu2 %v1218_v37  ;;  %1237 = vmatpush.bf16.msra.mxu3 %v1218_v37  ;;  %v459_v37 = vld [vmem:[#allocation2 + $0x50] sm:$0xff] }
  0x7e   : > { %684 = vmatpush.bf16.msra.mxu0 %v1217_v38  ;;  %1238 = vmatpush.bf16.msra.mxu1 %v1217_v38 }
  0x7f   : > { %1239 = vmatpush.bf16.msra.mxu2 %v1217_v38  ;;  %1240 = vmatpush.bf16.msra.mxu3 %v1217_v38  ;;  %v467_v38 = vld [vmem:[#allocation2 + $0x60] sm:$0xff] }
  0x82   : > { %685 = vmatpush.bf16.msra.mxu0 %v1216_v39  ;;  %1241 = vmatpush.bf16.msra.mxu1 %v1216_v39 }
  0x83   : > { %1242 = vmatpush.bf16.msra.mxu2 %v1216_v39  ;;  %1243 = vmatpush.bf16.msra.mxu3 %v1216_v39 }
  0x86   : > { %686 = vmatpush.bf16.msra.mxu0 %v1215_v40  ;;  %1244 = vmatpush.bf16.msra.mxu1 %v1215_v40 }
  0x87   : > { %1245 = vmatpush.bf16.msra.mxu2 %v1215_v40  ;;  %1246 = vmatpush.bf16.msra.mxu3 %v1215_v40 }
  0x89   : > { %687 = vmatmul.bf16.vlgmr.msra.gmra.mxu0 %v1199_v41  ;;  %707 = vmatmul.bf16.vlgmr.msra.gmra.mxu1 %v1203_v42 }
  0x8a   : > { %727 = vmatmul.bf16.vlgmr.msra.gmra.mxu2 %v1207_v43  ;;  %747 = vmatmul.bf16.vlgmr.msra.gmra.mxu3 %v1211_v44 }
  0x99   : > { %692 = vmatmul.bf16.gmra.mxu0 %v1200_v45  ;;  %712 = vmatmul.bf16.gmra.mxu1 %v1204_v46 }
  0x9a   : > { %732 = vmatmul.bf16.gmra.mxu2 %v1208_v47  ;;  %752 = vmatmul.bf16.gmra.mxu3 %v1212_v48  ;;  %v475_v47 = vld [vmem:[#allocation2 + $0xe0] sm:$0xff] }
  0x9b   : > { %v483_v48 = vld [vmem:[#allocation2 + $0xa0] sm:$0xff] }
  0xa9   : > { %697 = vmatmul.bf16.gmra.mxu0 %v1201_v49  ;;  %717 = vmatmul.bf16.gmra.mxu1 %v1205_v50  ;;  %v460_v49 = vld [vmem:[#allocation2 + $0x68] sm:$0xff]  ;;  %v468_v50 = vld [vmem:[#allocation2 + $0xf0] sm:$0xff] }
  0xaa   : > { %737 = vmatmul.bf16.gmra.mxu2 %v1209_v51  ;;  %757 = vmatmul.bf16.gmra.mxu3 %v1213_v52 }
  0xb9   : > { %702 = vmatmul.bf16.gmra.mxu0 %v1202_v53  ;;  %722 = vmatmul.bf16.gmra.mxu1 %v1206_v54 }
  0xba   : > { %742 = vmatmul.bf16.gmra.mxu2 %v1210_v55  ;;  %762 = vmatmul.bf16.gmra.mxu3 %v1214_v56 }
 0x106   : > { %v688_v59 = vpop.f32.mrf.mxu0  ;;  %v708_v60 = vpop.f32.mrf.mxu1 }
 0x107   : > { %v768_v61 = vadd.f32 %v688_v59, %v455_v57  ;;  %v776_v62 = vadd.f32 %v708_v60, %v463_v58  ;;  %v476_v59 = vld [vmem:[#allocation2 + $0x90] sm:$0xff]  ;;  %v484_v60 = vld [vmem:[#allocation2 + $0xf8] sm:$0xff] }
 0x109   : > { %800 = vst [vmem:[#allocation2 + $0xb0] sm:$0xff] %v768_v61  ;;  %v461_v61 = vld [vmem:[#allocation2 + $0x30] sm:$0xff] }
 0x10a   : > { %808 = vst [vmem:[#allocation2 + $0x80] sm:$0xff] %v776_v62  ;;  %v469_v62 = vld [vmem:[#allocation2 + $0x8] sm:$0xff] }
 0x10d   : > { %v728_v3 = vpop.f32.mrf.mxu2  ;;  %v748_v4 = vpop.f32.mrf.mxu3 }
 0x10e   : > { %v784_v5 = vadd.f32 %v728_v3, %v471_v63  ;;  %v792_v6 = vadd.f32 %v748_v4, %v479_v0  ;;  %v690_v7 = vpop.f32.mrf.mxu0  ;;  %v710_v8 = vpop.f32.mrf.mxu1 }
 0x10f   : > { %v769_v9 = vadd.f32 %v690_v7, %v456_v1  ;;  %v777_v10 = vadd.f32 %v710_v8, %v464_v2  ;;  %v477_v7 = vld [vmem:[#allocation2 + $0x70] sm:$0xff]  ;;  %v485_v8 = vld [vmem:[#allocation2 + $0x20] sm:$0xff] }
 0x110   : > { %816 = vst [vmem:[#allocation2 + $0x38] sm:$0xff] %v784_v5 }
 0x111   : > { %824 = vst [vmem:[#allocation2 + $0xa8] sm:$0xff] %v792_v6 }
 0x112   : > { %801 = vst [vmem:[#allocation2] sm:$0xff] %v769_v9  ;;  %v462_v9 = vld [vmem:[#allocation2 + $0x48] sm:$0xff] }
 0x113   : > { %809 = vst [vmem:[#allocation2 + $0x88] sm:$0xff] %v777_v10  ;;  %v470_v10 = vld [vmem:[#allocation2 + $0x78] sm:$0xff] }
 0x115   : > { %v730_v15 = vpop.f32.mrf.mxu2  ;;  %v750_v16 = vpop.f32.mrf.mxu3 }
 0x116   : > { %v785_v17 = vadd.f32 %v730_v15, %v472_v11  ;;  %v793_v18 = vadd.f32 %v750_v16, %v480_v12  ;;  %v693_v19 = vpop.f32.mrf.mxu0  ;;  %v713_v20 = vpop.f32.mrf.mxu1 }
 0x117   : > { %v770_v21 = vadd.f32 %v693_v19, %v457_v13  ;;  %v778_v22 = vadd.f32 %v713_v20, %v465_v14  ;;  %v478_v19 = vld [vmem:[#allocation2 + $0xc0] sm:$0xff]  ;;  %v486_v20 = vld [vmem:[#allocation2 + $0x98] sm:$0xff] }
 0x118   : > { %817 = vst [vmem:[#allocation2 + $0x58] sm:$0xff] %v785_v17 }
 0x119   : > { %825 = vst [vmem:[#allocation2 + $0xd0] sm:$0xff] %v793_v18 }
 0x11a   : > { %802 = vst [vmem:[#allocation2 + $0xd8] sm:$0xff] %v770_v21 }
 0x11b   : > { %810 = vst [vmem:[#allocation2 + $0xe8] sm:$0xff] %v778_v22 }
 0x11d   : > { %v733_v27 = vpop.f32.mrf.mxu2  ;;  %v753_v28 = vpop.f32.mrf.mxu3 }
 0x11e   : > { %v786_v29 = vadd.f32 %v733_v27, %v473_v23  ;;  %v794_v30 = vadd.f32 %v753_v28, %v481_v24  ;;  %v695_v31 = vpop.f32.mrf.mxu0  ;;  %v715_v32 = vpop.f32.mrf.mxu1 }
 0x11f   : > { %v771_v33 = vadd.f32 %v695_v31, %v458_v25  ;;  %v779_v34 = vadd.f32 %v715_v32, %v466_v26 }
 0x120   : > { %818 = vst [vmem:[#allocation2 + $0x40] sm:$0xff] %v786_v29 }
 0x121   : > { %826 = vst [vmem:[#allocation2 + $0x10] sm:$0xff] %v794_v30 }
 0x122   : > { %803 = vst [vmem:[#allocation2 + $0x18] sm:$0xff] %v771_v33 }
 0x123   : > { %811 = vst [vmem:[#allocation2 + $0xb8] sm:$0xff] %v779_v34 }
 0x125   : > { %v735_v39 = vpop.f32.mrf.mxu2  ;;  %v755_v40 = vpop.f32.mrf.mxu3 }
 0x126   : > { %v787_v41 = vadd.f32 %v735_v39, %v474_v35  ;;  %v795_v42 = vadd.f32 %v755_v40, %v482_v36  ;;  %v698_v43 = vpop.f32.mrf.mxu0  ;;  %v718_v44 = vpop.f32.mrf.mxu1 }
 0x127   : > { %v772_v45 = vadd.f32 %v698_v43, %v459_v37  ;;  %v780_v46 = vadd.f32 %v718_v44, %v467_v38 }
 0x128   : > { %819 = vst [vmem:[#allocation2 + $0xc8] sm:$0xff] %v787_v41 }
 0x129   : > { %827 = vst [vmem:[#allocation2 + $0x28] sm:$0xff] %v795_v42 }
 0x12a   : > { %804 = vst [vmem:[#allocation2 + $0x50] sm:$0xff] %v772_v45 }
 0x12b   : > { %812 = vst [vmem:[#allocation2 + $0x60] sm:$0xff] %v780_v46 }
 0x12d   : > { %v738_v51 = vpop.f32.mrf.mxu2  ;;  %v758_v52 = vpop.f32.mrf.mxu3 }
 0x12e   : > { %v788_v53 = vadd.f32 %v738_v51, %v475_v47  ;;  %v796_v54 = vadd.f32 %v758_v52, %v483_v48  ;;  %v700_v55 = vpop.f32.mrf.mxu0  ;;  %v720_v56 = vpop.f32.mrf.mxu1 }
 0x12f   : > { %v773_v57 = vadd.f32 %v700_v55, %v460_v49  ;;  %v781_v58 = vadd.f32 %v720_v56, %v468_v50 }
 0x130   : > { %820 = vst [vmem:[#allocation2 + $0xe0] sm:$0xff] %v788_v53 }
 0x131   : > { %828 = vst [vmem:[#allocation2 + $0xa0] sm:$0xff] %v796_v54 }
 0x132   : > { %805 = vst [vmem:[#allocation2 + $0x68] sm:$0xff] %v773_v57 }
 0x133   : > { %813 = vst [vmem:[#allocation2 + $0xf0] sm:$0xff] %v781_v58 }
 0x135   : > { %v740_v63 = vpop.f32.mrf.mxu2  ;;  %v760_v0 = vpop.f32.mrf.mxu3 }
 0x136   : > { %v789_v1 = vadd.f32 %v740_v63, %v476_v59  ;;  %v797_v2 = vadd.f32 %v760_v0, %v484_v60  ;;  %v703_v3 = vpop.f32.mrf.mxu0  ;;  %v723_v4 = vpop.f32.mrf.mxu1 }
 0x137   : > { %v774_v5 = vadd.f32 %v703_v3, %v461_v61  ;;  %v782_v6 = vadd.f32 %v723_v4, %v469_v62 }
 0x138   : > { %821 = vst [vmem:[#allocation2 + $0x90] sm:$0xff] %v789_v1 }
 0x139   : > { %829 = vst [vmem:[#allocation2 + $0xf8] sm:$0xff] %v797_v2 }
 0x13a   : > { %806 = vst [vmem:[#allocation2 + $0x30] sm:$0xff] %v774_v5 }
 0x13b   : > { %814 = vst [vmem:[#allocation2 + $0x8] sm:$0xff] %v782_v6 }
 0x13d   : > { %v743_v11 = vpop.f32.mrf.mxu2  ;;  %v763_v12 = vpop.f32.mrf.mxu3 }
 0x13e   : > { %v790_v13 = vadd.f32 %v743_v11, %v477_v7  ;;  %v798_v14 = vadd.f32 %v763_v12, %v485_v8  ;;  %v705_v15 = vpop.f32.mrf.mxu0  ;;  %v725_v16 = vpop.f32.mrf.mxu1 }
 0x13f   : > { %v775_v17 = vadd.f32 %v705_v15, %v462_v9  ;;  %v783_v18 = vadd.f32 %v725_v16, %v470_v10 }
 0x140   : > { %822 = vst [vmem:[#allocation2 + $0x70] sm:$0xff] %v790_v13 }
 0x141   : > { %830 = vst [vmem:[#allocation2 + $0x20] sm:$0xff] %v798_v14 }
 0x142   : > { %807 = vst [vmem:[#allocation2 + $0x48] sm:$0xff] %v775_v17 }
 0x143   : > { %815 = vst [vmem:[#allocation2 + $0x78] sm:$0xff] %v783_v18 }
 0x145   : > { %v745_v21 = vpop.f32.mrf.mxu2  ;;  %v765_v22 = vpop.f32.mrf.mxu3  ;;  %835 = sbr.rel (%p1196_p13) target bundleno = 372 (0x174), region = 81 }
 0x146   : > { %v791_v23 = vadd.f32 %v745_v21, %v478_v19  ;;  %v799_v24 = vadd.f32 %v765_v22, %v486_v20 }
 0x148   : > { %823 = vst [vmem:[#allocation2 + $0xc0] sm:$0xff] %v791_v23 }
 0x149   : > { %831 = vst [vmem:[#allocation2 + $0x98] sm:$0xff] %v799_v24 }
 0x14a   : > { %v836_v25 = vld [vmem:[#allocation2 + $0xb0] sm:$0xff]  ;;  %v1621_v26 = vld [vmem:[%s1710_s2] ss:$0 sm:$0xff]  ;;  %v838_v28 = vld [vmem:[#allocation2 + $0xd8] sm:$0xff] }
 0x14b   : > { %v837_v27 = vld [vmem:[#allocation2] sm:$0xff]  ;;  %v839_v29 = vld [vmem:[#allocation2 + $0x18] sm:$0xff]  ;;  %v872_v30 = vadd.f32 %v1621_v26, %v836_v25  ;;  %v874_v32 = vadd.f32 %v1621_v26, %v838_v28  ;;  %v840_v33 = vld [vmem:[#allocation2 + $0x50] sm:$0xff] }
 0x14c   : > { %v873_v31 = vadd.f32 %v1621_v26, %v837_v27  ;;  %v841_v34 = vld [vmem:[#allocation2 + $0x68] sm:$0xff]  ;;  %v875_v35 = vadd.f32 %v1621_v26, %v839_v29  ;;  %v842_v36 = vld [vmem:[#allocation2 + $0x30] sm:$0xff]  ;;  %v876_v37 = vadd.f32 %v1621_v26, %v840_v33  ;;  %v844_v40 = vld [vmem:[#allocation2 + $0x80] sm:$0xff] }
 0x14d   : > { %1306 = vtanh.f32 %v872_v30  ;;  %v843_v38 = vld [vmem:[#allocation2 + $0x48] sm:$0xff]  ;;  %v877_v39 = vadd.f32 %v1621_v26, %v841_v34  ;;  %v878_v41 = vadd.f32 %v1621_v26, %v842_v36  ;;  %v880_v45 = vadd.f32 %v1621_v26, %v844_v40  ;;  %v847_v46 = vld [vmem:[#allocation2 + $0xb8] sm:$0xff]  ;;  %v848_v48 = vld [vmem:[#allocation2 + $0x60] sm:$0xff] }
 0x14e   : > { %1308 = vtanh.f32 %v873_v31  ;;  %v845_v42 = vld [vmem:[#allocation2 + $0x88] sm:$0xff]  ;;  %v879_v43 = vadd.f32 %v1621_v26, %v843_v38  ;;  %v849_v51 = vld [vmem:[#allocation2 + $0xf0] sm:$0xff]  ;;  %v883_v53 = vadd.f32 %v1621_v26, %v847_v46  ;;  %v884_v56 = vadd.f32 %v1621_v26, %v848_v48  ;;  %v851_v57 = vld [vmem:[#allocation2 + $0x78] sm:$0xff] }
 0x14f   : > { %1310 = vtanh.f32 %v874_v32  ;;  %v846_v44 = vld [vmem:[#allocation2 + $0xe8] sm:$0xff]  ;;  %v881_v47 = vadd.f32 %v1621_v26, %v845_v42  ;;  %v885_v59 = vadd.f32 %v1621_v26, %v849_v51  ;;  %v852_v60 = vld [vmem:[#allocation2 + $0x38] sm:$0xff]  ;;  %v887_v1 = vadd.f32 %v1621_v26, %v851_v57  ;;  %v854_v2 = vld [vmem:[#allocation2 + $0x40] sm:$0xff] }
 0x150   : > { %1312 = vtanh.f32 %v875_v35  ;;  %v882_v50 = vadd.f32 %v1621_v26, %v846_v44  ;;  %v850_v54 = vld [vmem:[#allocation2 + $0x8] sm:$0xff]  ;;  %v853_v63 = vld [vmem:[#allocation2 + $0x58] sm:$0xff]  ;;  %v888_v4 = vadd.f32 %v1621_v26, %v852_v60  ;;  %v856_v8 = vld [vmem:[#allocation2 + $0xe0] sm:$0xff]  ;;  %v890_v10 = vadd.f32 %v1621_v26, %v854_v2 }
 0x151   : > { %1314 = vtanh.f32 %v876_v37  ;;  %v886_v62 = vadd.f32 %v1621_v26, %v850_v54  ;;  %v855_v5 = vld [vmem:[#allocation2 + $0xc8] sm:$0xff]  ;;  %v889_v7 = vadd.f32 %v1621_v26, %v853_v63  ;;  %v857_v11 = vld [vmem:[#allocation2 + $0x90] sm:$0xff]  ;;  %v892_v16 = vadd.f32 %v1621_v26, %v856_v8  ;;  %v859_v17 = vld [vmem:[#allocation2 + $0xc0] sm:$0xff] }
 0x152   : > { %1316 = vtanh.f32 %v877_v39  ;;  %v891_v13 = vadd.f32 %v1621_v26, %v855_v5  ;;  %v858_v14 = vld [vmem:[#allocation2 + $0x70] sm:$0xff]  ;;  %v893_v19 = vadd.f32 %v1621_v26, %v857_v11  ;;  %v860_v20 = vld [vmem:[#allocation2 + $0xa8] sm:$0xff]  ;;  %v895_v25 = vadd.f32 %v1621_v26, %v859_v17  ;;  %v864_v33 = vld [vmem:[#allocation2 + $0xa0] sm:$0xff] }
 0x153   : > { %v1307_v49 = vpop.eup %1306  ;;  %1318 = vtanh.f32 %v878_v41  ;;  %v894_v22 = vadd.f32 %v1621_v26, %v858_v14  ;;  %v861_v23 = vld [vmem:[#allocation2 + $0xd0] sm:$0xff]  ;;  %v896_v29 = vadd.f32 %v1621_v26, %v860_v20  ;;  %v863_v30 = vld [vmem:[#allocation2 + $0x28] sm:$0xff]  ;;  %v865_v36 = vld [vmem:[#allocation2 + $0xf8] sm:$0xff]  ;;  %v900_v41 = vadd.f32 %v1621_v26, %v864_v33 }
 0x154   : > { %v1309_v52 = vpop.eup %1308  ;;  %936 = vst [vmem:[%s1588_s29] sm:$0xff] %v1307_v49  ;;  %1320 = vtanh.f32 %v879_v43  ;;  %v862_v27 = vld [vmem:[#allocation2 + $0x10] sm:$0xff]  ;;  %v897_v32 = vadd.f32 %v1621_v26, %v861_v23  ;;  %v899_v38 = vadd.f32 %v1621_v26, %v863_v30  ;;  %v866_v39 = vld [vmem:[#allocation2 + $0x20] sm:$0xff]  ;;  %v867_v42 = vld [vmem:[#allocation2 + $0x98] sm:$0xff]  ;;  %v901_v44 = vadd.f32 %v1621_v26, %v865_v36 }
 0x155   : > { %v1311_v55 = vpop.eup %1310  ;;  %937 = vst [vmem:[%s1588_s29 + $0x8] sm:$0xff] %v1309_v52  ;;  %1322 = vtanh.f32 %v880_v45  ;;  %v898_v35 = vadd.f32 %v1621_v26, %v862_v27  ;;  %v902_v46 = vadd.f32 %v1621_v26, %v866_v39  ;;  %v903_v48 = vadd.f32 %v1621_v26, %v867_v42 }
 0x156   : > { %v1313_v58 = vpop.eup %1312  ;;  %938 = vst [vmem:[%s1588_s29 + $0x10] sm:$0xff] %v1311_v55  ;;  %1324 = vtanh.f32 %v881_v47 }
 0x157   : > { %v1315_v61 = vpop.eup %1314  ;;  %939 = vst [vmem:[%s1588_s29 + $0x18] sm:$0xff] %v1313_v58  ;;  %1326 = vtanh.f32 %v882_v50 }
 0x158   : > { %v1317_v0 = vpop.eup %1316  ;;  %940 = vst [vmem:[%s1588_s29 + $0x20] sm:$0xff] %v1315_v61  ;;  %1328 = vtanh.f32 %v883_v53 }
 0x159   : > { %v1319_v3 = vpop.eup %1318  ;;  %941 = vst [vmem:[%s1588_s29 + $0x28] sm:$0xff] %v1317_v0  ;;  %1330 = vtanh.f32 %v884_v56 }
 0x15a   : > { %v1321_v6 = vpop.eup %1320  ;;  %942 = vst [vmem:[%s1588_s29 + $0x30] sm:$0xff] %v1319_v3  ;;  %1332 = vtanh.f32 %v885_v59 }
 0x15b   : > { %v1323_v9 = vpop.eup %1322  ;;  %943 = vst [vmem:[%s1588_s29 + $0x38] sm:$0xff] %v1321_v6  ;;  %1334 = vtanh.f32 %v886_v62 }
 0x15c   : > { %v1325_v12 = vpop.eup %1324  ;;  %944 = vst [vmem:[%s1588_s29 + $0x40] sm:$0xff] %v1323_v9  ;;  %1336 = vtanh.f32 %v887_v1 }
 0x15d   : > { %v1327_v15 = vpop.eup %1326  ;;  %945 = vst [vmem:[%s1588_s29 + $0x48] sm:$0xff] %v1325_v12  ;;  %1338 = vtanh.f32 %v888_v4 }
 0x15e   : > { %v1329_v18 = vpop.eup %1328  ;;  %946 = vst [vmem:[%s1588_s29 + $0x50] sm:$0xff] %v1327_v15  ;;  %1340 = vtanh.f32 %v889_v7 }
 0x15f   : > { %v1331_v21 = vpop.eup %1330  ;;  %947 = vst [vmem:[%s1588_s29 + $0x58] sm:$0xff] %v1329_v18  ;;  %1342 = vtanh.f32 %v890_v10 }
 0x160   : > { %v1333_v24 = vpop.eup %1332  ;;  %948 = vst [vmem:[%s1588_s29 + $0x60] sm:$0xff] %v1331_v21  ;;  %1344 = vtanh.f32 %v891_v13 }
 0x161   : > { %v1335_v28 = vpop.eup %1334  ;;  %949 = vst [vmem:[%s1588_s29 + $0x68] sm:$0xff] %v1333_v24  ;;  %1346 = vtanh.f32 %v892_v16 }
 0x162   : > { %v1337_v31 = vpop.eup %1336  ;;  %950 = vst [vmem:[%s1588_s29 + $0x70] sm:$0xff] %v1335_v28  ;;  %1348 = vtanh.f32 %v893_v19 }
 0x163   : > { %v1339_v34 = vpop.eup %1338  ;;  %951 = vst [vmem:[%s1588_s29 + $0x78] sm:$0xff] %v1337_v31  ;;  %1350 = vtanh.f32 %v894_v22 }
 0x164   : > { %v1341_v37 = vpop.eup %1340  ;;  %952 = vst [vmem:[%s1588_s29 + $0x80] sm:$0xff] %v1339_v34  ;;  %1352 = vtanh.f32 %v895_v25 }
 0x165   : > { %v1343_v40 = vpop.eup %1342  ;;  %953 = vst [vmem:[%s1588_s29 + $0x88] sm:$0xff] %v1341_v37  ;;  %1354 = vtanh.f32 %v896_v29 }
 0x166   : > { %v1345_v43 = vpop.eup %1344  ;;  %954 = vst [vmem:[%s1588_s29 + $0x90] sm:$0xff] %v1343_v40  ;;  %1356 = vtanh.f32 %v897_v32 }
 0x167   : > { %v1347_v45 = vpop.eup %1346  ;;  %955 = vst [vmem:[%s1588_s29 + $0x98] sm:$0xff] %v1345_v43  ;;  %1358 = vtanh.f32 %v898_v35 }
 0x168   : > { %v1349_v47 = vpop.eup %1348  ;;  %956 = vst [vmem:[%s1588_s29 + $0xa0] sm:$0xff] %v1347_v45  ;;  %1360 = vtanh.f32 %v899_v38 }
 0x169   : > { %v1351_v49 = vpop.eup %1350  ;;  %957 = vst [vmem:[%s1588_s29 + $0xa8] sm:$0xff] %v1349_v47  ;;  %1362 = vtanh.f32 %v900_v41 }
 0x16a   : > { %v1353_v50 = vpop.eup %1352  ;;  %958 = vst [vmem:[%s1588_s29 + $0xb0] sm:$0xff] %v1351_v49  ;;  %1364 = vtanh.f32 %v901_v44 }
 0x16b   : > { %v1355_v51 = vpop.eup %1354  ;;  %959 = vst [vmem:[%s1588_s29 + $0xb8] sm:$0xff] %v1353_v50  ;;  %1366 = vtanh.f32 %v902_v46 }
 0x16c   : > { %v1357_v52 = vpop.eup %1356  ;;  %960 = vst [vmem:[%s1588_s29 + $0xc0] sm:$0xff] %v1355_v51  ;;  %1368 = vtanh.f32 %v903_v48 }
 0x16d   : > { %v1359_v53 = vpop.eup %1358  ;;  %961 = vst [vmem:[%s1588_s29 + $0xc8] sm:$0xff] %v1357_v52 }
 0x16e   : > { %v1361_v26 = vpop.eup %1360  ;;  %962 = vst [vmem:[%s1588_s29 + $0xd0] sm:$0xff] %v1359_v53 }
 0x16f   : > { %v1363_v54 = vpop.eup %1362  ;;  %963 = vst [vmem:[%s1588_s29 + $0xd8] sm:$0xff] %v1361_v26 }
 0x170   : > { %v1365_v55 = vpop.eup %1364  ;;  %964 = vst [vmem:[%s1588_s29 + $0xe0] sm:$0xff] %v1363_v54 }
 0x171   : > { %v1367_v56 = vpop.eup %1366  ;;  %965 = vst [vmem:[%s1588_s29 + $0xe8] sm:$0xff] %v1365_v55 }
 0x172   : > { %v1369_v57 = vpop.eup %1368  ;;  %966 = vst [vmem:[%s1588_s29 + $0xf0] sm:$0xff] %v1367_v56 }
 0x173   : > { %967 = vst [vmem:[%s1588_s29 + $0xf8] sm:$0xff] %v1369_v57 }
 0x174 PF: > { %s13_s18 = sadd.s32 1, %s1424_s18   ;;  %s1712_s12 = smov %s1404_s13 }
 0x175   : > { %p10_p0 = scmp.ge.s32.totalorder %s13_s18, 52   ;;  %s1713_s13 = smov %s1498_s25 }
 0x176   : > { %s1714_s14 = smov %s1416_s16  ;;  %s1715_s15 = smov %s1420_s17 }
 0x177   : > { %s1716_s16 = smov %s1719_s19  ;;  %s1717_s17 = smov %s1723_s20 }
 0x178   :  { %12 = sbr.rel (!%p10_p0) target bundleno = 4 (0x4), region = 122 }

</bundles_post_ra>
